<compile_context>
chip_gen: v7x
topology: tpu7x:2x2x1
jax: 0.10.0
libtpu: 0.0.40
codegen_flags: <defaults>
</compile_context>

<pallas_src>
import functools

import jax
import jax.numpy as jnp
from jax.experimental import pallas as pl
from jax.experimental.pallas import tpu as pltpu

LN_EPS = 1e-5  # PyTorch nn.LayerNorm default


# ----------------------------------------------------------------------------
# per-generation VMEM budgeting
# ----------------------------------------------------------------------------
@functools.lru_cache(maxsize=None)
def _vmem_limits():
    """(vmem_limit_bytes for CompilerParams, planning budget for tile heuristics)."""
    cap = 64 * 1024 * 1024  # conservative fallback = v7x per-core VMEM
    try:
        info = pltpu.get_tpu_info()
        for name in ("vmem_capacity_bytes", "vmem_size_bytes", "vmem_bytes"):
            v = getattr(info, name, None)
            if v:
                cap = int(v)
                break
    except Exception:
        pass
    limit = cap * 3 // 4              # ~48 MiB on v7x, ~96 MiB on v5e/v6e
    budget = int(limit * 0.6)         # headroom for Mosaic scratch / semaphores
    return limit, budget


# ----------------------------------------------------------------------------
# block-size heuristics (explicit per-step VMEM accounting)
# ----------------------------------------------------------------------------
def _pick_window_block(num_windows, n, c, num_heads, budget_bytes, has_residual,
                       row_cap=1024):
    """Largest divisor of num_windows whose per-step footprint fits the budget."""
    best = 1
    for d in range(1, num_windows + 1):
        if num_windows % d:
            continue
        rows = d * n
        if d > 1 and rows > row_cap:
            continue
        io = rows * c * 4 * 2 * (3 if has_residual else 2)      # x/out (+res), 2 buffers
        weights = 16 * c * c                                     # bf16 qkv+proj, 2 buffers
        inter = rows * c * 4 * 12 + d * num_heads * n * n * 6    # qkv, head copies, scores
        if io + weights + inter <= budget_bytes:
            best = d
    # keep >= 2 grid steps (v7x megacore) when each half still fills the MXU rows
    if best == num_windows and num_windows > 1:
        cands = [d for d in range(1, num_windows)
                 if num_windows % d == 0 and d * n >= 256]
        if cands:
            best = max(cands)
    return best


def _pick_hidden_block(c, hid, budget_bytes):
    """Hidden-dim tile for the MLP: multiple of 128 dividing hid (or full hid)."""
    if 8 * c * hid <= budget_bytes // 2:     # bf16 w1+w2 blocks, 2 pipeline buffers
        return hid
    best = None
    for hblk in range(128, hid, 128):
        if hid % hblk == 0 and 8 * c * hblk <= budget_bytes // 2:
            best = hblk
    return best if best is not None else hid


def _pick_row_block(m, c, hblk, budget_bytes, has_residual):
    weights = 8 * c * hblk                                       # bf16 w1+w2 blocks, 2 buffers
    tm = 1024
    while tm > 8:
        per_row = 4 * c * (2 * (3 if has_residual else 2) + 4)   # in/out(+res) x2buf, scratches, temps
        per_row += 6 * hblk                                      # h in f32 + bf16
        if weights + tm * per_row <= budget_bytes:
            break
        tm //= 2
    if m <= tm:
        if m >= 512:                                             # split for the 2 v7x TensorCores
            return max(8, (((m + 1) // 2) + 7) // 8 * 8)
        return m
    return tm


# ----------------------------------------------------------------------------
# Pallas kernels
# ----------------------------------------------------------------------------
def _attention_kernel(scale_ref, x_ref, *refs, num_heads, head_dim,
                      apply_ln, add_residual, has_qkv_bias, eps):
    it = iter(refs)
    res_ref = next(it) if add_residual else None
    g_ref = next(it) if apply_ln else None
    b_ref = next(it) if apply_ln else None
    wqkv_ref = next(it)
    bqkv_ref = next(it) if has_qkv_bias else None
    wproj_ref = next(it)
    bproj_ref = next(it)
    o_ref = next(it)

    wb, n, c = x_ref.shape
    m = wb * n
    nh, hd = num_heads, head_dim

    x = x_ref[...].astype(jnp.float32)                           # (WBLK, N, C)
    if add_residual:
        x = x + res_ref[...].astype(jnp.float32)
    if apply_ln:                                                 # fused norm1 (per token, f32)
        mean = jnp.mean(x, axis=-1, keepdims=True)
        var = jnp.mean(jnp.square(x - mean), axis=-1, keepdims=True)
        x = (x - mean) * jax.lax.rsqrt(var + eps)
        x = x * g_ref[...] + b_ref[...]

    # One large QKV projection: bf16 operands on the MXU, f32 accumulation.
    qkv = jnp.dot(x.reshape(m, c).astype(jnp.bfloat16), wqkv_ref[...],
                  preferred_element_type=jnp.float32)            # (M, 3C) f32
    if has_qkv_bias:
        qkv = qkv + bqkv_ref[...]
    qkv3 = qkv.reshape(wb, n, 3 * c)                             # leading-dim split only

    # Head-grouping rearrange: (WBLK, N, C) -> (WBLK*NH, N, HD), one layout pass per operand.
    def split_heads(t):
        heads = [t[:, :, h * hd:(h + 1) * hd] for h in range(nh)]
        return jnp.stack(heads, axis=1).reshape(wb * nh, n, hd)

    q = split_heads(qkv3[:, :, 0 * c:1 * c]).astype(jnp.bfloat16)
    k = split_heads(qkv3[:, :, 1 * c:2 * c]).astype(jnp.bfloat16)
    v = split_heads(qkv3[:, :, 2 * c:3 * c]).astype(jnp.bfloat16)

    # Batched attention math over (window x head); softmax kept in f32.
    scale = scale_ref[0]
    s = jnp.einsum('bnd,bmd->bnm', q, k,
                   preferred_element_type=jnp.float32) * scale   # (WBLK*NH, N, N)
    s = s - jnp.max(s, axis=-1, keepdims=True)
    p = jnp.exp(s)
    p = p * pl.reciprocal(jnp.sum(p, axis=-1, keepdims=True), approx=True)
    o = jnp.einsum('bnm,bmd->bnd', p.astype(jnp.bfloat16), v,
                   preferred_element_type=jnp.float32)           # (WBLK*NH, N, HD)

    # Merge heads back along the lane axis, then ONE full-K output projection.
    o4 = o.reshape(wb, nh, n, hd)
    oc = jnp.concatenate([o4[:, h] for h in range(nh)], axis=-1)  # (WBLK, N, C)
    out = jnp.dot(oc.reshape(m, c).astype(jnp.bfloat16), wproj_ref[...],
                  preferred_element_type=jnp.float32) + bproj_ref[...]
    o_ref[...] = out.reshape(wb, n, c).astype(o_ref.dtype)


def fused_attention(x, scale, wqkv_t, wproj_t, bproj, *, num_heads,
                    ln_g=None, ln_b=None, bqkv=None, residual=None):
    """Multi-head self-attention over x (Bw, N, C); optional fused LN / residual / qkv bias."""
    bw, n, c = x.shape
    hd = c // num_heads
    apply_ln = ln_g is not None
    add_residual = residual is not None
    has_qkv_bias = bqkv is not None
    vmem_limit, budget = _vmem_limits()
    wblk = _pick_window_block(bw, n, c, num_heads, budget, add_residual)

    inputs = [scale, x]
    in_specs = [
        pl.BlockSpec(memory_space=pltpu.MemorySpace.SMEM),        # learnable scale (scalar)
        pl.BlockSpec((wblk, n, c), lambda i: (i, 0, 0)),
    ]
    if add_residual:
        inputs.append(residual)
        in_specs.append(pl.BlockSpec((wblk, n, c), lambda i: (i, 0, 0)))
    if apply_ln:
        inputs += [ln_g, ln_b]
        in_specs += [pl.BlockSpec((1, c), lambda i: (0, 0)),
                     pl.BlockSpec((1, c), lambda i: (0, 0))]
    inputs.append(wqkv_t)
    in_specs.append(pl.BlockSpec((c, 3 * c), lambda i: (0, 0)))
    if has_qkv_bias:
        inputs.append(bqkv)
        in_specs.append(pl.BlockSpec((1, 3 * c), lambda i: (0, 0)))
    inputs += [wproj_t, bproj]
    in_specs += [pl.BlockSpec((c, c), lambda i: (0, 0)),
                 pl.BlockSpec((1, c), lambda i: (0, 0))]

    kernel = functools.partial(_attention_kernel, num_heads=num_heads, head_dim=hd,
                               apply_ln=apply_ln, add_residual=add_residual,
                               has_qkv_bias=has_qkv_bias, eps=LN_EPS)
    return pl.pallas_call(
        kernel,
        out_shape=jax.ShapeDtypeStruct((bw, n, c), x.dtype),
        grid=(bw // wblk,),
        in_specs=in_specs,
        out_specs=pl.BlockSpec((wblk, n, c), lambda i: (i, 0, 0)),
        compiler_params=pltpu.CompilerParams(
            dimension_semantics=("parallel",),
            vmem_limit_bytes=vmem_limit),
    )(*inputs)


def _layernorm_kernel(x_ref, g_ref, b_ref, o_ref, *, eps):
    x = x_ref[...].astype(jnp.float32)
    mean = jnp.mean(x, axis=-1, keepdims=True)
    var = jnp.mean(jnp.square(x - mean), axis=-1, keepdims=True)
    y = (x - mean) * jax.lax.rsqrt(var + eps)
    o_ref[...] = (y * g_ref[...] + b_ref[...]).astype(o_ref.dtype)


def layernorm(x2d, gamma, beta):
    """Standalone LayerNorm (only used when window padding is required)."""
    m, c = x2d.shape
    vmem_limit, budget = _vmem_limits()
    tm = 1024
    while tm > 8 and tm * c * 4 * 5 > budget:
        tm //= 2
    if m <= tm:
        tm = m
    kernel = functools.partial(_layernorm_kernel, eps=LN_EPS)
    return pl.pallas_call(
        kernel,
        out_shape=jax.ShapeDtypeStruct((m, c), x2d.dtype),
        grid=(pl.cdiv(m, tm),),
        in_specs=[pl.BlockSpec((tm, c), lambda i: (i, 0)),
                  pl.BlockSpec((1, c), lambda i: (0, 0)),
                  pl.BlockSpec((1, c), lambda i: (0, 0))],
        out_specs=pl.BlockSpec((tm, c), lambda i: (i, 0)),
        compiler_params=pltpu.CompilerParams(
            dimension_semantics=("parallel",),
            vmem_limit_bytes=vmem_limit),
    )(x2d, gamma, beta)


def _norm_mlp_kernel(x_ref, *refs, eps, add_residual):
    # y = norm2(x [+ residual]);  out = y + Linear2(ReLU(Linear1(y)))
    # NOTE: the residual around the MLP really is the *post-norm* y in this module
    # (`x = self.norm2(x); mlp_out = self.mlp(x); x = x + mlp_out`), not pre-norm Swin.
    it = iter(refs)
    res_ref = next(it) if add_residual else None
    g_ref = next(it)
    b_ref = next(it)
    w1_ref = next(it)
    b1_ref = next(it)
    w2_ref = next(it)
    b2_ref = next(it)
    o_ref = next(it)
    y_ref = next(it)     # (TM, C) f32 scratch: normalized activations
    acc_ref = next(it)   # (TM, C) f32 scratch: MLP output accumulator

    k = pl.program_id(1)

    @pl.when(k == 0)
    def _init():
        x = x_ref[...].astype(jnp.float32)
        if add_residual:
            x = x + res_ref[...].astype(jnp.float32)
        mean = jnp.mean(x, axis=-1, keepdims=True)
        var = jnp.mean(jnp.square(x - mean), axis=-1, keepdims=True)
        y = (x - mean) * jax.lax.rsqrt(var + eps)
        y_ref[...] = y * g_ref[...] + b_ref[...]
        acc_ref[...] = jnp.zeros_like(acc_ref)

    # hidden-dim block: bf16 MXU operands, f32 accumulation
    y = y_ref[...]
    h = jnp.dot(y.astype(jnp.bfloat16), w1_ref[...],
                preferred_element_type=jnp.float32) + b1_ref[...]
    h = jnp.maximum(h, 0.0)                                      # ReLU
    acc_ref[...] += jnp.dot(h.astype(jnp.bfloat16), w2_ref[...],
                            preferred_element_type=jnp.float32)

    @pl.when(k == pl.num_programs(1) - 1)
    def _finalize():
        o_ref[...] = (y_ref[...] + acc_ref[...] + b2_ref[...]).astype(o_ref.dtype)


def norm_mlp_residual(x2d, gamma, beta, w1_t, b1, w2_t, b2, *, residual=None):
    m, c = x2d.shape
    hid = w1_t.shape[1]
    add_residual = residual is not None
    vmem_limit, budget = _vmem_limits()
    hblk = _pick_hidden_block(c, hid, budget)
    tm = _pick_row_block(m, c, hblk, budget, add_residual)
    grid = (pl.cdiv(m, tm), hid // hblk)

    inputs = [x2d]
    in_specs = [pl.BlockSpec((tm, c), lambda i, k: (i, 0))]
    if add_residual:
        inputs.append(residual)
        in_specs.append(pl.BlockSpec((tm, c), lambda i, k: (i, 0)))
    inputs += [gamma, beta, w1_t, b1, w2_t, b2]
    in_specs += [pl.BlockSpec((1, c), lambda i, k: (0, 0)),
                 pl.BlockSpec((1, c), lambda i, k: (0, 0)),
                 pl.BlockSpec((c, hblk), lambda i, k: (0, k)),
                 pl.BlockSpec((1, hblk), lambda i, k: (0, k)),
                 pl.BlockSpec((hblk, c), lambda i, k: (k, 0)),
                 pl.BlockSpec((1, c), lambda i, k: (0, 0))]

    kernel = functools.partial(_norm_mlp_kernel, eps=LN_EPS, add_residual=add_residual)
    return pl.pallas_call(
        kernel,
        out_shape=jax.ShapeDtypeStruct((m, c), x2d.dtype),
        grid=grid,
        in_specs=in_specs,
        out_specs=pl.BlockSpec((tm, c), lambda i, k: (i, 0)),
        scratch_shapes=[pltpu.VMEM((tm, c), jnp.float32),
                        pltpu.VMEM((tm, c), jnp.float32)],
        compiler_params=pltpu.CompilerParams(
            dimension_semantics=("parallel", "arbitrary"),
            vmem_limit_bytes=vmem_limit),
    )(*inputs)


# ----------------------------------------------------------------------------
# JAX glue (layout plumbing only)
# ----------------------------------------------------------------------------
def window_partition(x, ws):
    B, H, W, C = x.shape
    pad_h = (-H) % ws
    pad_w = (-W) % ws
    x = jnp.pad(x, ((0, 0), (0, pad_h), (0, pad_w), (0, 0)))
    Hp, Wp = H + pad_h, W + pad_w
    x = x.reshape(B, Hp // ws, ws, Wp // ws, ws, C)
    return x.transpose(0, 1, 3, 2, 4, 5).reshape(-1, ws, ws, C)


def window_reverse(windows, ws, H, W):
    pad_h = (-H) % ws
    pad_w = (-W) % ws
    Hp, Wp = H + pad_h, W + pad_w
    B = windows.shape[0] // ((Hp // ws) * (Wp // ws))
    x = windows.reshape(B, Hp // ws, Wp // ws, ws, ws, -1)
    x = x.transpose(0, 1, 3, 2, 4, 5).reshape(B, Hp, Wp, -1)
    return x[:, :H, :W, :]


def swin_transformer_block(x, H, W, params, cross_input=None, *,
                           num_heads, window_size, shift_size):
    B, L, C = x.shape
    assert L == H * W, 'input feature has wrong size'
    shortcut = x

    pad_h = (-H) % window_size
    pad_w = (-W) % window_size
    fuse_ln = (pad_h == 0 and pad_w == 0)   # LN commutes with roll/partition only when unpadded

    if fuse_ln:
        xn = x.reshape(B, H, W, C)
        ln_g, ln_b = params["ln1_g"], params["ln1_b"]
    else:
        # reference applies norm1 before zero-padding the windows
        xn = layernorm(x.reshape(B * L, C),
                       params["ln1_g"], params["ln1_b"]).reshape(B, H, W, C)
        ln_g = ln_b = None

    # cyclic shift + window partition (layout plumbing; no attention mask in the reference)
    if shift_size > 0:
        xn = jnp.roll(xn, shift=(-shift_size, -shift_size), axis=(1, 2))
    xw = window_partition(xn, window_size).reshape(-1, window_size * window_size, C)

    # window attention (norm1 fused, qkv has no bias)
    attn_w = fused_attention(xw, params["w_scale"], params["w_qkv_t"],
                             params["w_proj_t"], params["w_proj_b"],
                             num_heads=num_heads, ln_g=ln_g, ln_b=ln_b)

    # window reverse + reverse shift (layout plumbing)
    attn_w = attn_w.reshape(-1, window_size, window_size, C)
    shifted = window_reverse(attn_w, window_size, H, W)
    if shift_size > 0:
        shifted = jnp.roll(shifted, shift=(shift_size, shift_size), axis=(1, 2))
    attn_tokens = shifted.reshape(B, H * W, C)

    if cross_input is not None:
        # x2 = cross_attn(shortcut + attn); the reference CrossAttention computes qkv
        # from the query only (key/value args are numerically unused) and replaces x.
        x2 = fused_attention(attn_tokens, params["c_scale"], params["c_qkv_t"],
                             params["c_proj_t"], params["c_proj_b"],
                             num_heads=num_heads,
                             bqkv=params["c_qkv_b"], residual=shortcut)
        out = norm_mlp_residual(x2.reshape(B * L, C),
                                params["ln2_g"], params["ln2_b"],
                                params["mlp_w1_t"], params["mlp_b1"],
                                params["mlp_w2_t"], params["mlp_b2"])
    else:
        # residual add (shortcut + attn) fused into the norm2+MLP kernel
        out = norm_mlp_residual(attn_tokens.reshape(B * L, C),
                                params["ln2_g"], params["ln2_b"],
                                params["mlp_w1_t"], params["mlp_b1"],
                                params["mlp_w2_t"], params["mlp_b2"],
                                residual=shortcut.reshape(B * L, C))
    return out.reshape(B, L, C)


# ----------------------------------------------------------------------------
# Deterministic parameter init (shapes follow the nn.Module __init__)
# ----------------------------------------------------------------------------
def init_params(key, dim, num_heads, mlp_ratio=4.0):
    hidden = int(dim * mlp_ratio)
    head_dim = dim // num_heads
    ks = jax.random.split(key, 8)
    std = 0.02
    wdt = jnp.bfloat16  # matmul weights stored bf16 (MXU operands); f32 accumulation in-kernel
    # Linear weights stored pre-transposed: (in_features, out_features).
    return {
        "ln1_g": jnp.ones((1, dim), jnp.float32),
        "ln1_b": jnp.zeros((1, dim), jnp.float32),
        "ln2_g": jnp.ones((1, dim), jnp.float32),
        "ln2_b": jnp.zeros((1, dim), jnp.float32),
        # WindowAttention: qkv (no bias), proj, learnable scale (init = head_dim^-0.5)
        "w_qkv_t": (std * jax.random.normal(ks[0], (dim, 3 * dim), jnp.float32)).astype(wdt),
        "w_proj_t": (std * jax.random.normal(ks[1], (dim, dim), jnp.float32)).astype(wdt),
        "w_proj_b": jnp.zeros((1, dim), jnp.float32),
        "w_scale": jnp.full((1,), head_dim ** -0.5, jnp.float32),
        # CrossAttention: qkv (with bias), proj, learnable scale
        "c_qkv_t": (std * jax.random.normal(ks[2], (dim, 3 * dim), jnp.float32)).astype(wdt),
        "c_qkv_b": std * jax.random.normal(ks[3], (1, 3 * dim), jnp.float32),
        "c_proj_t": (std * jax.random.normal(ks[4], (dim, dim), jnp.float32)).astype(wdt),
        "c_proj_b": jnp.zeros((1, dim), jnp.float32),
        "c_scale": jnp.full((1,), head_dim ** -0.5, jnp.float32),
        # MLP
        "mlp_w1_t": (std * jax.random.normal(ks[5], (dim, hidden), jnp.float32)).astype(wdt),
        "mlp_b1": jnp.zeros((1, hidden), jnp.float32),
        "mlp_w2_t": (std * jax.random.normal(ks[6], (hidden, dim), jnp.float32)).astype(wdt),
        "mlp_b2": jnp.zeros((1, dim), jnp.float32),
    }


if __name__ == "__main__":
    # Small shapes consistent with the module's forward.
    B, C, H, W = 2, 32, 8, 8
    num_heads, window_size, shift_size = 4, 4, 2
    L = H * W

    key = jax.random.PRNGKey(0)
    k_x, k_c, k_p = jax.random.split(key, 3)
    x = jax.random.normal(k_x, (B, L, C), jnp.float32)
    cross_input = jax.random.normal(k_c, (B, L, C), jnp.float32)  # unused by reference cross-attn math
    params = init_params(k_p, C, num_heads)

    fn = jax.jit(functools.partial(swin_transformer_block,
                                   num_heads=num_heads,
                                   window_size=window_size,
                                   shift_size=shift_size),
                 static_argnums=(1, 2))

    out_cross = fn(x, H, W, params, cross_input)   # path with CrossAttention
    out_plain = fn(x, H, W, params, None)          # path without CrossAttention
    ln_smoke = layernorm(x.reshape(B * L, C), params["ln1_g"], params["ln1_b"])  # padded-path kernel
    jax.block_until_ready((out_cross, out_plain, ln_smoke))

    assert out_cross.shape == (B, L, C) and out_cross.dtype == jnp.float32
    assert out_plain.shape == (B, L, C) and out_plain.dtype == jnp.float32
    assert ln_smoke.shape == (B * L, C)
    assert bool(jnp.all(jnp.isfinite(out_cross))) and bool(jnp.all(jnp.isfinite(out_plain)))
    print("KERNEL_OK")
</pallas_src>

<mosaic_0001>
module attributes {stable_mosaic.version = 11 : i64} {
  func.func @_attention_kernel(%arg0: i32, %arg1: memref<1xf32, #tpu.memory_space<smem>>, %arg2: memref<8x16x32xf32, #tpu.memory_space<vmem>>, %arg3: memref<1x32xf32, #tpu.memory_space<vmem>>, %arg4: memref<1x32xf32, #tpu.memory_space<vmem>>, %arg5: memref<32x96xbf16, #tpu.memory_space<vmem>>, %arg6: memref<32x32xbf16, #tpu.memory_space<vmem>>, %arg7: memref<1x32xf32, #tpu.memory_space<vmem>>, %arg8: memref<8x16x32xf32, #tpu.memory_space<vmem>>) attributes {dimension_semantics = [#tpu.dimension_semantics<parallel>], iteration_bounds = array<i64: 1>, scalar_prefetch = 0 : i64, scratch_operands = 0 : i64, tpu.core_type = #tpu.core_type<tc>, window_params = [{transform_indices = @transform_0, window_bounds = array<i64: 1>}, {transform_indices = @transform_1, window_bounds = array<i64: 8, 16, 32>}, {pipeline_mode = #tpu.pipeline_mode<synchronous>, transform_indices = @transform_2, window_bounds = array<i64: 1, 32>}, {pipeline_mode = #tpu.pipeline_mode<synchronous>, transform_indices = @transform_3, window_bounds = array<i64: 1, 32>}, {pipeline_mode = #tpu.pipeline_mode<synchronous>, transform_indices = @transform_4, window_bounds = array<i64: 32, 96>}, {pipeline_mode = #tpu.pipeline_mode<synchronous>, transform_indices = @transform_5, window_bounds = array<i64: 32, 32>}, {pipeline_mode = #tpu.pipeline_mode<synchronous>, transform_indices = @transform_6, window_bounds = array<i64: 1, 32>}, {transform_indices = @transform_7, window_bounds = array<i64: 8, 16, 32>}]} {
    %c0 = arith.constant 0 : index
    %c0_0 = arith.constant 0 : index
    %c0_1 = arith.constant 0 : index
    %0 = vector.load %arg2[%c0, %c0_0, %c0_1] : memref<8x16x32xf32, #tpu.memory_space<vmem>>, vector<8x16x32xf32>
    %cst = arith.constant dense<0.000000e+00> : vector<8x16xf32>
    %1 = vector.multi_reduction <add>, %0, %cst [2] : vector<8x16x32xf32> to vector<8x16xf32>
    %2 = vector.shape_cast %1 : vector<8x16xf32> to vector<8x16x1xf32>
    %cst_2 = arith.constant 3.200000e+01 : f32
    %3 = vector.broadcast %cst_2 : f32 to vector<8x16x1xf32>
    %4 = arith.divf %2, %3 : vector<8x16x1xf32>
    %5 = vector.broadcast %4 : vector<8x16x1xf32> to vector<8x16x32xf32>
    %6 = arith.subf %0, %5 : vector<8x16x32xf32>
    %7 = arith.mulf %6, %6 : vector<8x16x32xf32>
    %cst_3 = arith.constant dense<0.000000e+00> : vector<8x16xf32>
    %8 = vector.multi_reduction <add>, %7, %cst_3 [2] : vector<8x16x32xf32> to vector<8x16xf32>
    %9 = vector.shape_cast %8 : vector<8x16xf32> to vector<8x16x1xf32>
    %cst_4 = arith.constant 3.200000e+01 : f32
    %10 = vector.broadcast %cst_4 : f32 to vector<8x16x1xf32>
    %11 = arith.divf %9, %10 : vector<8x16x1xf32>
    %12 = vector.broadcast %4 : vector<8x16x1xf32> to vector<8x16x32xf32>
    %13 = arith.subf %0, %12 : vector<8x16x32xf32>
    %cst_5 = arith.constant 9.99999974E-6 : f32
    %14 = vector.broadcast %cst_5 : f32 to vector<8x16x1xf32>
    %15 = arith.addf %11, %14 : vector<8x16x1xf32>
    %16 = math.rsqrt %15 : vector<8x16x1xf32>
    %17 = vector.broadcast %16 : vector<8x16x1xf32> to vector<8x16x32xf32>
    %18 = arith.mulf %13, %17 : vector<8x16x32xf32>
    %c0_6 = arith.constant 0 : index
    %c0_7 = arith.constant 0 : index
    %19 = vector.load %arg3[%c0_6, %c0_7] : memref<1x32xf32, #tpu.memory_space<vmem>>, vector<1x32xf32>
    %20 = vector.shape_cast %19 : vector<1x32xf32> to vector<1x1x32xf32>
    %21 = vector.broadcast %20 : vector<1x1x32xf32> to vector<8x16x32xf32>
    %22 = arith.mulf %18, %21 : vector<8x16x32xf32>
    %c0_8 = arith.constant 0 : index
    %c0_9 = arith.constant 0 : index
    %23 = vector.load %arg4[%c0_8, %c0_9] : memref<1x32xf32, #tpu.memory_space<vmem>>, vector<1x32xf32>
    %24 = vector.shape_cast %23 : vector<1x32xf32> to vector<1x1x32xf32>
    %25 = vector.broadcast %24 : vector<1x1x32xf32> to vector<8x16x32xf32>
    %26 = arith.addf %22, %25 : vector<8x16x32xf32>
    %27 = vector.shape_cast %26 : vector<8x16x32xf32> to vector<128x32xf32>
    %28 = arith.truncf %27 : vector<128x32xf32> to vector<128x32xbf16>
    %c0_10 = arith.constant 0 : index
    %c0_11 = arith.constant 0 : index
    %29 = vector.load %arg5[%c0_10, %c0_11] : memref<32x96xbf16, #tpu.memory_space<vmem>>, vector<32x96xbf16>
    %cst_12 = arith.constant dense<0.000000e+00> : vector<128x96xf32>
    %30 = tpu.matmul %28, %29, %cst_12 {dimension_numbers = #tpu.dot_dimension_numbers<[1], [0], [0], [1], [0, 0, 1, 1], [], []>} : vector<128x32xbf16>, vector<32x96xbf16>, vector<128x96xf32> -> vector<128x96xf32>
    %31 = vector.shape_cast %30 : vector<128x96xf32> to vector<8x16x96xf32>
    %32 = vector.extract_strided_slice %31 {offsets = [0, 0, 0], sizes = [8, 16, 32], strides = [1, 1, 1]} : vector<8x16x96xf32> to vector<8x16x32xf32>
    %33 = vector.extract_strided_slice %32 {offsets = [0, 0, 0], sizes = [8, 16, 8], strides = [1, 1, 1]} : vector<8x16x32xf32> to vector<8x16x8xf32>
    %34 = vector.extract_strided_slice %32 {offsets = [0, 0, 8], sizes = [8, 16, 8], strides = [1, 1, 1]} : vector<8x16x32xf32> to vector<8x16x8xf32>
    %35 = vector.extract_strided_slice %32 {offsets = [0, 0, 16], sizes = [8, 16, 8], strides = [1, 1, 1]} : vector<8x16x32xf32> to vector<8x16x8xf32>
    %36 = vector.extract_strided_slice %32 {offsets = [0, 0, 24], sizes = [8, 16, 8], strides = [1, 1, 1]} : vector<8x16x32xf32> to vector<8x16x8xf32>
    %37 = vector.shape_cast %33 : vector<8x16x8xf32> to vector<8x1x16x8xf32>
    %38 = vector.shape_cast %34 : vector<8x16x8xf32> to vector<8x1x16x8xf32>
    %39 = vector.shape_cast %35 : vector<8x16x8xf32> to vector<8x1x16x8xf32>
    %40 = vector.shape_cast %36 : vector<8x16x8xf32> to vector<8x1x16x8xf32>
    %41 = tpu.concatenate %37, %38, %39, %40 in 1 : vector<8x1x16x8xf32>, vector<8x1x16x8xf32>, vector<8x1x16x8xf32>, vector<8x1x16x8xf32> -> vector<8x4x16x8xf32>
    %42 = vector.shape_cast %41 : vector<8x4x16x8xf32> to vector<32x16x8xf32>
    %43 = arith.truncf %42 : vector<32x16x8xf32> to vector<32x16x8xbf16>
    %44 = vector.extract_strided_slice %31 {offsets = [0, 0, 32], sizes = [8, 16, 32], strides = [1, 1, 1]} : vector<8x16x96xf32> to vector<8x16x32xf32>
    %45 = vector.extract_strided_slice %44 {offsets = [0, 0, 0], sizes = [8, 16, 8], strides = [1, 1, 1]} : vector<8x16x32xf32> to vector<8x16x8xf32>
    %46 = vector.extract_strided_slice %44 {offsets = [0, 0, 8], sizes = [8, 16, 8], strides = [1, 1, 1]} : vector<8x16x32xf32> to vector<8x16x8xf32>
    %47 = vector.extract_strided_slice %44 {offsets = [0, 0, 16], sizes = [8, 16, 8], strides = [1, 1, 1]} : vector<8x16x32xf32> to vector<8x16x8xf32>
    %48 = vector.extract_strided_slice %44 {offsets = [0, 0, 24], sizes = [8, 16, 8], strides = [1, 1, 1]} : vector<8x16x32xf32> to vector<8x16x8xf32>
    %49 = vector.shape_cast %45 : vector<8x16x8xf32> to vector<8x1x16x8xf32>
    %50 = vector.shape_cast %46 : vector<8x16x8xf32> to vector<8x1x16x8xf32>
    %51 = vector.shape_cast %47 : vector<8x16x8xf32> to vector<8x1x16x8xf32>
    %52 = vector.shape_cast %48 : vector<8x16x8xf32> to vector<8x1x16x8xf32>
    %53 = tpu.concatenate %49, %50, %51, %52 in 1 : vector<8x1x16x8xf32>, vector<8x1x16x8xf32>, vector<8x1x16x8xf32>, vector<8x1x16x8xf32> -> vector<8x4x16x8xf32>
    %54 = vector.shape_cast %53 : vector<8x4x16x8xf32> to vector<32x16x8xf32>
    %55 = arith.truncf %54 : vector<32x16x8xf32> to vector<32x16x8xbf16>
    %56 = vector.extract_strided_slice %31 {offsets = [0, 0, 64], sizes = [8, 16, 32], strides = [1, 1, 1]} : vector<8x16x96xf32> to vector<8x16x32xf32>
    %57 = vector.extract_strided_slice %56 {offsets = [0, 0, 0], sizes = [8, 16, 8], strides = [1, 1, 1]} : vector<8x16x32xf32> to vector<8x16x8xf32>
    %58 = vector.extract_strided_slice %56 {offsets = [0, 0, 8], sizes = [8, 16, 8], strides = [1, 1, 1]} : vector<8x16x32xf32> to vector<8x16x8xf32>
    %59 = vector.extract_strided_slice %56 {offsets = [0, 0, 16], sizes = [8, 16, 8], strides = [1, 1, 1]} : vector<8x16x32xf32> to vector<8x16x8xf32>
    %60 = vector.extract_strided_slice %56 {offsets = [0, 0, 24], sizes = [8, 16, 8], strides = [1, 1, 1]} : vector<8x16x32xf32> to vector<8x16x8xf32>
    %61 = vector.shape_cast %57 : vector<8x16x8xf32> to vector<8x1x16x8xf32>
    %62 = vector.shape_cast %58 : vector<8x16x8xf32> to vector<8x1x16x8xf32>
    %63 = vector.shape_cast %59 : vector<8x16x8xf32> to vector<8x1x16x8xf32>
    %64 = vector.shape_cast %60 : vector<8x16x8xf32> to vector<8x1x16x8xf32>
    %65 = tpu.concatenate %61, %62, %63, %64 in 1 : vector<8x1x16x8xf32>, vector<8x1x16x8xf32>, vector<8x1x16x8xf32>, vector<8x1x16x8xf32> -> vector<8x4x16x8xf32>
    %66 = vector.shape_cast %65 : vector<8x4x16x8xf32> to vector<32x16x8xf32>
    %67 = arith.truncf %66 : vector<32x16x8xf32> to vector<32x16x8xbf16>
    %c0_13 = arith.constant 0 : index
    %68 = memref.load %arg1[%c0_13] : memref<1xf32, #tpu.memory_space<smem>>
    "tpu.trace_start"() <{level = 10 : i32, message = "bnd,bmd->bnm"}> : () -> ()
    %cst_14 = arith.constant dense<0.000000e+00> : vector<32x16x16xf32>
    %69 = tpu.matmul %43, %55, %cst_14 {dimension_numbers = #tpu.dot_dimension_numbers<[2], [2], [1], [1], [0, 0, 0, 1, 1, 1], [0], [0]>} : vector<32x16x8xbf16>, vector<32x16x8xbf16>, vector<32x16x16xf32> -> vector<32x16x16xf32>
    "tpu.trace_stop"() : () -> ()
    %70 = vector.broadcast %68 : f32 to vector<32x16x16xf32>
    %71 = arith.mulf %69, %70 : vector<32x16x16xf32>
    %cst_15 = arith.constant dense<0xFF800000> : vector<32x16xf32>
    %72 = vector.multi_reduction <maximumf>, %71, %cst_15 [2] : vector<32x16x16xf32> to vector<32x16xf32>
    %73 = vector.shape_cast %72 : vector<32x16xf32> to vector<32x16x1xf32>
    %74 = vector.broadcast %73 : vector<32x16x1xf32> to vector<32x16x16xf32>
    %75 = arith.subf %71, %74 : vector<32x16x16xf32>
    %76 = math.exp %75 : vector<32x16x16xf32>
    %cst_16 = arith.constant dense<0.000000e+00> : vector<32x16xf32>
    %77 = vector.multi_reduction <add>, %76, %cst_16 [2] : vector<32x16x16xf32> to vector<32x16xf32>
    %78 = vector.shape_cast %77 : vector<32x16xf32> to vector<32x16x1xf32>
    %79 = tpu.reciprocal %78 {approx = true} : vector<32x16x1xf32> -> vector<32x16x1xf32>
    %80 = vector.broadcast %79 : vector<32x16x1xf32> to vector<32x16x16xf32>
    %81 = arith.mulf %76, %80 : vector<32x16x16xf32>
    %82 = arith.truncf %81 : vector<32x16x16xf32> to vector<32x16x16xbf16>
    "tpu.trace_start"() <{level = 10 : i32, message = "bnm,bmd->bnd"}> : () -> ()
    %cst_17 = arith.constant dense<0.000000e+00> : vector<32x16x8xf32>
    %83 = tpu.matmul %82, %67, %cst_17 {dimension_numbers = #tpu.dot_dimension_numbers<[2], [1], [1], [2], [0, 0, 0, 1, 1, 2], [0], [0]>} : vector<32x16x16xbf16>, vector<32x16x8xbf16>, vector<32x16x8xf32> -> vector<32x16x8xf32>
    "tpu.trace_stop"() : () -> ()
    %84 = vector.shape_cast %83 : vector<32x16x8xf32> to vector<8x4x16x8xf32>
    %85 = vector.extract_strided_slice %84 {offsets = [0, 0, 0, 0], sizes = [8, 1, 16, 8], strides = [1, 1, 1, 1]} : vector<8x4x16x8xf32> to vector<8x1x16x8xf32>
    %86 = vector.shape_cast %85 : vector<8x1x16x8xf32> to vector<8x16x8xf32>
    %87 = vector.extract_strided_slice %84 {offsets = [0, 1, 0, 0], sizes = [8, 1, 16, 8], strides = [1, 1, 1, 1]} : vector<8x4x16x8xf32> to vector<8x1x16x8xf32>
    %88 = vector.shape_cast %87 : vector<8x1x16x8xf32> to vector<8x16x8xf32>
    %89 = vector.extract_strided_slice %84 {offsets = [0, 2, 0, 0], sizes = [8, 1, 16, 8], strides = [1, 1, 1, 1]} : vector<8x4x16x8xf32> to vector<8x1x16x8xf32>
    %90 = vector.shape_cast %89 : vector<8x1x16x8xf32> to vector<8x16x8xf32>
    %91 = vector.extract_strided_slice %84 {offsets = [0, 3, 0, 0], sizes = [8, 1, 16, 8], strides = [1, 1, 1, 1]} : vector<8x4x16x8xf32> to vector<8x1x16x8xf32>
    %92 = vector.shape_cast %91 : vector<8x1x16x8xf32> to vector<8x16x8xf32>
    %93 = tpu.concatenate %86, %88, %90, %92 in 2 : vector<8x16x8xf32>, vector<8x16x8xf32>, vector<8x16x8xf32>, vector<8x16x8xf32> -> vector<8x16x32xf32>
    %94 = vector.shape_cast %93 : vector<8x16x32xf32> to vector<128x32xf32>
    %95 = arith.truncf %94 : vector<128x32xf32> to vector<128x32xbf16>
    %c0_18 = arith.constant 0 : index
    %c0_19 = arith.constant 0 : index
    %96 = vector.load %arg6[%c0_18, %c0_19] : memref<32x32xbf16, #tpu.memory_space<vmem>>, vector<32x32xbf16>
    %cst_20 = arith.constant dense<0.000000e+00> : vector<128x32xf32>
    %97 = tpu.matmul %95, %96, %cst_20 {dimension_numbers = #tpu.dot_dimension_numbers<[1], [0], [0], [1], [0, 0, 1, 1], [], []>} : vector<128x32xbf16>, vector<32x32xbf16>, vector<128x32xf32> -> vector<128x32xf32>
    %c0_21 = arith.constant 0 : index
    %c0_22 = arith.constant 0 : index
    %98 = vector.load %arg7[%c0_21, %c0_22] : memref<1x32xf32, #tpu.memory_space<vmem>>, vector<1x32xf32>
    %99 = vector.broadcast %98 : vector<1x32xf32> to vector<128x32xf32>
    %100 = arith.addf %97, %99 : vector<128x32xf32>
    %101 = vector.shape_cast %100 : vector<128x32xf32> to vector<8x16x32xf32>
    %c0_23 = arith.constant 0 : index
    %c0_24 = arith.constant 0 : index
    %c0_25 = arith.constant 0 : index
    %102 = vector.load %arg8[%c0_23, %c0_24, %c0_25] : memref<8x16x32xf32, #tpu.memory_space<vmem>>, vector<8x16x32xf32>
    tpu.vector_store %arg8[%c0_23, %c0_24, %c0_25], %101 {strides = array<i32>} : memref<8x16x32xf32, #tpu.memory_space<vmem>>, vector<8x16x32xf32>,
    return
  }
  func.func @transform_0(%arg0: i32) -> i32 {
    %c0_i32 = arith.constant 0 : i32
    %c0_i32_0 = arith.constant 0 : i32
    return %c0_i32 : i32
  }
  func.func @transform_1(%arg0: i32) -> (i32, i32, i32) {
    %c0_i32 = arith.constant 0 : i32
    %c0_i32_0 = arith.constant 0 : i32
    %c0_i32_1 = arith.constant 0 : i32
    return %arg0, %c0_i32, %c0_i32_0 : i32, i32, i32
  }
  func.func @transform_2(%arg0: i32) -> (i32, i32) {
    %c0_i32 = arith.constant 0 : i32
    %c0_i32_0 = arith.constant 0 : i32
    %c0_i32_1 = arith.constant 0 : i32
    return %c0_i32, %c0_i32_0 : i32, i32
  }
  func.func @transform_3(%arg0: i32) -> (i32, i32) {
    %c0_i32 = arith.constant 0 : i32
    %c0_i32_0 = arith.constant 0 : i32
    %c0_i32_1 = arith.constant 0 : i32
    return %c0_i32, %c0_i32_0 : i32, i32
  }
  func.func @transform_4(%arg0: i32) -> (i32, i32) {
    %c0_i32 = arith.constant 0 : i32
    %c0_i32_0 = arith.constant 0 : i32
    %c0_i32_1 = arith.constant 0 : i32
    return %c0_i32, %c0_i32_0 : i32, i32
  }
  func.func @transform_5(%arg0: i32) -> (i32, i32) {
    %c0_i32 = arith.constant 0 : i32
    %c0_i32_0 = arith.constant 0 : i32
    %c0_i32_1 = arith.constant 0 : i32
    return %c0_i32, %c0_i32_0 : i32, i32
  }
  func.func @transform_6(%arg0: i32) -> (i32, i32) {
    %c0_i32 = arith.constant 0 : i32
    %c0_i32_0 = arith.constant 0 : i32
    %c0_i32_1 = arith.constant 0 : i32
    return %c0_i32, %c0_i32_0 : i32, i32
  }
  func.func @transform_7(%arg0: i32) -> (i32, i32, i32) {
    %c0_i32 = arith.constant 0 : i32
    %c0_i32_0 = arith.constant 0 : i32
    %c0_i32_1 = arith.constant 0 : i32
    return %arg0, %c0_i32, %c0_i32_0 : i32, i32, i32
  }
}

module attributes {stable_mosaic.version = 11 : i64} {
  func.func @_attention_kernel(%arg0: i32, %arg1: memref<1xf32, #tpu.memory_space<smem>>, %arg2: memref<2x64x32xf32, #tpu.memory_space<vmem>>, %arg3: memref<2x64x32xf32, #tpu.memory_space<vmem>>, %arg4: memref<32x96xbf16, #tpu.memory_space<vmem>>, %arg5: memref<1x96xf32, #tpu.memory_space<vmem>>, %arg6: memref<32x32xbf16, #tpu.memory_space<vmem>>, %arg7: memref<1x32xf32, #tpu.memory_space<vmem>>, %arg8: memref<2x64x32xf32, #tpu.memory_space<vmem>>) attributes {dimension_semantics = [#tpu.dimension_semantics<parallel>], iteration_bounds = array<i64: 1>, scalar_prefetch = 0 : i64, scratch_operands = 0 : i64, tpu.core_type = #tpu.core_type<tc>, window_params = [{transform_indices = @transform_0, window_bounds = array<i64: 1>}, {transform_indices = @transform_1, window_bounds = array<i64: 2, 64, 32>}, {transform_indices = @transform_2, window_bounds = array<i64: 2, 64, 32>}, {pipeline_mode = #tpu.pipeline_mode<synchronous>, transform_indices = @transform_3, window_bounds = array<i64: 32, 96>}, {pipeline_mode = #tpu.pipeline_mode<synchronous>, transform_indices = @transform_4, window_bounds = array<i64: 1, 96>}, {pipeline_mode = #tpu.pipeline_mode<synchronous>, transform_indices = @transform_5, window_bounds = array<i64: 32, 32>}, {pipeline_mode = #tpu.pipeline_mode<synchronous>, transform_indices = @transform_6, window_bounds = array<i64: 1, 32>}, {transform_indices = @transform_7, window_bounds = array<i64: 2, 64, 32>}]} {
    %c0 = arith.constant 0 : index
    %c0_0 = arith.constant 0 : index
    %c0_1 = arith.constant 0 : index
    %0 = vector.load %arg2[%c0, %c0_0, %c0_1] : memref<2x64x32xf32, #tpu.memory_space<vmem>>, vector<2x64x32xf32>
    %c0_2 = arith.constant 0 : index
    %c0_3 = arith.constant 0 : index
    %c0_4 = arith.constant 0 : index
    %1 = vector.load %arg3[%c0_2, %c0_3, %c0_4] : memref<2x64x32xf32, #tpu.memory_space<vmem>>, vector<2x64x32xf32>
    %2 = arith.addf %0, %1 : vector<2x64x32xf32>
    %3 = vector.shape_cast %2 : vector<2x64x32xf32> to vector<128x32xf32>
    %4 = arith.truncf %3 : vector<128x32xf32> to vector<128x32xbf16>
    %c0_5 = arith.constant 0 : index
    %c0_6 = arith.constant 0 : index
    %5 = vector.load %arg4[%c0_5, %c0_6] : memref<32x96xbf16, #tpu.memory_space<vmem>>, vector<32x96xbf16>
    %cst = arith.constant dense<0.000000e+00> : vector<128x96xf32>
    %6 = tpu.matmul %4, %5, %cst {dimension_numbers = #tpu.dot_dimension_numbers<[1], [0], [0], [1], [0, 0, 1, 1], [], []>} : vector<128x32xbf16>, vector<32x96xbf16>, vector<128x96xf32> -> vector<128x96xf32>
    %c0_7 = arith.constant 0 : index
    %c0_8 = arith.constant 0 : index
    %7 = vector.load %arg5[%c0_7, %c0_8] : memref<1x96xf32, #tpu.memory_space<vmem>>, vector<1x96xf32>
    %8 = vector.broadcast %7 : vector<1x96xf32> to vector<128x96xf32>
    %9 = arith.addf %6, %8 : vector<128x96xf32>
    %10 = vector.shape_cast %9 : vector<128x96xf32> to vector<2x64x96xf32>
    %11 = vector.extract_strided_slice %10 {offsets = [0, 0, 0], sizes = [2, 64, 32], strides = [1, 1, 1]} : vector<2x64x96xf32> to vector<2x64x32xf32>
    %12 = vector.extract_strided_slice %11 {offsets = [0, 0, 0], sizes = [2, 64, 8], strides = [1, 1, 1]} : vector<2x64x32xf32> to vector<2x64x8xf32>
    %13 = vector.extract_strided_slice %11 {offsets = [0, 0, 8], sizes = [2, 64, 8], strides = [1, 1, 1]} : vector<2x64x32xf32> to vector<2x64x8xf32>
    %14 = vector.extract_strided_slice %11 {offsets = [0, 0, 16], sizes = [2, 64, 8], strides = [1, 1, 1]} : vector<2x64x32xf32> to vector<2x64x8xf32>
    %15 = vector.extract_strided_slice %11 {offsets = [0, 0, 24], sizes = [2, 64, 8], strides = [1, 1, 1]} : vector<2x64x32xf32> to vector<2x64x8xf32>
    %16 = vector.shape_cast %12 : vector<2x64x8xf32> to vector<2x1x64x8xf32>
    %17 = vector.shape_cast %13 : vector<2x64x8xf32> to vector<2x1x64x8xf32>
    %18 = vector.shape_cast %14 : vector<2x64x8xf32> to vector<2x1x64x8xf32>
    %19 = vector.shape_cast %15 : vector<2x64x8xf32> to vector<2x1x64x8xf32>
    %20 = tpu.concatenate %16, %17, %18, %19 in 1 : vector<2x1x64x8xf32>, vector<2x1x64x8xf32>, vector<2x1x64x8xf32>, vector<2x1x64x8xf32> -> vector<2x4x64x8xf32>
    %21 = vector.shape_cast %20 : vector<2x4x64x8xf32> to vector<8x64x8xf32>
    %22 = arith.truncf %21 : vector<8x64x8xf32> to vector<8x64x8xbf16>
    %23 = vector.extract_strided_slice %10 {offsets = [0, 0, 32], sizes = [2, 64, 32], strides = [1, 1, 1]} : vector<2x64x96xf32> to vector<2x64x32xf32>
    %24 = vector.extract_strided_slice %23 {offsets = [0, 0, 0], sizes = [2, 64, 8], strides = [1, 1, 1]} : vector<2x64x32xf32> to vector<2x64x8xf32>
    %25 = vector.extract_strided_slice %23 {offsets = [0, 0, 8], sizes = [2, 64, 8], strides = [1, 1, 1]} : vector<2x64x32xf32> to vector<2x64x8xf32>
    %26 = vector.extract_strided_slice %23 {offsets = [0, 0, 16], sizes = [2, 64, 8], strides = [1, 1, 1]} : vector<2x64x32xf32> to vector<2x64x8xf32>
    %27 = vector.extract_strided_slice %23 {offsets = [0, 0, 24], sizes = [2, 64, 8], strides = [1, 1, 1]} : vector<2x64x32xf32> to vector<2x64x8xf32>
    %28 = vector.shape_cast %24 : vector<2x64x8xf32> to vector<2x1x64x8xf32>
    %29 = vector.shape_cast %25 : vector<2x64x8xf32> to vector<2x1x64x8xf32>
    %30 = vector.shape_cast %26 : vector<2x64x8xf32> to vector<2x1x64x8xf32>
    %31 = vector.shape_cast %27 : vector<2x64x8xf32> to vector<2x1x64x8xf32>
    %32 = tpu.concatenate %28, %29, %30, %31 in 1 : vector<2x1x64x8xf32>, vector<2x1x64x8xf32>, vector<2x1x64x8xf32>, vector<2x1x64x8xf32> -> vector<2x4x64x8xf32>
    %33 = vector.shape_cast %32 : vector<2x4x64x8xf32> to vector<8x64x8xf32>
    %34 = arith.truncf %33 : vector<8x64x8xf32> to vector<8x64x8xbf16>
    %35 = vector.extract_strided_slice %10 {offsets = [0, 0, 64], sizes = [2, 64, 32], strides = [1, 1, 1]} : vector<2x64x96xf32> to vector<2x64x32xf32>
    %36 = vector.extract_strided_slice %35 {offsets = [0, 0, 0], sizes = [2, 64, 8], strides = [1, 1, 1]} : vector<2x64x32xf32> to vector<2x64x8xf32>
    %37 = vector.extract_strided_slice %35 {offsets = [0, 0, 8], sizes = [2, 64, 8], strides = [1, 1, 1]} : vector<2x64x32xf32> to vector<2x64x8xf32>
    %38 = vector.extract_strided_slice %35 {offsets = [0, 0, 16], sizes = [2, 64, 8], strides = [1, 1, 1]} : vector<2x64x32xf32> to vector<2x64x8xf32>
    %39 = vector.extract_strided_slice %35 {offsets = [0, 0, 24], sizes = [2, 64, 8], strides = [1, 1, 1]} : vector<2x64x32xf32> to vector<2x64x8xf32>
    %40 = vector.shape_cast %36 : vector<2x64x8xf32> to vector<2x1x64x8xf32>
    %41 = vector.shape_cast %37 : vector<2x64x8xf32> to vector<2x1x64x8xf32>
    %42 = vector.shape_cast %38 : vector<2x64x8xf32> to vector<2x1x64x8xf32>
    %43 = vector.shape_cast %39 : vector<2x64x8xf32> to vector<2x1x64x8xf32>
    %44 = tpu.concatenate %40, %41, %42, %43 in 1 : vector<2x1x64x8xf32>, vector<2x1x64x8xf32>, vector<2x1x64x8xf32>, vector<2x1x64x8xf32> -> vector<2x4x64x8xf32>
    %45 = vector.shape_cast %44 : vector<2x4x64x8xf32> to vector<8x64x8xf32>
    %46 = arith.truncf %45 : vector<8x64x8xf32> to vector<8x64x8xbf16>
    %c0_9 = arith.constant 0 : index
    %47 = memref.load %arg1[%c0_9] : memref<1xf32, #tpu.memory_space<smem>>
    "tpu.trace_start"() <{level = 10 : i32, message = "bnd,bmd->bnm"}> : () -> ()
    %cst_10 = arith.constant dense<0.000000e+00> : vector<8x64x64xf32>
    %48 = tpu.matmul %22, %34, %cst_10 {dimension_numbers = #tpu.dot_dimension_numbers<[2], [2], [1], [1], [0, 0, 0, 1, 1, 1], [0], [0]>} : vector<8x64x8xbf16>, vector<8x64x8xbf16>, vector<8x64x64xf32> -> vector<8x64x64xf32>
    "tpu.trace_stop"() : () -> ()
    %49 = vector.broadcast %47 : f32 to vector<8x64x64xf32>
    %50 = arith.mulf %48, %49 : vector<8x64x64xf32>
    %cst_11 = arith.constant dense<0xFF800000> : vector<8x64xf32>
    %51 = vector.multi_reduction <maximumf>, %50, %cst_11 [2] : vector<8x64x64xf32> to vector<8x64xf32>
    %52 = vector.shape_cast %51 : vector<8x64xf32> to vector<8x64x1xf32>
    %53 = vector.broadcast %52 : vector<8x64x1xf32> to vector<8x64x64xf32>
    %54 = arith.subf %50, %53 : vector<8x64x64xf32>
    %55 = math.exp %54 : vector<8x64x64xf32>
    %cst_12 = arith.constant dense<0.000000e+00> : vector<8x64xf32>
    %56 = vector.multi_reduction <add>, %55, %cst_12 [2] : vector<8x64x64xf32> to vector<8x64xf32>
    %57 = vector.shape_cast %56 : vector<8x64xf32> to vector<8x64x1xf32>
    %58 = tpu.reciprocal %57 {approx = true} : vector<8x64x1xf32> -> vector<8x64x1xf32>
    %59 = vector.broadcast %58 : vector<8x64x1xf32> to vector<8x64x64xf32>
    %60 = arith.mulf %55, %59 : vector<8x64x64xf32>
    %61 = arith.truncf %60 : vector<8x64x64xf32> to vector<8x64x64xbf16>
    "tpu.trace_start"() <{level = 10 : i32, message = "bnm,bmd->bnd"}> : () -> ()
    %cst_13 = arith.constant dense<0.000000e+00> : vector<8x64x8xf32>
    %62 = tpu.matmul %61, %46, %cst_13 {dimension_numbers = #tpu.dot_dimension_numbers<[2], [1], [1], [2], [0, 0, 0, 1, 1, 2], [0], [0]>} : vector<8x64x64xbf16>, vector<8x64x8xbf16>, vector<8x64x8xf32> -> vector<8x64x8xf32>
    "tpu.trace_stop"() : () -> ()
    %63 = vector.shape_cast %62 : vector<8x64x8xf32> to vector<2x4x64x8xf32>
    %64 = vector.extract_strided_slice %63 {offsets = [0, 0, 0, 0], sizes = [2, 1, 64, 8], strides = [1, 1, 1, 1]} : vector<2x4x64x8xf32> to vector<2x1x64x8xf32>
    %65 = vector.shape_cast %64 : vector<2x1x64x8xf32> to vector<2x64x8xf32>
    %66 = vector.extract_strided_slice %63 {offsets = [0, 1, 0, 0], sizes = [2, 1, 64, 8], strides = [1, 1, 1, 1]} : vector<2x4x64x8xf32> to vector<2x1x64x8xf32>
    %67 = vector.shape_cast %66 : vector<2x1x64x8xf32> to vector<2x64x8xf32>
    %68 = vector.extract_strided_slice %63 {offsets = [0, 2, 0, 0], sizes = [2, 1, 64, 8], strides = [1, 1, 1, 1]} : vector<2x4x64x8xf32> to vector<2x1x64x8xf32>
    %69 = vector.shape_cast %68 : vector<2x1x64x8xf32> to vector<2x64x8xf32>
    %70 = vector.extract_strided_slice %63 {offsets = [0, 3, 0, 0], sizes = [2, 1, 64, 8], strides = [1, 1, 1, 1]} : vector<2x4x64x8xf32> to vector<2x1x64x8xf32>
    %71 = vector.shape_cast %70 : vector<2x1x64x8xf32> to vector<2x64x8xf32>
    %72 = tpu.concatenate %65, %67, %69, %71 in 2 : vector<2x64x8xf32>, vector<2x64x8xf32>, vector<2x64x8xf32>, vector<2x64x8xf32> -> vector<2x64x32xf32>
    %73 = vector.shape_cast %72 : vector<2x64x32xf32> to vector<128x32xf32>
    %74 = arith.truncf %73 : vector<128x32xf32> to vector<128x32xbf16>
    %c0_14 = arith.constant 0 : index
    %c0_15 = arith.constant 0 : index
    %75 = vector.load %arg6[%c0_14, %c0_15] : memref<32x32xbf16, #tpu.memory_space<vmem>>, vector<32x32xbf16>
    %cst_16 = arith.constant dense<0.000000e+00> : vector<128x32xf32>
    %76 = tpu.matmul %74, %75, %cst_16 {dimension_numbers = #tpu.dot_dimension_numbers<[1], [0], [0], [1], [0, 0, 1, 1], [], []>} : vector<128x32xbf16>, vector<32x32xbf16>, vector<128x32xf32> -> vector<128x32xf32>
    %c0_17 = arith.constant 0 : index
    %c0_18 = arith.constant 0 : index
    %77 = vector.load %arg7[%c0_17, %c0_18] : memref<1x32xf32, #tpu.memory_space<vmem>>, vector<1x32xf32>
    %78 = vector.broadcast %77 : vector<1x32xf32> to vector<128x32xf32>
    %79 = arith.addf %76, %78 : vector<128x32xf32>
    %80 = vector.shape_cast %79 : vector<128x32xf32> to vector<2x64x32xf32>
    %c0_19 = arith.constant 0 : index
    %c0_20 = arith.constant 0 : index
    %c0_21 = arith.constant 0 : index
    %81 = vector.load %arg8[%c0_19, %c0_20, %c0_21] : memref<2x64x32xf32, #tpu.memory_space<vmem>>, vector<2x64x32xf32>
    tpu.vector_store %arg8[%c0_19, %c0_20, %c0_21], %80 {strides = array<i32>} : memref<2x64x32xf32, #tpu.memory_space<vmem>>, vector<2x64x32xf32>,
    return
  }
  func.func @transform_0(%arg0: i32) -> i32 {
    %c0_i32 = arith.constant 0 : i32
    %c0_i32_0 = arith.constant 0 : i32
    return %c0_i32 : i32
  }
  func.func @transform_1(%arg0: i32) -> (i32, i32, i32) {
    %c0_i32 = arith.constant 0 : i32
    %c0_i32_0 = arith.constant 0 : i32
    %c0_i32_1 = arith.constant 0 : i32
    return %arg0, %c0_i32, %c0_i32_0 : i32, i32, i32
  }
  func.func @transform_2(%arg0: i32) -> (i32, i32, i32) {
    %c0_i32 = arith.constant 0 : i32
    %c0_i32_0 = arith.constant 0 : i32
    %c0_i32_1 = arith.constant 0 : i32
    return %arg0, %c0_i32, %c0_i32_0 : i32, i32, i32
  }
  func.func @transform_3(%arg0: i32) -> (i32, i32) {
    %c0_i32 = arith.constant 0 : i32
    %c0_i32_0 = arith.constant 0 : i32
    %c0_i32_1 = arith.constant 0 : i32
    return %c0_i32, %c0_i32_0 : i32, i32
  }
  func.func @transform_4(%arg0: i32) -> (i32, i32) {
    %c0_i32 = arith.constant 0 : i32
    %c0_i32_0 = arith.constant 0 : i32
    %c0_i32_1 = arith.constant 0 : i32
    return %c0_i32, %c0_i32_0 : i32, i32
  }
  func.func @transform_5(%arg0: i32) -> (i32, i32) {
    %c0_i32 = arith.constant 0 : i32
    %c0_i32_0 = arith.constant 0 : i32
    %c0_i32_1 = arith.constant 0 : i32
    return %c0_i32, %c0_i32_0 : i32, i32
  }
  func.func @transform_6(%arg0: i32) -> (i32, i32) {
    %c0_i32 = arith.constant 0 : i32
    %c0_i32_0 = arith.constant 0 : i32
    %c0_i32_1 = arith.constant 0 : i32
    return %c0_i32, %c0_i32_0 : i32, i32
  }
  func.func @transform_7(%arg0: i32) -> (i32, i32, i32) {
    %c0_i32 = arith.constant 0 : i32
    %c0_i32_0 = arith.constant 0 : i32
    %c0_i32_1 = arith.constant 0 : i32
    return %arg0, %c0_i32, %c0_i32_0 : i32, i32, i32
  }
}

module attributes {stable_mosaic.version = 11 : i64} {
  func.func @_norm_mlp_kernel(%arg0: i32, %arg1: i32, %arg2: memref<128x32xf32, #tpu.memory_space<vmem>>, %arg3: memref<1x32xf32, #tpu.memory_space<vmem>>, %arg4: memref<1x32xf32, #tpu.memory_space<vmem>>, %arg5: memref<32x128xbf16, #tpu.memory_space<vmem>>, %arg6: memref<1x128xf32, #tpu.memory_space<vmem>>, %arg7: memref<128x32xbf16, #tpu.memory_space<vmem>>, %arg8: memref<1x32xf32, #tpu.memory_space<vmem>>, %arg9: memref<128x32xf32, #tpu.memory_space<vmem>>, %arg10: memref<128x32xf32, #tpu.memory_space<vmem>>, %arg11: memref<128x32xf32, #tpu.memory_space<vmem>>) attributes {dimension_semantics = [#tpu.dimension_semantics<parallel>, #tpu.dimension_semantics<arbitrary>], iteration_bounds = array<i64: 1, 1>, scalar_prefetch = 0 : i64, scratch_operands = 2 : i64, tpu.core_type = #tpu.core_type<tc>, window_params = [{transform_indices = @transform_0, window_bounds = array<i64: 128, 32>}, {pipeline_mode = #tpu.pipeline_mode<synchronous>, transform_indices = @transform_1, window_bounds = array<i64: 1, 32>}, {pipeline_mode = #tpu.pipeline_mode<synchronous>, transform_indices = @transform_2, window_bounds = array<i64: 1, 32>}, {transform_indices = @transform_3, window_bounds = array<i64: 32, 128>}, {transform_indices = @transform_4, window_bounds = array<i64: 1, 128>}, {transform_indices = @transform_5, window_bounds = array<i64: 128, 32>}, {pipeline_mode = #tpu.pipeline_mode<synchronous>, transform_indices = @transform_6, window_bounds = array<i64: 1, 32>}, {transform_indices = @transform_7, window_bounds = array<i64: 128, 32>}]} {
    %c0_i32 = arith.constant 0 : i32
    %0 = arith.cmpi eq, %arg1, %c0_i32 : i32
    %1 = arith.extui %0 : i1 to i32
    %c0_i32_0 = arith.constant 0 : i32
    %2 = arith.cmpi ne, %1, %c0_i32_0 : i32
    scf.if %2 {
      %c0_16 = arith.constant 0 : index
      %c0_17 = arith.constant 0 : index
      %21 = vector.load %arg2[%c0_16, %c0_17] : memref<128x32xf32, #tpu.memory_space<vmem>>, vector<128x32xf32>
      %cst_18 = arith.constant dense<0.000000e+00> : vector<128xf32>
      %22 = vector.multi_reduction <add>, %21, %cst_18 [1] : vector<128x32xf32> to vector<128xf32>
      %23 = vector.shape_cast %22 : vector<128xf32> to vector<128x1xf32>
      %cst_19 = arith.constant 3.200000e+01 : f32
      %24 = vector.broadcast %cst_19 : f32 to vector<128x1xf32>
      %25 = arith.divf %23, %24 : vector<128x1xf32>
      %26 = vector.broadcast %25 : vector<128x1xf32> to vector<128x32xf32>
      %27 = arith.subf %21, %26 : vector<128x32xf32>
      %28 = arith.mulf %27, %27 : vector<128x32xf32>
      %cst_20 = arith.constant dense<0.000000e+00> : vector<128xf32>
      %29 = vector.multi_reduction <add>, %28, %cst_20 [1] : vector<128x32xf32> to vector<128xf32>
      %30 = vector.shape_cast %29 : vector<128xf32> to vector<128x1xf32>
      %cst_21 = arith.constant 3.200000e+01 : f32
      %31 = vector.broadcast %cst_21 : f32 to vector<128x1xf32>
      %32 = arith.divf %30, %31 : vector<128x1xf32>
      %33 = vector.broadcast %25 : vector<128x1xf32> to vector<128x32xf32>
      %34 = arith.subf %21, %33 : vector<128x32xf32>
      %cst_22 = arith.constant 9.99999974E-6 : f32
      %35 = vector.broadcast %cst_22 : f32 to vector<128x1xf32>
      %36 = arith.addf %32, %35 : vector<128x1xf32>
      %37 = math.rsqrt %36 : vector<128x1xf32>
      %38 = vector.broadcast %37 : vector<128x1xf32> to vector<128x32xf32>
      %39 = arith.mulf %34, %38 : vector<128x32xf32>
      %c0_23 = arith.constant 0 : index
      %c0_24 = arith.constant 0 : index
      %40 = vector.load %arg3[%c0_23, %c0_24] : memref<1x32xf32, #tpu.memory_space<vmem>>, vector<1x32xf32>
      %41 = vector.broadcast %40 : vector<1x32xf32> to vector<128x32xf32>
      %42 = arith.mulf %39, %41 : vector<128x32xf32>
      %c0_25 = arith.constant 0 : index
      %c0_26 = arith.constant 0 : index
      %43 = vector.load %arg4[%c0_25, %c0_26] : memref<1x32xf32, #tpu.memory_space<vmem>>, vector<1x32xf32>
      %44 = vector.broadcast %43 : vector<1x32xf32> to vector<128x32xf32>
      %45 = arith.addf %42, %44 : vector<128x32xf32>
      %c0_27 = arith.constant 0 : index
      %c0_28 = arith.constant 0 : index
      %46 = vector.load %arg10[%c0_27, %c0_28] : memref<128x32xf32, #tpu.memory_space<vmem>>, vector<128x32xf32>
      tpu.vector_store %arg10[%c0_27, %c0_28], %45 {strides = array<i32>} : memref<128x32xf32, #tpu.memory_space<vmem>>, vector<128x32xf32>,
      %cst_29 = arith.constant 0.000000e+00 : f32
      %47 = vector.broadcast %cst_29 : f32 to vector<128x32xf32>
      %c0_30 = arith.constant 0 : index
      %c0_31 = arith.constant 0 : index
      %48 = vector.load %arg11[%c0_30, %c0_31] : memref<128x32xf32, #tpu.memory_space<vmem>>, vector<128x32xf32>
      tpu.vector_store %arg11[%c0_30, %c0_31], %47 {strides = array<i32>} : memref<128x32xf32, #tpu.memory_space<vmem>>, vector<128x32xf32>,
    } else {
    }
    %c0 = arith.constant 0 : index
    %c0_1 = arith.constant 0 : index
    %3 = vector.load %arg10[%c0, %c0_1] : memref<128x32xf32, #tpu.memory_space<vmem>>, vector<128x32xf32>
    %4 = arith.truncf %3 : vector<128x32xf32> to vector<128x32xbf16>
    %c0_2 = arith.constant 0 : index
    %c0_3 = arith.constant 0 : index
    %5 = vector.load %arg5[%c0_2, %c0_3] : memref<32x128xbf16, #tpu.memory_space<vmem>>, vector<32x128xbf16>
    %cst = arith.constant dense<0.000000e+00> : vector<128x128xf32>
    %6 = tpu.matmul %4, %5, %cst {dimension_numbers = #tpu.dot_dimension_numbers<[1], [0], [0], [1], [0, 0, 1, 1], [], []>} : vector<128x32xbf16>, vector<32x128xbf16>, vector<128x128xf32> -> vector<128x128xf32>
    %c0_4 = arith.constant 0 : index
    %c0_5 = arith.constant 0 : index
    %7 = vector.load %arg6[%c0_4, %c0_5] : memref<1x128xf32, #tpu.memory_space<vmem>>, vector<1x128xf32>
    %8 = vector.broadcast %7 : vector<1x128xf32> to vector<128x128xf32>
    %9 = arith.addf %6, %8 : vector<128x128xf32>
    %cst_6 = arith.constant 0.000000e+00 : f32
    %10 = vector.broadcast %cst_6 : f32 to vector<128x128xf32>
    %11 = arith.maximumf %9, %10 : vector<128x128xf32>
    %c0_7 = arith.constant 0 : index
    %c0_8 = arith.constant 0 : index
    %12 = vector.load %arg11[%c0_7, %c0_8] : memref<128x32xf32, #tpu.memory_space<vmem>>, vector<128x32xf32>
    %13 = arith.truncf %11 : vector<128x128xf32> to vector<128x128xbf16>
    %c0_9 = arith.constant 0 : index
    %c0_10 = arith.constant 0 : index
    %14 = vector.load %arg7[%c0_9, %c0_10] : memref<128x32xbf16, #tpu.memory_space<vmem>>, vector<128x32xbf16>
    %cst_11 = arith.constant dense<0.000000e+00> : vector<128x32xf32>
    %15 = tpu.matmul %13, %14, %cst_11 {dimension_numbers = #tpu.dot_dimension_numbers<[1], [0], [0], [1], [0, 0, 1, 1], [], []>} : vector<128x128xbf16>, vector<128x32xbf16>, vector<128x32xf32> -> vector<128x32xf32>
    %16 = arith.addf %12, %15 : vector<128x32xf32>
    %c0_12 = arith.constant 0 : index
    %c0_13 = arith.constant 0 : index
    %17 = vector.load %arg11[%c0_12, %c0_13] : memref<128x32xf32, #tpu.memory_space<vmem>>, vector<128x32xf32>
    tpu.vector_store %arg11[%c0_12, %c0_13], %16 {strides = array<i32>} : memref<128x32xf32, #tpu.memory_space<vmem>>, vector<128x32xf32>,
    %c0_i32_14 = arith.constant 0 : i32
    %18 = arith.cmpi eq, %arg1, %c0_i32_14 : i32
    %19 = arith.extui %18 : i1 to i32
    %c0_i32_15 = arith.constant 0 : i32
    %20 = arith.cmpi ne, %19, %c0_i32_15 : i32
    scf.if %20 {
      %c0_16 = arith.constant 0 : index
      %c0_17 = arith.constant 0 : index
      %21 = vector.load %arg10[%c0_16, %c0_17] : memref<128x32xf32, #tpu.memory_space<vmem>>, vector<128x32xf32>
      %c0_18 = arith.constant 0 : index
      %c0_19 = arith.constant 0 : index
      %22 = vector.load %arg11[%c0_18, %c0_19] : memref<128x32xf32, #tpu.memory_space<vmem>>, vector<128x32xf32>
      %23 = arith.addf %21, %22 : vector<128x32xf32>
      %c0_20 = arith.constant 0 : index
      %c0_21 = arith.constant 0 : index
      %24 = vector.load %arg8[%c0_20, %c0_21] : memref<1x32xf32, #tpu.memory_space<vmem>>, vector<1x32xf32>
      %25 = vector.broadcast %24 : vector<1x32xf32> to vector<128x32xf32>
      %26 = arith.addf %23, %25 : vector<128x32xf32>
      %c0_22 = arith.constant 0 : index
      %c0_23 = arith.constant 0 : index
      %27 = vector.load %arg9[%c0_22, %c0_23] : memref<128x32xf32, #tpu.memory_space<vmem>>, vector<128x32xf32>
      tpu.vector_store %arg9[%c0_22, %c0_23], %26 {strides = array<i32>} : memref<128x32xf32, #tpu.memory_space<vmem>>, vector<128x32xf32>,
    } else {
    }
    return
  }
  func.func @transform_0(%arg0: i32, %arg1: i32) -> (i32, i32) {
    %c0_i32 = arith.constant 0 : i32
    %c0_i32_0 = arith.constant 0 : i32
    return %arg0, %c0_i32 : i32, i32
  }
  func.func @transform_1(%arg0: i32, %arg1: i32) -> (i32, i32) {
    %c0_i32 = arith.constant 0 : i32
    %c0_i32_0 = arith.constant 0 : i32
    %c0_i32_1 = arith.constant 0 : i32
    return %c0_i32, %c0_i32_0 : i32, i32
  }
  func.func @transform_2(%arg0: i32, %arg1: i32) -> (i32, i32) {
    %c0_i32 = arith.constant 0 : i32
    %c0_i32_0 = arith.constant 0 : i32
    %c0_i32_1 = arith.constant 0 : i32
    return %c0_i32, %c0_i32_0 : i32, i32
  }
  func.func @transform_3(%arg0: i32, %arg1: i32) -> (i32, i32) {
    %c0_i32 = arith.constant 0 : i32
    %c0_i32_0 = arith.constant 0 : i32
    return %c0_i32, %arg1 : i32, i32
  }
  func.func @transform_4(%arg0: i32, %arg1: i32) -> (i32, i32) {
    %c0_i32 = arith.constant 0 : i32
    %c0_i32_0 = arith.constant 0 : i32
    return %c0_i32, %arg1 : i32, i32
  }
  func.func @transform_5(%arg0: i32, %arg1: i32) -> (i32, i32) {
    %c0_i32 = arith.constant 0 : i32
    %c0_i32_0 = arith.constant 0 : i32
    return %arg1, %c0_i32 : i32, i32
  }
  func.func @transform_6(%arg0: i32, %arg1: i32) -> (i32, i32) {
    %c0_i32 = arith.constant 0 : i32
    %c0_i32_0 = arith.constant 0 : i32
    %c0_i32_1 = arith.constant 0 : i32
    return %c0_i32, %c0_i32_0 : i32, i32
  }
  func.func @transform_7(%arg0: i32, %arg1: i32) -> (i32, i32) {
    %c0_i32 = arith.constant 0 : i32
    %c0_i32_0 = arith.constant 0 : i32
    return %arg0, %c0_i32 : i32, i32
  }
}

</mosaic_0001>

<bundles_post_ra>
// kernel: swin_transformer_block.5
= control target key start
LH: loop header
LB: loop body
LE: loop exit
PB: predicated region body
PF: predicated region fallthrough
CT: control target
= control target key end

     0   :  { %vm47_vm0 = vcmask 261120   ;;  %s1547_s0 = inlined_call_operand.vmem [shape: f32[128,32], index: 0, kind: input, shape index: {}]   ;;  %s1548_s3 = inlined_call_operand.vmem [shape: bf16[32,128], index: 3, kind: input, shape index: {}]   ;;  %s1549_s5 = inlined_call_operand.vmem [shape: bf16[128,32], index: 5, kind: input, shape index: {}]   ;;  %s1550_s1 = inlined_call_operand.vmem [shape: f32[1,32], index: 1, kind: input, shape index: {}]   ;;  %s1551_s2 = inlined_call_operand.vmem [shape: f32[1,32], index: 2, kind: input, shape index: {}]   ;;  %s1552_s4 = inlined_call_operand.vmem [shape: f32[1,128], index: 4, kind: input, shape index: {}]   ;;  %s1553_s6 = inlined_call_operand.vmem [shape: f32[1,32], index: 6, kind: input, shape index: {}]   ;;  %s1554_s7 = inlined_call_operand.vmem [shape: f32[128,32], index: 7, kind: output, shape index: {}]  }
   0x1   :  { %v31_v0 = vld [vmem:[%s1547_s0] sm:$0xff]  ;;  %v33_v1 = vld [vmem:[%s1547_s0 + $0x10] sm:$0xff]  ;;  %v32_v2 = vld [vmem:[%s1547_s0 + $0x8] sm:$0xff] }
   0x2   :  { %v48_v3 = vsel %vm47_vm0, %v31_v0, 0.0  ;;  %v54_v4 = vsel %vm47_vm0, %v33_v1, 0.0  ;;  %v34_v5 = vld [vmem:[%s1547_s0 + $0x18] sm:$0xff]  ;;  %v51_v6 = vsel %vm47_vm0, %v32_v2, 0.0  ;;  %v35_v8 = vld [vmem:[%s1547_s0 + $0x20] sm:$0xff]  ;;  %v36_v9 = vld [vmem:[%s1547_s0 + $0x28] sm:$0xff] }
   0x3   :  { %49 = vadd.xlane.f32.xlu0 %v48_v3  ;;  %55 = vadd.xlane.f32.xlu1 %v54_v4  ;;  %v57_v7 = vsel %vm47_vm0, %v34_v5, 0.0  ;;  %v60_v10 = vsel %vm47_vm0, %v35_v8, 0.0  ;;  %v63_v11 = vsel %vm47_vm0, %v36_v9, 0.0  ;;  %v1058_v12 = vld [vmem:[%s1547_s0 + $0x30] sm:$0xff]  ;;  %v1063_v13 = vld [vmem:[%s1547_s0 + $0x38] sm:$0xff]  ;;  %v1072_v16 = vld [vmem:[%s1547_s0 + $0x40] sm:$0xff] }
   0x4   :  { %v66_v14 = vsel %vm47_vm0, %v1058_v12, 0.0  ;;  %v69_v15 = vsel %vm47_vm0, %v1063_v13, 0.0  ;;  %v1077_v17 = vld [vmem:[%s1547_s0 + $0x48] sm:$0xff]  ;;  %v72_v18 = vsel %vm47_vm0, %v1072_v16, 0.0  ;;  %v1086_v20 = vld [vmem:[%s1547_s0 + $0x50] sm:$0xff]  ;;  %v1091_v21 = vld [vmem:[%s1547_s0 + $0x58] sm:$0xff] }
   0x5   :  { %v75_v19 = vsel %vm47_vm0, %v1077_v17, 0.0  ;;  %v78_v22 = vsel %vm47_vm0, %v1086_v20, 0.0  ;;  %v81_v23 = vsel %vm47_vm0, %v1091_v21, 0.0  ;;  %v1100_v24 = vld [vmem:[%s1547_s0 + $0x60] sm:$0xff]  ;;  %v1105_v25 = vld [vmem:[%s1547_s0 + $0x68] sm:$0xff]  ;;  %v1114_v28 = vld [vmem:[%s1547_s0 + $0x70] sm:$0xff] }
   0x6   :  { %v84_v26 = vsel %vm47_vm0, %v1100_v24, 0.0  ;;  %v87_v27 = vsel %vm47_vm0, %v1105_v25, 0.0  ;;  %v1119_v29 = vld [vmem:[%s1547_s0 + $0x78] sm:$0xff]  ;;  %v90_v30 = vsel %vm47_vm0, %v1114_v28, 0.0 }
   0x7   :  { %52 = vadd.xlane.f32.xlu0 %v51_v6  ;;  %58 = vadd.xlane.f32.xlu1 %v57_v7  ;;  %v93_v31 = vsel %vm47_vm0, %v1119_v29, 0.0 }
   0xb   :  { %61 = vadd.xlane.f32.xlu0 %v60_v10  ;;  %64 = vadd.xlane.f32.xlu1 %v63_v11 }
   0xf   :  { %67 = vadd.xlane.f32.xlu0 %v66_v14  ;;  %70 = vadd.xlane.f32.xlu1 %v69_v15 }
  0x13   :  { %73 = vadd.xlane.f32.xlu0 %v72_v18  ;;  %76 = vadd.xlane.f32.xlu1 %v75_v19 }
  0x17   :  { %79 = vadd.xlane.f32.xlu0 %v78_v22  ;;  %82 = vadd.xlane.f32.xlu1 %v81_v23 }
  0x1b   :  { %85 = vadd.xlane.f32.xlu0 %v84_v26  ;;  %88 = vadd.xlane.f32.xlu1 %v87_v27 }
  0x1f   :  { %91 = vadd.xlane.f32.xlu0 %v90_v30  ;;  %94 = vadd.xlane.f32.xlu1 %v93_v31 }
  0x90   :  { %v50_v32 = vpop.xlane.xlu0 %49  ;;  %v56_v33 = vpop.xlane.xlu1 %55 }
  0x91   :  { %v97_v34 = vmul.f32 0.03125, %v50_v32  ;;  %v99_v35 = vmul.f32 0.03125, %v56_v33 }
  0x93   :  { %v1125_v36 = vsub.f32 %v31_v0, %v97_v34  ;;  %v1127_v37 = vsub.f32 %v33_v1, %v99_v35 }
  0x94   :  { %v53_v38 = vpop.xlane.xlu0 %52  ;;  %v59_v39 = vpop.xlane.xlu1 %58 }
  0x95   :  { %v98_v40 = vmul.f32 0.03125, %v53_v38  ;;  %v100_v41 = vmul.f32 0.03125, %v59_v39  ;;  %v129_v42 = vmul.f32 %v1125_v36, %v1125_v36  ;;  %v131_v43 = vmul.f32 %v1127_v37, %v1127_v37 }
  0x97   :  { %v1133_v44 = vsub.f32 %v32_v2, %v98_v40  ;;  %v1135_v45 = vsub.f32 %v34_v5, %v100_v41  ;;  %v145_v46 = vsel %vm47_vm0, %v129_v42, 0.0  ;;  %v151_v49 = vsel %vm47_vm0, %v131_v43, 0.0 }
  0x98   :  { %146 = vadd.xlane.f32.xlu0 %v145_v46  ;;  %v62_v47 = vpop.xlane.xlu0 %61  ;;  %v65_v48 = vpop.xlane.xlu1 %64 }
  0x99   :  { %v101_v50 = vmul.f32 0.03125, %v62_v47  ;;  %v102_v51 = vmul.f32 0.03125, %v65_v48  ;;  %v130_v52 = vmul.f32 %v1133_v44, %v1133_v44  ;;  %v132_v53 = vmul.f32 %v1135_v45, %v1135_v45 }
  0x9b   :  { %v1143_v54 = vsub.f32 %v35_v8, %v101_v50  ;;  %v1145_v55 = vsub.f32 %v36_v9, %v102_v51  ;;  %v148_v56 = vsel %vm47_vm0, %v130_v52, 0.0  ;;  %v154_v59 = vsel %vm47_vm0, %v132_v53, 0.0  ;;  %v949_v53 = vld [vmem:[%s1548_s3 + $0x8] sm:$0xff]  }
  0x9c   :  { %152 = vadd.xlane.f32.xlu0 %v151_v49  ;;  %149 = vadd.xlane.f32.xlu1 %v148_v56  ;;  %v68_v57 = vpop.xlane.xlu0 %67  ;;  %v71_v58 = vpop.xlane.xlu1 %70  ;;  %v1224_v56 = vld [vmem:[%s1549_s5] sm:$0xff]  }
  0x9d   :  { %v103_v60 = vmul.f32 0.03125, %v68_v57  ;;  %v104_v61 = vmul.f32 0.03125, %v71_v58  ;;  %v133_v62 = vmul.f32 %v1143_v54, %v1143_v54  ;;  %v134_v63 = vmul.f32 %v1145_v55, %v1145_v55  ;;  %v1230_v57 = vld [vmem:[%s1549_s5 + $0x8] sm:$0xff]   ;;  %931 = vmatprep.subr.bf16.mxu1 %v1224_v56  ;;  %v1238_v58 = vld [vmem:[%s1549_s5 + $0x10] sm:$0xff]  }
  0x9e   :  { %939 = vmatpush3.bf16.msra.mxu1 %v1224_v56 }
  0x9f   :  { %v1154_v0 = vsub.f32 %v1058_v12, %v103_v60  ;;  %v1157_v1 = vsub.f32 %v1063_v13, %v104_v61  ;;  %v157_v2 = vsel %vm47_vm0, %v133_v62, 0.0  ;;  %v160_v5 = vsel %vm47_vm0, %v134_v63, 0.0  ;;  %932 = vmatprep.subr.bf16.mxu1 %v1230_v57  ;;  %v1252_v60 = vld [vmem:[%s1549_s5 + $0x20] sm:$0xff]   ;;  %v1259_v61 = vld [vmem:[%s1549_s5 + $0x28] sm:$0xff]  }
  0xa0   :  { %155 = vadd.xlane.f32.xlu1 %v154_v59  ;;  %158 = vadd.xlane.f32.xlu0 %v157_v2  ;;  %v74_v3 = vpop.xlane.xlu0 %73  ;;  %v77_v4 = vpop.xlane.xlu1 %76  ;;  %v1245_v59 = vld [vmem:[%s1549_s5 + $0x18] sm:$0xff]  }
  0xa1   :  { %v105_v6 = vmul.f32 0.03125, %v74_v3  ;;  %v106_v7 = vmul.f32 0.03125, %v77_v4  ;;  %v135_v8 = vmul.f32 %v1154_v0, %v1154_v0  ;;  %v136_v9 = vmul.f32 %v1157_v1, %v1157_v1 }
  0xa2   :  { %940 = vmatpush3.bf16.msra.mxu1 %v1230_v57 }
  0xa3   :  { %v1166_v10 = vsub.f32 %v1072_v16, %v105_v6  ;;  %v1169_v11 = vsub.f32 %v1077_v17, %v106_v7  ;;  %v163_v12 = vsel %vm47_vm0, %v135_v8, 0.0  ;;  %v166_v15 = vsel %vm47_vm0, %v136_v9, 0.0  ;;  %933 = vmatprep.subr.bf16.mxu1 %v1238_v58 }
  0xa4   :  { %161 = vadd.xlane.f32.xlu1 %v160_v5  ;;  %164 = vadd.xlane.f32.xlu0 %v163_v12  ;;  %v80_v13 = vpop.xlane.xlu0 %79  ;;  %v83_v14 = vpop.xlane.xlu1 %82 }
  0xa5   :  { %v107_v18 = vmul.f32 0.03125, %v80_v13  ;;  %v108_v19 = vmul.f32 0.03125, %v83_v14  ;;  %v137_v22 = vmul.f32 %v1166_v10, %v1166_v10  ;;  %v138_v16 = vmul.f32 %v1169_v11, %v1169_v11 }
  0xa6   :  { %941 = vmatpush3.bf16.msra.mxu1 %v1238_v58 }
  0xa7   :  { %v1178_v23 = vsub.f32 %v1086_v20, %v107_v18  ;;  %v1181_v17 = vsub.f32 %v1091_v21, %v108_v19  ;;  %v169_v26 = vsel %vm47_vm0, %v137_v22, 0.0  ;;  %v172_v31 = vsel %vm47_vm0, %v138_v16, 0.0  ;;  %934 = vmatprep.subr.bf16.mxu1 %v1245_v59 }
  0xa8   :  { %167 = vadd.xlane.f32.xlu1 %v166_v15  ;;  %170 = vadd.xlane.f32.xlu0 %v169_v26  ;;  %v86_v27 = vpop.xlane.xlu0 %85  ;;  %v89_v30 = vpop.xlane.xlu1 %88 }
  0xa9   :  { %v109_v32 = vmul.f32 0.03125, %v86_v27  ;;  %v110_v33 = vmul.f32 0.03125, %v89_v30  ;;  %v139_v34 = vmul.f32 %v1178_v23, %v1178_v23  ;;  %v140_v20 = vmul.f32 %v1181_v17, %v1181_v17  ;;  %v1267_v30 = vld [vmem:[%s1550_s1] ss:$0 sm:$0xff] }
  0xaa   :  { %942 = vmatpush3.bf16.msra.mxu1 %v1245_v59 }
  0xab   :  { %v1190_v35 = vsub.f32 %v1100_v24, %v109_v32  ;;  %v1193_v21 = vsub.f32 %v1105_v25, %v110_v33  ;;  %v175_v38 = vsel %vm47_vm0, %v139_v34, 0.0  ;;  %v178_v41 = vsel %vm47_vm0, %v140_v20, 0.0  ;;  %935 = vmatprep.subr.bf16.mxu1 %v1252_v60 }
  0xac   :  { %173 = vadd.xlane.f32.xlu1 %v172_v31  ;;  %176 = vadd.xlane.f32.xlu0 %v175_v38  ;;  %v92_v39 = vpop.xlane.xlu0 %91  ;;  %v95_v40 = vpop.xlane.xlu1 %94  ;;  %v1273_v38 = vld [vmem:[%s1551_s2] ss:$0 sm:$0xff] }
  0xad   :  { %v111_v42 = vmul.f32 0.03125, %v92_v39  ;;  %v112_v43 = vmul.f32 0.03125, %v95_v40  ;;  %v141_v46 = vmul.f32 %v1190_v35, %v1190_v35  ;;  %v142_v24 = vmul.f32 %v1193_v21, %v1193_v21 }
  0xae   :  { %943 = vmatpush3.bf16.msra.mxu1 %v1252_v60 }
  0xaf   :  { %v1202_v47 = vsub.f32 %v1114_v28, %v111_v42  ;;  %v1205_v25 = vsub.f32 %v1119_v29, %v112_v43  ;;  %v181_v48 = vsel %vm47_vm0, %v141_v46, 0.0  ;;  %v184_v49 = vsel %vm47_vm0, %v142_v24, 0.0  ;;  %v948_v29 = vld [vmem:[%s1548_s3] sm:$0xff]   ;;  %936 = vmatprep.subr.bf16.mxu1 %v1259_v61 }
  0xb0   :  { %179 = vadd.xlane.f32.xlu1 %v178_v41  ;;  %182 = vadd.xlane.f32.xlu0 %v181_v48 }
  0xb1   :  { %v143_v50 = vmul.f32 %v1202_v47, %v1202_v47  ;;  %v144_v51 = vmul.f32 %v1205_v25, %v1205_v25  ;;  %879 = vmatprep.subr.bf16.mxu0 %v948_v29 }
  0xb2   :  { %880 = vmatpush3.bf16.msra.mxu0 %v948_v29  ;;  %944 = vmatpush3.bf16.msra.mxu1 %v1259_v61 }
  0xb3   :  { %v187_v52 = vsel %vm47_vm0, %v143_v50, 0.0  ;;  %v190_v28 = vsel %vm47_vm0, %v144_v51, 0.0  ;;  %881 = vmatprep.subr.bf16.mxu0 %v949_v53 }
  0xb4   :  { %185 = vadd.xlane.f32.xlu1 %v184_v49  ;;  %188 = vadd.xlane.f32.xlu0 %v187_v52 }
  0xb6   :  { %882 = vmatpush3.bf16.msra.mxu0 %v949_v53 }
  0xb7   :  { %899 = vmatprep.subr.bf16.mxu0 %v1224_v56 }
  0xb8   :  { %191 = vadd.xlane.f32.xlu1 %v190_v28 }
 0x125   :  { %v147_v62 = vpop.xlane.xlu0 %146 }
 0x126   :  { %v193_v63 = vmul.f32 0.03125, %v147_v62 }
 0x128   :  { %v209_v2 = vadd.f32 1e-05, %v193_v63 }
 0x129   :  { %v150_v3 = vpop.xlane.xlu1 %149  ;;  %v153_v4 = vpop.xlane.xlu0 %152 }
 0x12a   :  { %958 = vrsqrt.f32 %v209_v2  ;;  %v194_v5 = vmul.f32 0.03125, %v150_v3  ;;  %v195_v6 = vmul.f32 0.03125, %v153_v4 }
 0x12c   :  { %v210_v7 = vadd.f32 1e-05, %v194_v5  ;;  %v211_v8 = vadd.f32 1e-05, %v195_v6 }
 0x12d   :  { %v156_v9 = vpop.xlane.xlu1 %155  ;;  %v159_v12 = vpop.xlane.xlu0 %158 }
 0x12e   :  { %960 = vrsqrt.f32 %v210_v7  ;;  %v196_v13 = vmul.f32 0.03125, %v156_v9  ;;  %v197_v14 = vmul.f32 0.03125, %v159_v12 }
 0x12f   :  { %962 = vrsqrt.f32 %v211_v8 }
 0x130   :  { %v212_v15 = vadd.f32 1e-05, %v196_v13  ;;  %v213_v18 = vadd.f32 1e-05, %v197_v14 }
 0x131   :  { %v162_v19 = vpop.xlane.xlu1 %161  ;;  %v165_v22 = vpop.xlane.xlu0 %164 }
 0x132   :  { %964 = vrsqrt.f32 %v212_v15  ;;  %v198_v16 = vmul.f32 0.03125, %v162_v19  ;;  %v199_v26 = vmul.f32 0.03125, %v165_v22 }
 0x133   :  { %966 = vrsqrt.f32 %v213_v18 }
 0x134   :  { %v959_v27 = vpop.eup %958  ;;  %v214_v31 = vadd.f32 1e-05, %v198_v16  ;;  %v215_v32 = vadd.f32 1e-05, %v199_v26 }
 0x135   :  { %v241_v33 = vmul.f32 %v959_v27, %v1125_v36  ;;  %v168_v34 = vpop.xlane.xlu1 %167  ;;  %v171_v20 = vpop.xlane.xlu0 %170 }
 0x136   :  { %968 = vrsqrt.f32 %v214_v31  ;;  %v200_v39 = vmul.f32 0.03125, %v168_v34  ;;  %v201_v40 = vmul.f32 0.03125, %v171_v20 }
 0x137   :  { %v264_v41 = vmul.f32 %v1267_v30, %v241_v33  ;;  %970 = vrsqrt.f32 %v215_v32 }
 0x138   :  { %v961_v42 = vpop.eup %960  ;;  %v216_v43 = vadd.f32 1e-05, %v200_v39  ;;  %v217_v46 = vadd.f32 1e-05, %v201_v40 }
 0x139   :  { %v963_v24 = vpop.eup %962  ;;  %v287_v48 = vadd.f32 %v1273_v38, %v264_v41  ;;  %v242_v36 = vmul.f32 %v961_v42, %v1133_v44  ;;  %v174_v49 = vpop.xlane.xlu1 %173 }
 0x13a   :  { %v177_v50 = vpop.xlane.xlu0 %176  ;;  %v243_v51 = vmul.f32 %v963_v24, %v1127_v37  ;;  %972 = vrsqrt.f32 %v216_v43  ;;  %v202_v52 = vmul.f32 0.03125, %v174_v49 }
 0x13b   :  { %v203_v28 = vmul.f32 0.03125, %v177_v50  ;;  %303 = vst.msk [vmem:[#allocation2] sm:$0xff] %vm47_vm0, %v287_v48  ;;  %v265_v29 = vmul.f32 %v1267_v30, %v242_v36  ;;  %974 = vrsqrt.f32 %v217_v46 }
 0x13c   :  { %v965_v53 = vpop.eup %964  ;;  %v266_v62 = vmul.f32 %v1267_v30, %v243_v51  ;;  %v218_v63 = vadd.f32 1e-05, %v202_v52 }
 0x13d   :  { %v219_v2 = vadd.f32 1e-05, %v203_v28  ;;  %v967_v3 = vpop.eup %966  ;;  %v288_v44 = vadd.f32 %v1273_v38, %v265_v29  ;;  %v244_v4 = vmul.f32 %v965_v53, %v1135_v45  ;;  %v180_v5 = vpop.xlane.xlu1 %179 }
 0x13e   :  { %v183_v37 = vpop.xlane.xlu0 %182  ;;  %v289_v6 = vadd.f32 %v1273_v38, %v266_v62  ;;  %v245_v7 = vmul.f32 %v967_v3, %v1143_v54  ;;  %976 = vrsqrt.f32 %v218_v63  ;;  %v204_v8 = vmul.f32 0.03125, %v180_v5 }
 0x13f   :  { %304 = vst.msk [vmem:[#allocation2 + $0x8] sm:$0xff] %vm47_vm0, %v288_v44  ;;  %v267_v9 = vmul.f32 %v1267_v30, %v244_v4  ;;  %978 = vrsqrt.f32 %v219_v2  ;;  %v205_v12 = vmul.f32 0.03125, %v183_v37 }
 0x140   :  { %v969_v13 = vpop.eup %968  ;;  %305 = vst.msk [vmem:[#allocation2 + $0x10] sm:$0xff] %vm47_vm0, %v289_v6  ;;  %v268_v14 = vmul.f32 %v1267_v30, %v245_v7  ;;  %v220_v45 = vadd.f32 1e-05, %v204_v8 }
 0x141   :  { %v971_v15 = vpop.eup %970  ;;  %v290_v18 = vadd.f32 %v1273_v38, %v267_v9  ;;  %v246_v19 = vmul.f32 %v969_v13, %v1145_v55  ;;  %v221_v54 = vadd.f32 1e-05, %v205_v12  ;;  %v186_v22 = vpop.xlane.xlu1 %185 }
 0x142   :  { %v189_v16 = vpop.xlane.xlu0 %188  ;;  %v291_v26 = vadd.f32 %v1273_v38, %v268_v14  ;;  %v247_v27 = vmul.f32 %v971_v15, %v1154_v0  ;;  %980 = vrsqrt.f32 %v220_v45  ;;  %v206_v31 = vmul.f32 0.03125, %v186_v22  ;;  %v1302_v48 = vld [vmem:[#allocation2] sm:$0xff] }
 0x143   :  { %306 = vst.msk [vmem:[#allocation2 + $0x18] sm:$0xff] %vm47_vm0, %v290_v18  ;;  %v269_v32 = vmul.f32 %v1267_v30, %v246_v19  ;;  %982 = vrsqrt.f32 %v221_v54  ;;  %v207_v33 = vmul.f32 0.03125, %v189_v16 }
 0x144   :  { %v973_v34 = vpop.eup %972  ;;  %307 = vst.msk [vmem:[#allocation2 + $0x20] sm:$0xff] %vm47_vm0, %v291_v26  ;;  %v270_v55 = vmul.f32 %v1267_v30, %v247_v27  ;;  %v222_v20 = vadd.f32 1e-05, %v206_v31 }
 0x145   :  { %v975_v39 = vpop.eup %974  ;;  %v292_v40 = vadd.f32 %v1273_v38, %v269_v32  ;;  %v248_v41 = vmul.f32 %v973_v34, %v1157_v1  ;;  %v223_v0 = vadd.f32 1e-05, %v207_v33  ;;  %v192_v42 = vpop.xlane.xlu1 %191 }
 0x146   :  { %v293_v43 = vadd.f32 %v1273_v38, %v270_v55  ;;  %v249_v46 = vmul.f32 %v975_v39, %v1166_v10  ;;  %984 = vrsqrt.f32 %v222_v20  ;;  %v208_v24 = vmul.f32 0.03125, %v192_v42  ;;  %v1304_v36 = vld [vmem:[#allocation2 + $0x8] sm:$0xff]  ;;  %v833_v42 = vld [vmem:[%s1552_s4] ss:$0 sm:$0xff] }
 0x147   :  { %308 = vst.msk [vmem:[#allocation2 + $0x28] sm:$0xff] %vm47_vm0, %v292_v40  ;;  %v271_v49 = vmul.f32 %v1267_v30, %v248_v41  ;;  %986 = vrsqrt.f32 %v223_v0  ;;  %v351_v1 = vpack.c.bf16 %v1304_v36, %v1302_v48  ;;  %v1317_v63 = vld [vmem:[#allocation2 + $0x10] sm:$0xff]  ;;  %v957_v0 = vld [vmem:[%s1549_s5 + $0x38] sm:$0xff]  }
 0x148   :  { %v977_v50 = vpop.eup %976  ;;  %309 = vst.msk [vmem:[#allocation2 + $0x30] sm:$0xff] %vm47_vm0, %v293_v43  ;;  %v272_v51 = vmul.f32 %v1267_v30, %v249_v46  ;;  %v224_v10 = vadd.f32 1e-05, %v208_v24 }
 0x149   :  { %v979_v52 = vpop.eup %978  ;;  %v294_v28 = vadd.f32 %v1273_v38, %v271_v49  ;;  %v250_v29 = vmul.f32 %v977_v50, %v1169_v11  ;;  %883 = vmatprep.mubr.msk.bf16.mxu0 %vm47_vm0, %v351_v1 }
 0x14a   :  { %v295_v53 = vadd.f32 %v1273_v38, %v272_v51  ;;  %v251_v62 = vmul.f32 %v979_v52, %v1178_v23  ;;  %988 = vrsqrt.f32 %v224_v10  ;;  %v1319_v2 = vld [vmem:[#allocation2 + $0x18] sm:$0xff] }
 0x14b   :  { %310 = vst.msk [vmem:[#allocation2 + $0x38] sm:$0xff] %vm47_vm0, %v294_v28  ;;  %v273_v3 = vmul.f32 %v1267_v30, %v250_v29  ;;  %v352_v44 = vpack.c.bf16 %v1319_v2, %v1317_v63  ;;  %v1332_v8 = vld [vmem:[#allocation2 + $0x20] sm:$0xff] }
 0x14c   :  { %v981_v4 = vpop.eup %980  ;;  %311 = vst.msk [vmem:[#allocation2 + $0x40] sm:$0xff] %vm47_vm0, %v295_v53  ;;  %v274_v11 = vmul.f32 %v1267_v30, %v251_v62 }
 0x14d   :  { %v983_v5 = vpop.eup %982  ;;  %v296_v23 = vadd.f32 %v1273_v38, %v273_v3  ;;  %v252_v37 = vmul.f32 %v981_v4, %v1181_v17  ;;  %884 = vmatmul.mubr.msk.bf16.vlgmr.msra.gmra.mrb[0].mxu0 %vm47_vm0, %v352_v44 }
 0x14e   :  { %v297_v6 = vadd.f32 %v1273_v38, %v274_v11  ;;  %v253_v7 = vmul.f32 %v983_v5, %v1190_v35  ;;  %v1334_v9 = vld [vmem:[#allocation2 + $0x28] sm:$0xff]  ;;  %900 = vmatpush3.bf16.msra.mxu0 %v1224_v56 }
 0x14f   :  { %312 = vst.msk [vmem:[#allocation2 + $0x48] sm:$0xff] %vm47_vm0, %v296_v23  ;;  %v275_v12 = vmul.f32 %v1267_v30, %v252_v37  ;;  %v353_v13 = vpack.c.bf16 %v1334_v9, %v1332_v8  ;;  %901 = vmatprep.subr.bf16.mxu0 %v1230_v57  ;;  %v1349_v19 = vld [vmem:[#allocation2 + $0x30] sm:$0xff] }
 0x150   :  { %v985_v17 = vpop.eup %984  ;;  %313 = vst.msk [vmem:[#allocation2 + $0x50] sm:$0xff] %vm47_vm0, %v297_v6  ;;  %v276_v35 = vmul.f32 %v1267_v30, %v253_v7 }
 0x151   :  { %v987_v14 = vpop.eup %986  ;;  %v298_v45 = vadd.f32 %v1273_v38, %v275_v12  ;;  %v254_v15 = vmul.f32 %v985_v17, %v1193_v21  ;;  %887 = vmatprep.mubr.msk.bf16.mxu0 %vm47_vm0, %v353_v13 }
 0x152   :  { %v299_v56 = vadd.f32 %v1273_v38, %v276_v35  ;;  %v255_v18 = vmul.f32 %v987_v14, %v1202_v47  ;;  %v1351_v54 = vld [vmem:[#allocation2 + $0x38] sm:$0xff]  ;;  %902 = vmatpush3.bf16.msra.mxu0 %v1230_v57 }
 0x153   :  { %314 = vst.msk [vmem:[#allocation2 + $0x58] sm:$0xff] %vm47_vm0, %v298_v45  ;;  %v277_v22 = vmul.f32 %v1267_v30, %v254_v15  ;;  %v354_v16 = vpack.c.bf16 %v1351_v54, %v1349_v19  ;;  %903 = vmatprep.subr.bf16.mxu0 %v1238_v58  ;;  %v1365_v31 = vld [vmem:[#allocation2 + $0x40] sm:$0xff] }
 0x154   :  { %v989_v21 = vpop.eup %988  ;;  %315 = vst.msk [vmem:[#allocation2 + $0x60] sm:$0xff] %vm47_vm0, %v299_v56  ;;  %v278_v47 = vmul.f32 %v1267_v30, %v255_v18 }
 0x155   :  { %v300_v26 = vadd.f32 %v1273_v38, %v277_v22  ;;  %v256_v27 = vmul.f32 %v989_v21, %v1205_v25  ;;  %888 = vmatmul.mubr.msk.bf16.gmra.mrb[4].mxu0 %vm47_vm0, %v354_v16 }
 0x156   :  { %v301_v57 = vadd.f32 %v1273_v38, %v278_v47  ;;  %v1367_v32 = vld [vmem:[#allocation2 + $0x48] sm:$0xff]  ;;  %904 = vmatpush3.bf16.msra.mxu0 %v1238_v58 }
 0x157   :  { %316 = vst.msk [vmem:[#allocation2 + $0x68] sm:$0xff] %vm47_vm0, %v300_v26  ;;  %v279_v33 = vmul.f32 %v1267_v30, %v256_v27  ;;  %v355_v34 = vpack.c.bf16 %v1367_v32, %v1365_v31  ;;  %905 = vmatprep.subr.bf16.mxu0 %v1245_v59  ;;  %v1378_v55 = vld [vmem:[#allocation2 + $0x50] sm:$0xff] }
 0x158   :  { %317 = vst.msk [vmem:[#allocation2 + $0x70] sm:$0xff] %vm47_vm0, %v301_v57 }
 0x159   :  { %v302_v25 = vadd.f32 %v1273_v38, %v279_v33  ;;  %891 = vmatprep.mubr.msk.bf16.mxu0 %vm47_vm0, %v355_v34 }
 0x15a   :  { %v1380_v20 = vld [vmem:[#allocation2 + $0x58] sm:$0xff]  ;;  %906 = vmatpush3.bf16.msra.mxu0 %v1245_v59 }
 0x15b   :  { %318 = vst.msk [vmem:[#allocation2 + $0x78] sm:$0xff] %vm47_vm0, %v302_v25  ;;  %v356_v58 = vpack.c.bf16 %v1380_v20, %v1378_v55  ;;  %907 = vmatprep.subr.bf16.mxu0 %v1252_v60  ;;  %v1388_v30 = vld [vmem:[#allocation2 + $0x60] sm:$0xff] }
 0x15d   :  { %892 = vmatmul.mubr.msk.bf16.gmra.mrb[8].mxu0 %vm47_vm0, %v356_v58 }
 0x15e   :  { %v1390_v38 = vld [vmem:[#allocation2 + $0x68] sm:$0xff]  ;;  %908 = vmatpush3.bf16.msra.mxu0 %v1252_v60  ;;  %v956_v60 = vld [vmem:[%s1549_s5 + $0x30] sm:$0xff]  }
 0x15f   :  { %v357_v39 = vpack.c.bf16 %v1390_v38, %v1388_v30  ;;  %909 = vmatprep.subr.bf16.mxu0 %v1259_v61  ;;  %v1397_v59 = vld [vmem:[#allocation2 + $0x70] sm:$0xff]  ;;  %937 = vmatprep.subr.bf16.mxu1 %v956_v60 }
 0x160   :  { %945 = vmatpush3.bf16.msra.mxu1 %v956_v60 }
 0x161   :  { %895 = vmatprep.mubr.msk.bf16.mxu0 %vm47_vm0, %v357_v39  ;;  %938 = vmatprep.subr.bf16.mxu1 %v957_v0 }
 0x162   :  { %v1399_v40 = vld [vmem:[#allocation2 + $0x78] sm:$0xff]  ;;  %910 = vmatpush3.bf16.msra.mxu0 %v1259_v61  ;;  %v990_v61 = vmov 0.0  }
 0x163   :  { %v358_v41 = vpack.c.bf16 %v1399_v40, %v1397_v59  ;;  %911 = vmatprep.subr.bf16.mxu0 %v956_v60  ;;  %321 = vst.msk [vmem:[#allocation3 + $0x10] sm:$0xff] %vm47_vm0, %v990_v61  ;;  %319 = vst.msk [vmem:[#allocation3] sm:$0xff] %vm47_vm0, %v990_v61 }
 0x164   :  { %946 = vmatpush3.bf16.msra.mxu1 %v957_v0  ;;  %320 = vst.msk [vmem:[#allocation3 + $0x8] sm:$0xff] %vm47_vm0, %v990_v61  ;;  %322 = vst.msk [vmem:[#allocation3 + $0x18] sm:$0xff] %vm47_vm0, %v990_v61 }
 0x165   :  { %896 = vmatmul.mubr.msk.bf16.gmra.mrb[12].mxu0 %vm47_vm0, %v358_v41  ;;  %323 = vst.msk [vmem:[#allocation3 + $0x20] sm:$0xff] %vm47_vm0, %v990_v61  ;;  %324 = vst.msk [vmem:[#allocation3 + $0x28] sm:$0xff] %vm47_vm0, %v990_v61 }
 0x166   :  { %912 = vmatpush3.bf16.msra.mxu0 %v956_v60  ;;  %325 = vst.msk [vmem:[#allocation3 + $0x30] sm:$0xff] %vm47_vm0, %v990_v61  ;;  %326 = vst.msk [vmem:[#allocation3 + $0x38] sm:$0xff] %vm47_vm0, %v990_v61 }
 0x167   :  { %913 = vmatprep.subr.bf16.mxu0 %v957_v0  ;;  %327 = vst.msk [vmem:[#allocation3 + $0x40] sm:$0xff] %vm47_vm0, %v990_v61  ;;  %328 = vst.msk [vmem:[#allocation3 + $0x48] sm:$0xff] %vm47_vm0, %v990_v61 }
 0x168   :  { %329 = vst.msk [vmem:[#allocation3 + $0x50] sm:$0xff] %vm47_vm0, %v990_v61  ;;  %330 = vst.msk [vmem:[#allocation3 + $0x58] sm:$0xff] %vm47_vm0, %v990_v61 }
 0x169   :  { %331 = vst.msk [vmem:[#allocation3 + $0x60] sm:$0xff] %vm47_vm0, %v990_v61  ;;  %332 = vst.msk [vmem:[#allocation3 + $0x68] sm:$0xff] %vm47_vm0, %v990_v61 }
 0x16a   :  { %914 = vmatpush3.bf16.msra.mxu0 %v957_v0  ;;  %333 = vst.msk [vmem:[#allocation3 + $0x70] sm:$0xff] %vm47_vm0, %v990_v61  ;;  %334 = vst.msk [vmem:[#allocation3 + $0x78] sm:$0xff] %vm47_vm0, %v990_v61 }
 0x220   :  { %v885_v43 = vpop.f32.mrb[0].mxu0 }
 0x221   :  { %v450_v46 = vadd.f32 %v885_v43, %v833_v42  ;;  %v441_v24 = vpop.f32.mrb[1].mxu0 }
 0x222   :  { %v442_v49 = vadd.f32 %v833_v42, %v441_v24  ;;  %v886_v1 = vpop.f32.mrb[2].mxu0 }
 0x223   :  { %v453_v50 = vadd.f32 %v886_v1, %v833_v42  ;;  %v444_v51 = vpop.f32.mrb[3].mxu0  ;;  %v506_v52 = vmax.f32 %v450_v46, 0.0 }
 0x224   :  { %v445_v10 = vadd.f32 %v833_v42, %v444_v51  ;;  %v504_v29 = vmax.f32 %v442_v49, 0.0 }
 0x225   :  { %v507_v28 = vmax.f32 %v453_v50, 0.0 }
 0x226   :  { %v505_v53 = vmax.f32 %v445_v10, 0.0 }
 0x227   :  { %v537_v62 = vpack.c.bf16 %v507_v28, %v506_v52  ;;  %v522_v28 = vld [vmem:[#allocation3 + $0x10] sm:$0xff] }
 0x228   :  { %v536_v3 = vpack.c.bf16 %v505_v53, %v504_v29  ;;  %v889_v44 = vpop.f32.mrb[4].mxu0  ;;  %v520_v29 = vld [vmem:[#allocation3] sm:$0xff] }
 0x229   :  { %v466_v4 = vadd.f32 %v889_v44, %v833_v42  ;;  %v457_v11 = vpop.f32.mrb[5].mxu0 }
 0x22a   :  { %v458_v5 = vadd.f32 %v833_v42, %v457_v11  ;;  %v890_v23 = vpop.f32.mrb[6].mxu0  ;;  %915 = vmatprep.mubr.bf16.mxu0 %v536_v3 }
 0x22b   :  { %v469_v37 = vadd.f32 %v890_v23, %v833_v42  ;;  %v460_v6 = vpop.f32.mrb[7].mxu0  ;;  %916 = vmatmul.mubr.bf16.vlgmr.msra.gmra.mrb[16].mxu0 %v537_v62  ;;  %v510_v12 = vmax.f32 %v466_v4, 0.0  ;;  %v523_v62 = vld [vmem:[#allocation3 + $0x18] sm:$0xff]  ;;  %v521_v4 = vld [vmem:[#allocation3 + $0x8] sm:$0xff] }
 0x22c   :  { %v461_v7 = vadd.f32 %v833_v42, %v460_v6  ;;  %v508_v17 = vmax.f32 %v458_v5, 0.0  ;;  %v526_v6 = vld [vmem:[#allocation3 + $0x30] sm:$0xff] }
 0x22d   :  { %v511_v13 = vmax.f32 %v469_v37, 0.0 }
 0x22e   :  { %v509_v35 = vmax.f32 %v461_v7, 0.0  ;;  %v524_v7 = vld [vmem:[#allocation3 + $0x20] sm:$0xff] }
 0x22f   :  { %v539_v14 = vpack.c.bf16 %v511_v13, %v510_v12  ;;  %v527_v13 = vld [vmem:[#allocation3 + $0x38] sm:$0xff] }
 0x230   :  { %v893_v45 = vpop.f32.mrb[8].mxu0  ;;  %v538_v15 = vpack.c.bf16 %v509_v35, %v508_v17 }
 0x231   :  { %v482_v56 = vadd.f32 %v893_v45, %v833_v42  ;;  %v473_v18 = vpop.f32.mrb[9].mxu0 }
 0x232   :  { %v474_v22 = vadd.f32 %v833_v42, %v473_v18  ;;  %v894_v16 = vpop.f32.mrb[10].mxu0  ;;  %919 = vmatprep.mubr.bf16.mxu1 %v538_v15  ;;  %v1437_v15 = vld [vmem:[%s1553_s6] ss:$0 sm:$0xff] }
 0x233   :  { %v485_v21 = vadd.f32 %v894_v16, %v833_v42  ;;  %v476_v47 = vpop.f32.mrb[11].mxu0  ;;  %920 = vmatmul.mubr.bf16.vlgmr.msra.gmra.mrb[0].mxu1 %v539_v14  ;;  %v514_v27 = vmax.f32 %v482_v56, 0.0  ;;  %v525_v14 = vld [vmem:[#allocation3 + $0x28] sm:$0xff] }
 0x234   :  { %v477_v26 = vadd.f32 %v833_v42, %v476_v47  ;;  %v512_v33 = vmax.f32 %v474_v22, 0.0 }
 0x235   :  { %v515_v57 = vmax.f32 %v485_v21, 0.0 }
 0x236   :  { %v513_v34 = vmax.f32 %v477_v26, 0.0 }
 0x237   :  { %v541_v25 = vpack.c.bf16 %v515_v57, %v514_v27 }
 0x238   :  { %v540_v58 = vpack.c.bf16 %v513_v34, %v512_v33  ;;  %v897_v39 = vpop.f32.mrb[12].mxu0 }
 0x239   :  { %v498_v41 = vadd.f32 %v897_v39, %v833_v42  ;;  %v489_v60 = vpop.f32.mrb[13].mxu0  ;;  %v530_v39 = vld [vmem:[#allocation3 + $0x50] sm:$0xff] }
 0x23a   :  { %v490_v0 = vadd.f32 %v833_v42, %v489_v60  ;;  %v898_v61 = vpop.f32.mrb[14].mxu0  ;;  %923 = vmatprep.mubr.bf16.mxu1 %v540_v58 }
 0x23b   :  { %v501_v43 = vadd.f32 %v898_v61, %v833_v42  ;;  %v492_v46 = vpop.f32.mrb[15].mxu0  ;;  %924 = vmatmul.mubr.bf16.gmra.mrb[4].mxu1 %v541_v25  ;;  %v518_v49 = vmax.f32 %v498_v41, 0.0  ;;  %v528_v41 = vld [vmem:[#allocation3 + $0x40] sm:$0xff] }
 0x23c   :  { %v493_v24 = vadd.f32 %v833_v42, %v492_v46  ;;  %v516_v50 = vmax.f32 %v490_v0, 0.0 }
 0x23d   :  { %v519_v1 = vmax.f32 %v501_v43, 0.0  ;;  %v529_v43 = vld [vmem:[#allocation3 + $0x48] sm:$0xff] }
 0x23e   :  { %v517_v51 = vmax.f32 %v493_v24, 0.0 }
 0x23f   :  { %v543_v10 = vpack.c.bf16 %v519_v1, %v518_v49 }
 0x240   :  { %v542_v52 = vpack.c.bf16 %v517_v51, %v516_v50 }
 0x242   :  { %927 = vmatprep.mubr.bf16.mxu1 %v542_v52 }
 0x243   :  { %928 = vmatmul.mubr.bf16.gmra.mrb[8].mxu1 %v543_v10 }
 0x2fe   :  { %v917_v53 = vpop.f32.mrb[16].mxu0 }
 0x2ff   :  { %v707_v3 = vadd.f32 %v917_v53, %v522_v28  ;;  %v642_v44 = vpop.f32.mrb[17].mxu0 }
 0x300   :  { %v705_v11 = vadd.f32 %v642_v44, %v520_v29  ;;  %v918_v5 = vpop.f32.mrb[18].mxu0 }
 0x301   :  { %723 = vst.msk [vmem:[#allocation3 + $0x10] sm:$0xff] %vm47_vm0, %v707_v3  ;;  %v708_v42 = vadd.f32 %v918_v5, %v523_v62  ;;  %v645_v23 = vpop.f32.mrb[19].mxu0 }
 0x302   :  { %721 = vst.msk [vmem:[#allocation3] sm:$0xff] %vm47_vm0, %v705_v11  ;;  %v706_v37 = vadd.f32 %v645_v23, %v521_v4  ;;  %v534_v4 = vld [vmem:[#allocation3 + $0x70] sm:$0xff]  ;;  %v532_v11 = vld [vmem:[#allocation3 + $0x60] sm:$0xff] }
 0x303   :  { %724 = vst.msk [vmem:[#allocation3 + $0x18] sm:$0xff] %vm47_vm0, %v708_v42 }
 0x304   :  { %722 = vst.msk [vmem:[#allocation3 + $0x8] sm:$0xff] %vm47_vm0, %v706_v37  ;;  %v533_v37 = vld [vmem:[#allocation3 + $0x68] sm:$0xff] }
 0x306   :  { %v921_v12 = vpop.f32.mrb[0].mxu1 }
 0x307   :  { %v711_v17 = vadd.f32 %v921_v12, %v526_v6  ;;  %v658_v35 = vpop.f32.mrb[1].mxu1 }
 0x308   :  { %v758_v45 = vld [vmem:[#allocation3 + $0x10] sm:$0xff]  ;;  %v709_v56 = vadd.f32 %v658_v35, %v524_v7  ;;  %v922_v18 = vpop.f32.mrb[2].mxu1 }
 0x309   :  { %v774_v22 = vadd.f32 %v758_v45, %v1317_v63  ;;  %v756_v16 = vld [vmem:[#allocation3] sm:$0xff]  ;;  %727 = vst.msk [vmem:[#allocation3 + $0x30] sm:$0xff] %vm47_vm0, %v711_v17  ;;  %v712_v21 = vadd.f32 %v922_v18, %v527_v13  ;;  %v661_v47 = vpop.f32.mrb[3].mxu1 }
 0x30a   :  { %v772_v26 = vadd.f32 %v756_v16, %v1302_v48  ;;  %v759_v27 = vld [vmem:[#allocation3 + $0x18] sm:$0xff]  ;;  %725 = vst.msk [vmem:[#allocation3 + $0x20] sm:$0xff] %vm47_vm0, %v709_v56  ;;  %v710_v57 = vadd.f32 %v661_v47, %v525_v14 }
 0x30b   :  { %v797_v33 = vadd.f32 %v1437_v15, %v774_v22  ;;  %v775_v34 = vadd.f32 %v759_v27, %v1319_v2  ;;  %v757_v25 = vld [vmem:[#allocation3 + $0x8] sm:$0xff]  ;;  %728 = vst.msk [vmem:[#allocation3 + $0x38] sm:$0xff] %vm47_vm0, %v712_v21 }
 0x30c   :  { %v795_v63 = vadd.f32 %v1437_v15, %v772_v26  ;;  %v773_v58 = vadd.f32 %v757_v25, %v1304_v36  ;;  %726 = vst.msk [vmem:[#allocation3 + $0x28] sm:$0xff] %vm47_vm0, %v710_v57  ;;  %v531_v36 = vld [vmem:[#allocation3 + $0x58] sm:$0xff] }
 0x30d   :  { %813 = vst.msk [vmem:[%s1554_s7 + $0x10] sm:$0xff] %vm47_vm0, %v797_v33  ;;  %v798_v48 = vadd.f32 %v1437_v15, %v775_v34 }
 0x30e   :  { %811 = vst.msk [vmem:[%s1554_s7] sm:$0xff] %vm47_vm0, %v795_v63  ;;  %v796_v2 = vadd.f32 %v1437_v15, %v773_v58  ;;  %v925_v60 = vpop.f32.mrb[4].mxu1 }
 0x30f   :  { %814 = vst.msk [vmem:[%s1554_s7 + $0x18] sm:$0xff] %vm47_vm0, %v798_v48  ;;  %v715_v0 = vadd.f32 %v925_v60, %v530_v39  ;;  %v674_v61 = vpop.f32.mrb[5].mxu1 }
 0x310   :  { %812 = vst.msk [vmem:[%s1554_s7 + $0x8] sm:$0xff] %vm47_vm0, %v796_v2  ;;  %v762_v46 = vld [vmem:[#allocation3 + $0x30] sm:$0xff]  ;;  %v713_v24 = vadd.f32 %v674_v61, %v528_v41  ;;  %v926_v49 = vpop.f32.mrb[6].mxu1 }
 0x311   :  { %v778_v1 = vadd.f32 %v762_v46, %v1349_v19  ;;  %v760_v50 = vld [vmem:[#allocation3 + $0x20] sm:$0xff]  ;;  %731 = vst.msk [vmem:[#allocation3 + $0x50] sm:$0xff] %vm47_vm0, %v715_v0  ;;  %v716_v51 = vadd.f32 %v926_v49, %v531_v36  ;;  %v677_v10 = vpop.f32.mrb[7].mxu1 }
 0x312   :  { %v776_v52 = vadd.f32 %v760_v50, %v1332_v8  ;;  %v763_v28 = vld [vmem:[#allocation3 + $0x38] sm:$0xff]  ;;  %729 = vst.msk [vmem:[#allocation3 + $0x40] sm:$0xff] %vm47_vm0, %v713_v24  ;;  %v714_v29 = vadd.f32 %v677_v10, %v529_v43 }
 0x313   :  { %v801_v53 = vadd.f32 %v1437_v15, %v778_v1  ;;  %v779_v62 = vadd.f32 %v763_v28, %v1351_v54  ;;  %v761_v3 = vld [vmem:[#allocation3 + $0x28] sm:$0xff]  ;;  %732 = vst.msk [vmem:[#allocation3 + $0x58] sm:$0xff] %vm47_vm0, %v716_v51 }
 0x314   :  { %v799_v19 = vadd.f32 %v1437_v15, %v776_v52  ;;  %v777_v44 = vadd.f32 %v761_v3, %v1334_v9  ;;  %730 = vst.msk [vmem:[#allocation3 + $0x48] sm:$0xff] %vm47_vm0, %v714_v29  ;;  %v535_v9 = vld [vmem:[#allocation3 + $0x78] sm:$0xff] }
 0x315   :  { %817 = vst.msk [vmem:[%s1554_s7 + $0x30] sm:$0xff] %vm47_vm0, %v801_v53  ;;  %v802_v8 = vadd.f32 %v1437_v15, %v779_v62 }
 0x316   :  { %815 = vst.msk [vmem:[%s1554_s7 + $0x20] sm:$0xff] %vm47_vm0, %v799_v19  ;;  %v800_v54 = vadd.f32 %v1437_v15, %v777_v44  ;;  %v929_v5 = vpop.f32.mrb[8].mxu1 }
 0x317   :  { %818 = vst.msk [vmem:[%s1554_s7 + $0x38] sm:$0xff] %vm47_vm0, %v802_v8  ;;  %v719_v42 = vadd.f32 %v929_v5, %v534_v4  ;;  %v690_v23 = vpop.f32.mrb[9].mxu1 }
 0x318   :  { %816 = vst.msk [vmem:[%s1554_s7 + $0x28] sm:$0xff] %vm47_vm0, %v800_v54  ;;  %v766_v6 = vld [vmem:[#allocation3 + $0x50] sm:$0xff]  ;;  %v717_v7 = vadd.f32 %v690_v23, %v532_v11  ;;  %v930_v12 = vpop.f32.mrb[10].mxu1 }
 0x319   :  { %v782_v13 = vadd.f32 %v766_v6, %v1378_v55  ;;  %v764_v17 = vld [vmem:[#allocation3 + $0x40] sm:$0xff]  ;;  %735 = vst.msk [vmem:[#allocation3 + $0x70] sm:$0xff] %vm47_vm0, %v719_v42  ;;  %v720_v35 = vadd.f32 %v930_v12, %v535_v9  ;;  %v693_v14 = vpop.f32.mrb[11].mxu1 }
 0x31a   :  { %v780_v45 = vadd.f32 %v764_v17, %v1365_v31  ;;  %v767_v56 = vld [vmem:[#allocation3 + $0x58] sm:$0xff]  ;;  %733 = vst.msk [vmem:[#allocation3 + $0x60] sm:$0xff] %vm47_vm0, %v717_v7  ;;  %v718_v18 = vadd.f32 %v693_v14, %v533_v37 }
 0x31b   :  { %v805_v22 = vadd.f32 %v1437_v15, %v782_v13  ;;  %v783_v16 = vadd.f32 %v767_v56, %v1380_v20  ;;  %v765_v21 = vld [vmem:[#allocation3 + $0x48] sm:$0xff]  ;;  %736 = vst.msk [vmem:[#allocation3 + $0x78] sm:$0xff] %vm47_vm0, %v720_v35 }
 0x31c   :  { %v803_v55 = vadd.f32 %v1437_v15, %v780_v45  ;;  %v781_v47 = vadd.f32 %v765_v21, %v1367_v32  ;;  %734 = vst.msk [vmem:[#allocation3 + $0x68] sm:$0xff] %vm47_vm0, %v718_v18 }
 0x31d   :  { %821 = vst.msk [vmem:[%s1554_s7 + $0x50] sm:$0xff] %vm47_vm0, %v805_v22  ;;  %v806_v31 = vadd.f32 %v1437_v15, %v783_v16 }
 0x31e   :  { %819 = vst.msk [vmem:[%s1554_s7 + $0x40] sm:$0xff] %vm47_vm0, %v803_v55  ;;  %v804_v20 = vadd.f32 %v1437_v15, %v781_v47 }
 0x31f   :  { %822 = vst.msk [vmem:[%s1554_s7 + $0x58] sm:$0xff] %vm47_vm0, %v806_v31 }
 0x320   :  { %820 = vst.msk [vmem:[%s1554_s7 + $0x48] sm:$0xff] %vm47_vm0, %v804_v20  ;;  %v770_v32 = vld [vmem:[#allocation3 + $0x70] sm:$0xff] }
 0x321   :  { %v786_v26 = vadd.f32 %v770_v32, %v1397_v59  ;;  %v768_v27 = vld [vmem:[#allocation3 + $0x60] sm:$0xff] }
 0x322   :  { %v784_v57 = vadd.f32 %v768_v27, %v1388_v30  ;;  %v771_v33 = vld [vmem:[#allocation3 + $0x78] sm:$0xff] }
 0x323   :  { %v809_v34 = vadd.f32 %v1437_v15, %v786_v26  ;;  %v787_v25 = vadd.f32 %v771_v33, %v1399_v40  ;;  %v769_v63 = vld [vmem:[#allocation3 + $0x68] sm:$0xff] }
 0x324   :  { %v807_v58 = vadd.f32 %v1437_v15, %v784_v57  ;;  %v785_v39 = vadd.f32 %v769_v63, %v1390_v38 }
 0x325   :  { %825 = vst.msk [vmem:[%s1554_s7 + $0x70] sm:$0xff] %vm47_vm0, %v809_v34  ;;  %v810_v59 = vadd.f32 %v1437_v15, %v787_v25 }
 0x326   :  { %823 = vst.msk [vmem:[%s1554_s7 + $0x60] sm:$0xff] %vm47_vm0, %v807_v58  ;;  %v808_v30 = vadd.f32 %v1437_v15, %v785_v39 }
 0x327   :  { %826 = vst.msk [vmem:[%s1554_s7 + $0x78] sm:$0xff] %vm47_vm0, %v810_v59 }
 0x328   :  { %824 = vst.msk [vmem:[%s1554_s7 + $0x68] sm:$0xff] %vm47_vm0, %v808_v30 }

// kernel: swin_transformer_block.4
= control target key start
LH: loop header
LB: loop body
LE: loop exit
PB: predicated region body
PF: predicated region fallthrough
CT: control target
= control target key end

     0   :  { %vm107_vm0 = vcmask 261120   ;;  %vm434_vm1 = vcmask 64512   ;;  %s4231_s21 = smov 104   ;;  %s4232_s22 = smov 96   ;;  %vm1296_vm2 = vcmask 523264   ;;  %vm2953_vm3 = vcmask 130048   ;;  %s5929_s3 = inlined_call_operand.vmem [shape: bf16[32,96], index: 3, kind: input, shape index: {}]   ;;  %s5930_s1 = inlined_call_operand.vmem [shape: f32[2,64,32], index: 1, kind: input, shape index: {}]   ;;  %s5931_s2 = inlined_call_operand.vmem [shape: f32[2,64,32], index: 2, kind: input, shape index: {}]   ;;  %s5932_s4 = inlined_call_operand.vmem [shape: f32[1,96], index: 4, kind: input, shape index: {}]   ;;  %s5933_s0 = inlined_call_operand.<no memory space> [shape: f32[1], index: 0, kind: input, shape index: {}]   ;;  %s5934_s5 = inlined_call_operand.vmem [shape: bf16[32,32], index: 5, kind: input, shape index: {}]   ;;  %s5935_s6 = inlined_call_operand.vmem [shape: f32[1,32], index: 6, kind: input, shape index: {}]   ;;  %s5936_s7 = inlined_call_operand.vmem [shape: f32[2,64,32], index: 7, kind: output, shape index: {}]  }
   0x1   :  { %v3969_v0 = vld [vmem:[%s5929_s3] sm:$0xff]   ;;  %v3970_v1 = vld [vmem:[%s5929_s3 + $0x8] sm:$0xff]   ;;  %v30_v7 = vld [vmem:[%s5930_s1 + $0x10] sm:$0xff]  ;;  %s4233_s23 = smov 64   ;;  %s4235_s26 = smov 16   ;;  %vm2970_vm4 = vcmask 195584  }
   0x2   :  { %3393 = vmatprep.subr.bf16.mxu0 %v3969_v0  ;;  %v28_v2 = vld [vmem:[%s5930_s1] sm:$0xff]  ;;  %v29_v3 = vld [vmem:[%s5930_s1 + $0x8] sm:$0xff]  ;;  %v31_v8 = vld [vmem:[%s5930_s1 + $0x18] sm:$0xff]  ;;  %s4236_s8 = smov 24  }
   0x3   :  { %v44_v4 = vld [vmem:[%s5931_s2] sm:$0xff]  ;;  %3394 = vmatpush3.bf16.msra.mxu0 %v3969_v0  ;;  %v45_v5 = vld [vmem:[%s5931_s2 + $0x8] sm:$0xff]  ;;  %v46_v10 = vld [vmem:[%s5931_s2 + $0x10] sm:$0xff] }
   0x4   :  { %v60_v6 = vadd.f32 %v44_v4, %v28_v2  ;;  %3395 = vmatprep.subr.bf16.mxu0 %v3970_v1  ;;  %v61_v9 = vadd.f32 %v45_v5, %v29_v3  ;;  %v47_v11 = vld [vmem:[%s5931_s2 + $0x18] sm:$0xff]  ;;  %v32_v12 = vld [vmem:[%s5930_s1 + $0x20] sm:$0xff]  ;;  %v62_v13 = vadd.f32 %v46_v10, %v30_v7  ;;  %v33_v15 = vld [vmem:[%s5930_s1 + $0x28] sm:$0xff] }
   0x5   :  { %v63_v14 = vadd.f32 %v47_v11, %v31_v8  ;;  %v48_v16 = vld [vmem:[%s5931_s2 + $0x20] sm:$0xff]  ;;  %v49_v17 = vld [vmem:[%s5931_s2 + $0x28] sm:$0xff]  ;;  %v34_v21 = vld [vmem:[%s5930_s1 + $0x30] sm:$0xff] }
   0x6   :  { %v76_v18 = vpack.c.bf16 %v61_v9, %v60_v6  ;;  %v64_v19 = vadd.f32 %v48_v16, %v32_v12  ;;  %v65_v20 = vadd.f32 %v49_v17, %v33_v15  ;;  %v35_v22 = vld [vmem:[%s5930_s1 + $0x38] sm:$0xff]  ;;  %v50_v24 = vld [vmem:[%s5931_s2 + $0x30] sm:$0xff]  ;;  %v36_v26 = vld [vmem:[%s5930_s1 + $0x40] sm:$0xff] }
   0x7   :  { %3396 = vmatpush3.bf16.msra.mxu0 %v3970_v1  ;;  %v77_v23 = vpack.c.bf16 %v63_v14, %v62_v13  ;;  %v51_v25 = vld [vmem:[%s5931_s2 + $0x38] sm:$0xff]  ;;  %v37_v28 = vld [vmem:[%s5930_s1 + $0x48] sm:$0xff]  ;;  %v52_v29 = vld [vmem:[%s5931_s2 + $0x40] sm:$0xff]  ;;  %v66_v31 = vadd.f32 %v50_v24, %v34_v21 }
   0x8   :  { %3397 = vmatprep.mubr.msk.bf16.mxu0 %vm107_vm0, %v76_v18  ;;  %v78_v27 = vpack.c.bf16 %v65_v20, %v64_v19  ;;  %v53_v30 = vld [vmem:[%s5931_s2 + $0x48] sm:$0xff]  ;;  %v67_v32 = vadd.f32 %v51_v25, %v35_v22  ;;  %v68_v33 = vadd.f32 %v52_v29, %v36_v26  ;;  %v38_v36 = vld [vmem:[%s5930_s1 + $0x50] sm:$0xff]  ;;  %v39_v37 = vld [vmem:[%s5930_s1 + $0x58] sm:$0xff] }
   0x9   :  { %v69_v34 = vadd.f32 %v53_v30, %v37_v28  ;;  %v54_v39 = vld [vmem:[%s5931_s2 + $0x50] sm:$0xff]  ;;  %v55_v40 = vld [vmem:[%s5931_s2 + $0x58] sm:$0xff]  ;;  %v40_v41 = vld [vmem:[%s5930_s1 + $0x60] sm:$0xff] }
   0xa   :  { %3398 = vmatmul.mubr.msk.bf16.vlgmr.msra.gmra.mrb[0].mxu0 %vm107_vm0, %v77_v23  ;;  %v79_v35 = vpack.c.bf16 %v67_v32, %v66_v31  ;;  %v41_v42 = vld [vmem:[%s5930_s1 + $0x68] sm:$0xff]  ;;  %v56_v43 = vld [vmem:[%s5931_s2 + $0x60] sm:$0xff]  ;;  %v70_v45 = vadd.f32 %v54_v39, %v38_v36  ;;  %v71_v46 = vadd.f32 %v55_v40, %v39_v37  ;;  %v42_v50 = vld [vmem:[%s5930_s1 + $0x70] sm:$0xff] }
   0xb   :  { %3401 = vmatprep.mubr.msk.bf16.mxu0 %vm107_vm0, %v78_v27  ;;  %v80_v38 = vpack.c.bf16 %v69_v34, %v68_v33  ;;  %v57_v44 = vld [vmem:[%s5931_s2 + $0x68] sm:$0xff]  ;;  %v72_v47 = vadd.f32 %v56_v43, %v40_v41  ;;  %v43_v52 = vld [vmem:[%s5930_s1 + $0x78] sm:$0xff]  ;;  %v58_v53 = vld [vmem:[%s5931_s2 + $0x70] sm:$0xff] }
   0xc   :  { %v73_v48 = vadd.f32 %v57_v44, %v41_v42  ;;  %v81_v49 = vpack.c.bf16 %v71_v46, %v70_v45  ;;  %v59_v54 = vld [vmem:[%s5931_s2 + $0x78] sm:$0xff]  ;;  %v74_v55 = vadd.f32 %v58_v53, %v42_v50  ;;  %v3159_v59 = vld [vmem:[%s5932_s4] ss:$0 sm:$0xff]  ;;  %s4229_s2 = smov 120   ;;  %s4230_s4 = smov 112  }
   0xd   :  { %v75_v56 = vadd.f32 %v59_v54, %v43_v52 }
   0xe   :  { %v82_v51 = vpack.c.bf16 %v73_v48, %v72_v47 }
   0xf   :  { %v83_v57 = vpack.c.bf16 %v75_v56, %v74_v55 }
  0x12   :  { %3402 = vmatmul.mubr.msk.bf16.gmra.mrb[4].mxu0 %vm107_vm0, %v79_v35 }
  0x13   :  { %3405 = vmatprep.mubr.msk.bf16.mxu0 %vm107_vm0, %v80_v38 }
  0x1a   :  { %3406 = vmatmul.mubr.msk.bf16.gmra.mrb[8].mxu0 %vm107_vm0, %v81_v49 }
  0x1b   :  { %3409 = vmatprep.mubr.msk.bf16.mxu0 %vm107_vm0, %v82_v51 }
  0x22   :  { %3410 = vmatmul.mubr.msk.bf16.gmra.mrb[12].mxu0 %vm107_vm0, %v83_v57 }
  0xdd   :  { %v3399_v58 = vpop.f32.mrb[0].mxu0 }
  0xde   :  { %v166_v60 = vpop.f32.mrb[1].mxu0  ;;  %v175_v62 = vadd.f32 %v3399_v58, %v3159_v59 }
  0xdf   :  { %v3400_v61 = vpop.f32.mrb[2].mxu0  ;;  %v167_v1 = vadd.f32 %v3159_v59, %v166_v60 }
  0xe0   :  { %v178_v63 = vadd.f32 %v3400_v61, %v3159_v59  ;;  %v169_v0 = vpop.f32.mrb[3].mxu0 }
  0xe1   :  { %v170_v2 = vadd.f32 %v3159_v59, %v169_v0 }
  0xe2   :  { %v3734_v3 = vpack.i.bf16 %v178_v63, %v175_v62  ;;  %v4390_v4 = vpack.c.bf16 %v178_v63, %v175_v62 }
  0xe3   :  { %v3729_v5 = vpack.i.bf16 %v170_v2, %v167_v1  ;;  %v4392_v6 = vpack.c.bf16 %v170_v2, %v167_v1 }
  0xe5   :  { %v3403_v7 = vpop.f32.mrb[4].mxu0  ;;  %3730 = vrot.lane.b32.xlu0 %v3729_v5, %s4229_s2  ;;  %3421 = vmatprep.mubr.msk.bf16.mxu1 %vm434_vm1, %v4392_v6 }
  0xe6   :  { %v191_v8 = vadd.f32 %v3403_v7, %v3159_v59  ;;  %v182_v9 = vpop.f32.mrb[5].mxu0 }
  0xe7   :  { %v183_v10 = vadd.f32 %v3159_v59, %v182_v9  ;;  %v3404_v11 = vpop.f32.mrb[6].mxu0 }
  0xe8   :  { %v194_v12 = vadd.f32 %v3404_v11, %v3159_v59  ;;  %v185_v13 = vpop.f32.mrb[7].mxu0 }
  0xe9   :  { %v186_v14 = vadd.f32 %v3159_v59, %v185_v13  ;;  %3735 = vrot.lane.b32.xlu0 %v3734_v3, %s4229_s2 }
  0xea   :  { %v3744_v15 = vpack.i.bf16 %v194_v12, %v191_v8  ;;  %v4398_v16 = vpack.c.bf16 %v194_v12, %v191_v8 }
  0xeb   :  { %v3739_v17 = vpack.i.bf16 %v186_v14, %v183_v10  ;;  %v4400_v18 = vpack.c.bf16 %v186_v14, %v183_v10 }
  0xed   :  { %3740 = vrot.lane.b32.xlu1 %v3739_v17, %s4229_s2  ;;  %3750 = vrot.lane.b32.xlu0 %v3729_v5, %s4230_s4  ;;  %v3407_v19 = vpop.f32.mrb[8].mxu0 }
  0xee   :  { %v207_v20 = vadd.f32 %v3407_v19, %v3159_v59  ;;  %v198_v21 = vpop.f32.mrb[9].mxu0 }
  0xef   :  { %v199_v22 = vadd.f32 %v3159_v59, %v198_v21  ;;  %v3408_v23 = vpop.f32.mrb[10].mxu0 }
  0xf0   :  { %v210_v24 = vadd.f32 %v3408_v23, %v3159_v59  ;;  %v201_v25 = vpop.f32.mrb[11].mxu0 }
  0xf1   :  { %3745 = vrot.lane.b32.xlu1 %v3744_v15, %s4229_s2  ;;  %3760 = vrot.lane.b32.xlu0 %v3734_v3, %s4230_s4  ;;  %v202_v26 = vadd.f32 %v3159_v59, %v201_v25 }
  0xf2   :  { %v4406_v27 = vpack.i.bf16 %v210_v24, %v207_v20  ;;  %v4408_v28 = vpack.c.bf16 %v210_v24, %v207_v20 }
  0xf3   :  { %v4410_v29 = vpack.i.bf16 %v202_v26, %v199_v22  ;;  %v4412_v30 = vpack.c.bf16 %v202_v26, %v199_v22 }
  0xf5   :  { %3755 = vrot.lane.b32.xlu1 %v3729_v5, %s4231_s21  ;;  %3770 = vrot.lane.b32.xlu0 %v3739_v17, %s4230_s4  ;;  %v3411_v31 = vpop.f32.mrb[12].mxu0 }
  0xf6   :  { %v223_v32 = vadd.f32 %v3411_v31, %v3159_v59  ;;  %v214_v33 = vpop.f32.mrb[13].mxu0 }
  0xf7   :  { %v215_v34 = vadd.f32 %v3159_v59, %v214_v33  ;;  %v3412_v35 = vpop.f32.mrb[14].mxu0 }
  0xf8   :  { %v226_v36 = vadd.f32 %v3412_v35, %v3159_v59  ;;  %v217_v37 = vpop.f32.mrb[15].mxu0 }
  0xf9   :  { %3765 = vrot.lane.b32.xlu1 %v3734_v3, %s4231_s21  ;;  %3780 = vrot.lane.b32.xlu0 %v3744_v15, %s4230_s4  ;;  %v218_v38 = vadd.f32 %v3159_v59, %v217_v37 }
  0xfa   :  { %v4418_v39 = vpack.i.bf16 %v226_v36, %v223_v32  ;;  %v4430_v42 = vpack.c.bf16 %v226_v36, %v223_v32 }
  0xfb   :  { %v4420_v40 = vpack.i.bf16 %v218_v38, %v215_v34  ;;  %v4428_v41 = vpack.c.bf16 %v218_v38, %v215_v34 }
  0xfd   :  { %3775 = vrot.lane.b32.xlu1 %v3739_v17, %s4231_s21  ;;  %426 = vrot.lane.b32.xlu0 %v4392_v6, %s4232_s22 }
 0x101   :  { %3785 = vrot.lane.b32.xlu1 %v3744_v15, %s4231_s21  ;;  %3790 = vrot.lane.b32.xlu0 %v4410_v29, %s4229_s2 }
 0x157   :  { %v3731_v43 = vpop.permute.xlu0 %3730 }
 0x158   :  { %v3733_v44 = vunpack.i.h.bf16 %v3731_v43  ;;  %v3732_v45 = vunpack.i.l.bf16 %v3731_v43 }
 0x15a   :  { %v4432_v46 = vpack.c.bf16 %v3733_v44, %v3732_v45 }
 0x15b   :  { %v3736_v47 = vpop.permute.xlu0 %3735 }
 0x15c   :  { %v3738_v48 = vunpack.i.h.bf16 %v3736_v47  ;;  %v3737_v49 = vunpack.i.l.bf16 %v3736_v47  ;;  %528 = vrot.lane.b32.xlu1 %v4432_v46, %s4232_s22  ;;  %3437 = vmatprep.mubr.msk.bf16.mxu0 %vm434_vm1, %v4432_v46 }
 0x15e   :  { %v4438_v50 = vpack.c.bf16 %v3738_v48, %v3737_v49 }
 0x15f   :  { %v3741_v51 = vpop.permute.xlu1 %3740  ;;  %v3751_v52 = vpop.permute.xlu0 %3750 }
 0x160   :  { %v3743_v53 = vunpack.i.h.bf16 %v3741_v51  ;;  %v3742_v54 = vunpack.i.l.bf16 %v3741_v51  ;;  %428 = vrot.lane.b32.xlu1 %v4390_v4, %s4232_s22  ;;  %530 = vrot.lane.b32.xlu0 %v4438_v50, %s4232_s22  ;;  %v3753_v61 = vunpack.i.h.bf16 %v3751_v52  ;;  %v3752_v62 = vunpack.i.l.bf16 %v3751_v52 }
 0x162   :  { %v4448_v57 = vpack.c.bf16 %v3743_v53, %v3742_v54  ;;  %v4460_v5 = vpack.c.bf16 %v3753_v61, %v3752_v62 }
 0x163   :  { %v3746_v55 = vpop.permute.xlu1 %3745  ;;  %v3761_v56 = vpop.permute.xlu0 %3760 }
 0x164   :  { %3795 = vrot.lane.b32.xlu1 %v4406_v27, %s4229_s2  ;;  %430 = vrot.lane.b32.xlu0 %v4400_v18, %s4232_s22  ;;  %v3748_v58 = vunpack.i.h.bf16 %v3746_v55  ;;  %v3747_v59 = vunpack.i.l.bf16 %v3746_v55  ;;  %v3763_v9 = vunpack.i.h.bf16 %v3761_v56  ;;  %v3762_v10 = vunpack.i.l.bf16 %v3761_v56 }
 0x166   :  { %v4454_v63 = vpack.c.bf16 %v3748_v58, %v3747_v59  ;;  %v4474_v15 = vpack.c.bf16 %v3763_v9, %v3762_v10 }
 0x167   :  { %v3771_v60 = vpop.permute.xlu0 %3770  ;;  %v3756_v0 = vpop.permute.xlu1 %3755 }
 0x168   :  { %532 = vrot.lane.b32.xlu1 %v4448_v57, %s4232_s22  ;;  %3800 = vrot.lane.b32.xlu0 %v4420_v40, %s4229_s2  ;;  %v3758_v2 = vunpack.i.h.bf16 %v3756_v0  ;;  %v3757_v3 = vunpack.i.l.bf16 %v3756_v0  ;;  %v3773_v17 = vunpack.i.h.bf16 %v3771_v60  ;;  %v3772_v19 = vunpack.i.l.bf16 %v3771_v60 }
 0x16a   :  { %v4468_v11 = vpack.c.bf16 %v3758_v2, %v3757_v3  ;;  %v4486_v24 = vpack.c.bf16 %v3773_v17, %v3772_v19 }
 0x16b   :  { %v3781_v1 = vpop.permute.xlu0 %3780  ;;  %v3766_v12 = vpop.permute.xlu1 %3765 }
 0x16c   :  { %432 = vrot.lane.b32.xlu1 %v4398_v16, %s4232_s22  ;;  %534 = vrot.lane.b32.xlu0 %v4454_v63, %s4232_s22  ;;  %v3768_v13 = vunpack.i.h.bf16 %v3766_v12  ;;  %v3767_v14 = vunpack.i.l.bf16 %v3766_v12  ;;  %v3783_v25 = vunpack.i.h.bf16 %v3781_v1  ;;  %v3782_v26 = vunpack.i.l.bf16 %v3781_v1 }
 0x16e   :  { %v4480_v20 = vpack.c.bf16 %v3768_v13, %v3767_v14  ;;  %v4498_v34 = vpack.c.bf16 %v3783_v25, %v3782_v26 }
 0x16f   :  { %v427_v7 = vpop.permute.xlu0 %426  ;;  %v3776_v21 = vpop.permute.xlu1 %3775 }
 0x170   :  { %3805 = vrot.lane.b32.xlu1 %v4418_v39, %s4229_s2  ;;  %629 = vrot.lane.b32.xlu0 %v4460_v5, %s4232_s22  ;;  %v448_v8 = vsel %vm434_vm1, %v427_v7, 0  ;;  %v3778_v22 = vunpack.i.h.bf16 %v3776_v21  ;;  %v3777_v23 = vunpack.i.l.bf16 %v3776_v21 }
 0x171   :  { %3689 = vmatprep.subr.msk.bf16.mxu1 %vm434_vm1, %v427_v7 }
 0x172   :  { %3414 = vmatpush3.bf16.xpose.msra.mxu1 %v448_v8 }
 0x173   :  { %v3786_v31 = vpop.permute.xlu1 %3785 }
 0x174   :  { %730 = vrot.lane.b32.xlu1 %v4468_v11, %s4232_s22  ;;  %3810 = vrot.lane.b32.xlu0 %v4410_v29, %s4230_s4  ;;  %v3788_v32 = vunpack.i.h.bf16 %v3786_v31  ;;  %v3787_v33 = vunpack.i.l.bf16 %v3786_v31 }
 0x176   :  { %v4504_v35 = vpack.c.bf16 %v3788_v32, %v3787_v33 }
 0x178   :  { %3815 = vrot.lane.b32.xlu1 %v4410_v29, %s4231_s21  ;;  %631 = vrot.lane.b32.xlu0 %v4474_v15, %s4232_s22  ;;  %v4492_v29 = vpack.c.bf16 %v3778_v22, %v3777_v23 }
 0x17c   :  { %732 = vrot.lane.b32.xlu1 %v4480_v20, %s4232_s22  ;;  %3820 = vrot.lane.b32.xlu0 %v4406_v27, %s4230_s4 }
 0x180   :  { %3825 = vrot.lane.b32.xlu1 %v4406_v27, %s4231_s21  ;;  %633 = vrot.lane.b32.xlu0 %v4486_v24, %s4232_s22  ;;  %v3791_v27 = vpop.permute.xlu0 %3790 }
 0x181   :  { %v3793_v36 = vunpack.i.h.bf16 %v3791_v27  ;;  %v3792_v37 = vunpack.i.l.bf16 %v3791_v27 }
 0x183   :  { %v4514_v38 = vpack.c.bf16 %v3793_v36, %v3792_v37 }
 0x184   :  { %734 = vrot.lane.b32.xlu1 %v4492_v29, %s4232_s22  ;;  %3830 = vrot.lane.b32.xlu0 %v4420_v40, %s4230_s4 }
 0x188   :  { %3835 = vrot.lane.b32.xlu1 %v4420_v40, %s4231_s21  ;;  %635 = vrot.lane.b32.xlu0 %v4498_v34, %s4232_s22 }
 0x18c   :  { %736 = vrot.lane.b32.xlu1 %v4504_v35, %s4232_s22  ;;  %3840 = vrot.lane.b32.xlu0 %v4418_v39, %s4230_s4 }
 0x190   :  { %3845 = vrot.lane.b32.xlu1 %v4418_v39, %s4231_s21  ;;  %831 = vrot.lane.b32.xlu0 %v4412_v30, %s4232_s22 }
 0x194   :  { %833 = vrot.lane.b32.xlu0 %v4408_v28, %s4232_s22  ;;  %932 = vrot.lane.b32.xlu1 %v4514_v38, %s4232_s22 }
 0x198   :  { %835 = vrot.lane.b32.xlu0 %v4428_v41, %s4232_s22 }
 0x19c   :  { %837 = vrot.lane.b32.xlu0 %v4430_v42, %s4232_s22 }
 0x1ce   :  { %v529_v40 = vpop.permute.xlu1 %528 }
 0x1cf   :  { %3693 = vmatprep.subr.msk.bf16.mxu0 %vm434_vm1, %v529_v40  ;;  %v549_v39 = vsel %vm434_vm1, %v529_v40, 0 }
 0x1d0   :  { %3430 = vmatpush3.bf16.xpose.msra.mxu0 %v549_v39 }
 0x1d2   :  { %v429_v43 = vpop.permute.xlu1 %428  ;;  %v531_v44 = vpop.permute.xlu0 %530 }
 0x1d3   :  { %3690 = vmatprep.subr.msk.bf16.mxu1 %vm434_vm1, %v429_v43  ;;  %3694 = vmatprep.subr.msk.bf16.mxu0 %vm434_vm1, %v531_v44  ;;  %v451_v45 = vsel %vm434_vm1, %v429_v43, 0  ;;  %v552_v52 = vsel %vm434_vm1, %v531_v44, 0 }
 0x1d4   :  { %3416 = vmatpush3.bf16.xpose.msra.mxu1 %v451_v45 }
 0x1d6   :  { %v3796_v47 = vpop.permute.xlu1 %3795  ;;  %v431_v48 = vpop.permute.xlu0 %430 }
 0x1d7   :  { %v3798_v49 = vunpack.i.h.bf16 %v3796_v47  ;;  %v3797_v51 = vunpack.i.l.bf16 %v3796_v47  ;;  %3691 = vmatprep.subr.msk.bf16.mxu1 %vm434_vm1, %v431_v48  ;;  %v454_v59 = vsel %vm434_vm1, %v431_v48, 0 }
 0x1d8   :  { %3432 = vmatpush3.bf16.xpose.msra.mxu0 %v552_v52 }
 0x1d9   :  { %v4531_v53 = vpack.c.bf16 %v3798_v49, %v3797_v51 }
 0x1da   :  { %v533_v54 = vpop.permute.xlu1 %532  ;;  %v3801_v55 = vpop.permute.xlu0 %3800 }
 0x1db   :  { %v3803_v56 = vunpack.i.h.bf16 %v3801_v55  ;;  %v3802_v58 = vunpack.i.l.bf16 %v3801_v55  ;;  %934 = vrot.lane.b32.xlu1 %v4531_v53, %s4232_s22  ;;  %3695 = vmatprep.subr.msk.bf16.mxu0 %vm434_vm1, %v533_v54  ;;  %v555_v0 = vsel %vm434_vm1, %v533_v54, 0 }
 0x1dc   :  { %3418 = vmatpush3.bf16.xpose.msra.mxu1 %v454_v59 }
 0x1dd   :  { %v4537_v60 = vpack.c.bf16 %v3803_v56, %v3802_v58 }
 0x1de   :  { %v433_v61 = vpop.permute.xlu1 %432  ;;  %v535_v62 = vpop.permute.xlu0 %534 }
 0x1df   :  { %3692 = vmatprep.subr.msk.bf16.mxu1 %vm434_vm1, %v433_v61  ;;  %936 = vrot.lane.b32.xlu1 %v4537_v60, %s4232_s22  ;;  %v457_v8 = vsel %vm434_vm1, %v433_v61, 0  ;;  %v558_v17 = vsel %vm434_vm1, %v535_v62, 0 }
 0x1e0   :  { %3434 = vmatpush3.bf16.xpose.msra.mxu0 %v555_v0 }
 0x1e1   :  { %3696 = vmatprep.subr.msk.bf16.mxu0 %vm434_vm1, %v535_v62 }
 0x1e2   :  { %v3806_v1 = vpop.permute.xlu1 %3805  ;;  %v630_v2 = vpop.permute.xlu0 %629 }
 0x1e3   :  { %v3808_v3 = vunpack.i.h.bf16 %v3806_v1  ;;  %v3807_v7 = vunpack.i.l.bf16 %v3806_v1  ;;  %v650_v26 = vsel %vm434_vm1, %v630_v2, 0 }
 0x1e4   :  { %3420 = vmatpush3.bf16.xpose.msra.mxu1 %v457_v8 }
 0x1e5   :  { %3697 = vmatprep.subr.msk.bf16.mxu1 %vm434_vm1, %v630_v2  ;;  %v4546_v9 = vpack.c.bf16 %v3808_v3, %v3807_v7 }
 0x1e6   :  { %v731_v10 = vpop.permute.xlu1 %730  ;;  %v3811_v12 = vpop.permute.xlu0 %3810 }
 0x1e7   :  { %v3813_v13 = vunpack.i.h.bf16 %v3811_v12  ;;  %v3812_v14 = vunpack.i.l.bf16 %v3811_v12  ;;  %938 = vrot.lane.b32.xlu1 %v4546_v9, %s4232_s22  ;;  %v751_v37 = vsel %vm434_vm1, %v731_v10, 0 }
 0x1e8   :  { %3436 = vmatpush3.bf16.xpose.msra.mxu0 %v558_v17 }
 0x1e9   :  { %3701 = vmatprep.subr.msk.bf16.mxu0 %vm434_vm1, %v731_v10  ;;  %v4552_v19 = vpack.c.bf16 %v3813_v13, %v3812_v14 }
 0x1ea   :  { %v3816_v21 = vpop.permute.xlu1 %3815  ;;  %v632_v22 = vpop.permute.xlu0 %631 }
 0x1eb   :  { %v3818_v23 = vunpack.i.h.bf16 %v3816_v21  ;;  %v3817_v25 = vunpack.i.l.bf16 %v3816_v21  ;;  %1033 = vrot.lane.b32.xlu0 %v4552_v19, %s4232_s22  ;;  %3422 = vmatmul.mubr.msk.bf16.vlgmr.msra.gmra.mrb[0].mxu1 %vm434_vm1, %v4390_v4  ;;  %v653_v47 = vsel %vm434_vm1, %v632_v22, 0 }
 0x1ec   :  { %3425 = vmatprep.mubr.msk.bf16.mxu1 %vm434_vm1, %v4400_v18  ;;  %3446 = vmatpush3.bf16.xpose.msra.mxu1 %v650_v26 }
 0x1ed   :  { %3698 = vmatprep.subr.msk.bf16.mxu1 %vm434_vm1, %v632_v22  ;;  %v4562_v31 = vpack.c.bf16 %v3818_v23, %v3817_v25 }
 0x1ee   :  { %v733_v32 = vpop.permute.xlu1 %732  ;;  %v3821_v33 = vpop.permute.xlu0 %3820 }
 0x1ef   :  { %v3823_v27 = vunpack.i.h.bf16 %v3821_v33  ;;  %v3822_v36 = vunpack.i.l.bf16 %v3821_v33  ;;  %3438 = vmatmul.mubr.msk.bf16.vlgmr.msra.gmra.mrb[16].mxu0 %vm434_vm1, %v4438_v50  ;;  %1134 = vrot.lane.b32.xlu1 %v4562_v31, %s4232_s22  ;;  %v754_v55 = vsel %vm434_vm1, %v733_v32, 0 }
 0x1f0   :  { %3441 = vmatprep.mubr.msk.bf16.mxu0 %vm434_vm1, %v4448_v57  ;;  %3462 = vmatpush3.bf16.xpose.msra.mxu0 %v751_v37 }
 0x1f1   :  { %3702 = vmatprep.subr.msk.bf16.mxu0 %vm434_vm1, %v733_v32  ;;  %v4572_v40 = vpack.c.bf16 %v3823_v27, %v3822_v36 }
 0x1f2   :  { %v3826_v39 = vpop.permute.xlu1 %3825  ;;  %v634_v43 = vpop.permute.xlu0 %633 }
 0x1f3   :  { %v3828_v44 = vunpack.i.h.bf16 %v3826_v39  ;;  %v3827_v45 = vunpack.i.l.bf16 %v3826_v39  ;;  %1035 = vrot.lane.b32.xlu0 %v4572_v40, %s4232_s22  ;;  %3426 = vmatmul.mubr.msk.bf16.gmra.mrb[4].mxu1 %vm434_vm1, %v4398_v16  ;;  %v656_v0 = vsel %vm434_vm1, %v634_v43, 0 }
 0x1f4   :  { %3448 = vmatpush3.bf16.xpose.msra.mxu1 %v653_v47  ;;  %3453 = vmatprep.mubr.msk.bf16.mxu1 %vm434_vm1, %v4460_v5 }
 0x1f5   :  { %3699 = vmatprep.subr.msk.bf16.mxu1 %vm434_vm1, %v634_v43  ;;  %v4582_v48 = vpack.c.bf16 %v3828_v44, %v3827_v45 }
 0x1f6   :  { %v735_v49 = vpop.permute.xlu1 %734  ;;  %v3831_v51 = vpop.permute.xlu0 %3830 }
 0x1f7   :  { %v3833_v52 = vunpack.i.h.bf16 %v3831_v51  ;;  %v3832_v54 = vunpack.i.l.bf16 %v3831_v51  ;;  %3442 = vmatmul.mubr.msk.bf16.gmra.mrb[20].mxu0 %vm434_vm1, %v4454_v63  ;;  %1136 = vrot.lane.b32.xlu1 %v4582_v48, %s4232_s22  ;;  %v757_v10 = vsel %vm434_vm1, %v735_v49, 0 }
 0x1f8   :  { %3464 = vmatpush3.bf16.xpose.msra.mxu0 %v754_v55  ;;  %3469 = vmatprep.mubr.msk.bf16.mxu0 %vm434_vm1, %v4468_v11 }
 0x1f9   :  { %3703 = vmatprep.subr.msk.bf16.mxu0 %vm434_vm1, %v735_v49  ;;  %v4592_v56 = vpack.c.bf16 %v3833_v52, %v3832_v54 }
 0x1fa   :  { %v3836_v58 = vpop.permute.xlu1 %3835  ;;  %v636_v59 = vpop.permute.xlu0 %635 }
 0x1fb   :  { %v3838_v61 = vunpack.i.h.bf16 %v3836_v58  ;;  %v3837_v62 = vunpack.i.l.bf16 %v3836_v58  ;;  %1037 = vrot.lane.b32.xlu0 %v4592_v56, %s4232_s22  ;;  %v659_v21 = vsel %vm434_vm1, %v636_v59, 0 }
 0x1fc   :  { %3450 = vmatpush3.bf16.xpose.msra.mxu1 %v656_v0 }
 0x1fd   :  { %3700 = vmatprep.subr.msk.bf16.mxu1 %vm434_vm1, %v636_v59  ;;  %v4598_v1 = vpack.c.bf16 %v3838_v61, %v3837_v62 }
 0x1fe   :  { %v737_v2 = vpop.permute.xlu1 %736  ;;  %v3841_v3 = vpop.permute.xlu0 %3840 }
 0x1ff   :  { %v3843_v7 = vunpack.i.h.bf16 %v3841_v3  ;;  %v3842_v8 = vunpack.i.l.bf16 %v3841_v3  ;;  %1138 = vrot.lane.b32.xlu1 %v4598_v1, %s4232_s22  ;;  %v760_v26 = vsel %vm434_vm1, %v737_v2, 0 }
 0x200   :  { %3466 = vmatpush3.bf16.xpose.msra.mxu0 %v757_v10 }
 0x201   :  { %3704 = vmatprep.subr.msk.bf16.mxu0 %vm434_vm1, %v737_v2  ;;  %v4604_v12 = vpack.c.bf16 %v3843_v7, %v3842_v8 }
 0x202   :  { %v3846_v13 = vpop.permute.xlu1 %3845  ;;  %v832_v22 = vpop.permute.xlu0 %831 }
 0x203   :  { %5994 = vst [vmem:[#allocation3_spill] sm:$0xff] %v4604_v12  ;;  %v3848_v14 = vunpack.i.h.bf16 %v3846_v13  ;;  %v3847_v17 = vunpack.i.l.bf16 %v3846_v13  ;;  %1039 = vrot.lane.b32.xlu0 %v4604_v12, %s4232_s22  ;;  %v852_v32 = vsel %vm434_vm1, %v832_v22, 0 }
 0x204   :  { %3452 = vmatpush3.bf16.xpose.msra.mxu1 %v659_v21 }
 0x205   :  { %3705 = vmatprep.subr.msk.bf16.mxu1 %vm434_vm1, %v832_v22  ;;  %v4610_v23 = vpack.c.bf16 %v3848_v14, %v3847_v17 }
 0x206   :  { %v933_v25 = vpop.permute.xlu1 %932 }
 0x207   :  { %5995 = vst [vmem:[#allocation4_spill] sm:$0xff] %v4610_v23  ;;  %2037 = vrot.lane.b32.xlu0 %v4400_v18, %s4233_s23  ;;  %1140 = vrot.lane.b32.xlu1 %v4610_v23, %s4232_s22  ;;  %v834_v18 = vpop.permute.xlu0 %833  ;;  %v953_v33 = vsel %vm434_vm1, %v933_v25, 0 }
 0x208   :  { %3468 = vmatpush3.bf16.xpose.msra.mxu0 %v760_v26 }
 0x209   :  { %3709 = vmatprep.subr.msk.bf16.mxu0 %vm434_vm1, %v933_v25 }
 0x20b   :  { %2122 = vrot.lane.b32.xlu0 %v4432_v46, %s4233_s23  ;;  %2033 = vrot.lane.b32.xlu1 %v4392_v6, %s4233_s23  ;;  %v855_v6 = vsel %vm434_vm1, %v834_v18, 0  ;;  %v836_v46 = vpop.permute.xlu0 %835 }
 0x20c   :  { %3454 = vmatmul.mubr.msk.bf16.vlgmr.msra.gmra.mrb[8].mxu1 %vm434_vm1, %v4474_v15 }
 0x20d   :  { %3457 = vmatprep.mubr.msk.bf16.mxu1 %vm434_vm1, %v4486_v24  ;;  %3478 = vmatpush3.bf16.xpose.msra.mxu1 %v852_v32 }
 0x20e   :  { %3706 = vmatprep.subr.msk.bf16.mxu1 %vm434_vm1, %v834_v18 }
 0x20f   :  { %3470 = vmatmul.mubr.msk.bf16.vlgmr.msra.gmra.mrb[24].mxu0 %vm434_vm1, %v4480_v20  ;;  %2124 = vrot.lane.b32.xlu0 %v4438_v50, %s4233_s23 }
 0x210   :  { %2035 = vrot.lane.b32.xlu1 %v4390_v4, %s4233_s23  ;;  %3473 = vmatprep.mubr.msk.bf16.mxu0 %vm434_vm1, %v4492_v29  ;;  %v858_v4 = vsel %vm434_vm1, %v836_v46, 0 }
 0x211   :  { %3494 = vmatpush3.bf16.xpose.msra.mxu0 %v953_v33 }
 0x213   :  { %2128 = vrot.lane.b32.xlu0 %v4454_v63, %s4233_s23 }
 0x214   :  { %2039 = vrot.lane.b32.xlu1 %v4398_v16, %s4233_s23  ;;  %3458 = vmatmul.mubr.msk.bf16.gmra.mrb[12].mxu1 %vm434_vm1, %v4498_v34  ;;  %v838_v16 = vpop.permute.xlu0 %837 }
 0x215   :  { %3480 = vmatpush3.bf16.xpose.msra.mxu1 %v855_v6  ;;  %3485 = vmatprep.mubr.msk.bf16.mxu1 %vm434_vm1, %v4412_v30  ;;  %v861_v50 = vsel %vm434_vm1, %v838_v16, 0 }
 0x216   :  { %3707 = vmatprep.subr.msk.bf16.mxu1 %vm434_vm1, %v836_v46 }
 0x217   :  { %3474 = vmatmul.mubr.msk.bf16.gmra.mrb[28].mxu0 %vm434_vm1, %v4504_v35  ;;  %2302 = vrot.lane.b32.xlu0 %v4480_v20, %s4233_s23 }
 0x218   :  { %2126 = vrot.lane.b32.xlu1 %v4448_v57, %s4233_s23  ;;  %3501 = vmatprep.mubr.msk.bf16.mxu0 %vm434_vm1, %v4514_v38 }
 0x21b   :  { %2306 = vrot.lane.b32.xlu0 %v4504_v35, %s4233_s23 }
 0x21c   :  { %2211 = vrot.lane.b32.xlu1 %v4460_v5, %s4233_s23 }
 0x21d   :  { %3482 = vmatpush3.bf16.xpose.msra.mxu1 %v858_v4 }
 0x21e   :  { %3708 = vmatprep.subr.msk.bf16.mxu1 %vm434_vm1, %v838_v16 }
 0x21f   :  { %2480 = vrot.lane.b32.xlu0 %v4531_v53, %s4233_s23 }
 0x220   :  { %2300 = vrot.lane.b32.xlu1 %v4468_v11, %s4233_s23 }
 0x223   :  { %2484 = vrot.lane.b32.xlu0 %v4546_v9, %s4233_s23 }
 0x224   :  { %2213 = vrot.lane.b32.xlu1 %v4474_v15, %s4233_s23 }
 0x225   :  { %3484 = vmatpush3.bf16.xpose.msra.mxu1 %v861_v50 }
 0x227   :  { %2569 = vrot.lane.b32.xlu0 %v4572_v40, %s4233_s23 }
 0x228   :  { %2215 = vrot.lane.b32.xlu1 %v4486_v24, %s4233_s23 }
 0x22b   :  { %2571 = vrot.lane.b32.xlu0 %v4592_v56, %s4233_s23 }
 0x22c   :  { %2304 = vrot.lane.b32.xlu1 %v4492_v29, %s4233_s23  ;;  %3486 = vmatmul.mubr.msk.bf16.vlgmr.msra.gmra.mrb[16].mxu1 %vm434_vm1, %v4408_v28 }
 0x22d   :  { %3489 = vmatprep.mubr.msk.bf16.mxu1 %vm434_vm1, %v4428_v41 }
 0x230   :  { %2217 = vrot.lane.b32.xlu1 %v4498_v34, %s4233_s23 }
 0x234   :  { %2389 = vrot.lane.b32.xlu1 %v4412_v30, %s4233_s23  ;;  %3490 = vmatmul.mubr.msk.bf16.gmra.mrb[20].mxu1 %vm434_vm1, %v4430_v42 }
 0x235   :  { %3517 = vmatprep.mubr.msk.bf16.mxu1 %vm434_vm1, %v4552_v19 }
 0x238   :  { %2478 = vrot.lane.b32.xlu1 %v4514_v38, %s4233_s23 }
 0x23c   :  { %2391 = vrot.lane.b32.xlu1 %v4408_v28, %s4233_s23 }
 0x240   :  { %2393 = vrot.lane.b32.xlu1 %v4428_v41, %s4233_s23 }
 0x244   :  { %2395 = vrot.lane.b32.xlu1 %v4430_v42, %s4233_s23 }
 0x248   :  { %2567 = vrot.lane.b32.xlu1 %v4552_v19, %s4233_s23 }
 0x24c   :  { %2656 = vrot.lane.b32.xlu1 %v4562_v31, %s4233_s23 }
 0x24d   :  { %v935_v30 = vpop.permute.xlu1 %934 }
 0x24e   :  { %3710 = vmatprep.subr.msk.bf16.mxu0 %vm434_vm1, %v935_v30  ;;  %v956_v57 = vsel %vm434_vm1, %v935_v30, 0 }
 0x24f   :  { %3496 = vmatpush3.bf16.xpose.msra.mxu0 %v956_v57 }
 0x250   :  { %2658 = vrot.lane.b32.xlu1 %v4582_v48, %s4233_s23 }
 0x251   :  { %v937_v28 = vpop.permute.xlu1 %936 }
 0x252   :  { %3711 = vmatprep.subr.msk.bf16.mxu0 %vm434_vm1, %v937_v28  ;;  %v959_v41 = vsel %vm434_vm1, %v937_v28, 0 }
 0x254   :  { %2482 = vrot.lane.b32.xlu1 %v4537_v60, %s4233_s23 }
 0x257   :  { %3498 = vmatpush3.bf16.xpose.msra.mxu0 %v959_v41 }
 0x258   :  { %2660 = vrot.lane.b32.xlu1 %v4598_v1, %s4233_s23 }
 0x259   :  { %v939_v42 = vpop.permute.xlu1 %938 }
 0x25a   :  { %3712 = vmatprep.subr.msk.bf16.mxu0 %vm434_vm1, %v939_v42  ;;  %v962_v63 = vsel %vm434_vm1, %v939_v42, 0 }
 0x25d   :  { %v1034_v5 = vpop.permute.xlu0 %1033 }
 0x25e   :  { %3713 = vmatprep.subr.msk.bf16.mxu1 %vm434_vm1, %v1034_v5  ;;  %v1054_v11 = vsel %vm434_vm1, %v1034_v5, 0 }
 0x25f   :  { %3500 = vmatpush3.bf16.xpose.msra.mxu0 %v962_v63  ;;  %3510 = vmatpush3.bf16.xpose.msra.mxu1 %v1054_v11 }
 0x261   :  { %v1135_v15 = vpop.permute.xlu1 %1134 }
 0x262   :  { %3717 = vmatprep.subr.msk.bf16.mxu0 %vm434_vm1, %v1135_v15  ;;  %v1155_v29 = vsel %vm434_vm1, %v1135_v15, 0 }
 0x265   :  { %v1036_v20 = vpop.permute.xlu0 %1035 }
 0x266   :  { %3502 = vmatmul.mubr.msk.bf16.vlgmr.msra.gmra.mrb[32].mxu0 %vm434_vm1, %v4531_v53  ;;  %3714 = vmatprep.subr.msk.bf16.mxu1 %vm434_vm1, %v1036_v20  ;;  %v1057_v24 = vsel %vm434_vm1, %v1036_v20, 0 }
 0x267   :  { %3505 = vmatprep.mubr.msk.bf16.mxu0 %vm434_vm1, %v4537_v60  ;;  %3512 = vmatpush3.bf16.xpose.msra.mxu1 %v1057_v24 }
 0x268   :  { %3526 = vmatpush3.bf16.xpose.msra.mxu0 %v1155_v29 }
 0x269   :  { %v1137_v34 = vpop.permute.xlu1 %1136 }
 0x26a   :  { %3718 = vmatprep.subr.msk.bf16.mxu0 %vm434_vm1, %v1137_v34  ;;  %v1158_v53 = vsel %vm434_vm1, %v1137_v34, 0 }
 0x26d   :  { %v1038_v35 = vpop.permute.xlu0 %1037 }
 0x26e   :  { %3506 = vmatmul.mubr.msk.bf16.gmra.mrb[36].mxu0 %vm434_vm1, %v4546_v9  ;;  %3715 = vmatprep.subr.msk.bf16.mxu1 %vm434_vm1, %v1038_v35  ;;  %v1060_v38 = vsel %vm434_vm1, %v1038_v35, 0 }
 0x26f   :  { %3514 = vmatpush3.bf16.xpose.msra.mxu1 %v1060_v38  ;;  %3533 = vmatprep.mubr.msk.bf16.mxu0 %vm434_vm1, %v4562_v31 }
 0x270   :  { %3528 = vmatpush3.bf16.xpose.msra.mxu0 %v1158_v53 }
 0x271   :  { %v1139_v60 = vpop.permute.xlu1 %1138 }
 0x272   :  { %3719 = vmatprep.subr.msk.bf16.mxu0 %vm434_vm1, %v1139_v60  ;;  %v1161_v9 = vsel %vm434_vm1, %v1139_v60, 0 }
 0x275   :  { %v1040_v19 = vpop.permute.xlu0 %1039 }
 0x276   :  { %3716 = vmatprep.subr.msk.bf16.mxu1 %vm434_vm1, %v1040_v19  ;;  %v1063_v27 = vsel %vm434_vm1, %v1040_v19, 0 }
 0x277   :  { %3516 = vmatpush3.bf16.xpose.msra.mxu1 %v1063_v27 }
 0x278   :  { %3530 = vmatpush3.bf16.xpose.msra.mxu0 %v1161_v9 }
 0x279   :  { %v1141_v36 = vpop.permute.xlu1 %1140  ;;  %v2038_v44 = vpop.permute.xlu0 %2037 }
 0x27a   :  { %3720 = vmatprep.subr.msk.bf16.mxu0 %vm434_vm1, %v1141_v36  ;;  %v1164_v31 = vsel %vm434_vm1, %v1141_v36, 0 }
 0x27d   :  { %v2034_v37 = vpop.permute.xlu1 %2033 }
 0x27e   :  { %3518 = vmatmul.mubr.msk.bf16.vlgmr.msra.gmra.mrb[24].mxu1 %vm434_vm1, %v4572_v40 }
 0x27f   :  { %3521 = vmatprep.mubr.msk.bf16.mxu1 %vm434_vm1, %v4592_v56  ;;  %v4765_v56 = vstv %s5933_s0  ;;  %s4234_s0 = smov 8  }
 0x280   :  { %3532 = vmatpush3.bf16.xpose.msra.mxu0 %v1164_v31 }
 0x281   :  { %3541 = vmatprep.subr.bf16.mxu0 %v2034_v37 }
 0x282   :  { %v2036_v39 = vpop.permute.xlu1 %2035 }
 0x286   :  { %v2040_v43 = vpop.permute.xlu1 %2039  ;;  %3522 = vmatmul.mubr.msk.bf16.gmra.mrb[28].mxu1 %vm434_vm1, %v4604_v12 }
 0x287   :  { %3534 = vmatmul.mubr.msk.bf16.vlgmr.msra.gmra.mrb[40].mxu0 %vm434_vm1, %v4582_v48  ;;  %v4754_v48 = vpop.permute.xlu0 %2122 }
 0x288   :  { %3537 = vmatprep.mubr.msk.bf16.mxu0 %vm434_vm1, %v4598_v1  ;;  %3542 = vmatpush3.bf16.msra.mxu0 %v2034_v37  ;;  %5998 = vst [vmem:[#allocation7_spill] sm:$0xff] %v4754_v48 }
 0x289   :  { %3543 = vmatprep.subr.bf16.mxu0 %v2036_v39 }
 0x28a   :  { %v4748_v40 = vpop.permute.xlu1 %2126 }
 0x28b   :  { %5996 = vst [vmem:[#allocation5_spill] sm:$0xff] %v4748_v40 }
 0x28c   :  { %3544 = vmatpush3.bf16.msra.mxu0 %v2036_v39 }
 0x28d   :  { %3545 = vmatprep.subr.bf16.mxu0 %v2038_v44 }
 0x28e   :  { %v2212_v45 = vpop.permute.xlu1 %2211 }
 0x28f   :  { %3538 = vmatmul.mubr.msk.bf16.gmra.mrb[44].mxu0 %vm434_vm1, %v4610_v23  ;;  %3573 = vmatprep.subr.bf16.mxu1 %v2212_v45 }
 0x290   :  { %3546 = vmatpush3.bf16.msra.mxu0 %v2038_v44  ;;  %3574 = vmatpush3.bf16.msra.mxu1 %v2212_v45 }
 0x291   :  { %3547 = vmatprep.subr.bf16.mxu0 %v2040_v43 }
 0x292   :  { %v4752_v47 = vpop.permute.xlu1 %2300 }
 0x293   :  { %5997 = vst [vmem:[#allocation6_spill] sm:$0xff] %v4752_v47 }
 0x294   :  { %3548 = vmatpush3.bf16.msra.mxu0 %v2040_v43 }
 0x295   :  { %3557 = vmatprep.subr.bf16.mxu0 %v4754_v48 }
 0x296   :  { %v2214_v49 = vpop.permute.xlu1 %2213 }
 0x297   :  { %3575 = vmatprep.subr.bf16.mxu1 %v2214_v49 }
 0x298   :  { %3576 = vmatpush3.bf16.msra.mxu1 %v2214_v49 }
 0x29a   :  { %v2216_v51 = vpop.permute.xlu1 %2215 }
 0x29b   :  { %3577 = vmatprep.subr.bf16.mxu1 %v2216_v51 }
 0x29c   :  { %3578 = vmatpush3.bf16.msra.mxu1 %v2216_v51 }
 0x29e   :  { %v4757_v52 = vpop.permute.xlu1 %2304 }
 0x29f   :  { %5999 = vst [vmem:[#allocation8_spill] sm:$0xff] %v4757_v52 }
 0x2a2   :  { %v2218_v54 = vpop.permute.xlu1 %2217 }
 0x2a3   :  { %3579 = vmatprep.subr.bf16.mxu1 %v2218_v54 }
 0x2a4   :  { %3580 = vmatpush3.bf16.msra.mxu1 %v2218_v54 }
 0x2a6   :  { %v4759_v55 = vpop.permute.xlu1 %2389 }
 0x2a7   :  { %6000 = vst [vmem:[#allocation9_spill] sm:$0xff] %v4759_v55  ;;  %3605 = vmatprep.subr.bf16.mxu1 %v4759_v55 }
 0x2be   :  { %v3423_v58 = vpop.f32.mrb[0].mxu1 }
 0x2bf   :  { %v4768_v59 = vmul.f32 %v3423_v58, %v4765_v56  ;;  %v493_v61 = vpop.f32.mrb[1].mxu1 }
 0x2c0   :  { %v3424_v62 = vpop.f32.mrb[2].mxu1  ;;  %v4771_v0 = vmul.f32 %v4765_v56, %v493_v61 }
 0x2c1   :  { %v496_v1 = vpop.f32.mrb[3].mxu1  ;;  %v1303_v2 = vsel %vm1296_vm2, %v4768_v59, -inf  ;;  %v4781_v14 = vmul.f32 %v3424_v62, %v4765_v56 }
 0x2c2   :  { %v4776_v3 = vmul.f32 %v4765_v56, %v496_v1  ;;  %v3439_v7 = vpop.f32.mrb[16].mxu0  ;;  %1304 = vmax.xlane.f32.xlu0 %v1303_v2  ;;  %v1297_v21 = vsel %vm1296_vm2, %v4771_v0, -inf }
 0x2c3   :  { %v594_v8 = vpop.f32.mrb[17].mxu0  ;;  %v1306_v4 = vsel %vm1296_vm2, %v4781_v14, -inf  ;;  %v4799_v57 = vmul.f32 %v3439_v7, %v4765_v56 }
 0x2c4   :  { %v3440_v10 = vpop.f32.mrb[18].mxu0  ;;  %v1300_v13 = vsel %vm1296_vm2, %v4776_v3, -inf  ;;  %v4821_v38 = vmul.f32 %v4765_v56, %v594_v8 }
 0x2c5   :  { %v597_v17 = vpop.f32.mrb[19].mxu0  ;;  %1301 = vmax.xlane.f32.xlu1 %v1300_v13  ;;  %v4809_v5 = vmul.f32 %v3440_v10, %v4765_v56  ;;  %v1327_v11 = vsel %vm1296_vm2, %v4799_v57, -inf }
 0x2c6   :  { %v3427_v22 = vpop.f32.mrb[4].mxu1  ;;  %1298 = vmax.xlane.f32.xlu0 %v1297_v21  ;;  %v4829_v36 = vmul.f32 %v4765_v56, %v597_v17  ;;  %v1321_v44 = vsel %vm1296_vm2, %v4821_v38, -inf }
 0x2c7   :  { %v4786_v25 = vmul.f32 %v3427_v22, %v4765_v56  ;;  %v509_v26 = vpop.f32.mrb[5].mxu1  ;;  %v1330_v20 = vsel %vm1296_vm2, %v4809_v5, -inf }
 0x2c8   :  { %v3428_v32 = vpop.f32.mrb[6].mxu1  ;;  %v4789_v18 = vmul.f32 %v4765_v56, %v509_v26  ;;  %v1324_v54 = vsel %vm1296_vm2, %v4829_v36, -inf }
 0x2c9   :  { %v4792_v33 = vmul.f32 %v3428_v32, %v4765_v56  ;;  %v512_v6 = vpop.f32.mrb[7].mxu1  ;;  %v1315_v46 = vsel %vm1296_vm2, %v4786_v25, -inf }
 0x2ca   :  { %v3443_v16 = vpop.f32.mrb[20].mxu0  ;;  %1316 = vmax.xlane.f32.xlu1 %v1315_v46  ;;  %1307 = vmax.xlane.f32.xlu0 %v1306_v4  ;;  %v4802_v28 = vmul.f32 %v4765_v56, %v512_v6  ;;  %v1309_v42 = vsel %vm1296_vm2, %v4789_v18, -inf }
 0x2cb   :  { %v610_v50 = vpop.f32.mrb[21].mxu0  ;;  %v1318_v63 = vsel %vm1296_vm2, %v4792_v33, -inf  ;;  %v4844_v61 = vmul.f32 %v3443_v16, %v4765_v56 }
 0x2cc   :  { %v3444_v30 = vpop.f32.mrb[22].mxu0  ;;  %v1312_v15 = vsel %vm1296_vm2, %v4802_v28, -inf  ;;  %v4868_v6 = vmul.f32 %v4765_v56, %v610_v50 }
 0x2cd   :  { %v613_v41 = vpop.f32.mrb[23].mxu0  ;;  %v4851_v8 = vmul.f32 %v3444_v30, %v4765_v56  ;;  %v1339_v22 = vsel %vm1296_vm2, %v4844_v61, -inf }
 0x2ce   :  { %1310 = vmax.xlane.f32.xlu1 %v1309_v42  ;;  %1319 = vmax.xlane.f32.xlu0 %v1318_v63  ;;  %v4873_v4 = vmul.f32 %v4765_v56, %v613_v41  ;;  %v1333_v42 = vsel %vm1296_vm2, %v4868_v6, -inf }
 0x2cf   :  { %v1342_v32 = vsel %vm1296_vm2, %v4851_v8, -inf }
 0x2d0   :  { %v1336_v63 = vsel %vm1296_vm2, %v4873_v4, -inf }
 0x2d2   :  { %1328 = vmax.xlane.f32.xlu1 %v1327_v11  ;;  %1313 = vmax.xlane.f32.xlu0 %v1312_v15 }
 0x2d6   :  { %1331 = vmax.xlane.f32.xlu0 %v1330_v20 }
 0x2df   :  { %v3455_v24 = vpop.f32.mrb[8].mxu1 }
 0x2e0   :  { %v4818_v29 = vmul.f32 %v3455_v24, %v4765_v56  ;;  %v695_v34 = vpop.f32.mrb[9].mxu1 }
 0x2e1   :  { %v3456_v35 = vpop.f32.mrb[10].mxu1  ;;  %v4834_v43 = vmul.f32 %v4765_v56, %v695_v34 }
 0x2e2   :  { %v4824_v53 = vmul.f32 %v3456_v35, %v4765_v56  ;;  %v698_v60 = vpop.f32.mrb[11].mxu1  ;;  %v3471_v19 = vpop.f32.mrb[24].mxu0  ;;  %v1351_v27 = vsel %vm1296_vm2, %v4818_v29, -inf }
 0x2e3   :  { %1352 = vmax.xlane.f32.xlu1 %v1351_v27  ;;  %v796_v9 = vpop.f32.mrb[25].mxu0  ;;  %v4839_v49 = vmul.f32 %v4765_v56, %v698_v60  ;;  %v1345_v2 = vsel %vm1296_vm2, %v4834_v43, -inf  ;;  %v4888_v41 = vmul.f32 %v3471_v19, %v4765_v56 }
 0x2e4   :  { %v3472_v37 = vpop.f32.mrb[26].mxu0  ;;  %v1354_v31 = vsel %vm1296_vm2, %v4824_v53, -inf }
 0x2e5   :  { %1355 = vmax.xlane.f32.xlu0 %v1354_v31  ;;  %v799_v39 = vpop.f32.mrb[27].mxu0  ;;  %v1348_v13 = vsel %vm1296_vm2, %v4839_v49, -inf  ;;  %v4893_v15 = vmul.f32 %v3472_v37, %v4765_v56  ;;  %v1375_v24 = vsel %vm1296_vm2, %v4888_v41, -inf  ;;  %v4905_v37 = vmul.f32 %v4765_v56, %v796_v9 }
 0x2e7   :  { %v3459_v45 = vpop.f32.mrb[12].mxu1  ;;  %1322 = vmax.xlane.f32.xlu1 %v1321_v44  ;;  %v1378_v19 = vsel %vm1296_vm2, %v4893_v15, -inf  ;;  %v1369_v9 = vsel %vm1296_vm2, %v4905_v37, -inf }
 0x2e8   :  { %v711_v51 = vpop.f32.mrb[13].mxu1  ;;  %v4858_v21 = vmul.f32 %v3459_v45, %v4765_v56 }
 0x2e9   :  { %v3460_v58 = vpop.f32.mrb[14].mxu1  ;;  %1325 = vmax.xlane.f32.xlu0 %v1324_v54  ;;  %v4878_v30 = vmul.f32 %v4765_v56, %v711_v51  ;;  %v4913_v51 = vmul.f32 %v4765_v56, %v799_v39 }
 0x2ea   :  { %v714_v62 = vpop.f32.mrb[15].mxu1  ;;  %v3475_v1 = vpop.f32.mrb[28].mxu0  ;;  %v4863_v26 = vmul.f32 %v3460_v58, %v4765_v56  ;;  %v1363_v46 = vsel %vm1296_vm2, %v4858_v21, -inf }
 0x2eb   :  { %1346 = vmax.xlane.f32.xlu1 %v1345_v2  ;;  %v4848_v7 = vpop.f32.mrb[29].mxu0  ;;  %v4883_v50 = vmul.f32 %v4765_v56, %v714_v62  ;;  %v1357_v11 = vsel %vm1296_vm2, %v4878_v30, -inf  ;;  %v1372_v39 = vsel %vm1296_vm2, %v4913_v51, -inf }
 0x2ec   :  { %v3476_v10 = vpop.f32.mrb[30].mxu0  ;;  %v1366_v16 = vsel %vm1296_vm2, %v4863_v26, -inf }
 0x2ed   :  { %1349 = vmax.xlane.f32.xlu0 %v1348_v13  ;;  %v4855_v17 = vpop.f32.mrb[31].mxu0  ;;  %v1360_v20 = vsel %vm1296_vm2, %v4883_v50, -inf }
 0x2ef   :  { %1340 = vmax.xlane.f32.xlu1 %v1339_v22 }
 0x2f1   :  { %1343 = vmax.xlane.f32.xlu0 %v1342_v32  ;;  %v4928_v32 = vmul.f32 %v3475_v1, %v4765_v56 }
 0x2f3   :  { %1364 = vmax.xlane.f32.xlu1 %v1363_v46 }
 0x2f5   :  { %1367 = vmax.xlane.f32.xlu0 %v1366_v16 }
 0x2f7   :  { %1334 = vmax.xlane.f32.xlu1 %v1333_v42  ;;  %v4933_v42 = vmul.f32 %v3476_v10, %v4765_v56  ;;  %v4949_v10 = vmul.f32 %v4765_v56, %v4848_v7 }
 0x2f9   :  { %1337 = vmax.xlane.f32.xlu0 %v1336_v63  ;;  %6003 = vst [vmem:[#allocation12_spill] sm:$0xff] %v4949_v10 }
 0x2fb   :  { %1358 = vmax.xlane.f32.xlu1 %v1357_v11 }
 0x2fd   :  { %1361 = vmax.xlane.f32.xlu0 %v1360_v20  ;;  %v1387_v20 = vsel %vm1296_vm2, %v4928_v32, -inf }
 0x2ff   :  { %v3487_v34 = vpop.f32.mrb[16].mxu1  ;;  %1376 = vmax.xlane.f32.xlu1 %v1375_v24  ;;  %v1390_v24 = vsel %vm1296_vm2, %v4933_v42, -inf }
 0x300   :  { %v4900_v35 = vmul.f32 %v3487_v34, %v4765_v56  ;;  %v897_v60 = vpop.f32.mrb[17].mxu1 }
 0x301   :  { %v3488_v27 = vpop.f32.mrb[18].mxu1  ;;  %1379 = vmax.xlane.f32.xlu0 %v1378_v19  ;;  %v4918_v58 = vmul.f32 %v4765_v56, %v897_v60  ;;  %v4955_v60 = vmul.f32 %v4765_v56, %v4855_v17 }
 0x302   :  { %v4908_v31 = vmul.f32 %v3488_v27, %v4765_v56  ;;  %v900_v44 = vpop.f32.mrb[19].mxu1  ;;  %v1399_v45 = vsel %vm1296_vm2, %v4900_v35, -inf }
 0x303   :  { %1400 = vmax.xlane.f32.xlu1 %v1399_v45  ;;  %v4923_v2 = vmul.f32 %v4765_v56, %v900_v44  ;;  %v1393_v16 = vsel %vm1296_vm2, %v4918_v58, -inf  ;;  %v1381_v44 = vsel %vm1296_vm2, %v4949_v10, -inf  ;;  %v1384_v45 = vsel %vm1296_vm2, %v4955_v60, -inf }
 0x304   :  { %v1402_v54 = vsel %vm1296_vm2, %v4908_v31, -inf }
 0x305   :  { %1403 = vmax.xlane.f32.xlu0 %v1402_v54  ;;  %v1396_v63 = vsel %vm1296_vm2, %v4923_v2, -inf }
 0x307   :  { %v3491_v62 = vpop.f32.mrb[20].mxu1  ;;  %1370 = vmax.xlane.f32.xlu1 %v1369_v9  ;;  %v4973_v9 = vpop.permute.xlu1 %2478 }
 0x308   :  { %v913_v13 = vpop.f32.mrb[21].mxu1  ;;  %v4938_v11 = vmul.f32 %v3491_v62, %v4765_v56  ;;  %6005 = vst [vmem:[#allocation14_spill] sm:$0xff] %v4973_v9  ;;  %v4975_v62 = vpop.permute.xlu0 %2124 }
 0x309   :  { %v3492_v22 = vpop.f32.mrb[22].mxu1  ;;  %1373 = vmax.xlane.f32.xlu0 %v1372_v39  ;;  %v4960_v27 = vmul.f32 %v4765_v56, %v913_v13  ;;  %6006 = vst [vmem:[#allocation15_spill] sm:$0xff] %v4975_v62 }
 0x30a   :  { %v916_v46 = vpop.f32.mrb[23].mxu1  ;;  %6001 = vst [vmem:[#allocation10_spill] sm:$0xff] %v4938_v11  ;;  %v4943_v1 = vmul.f32 %v3492_v22, %v4765_v56  ;;  %v1411_v34 = vsel %vm1296_vm2, %v4938_v11, -inf }
 0x30b   :  { %1394 = vmax.xlane.f32.xlu1 %v1393_v16  ;;  %6004 = vst [vmem:[#allocation13_spill] sm:$0xff] %v4960_v27  ;;  %v4965_v7 = vmul.f32 %v4765_v56, %v916_v46  ;;  %v1405_v17 = vsel %vm1296_vm2, %v4960_v27, -inf  ;;  %v4977_v13 = vpop.permute.xlu1 %2391 }
 0x30c   :  { %6002 = vst [vmem:[#allocation11_spill] sm:$0xff] %v4943_v1  ;;  %v1414_v19 = vsel %vm1296_vm2, %v4943_v1, -inf  ;;  %6007 = vst [vmem:[#allocation16_spill] sm:$0xff] %v4977_v13  ;;  %v4979_v39 = vpop.permute.xlu0 %2128 }
 0x30d   :  { %1397 = vmax.xlane.f32.xlu0 %v1396_v63  ;;  %v1408_v54 = vsel %vm1296_vm2, %v4965_v7, -inf  ;;  %6008 = vst [vmem:[#allocation17_spill] sm:$0xff] %v4979_v39 }
 0x30f   :  { %1388 = vmax.xlane.f32.xlu1 %v1387_v20  ;;  %v4981_v22 = vpop.permute.xlu1 %2393 }
 0x310   :  { %6009 = vst [vmem:[#allocation18_spill] sm:$0xff] %v4981_v22  ;;  %v4983_v46 = vpop.permute.xlu0 %2302 }
 0x311   :  { %1391 = vmax.xlane.f32.xlu0 %v1390_v24  ;;  %6010 = vst [vmem:[#allocation19_spill] sm:$0xff] %v4983_v46 }
 0x313   :  { %1412 = vmax.xlane.f32.xlu1 %v1411_v34  ;;  %v4985_v16 = vpop.permute.xlu1 %2395 }
 0x314   :  { %6011 = vst [vmem:[#allocation20_spill] sm:$0xff] %v4985_v16  ;;  %v4987_v63 = vpop.permute.xlu0 %2306 }
 0x315   :  { %1415 = vmax.xlane.f32.xlu0 %v1414_v19  ;;  %6012 = vst [vmem:[#allocation21_spill] sm:$0xff] %v4987_v63 }
 0x317   :  { %1382 = vmax.xlane.f32.xlu1 %v1381_v44  ;;  %v4989_v20 = vpop.permute.xlu1 %2567 }
 0x318   :  { %6013 = vst [vmem:[#allocation22_spill] sm:$0xff] %v4989_v20  ;;  %v4991_v24 = vpop.permute.xlu0 %2480 }
 0x319   :  { %1385 = vmax.xlane.f32.xlu0 %v1384_v45  ;;  %6014 = vst [vmem:[#allocation23_spill] sm:$0xff] %v4991_v24 }
 0x31b   :  { %1406 = vmax.xlane.f32.xlu1 %v1405_v17  ;;  %v4999_v45 = vpop.permute.xlu1 %2656 }
 0x31c   :  { %6015 = vst [vmem:[#allocation24_spill] sm:$0xff] %v4999_v45 }
 0x31d   :  { %1409 = vmax.xlane.f32.xlu0 %v1408_v54  ;;  %v5003_v54 = vpop.permute.xlu0 %2484 }
 0x31e   :  { %6016 = vst [vmem:[#allocation25_spill] sm:$0xff] %v5003_v54 }
 0x31f   :  { %v5007_v9 = vpop.permute.xlu1 %2658 }
 0x320   :  { %6017 = vst [vmem:[#allocation26_spill] sm:$0xff] %v5007_v9 }
 0x321   :  { %v5015_v22 = vpop.permute.xlu0 %2569 }
 0x322   :  { %6018 = vst [vmem:[#allocation27_spill] sm:$0xff] %v5015_v22 }
 0x323   :  { %v5017_v63 = vpop.permute.xlu1 %2482 }
 0x324   :  { %6019 = vst [vmem:[#allocation28_spill] sm:$0xff] %v5017_v63 }
 0x325   :  { %v5019_v13 = vpop.permute.xlu0 %2571 }
 0x326   :  { %6020 = vst [vmem:[#allocation29_spill] sm:$0xff] %v5019_v13 }
 0x327   :  { %v5021_v45 = vpop.permute.xlu1 %2660 }
 0x328   :  { %6021 = vst [vmem:[#allocation30_spill] sm:$0xff] %v5021_v45 }
 0x339   :  { %v4993_v34 = vpop.f32.mrb[32].mxu0 }
 0x33a   :  { %v4995_v19 = vpop.f32.mrb[33].mxu0 }
 0x33b   :  { %v4997_v44 = vpop.f32.mrb[34].mxu0 }
 0x33c   :  { %v5001_v17 = vpop.f32.mrb[35].mxu0 }
 0x341   :  { %v5005_v12 = vpop.f32.mrb[36].mxu0 }
 0x342   :  { %v5009_v16 = vpop.f32.mrb[37].mxu0 }
 0x343   :  { %v5011_v20 = vpop.f32.mrb[38].mxu0 }
 0x344   :  { %v5013_v24 = vpop.f32.mrb[39].mxu0 }
 0x34f   :  { %v1305_v52 = vpop.xlane.xlu0 %1304 }
 0x350   :  { %v1491_v54 = vsub.f32 %v4768_v59, %v1305_v52 }
 0x351   :  { %v5024_v55 = vpop.f32.mrb[24].mxu1 }
 0x352   :  { %v1557_v9 = vmul.f32 1.442695, %v1491_v54  ;;  %v5026_v46 = vpop.f32.mrb[25].mxu1  ;;  %v1302_v23 = vpop.xlane.xlu1 %1301 }
 0x353   :  { %v5028_v47 = vpop.f32.mrb[26].mxu1  ;;  %v1299_v39 = vpop.xlane.xlu0 %1298  ;;  %v1490_v45 = vsub.f32 %v4776_v3, %v1302_v23 }
 0x354   :  { %3973 = vpow2.f32 %v1557_v9  ;;  %v1489_v22 = vsub.f32 %v4771_v0, %v1299_v39  ;;  %v5031_v63 = vpop.f32.mrb[27].mxu1 }
 0x355   :  { %v1555_v0 = vmul.f32 1.442695, %v1490_v45 }
 0x356   :  { %v1553_v13 = vmul.f32 1.442695, %v1489_v22 }
 0x357   :  { %v1317_v40 = vpop.xlane.xlu1 %1316  ;;  %v1308_v62 = vpop.xlane.xlu0 %1307 }
 0x358   :  { %3975 = vpow2.f32 %v1553_v13  ;;  %v1495_v52 = vsub.f32 %v4786_v25, %v1317_v40  ;;  %v1492_v59 = vsub.f32 %v4781_v14, %v1308_v62 }
 0x359   :  { %v5036_v54 = vpop.f32.mrb[28].mxu1 }
 0x35a   :  { %v1565_v48 = vmul.f32 1.442695, %v1495_v52  ;;  %v1559_v1 = vmul.f32 1.442695, %v1492_v59  ;;  %v5038_v27 = vpop.f32.mrb[40].mxu0  ;;  %v5040_v9 = vpop.f32.mrb[29].mxu1 }
 0x35b   :  { %v5042_v39 = vpop.f32.mrb[41].mxu0  ;;  %v5044_v22 = vpop.f32.mrb[30].mxu1 }
 0x35c   :  { %3977 = vpow2.f32 %v1565_v48  ;;  %v5046_v23 = vpop.f32.mrb[42].mxu0  ;;  %v1311_v3 = vpop.xlane.xlu1 %1310 }
 0x35d   :  { %3979 = vpow2.f32 %v1559_v1  ;;  %v1493_v40 = vsub.f32 %v4789_v18, %v1311_v3  ;;  %v1320_v14 = vpop.xlane.xlu0 %1319  ;;  %v5049_v25 = vpop.f32.mrb[31].mxu1 }
 0x35e   :  { %v5051_v62 = vpop.eup %3973  ;;  %v1496_v13 = vsub.f32 %v4792_v33, %v1320_v14  ;;  %v5054_v52 = vpop.f32.mrb[43].mxu0  ;;  %3981 = vpow2.f32 %v1555_v0 }
 0x35f   :  { %6022 = vst [vmem:[#allocation31_spill] sm:$0xff] %v5051_v62  ;;  %v1561_v45 = vmul.f32 1.442695, %v1493_v40  ;;  %v1687_v48 = vsel %vm1296_vm2, %v5051_v62, 0.0 }
 0x360   :  { %v1567_v59 = vmul.f32 1.442695, %v1496_v13  ;;  %1688 = vadd.xlane.f32.xlu1 %v1687_v48 }
 0x361   :  { %3983 = vpow2.f32 %v1561_v45  ;;  %v1314_v1 = vpop.xlane.xlu0 %1313 }
 0x362   :  { %v5058_v10 = vpop.eup %3975  ;;  %v1494_v18 = vsub.f32 %v4802_v28, %v1314_v1  ;;  %v5061_v3 = vpop.f32.mrb[44].mxu0  ;;  %3985 = vpow2.f32 %v1567_v59 }
 0x363   :  { %6023 = vst [vmem:[#allocation32_spill] sm:$0xff] %v5058_v10  ;;  %v5063_v11 = vpop.f32.mrb[45].mxu0  ;;  %v1681_v33 = vsel %vm1296_vm2, %v5058_v10, 0.0 }
 0x364   :  { %v1563_v0 = vmul.f32 1.442695, %v1494_v18  ;;  %v5067_v40 = vpop.f32.mrb[46].mxu0  ;;  %1682 = vadd.xlane.f32.xlu1 %v1681_v33  ;;  %v5085_v18 = vmul.f32 %v4993_v34, %v4765_v56 }
 0x365   :  { %v5069_v14 = vpop.f32.mrb[47].mxu0 }
 0x366   :  { %v5071_v13 = vpop.eup %3977  ;;  %3987 = vpow2.f32 %v1563_v0  ;;  %v1423_v34 = vsel %vm1296_vm2, %v5085_v18, -inf }
 0x367   :  { %6024 = vst [vmem:[#allocation33_spill] sm:$0xff] %v5071_v13  ;;  %v5073_v45 = vpop.eup %3979  ;;  %v1699_v28 = vsel %vm1296_vm2, %v5071_v13, 0.0 }
 0x368   :  { %6025 = vst [vmem:[#allocation34_spill] sm:$0xff] %v5073_v45  ;;  %1700 = vadd.xlane.f32.xlu1 %v1699_v28  ;;  %v1690_v48 = vsel %vm1296_vm2, %v5073_v45, 0.0  ;;  %v5079_v59 = vpop.eup %3981  ;;  %v5093_v28 = vpop.xlane.xlu0 %1331 }
 0x369   :  { %6026 = vst [vmem:[#allocation35_spill] sm:$0xff] %v5079_v59  ;;  %1691 = vadd.xlane.f32.xlu0 %v1690_v48  ;;  %v1684_v0 = vsel %vm1296_vm2, %v5079_v59, 0.0  ;;  %v5097_v48 = vmul.f32 %v5024_v55, %v4765_v56  ;;  %v5113_v55 = vmul.f32 %v4997_v44, %v4765_v56  ;;  %v5129_v44 = vmul.f32 %v5028_v47, %v4765_v56 }
 0x36b   :  { %v5081_v1 = vpop.eup %3983  ;;  %6029 = vst [vmem:[#allocation38_spill] sm:$0xff] %v5097_v48  ;;  %6031 = vst [vmem:[#allocation40_spill] sm:$0xff] %v5113_v55  ;;  %v1447_v10 = vsel %vm1296_vm2, %v5097_v48, -inf  ;;  %v1426_v48 = vsel %vm1296_vm2, %v5113_v55, -inf }
 0x36c   :  { %6027 = vst [vmem:[#allocation36_spill] sm:$0xff] %v5081_v1  ;;  %v1693_v33 = vsel %vm1296_vm2, %v5081_v1, 0.0  ;;  %v5091_v13 = vpop.eup %3985  ;;  %6033 = vst [vmem:[#allocation42_spill] sm:$0xff] %v5129_v44 }
 0x36d   :  { %6028 = vst [vmem:[#allocation37_spill] sm:$0xff] %v5091_v13  ;;  %1694 = vadd.xlane.f32.xlu1 %v1693_v33  ;;  %1685 = vadd.xlane.f32.xlu0 %v1684_v0  ;;  %v1702_v62 = vsel %vm1296_vm2, %v5091_v13, 0.0  ;;  %v5109_v33 = vmul.f32 %v4765_v56, %v4995_v19  ;;  %v5115_v0 = vpop.xlane.xlu1 %1328  ;;  %v5125_v19 = vmul.f32 %v4765_v56, %v5026_v46 }
 0x36e   :  { %v5143_v46 = vmul.f32 %v5005_v12, %v4765_v56  ;;  %v5159_v12 = vmul.f32 %v5036_v54, %v4765_v56 }
 0x36f   :  { %6032 = vst [vmem:[#allocation41_spill] sm:$0xff] %v5125_v19  ;;  %v1417_v45 = vsel %vm1296_vm2, %v5109_v33, -inf  ;;  %v1441_v47 = vsel %vm1296_vm2, %v5125_v19, -inf }
 0x370   :  { %v5103_v1 = vpop.eup %3987  ;;  %6034 = vst [vmem:[#allocation43_spill] sm:$0xff] %v5143_v46  ;;  %6036 = vst [vmem:[#allocation45_spill] sm:$0xff] %v5159_v12  ;;  %v1435_v19 = vsel %vm1296_vm2, %v5143_v46, -inf  ;;  %v1459_v55 = vsel %vm1296_vm2, %v5159_v12, -inf }
 0x371   :  { %6030 = vst [vmem:[#allocation39_spill] sm:$0xff] %v5103_v1  ;;  %1424 = vmax.xlane.f32.xlu1 %v1423_v34  ;;  %1703 = vadd.xlane.f32.xlu0 %v1702_v62  ;;  %v1696_v13 = vsel %vm1296_vm2, %v5103_v1, 0.0  ;;  %v1353_v34 = vpop.xlane.xlu1 %1352  ;;  %v1450_v1 = vsel %vm1296_vm2, %v5129_v44, -inf }
 0x372   :  { %v5105_v59 = vpop.xlane.xlu0 %1355 }
 0x375   :  { %1448 = vmax.xlane.f32.xlu1 %v1447_v10  ;;  %1697 = vadd.xlane.f32.xlu0 %v1696_v13  ;;  %v5139_v13 = vmul.f32 %v4765_v56, %v5001_v17  ;;  %v5155_v17 = vmul.f32 %v4765_v56, %v5031_v63  ;;  %v5173_v63 = vmul.f32 %v5011_v20, %v4765_v56 }
 0x376   :  { %v5121_v62 = vpop.xlane.xlu0 %1325 }
 0x377   :  { %6035 = vst [vmem:[#allocation44_spill] sm:$0xff] %v5155_v17  ;;  %v1420_v44 = vsel %vm1296_vm2, %v5139_v13, -inf  ;;  %6038 = vst [vmem:[#allocation47_spill] sm:$0xff] %v5173_v63  ;;  %v1444_v46 = vsel %vm1296_vm2, %v5155_v17, -inf  ;;  %v1438_v12 = vsel %vm1296_vm2, %v5173_v63, -inf  ;;  %v5196_v17 = vmul.f32 %v4765_v56, %v5013_v24 }
 0x378   :  { %v5211_v24 = vmul.f32 %v4765_v56, %v5042_v39  ;;  %v1508_v39 = vsub.f32 %v4824_v53, %v5105_v59 }
 0x379   :  { %1418 = vmax.xlane.f32.xlu1 %v1417_v45  ;;  %1427 = vmax.xlane.f32.xlu0 %v1426_v48  ;;  %v5149_v45 = vpop.xlane.xlu1 %1322 }
 0x37a   :  { %v5135_v10 = vpop.xlane.xlu0 %1349  ;;  %v1497_v53 = vsub.f32 %v4821_v38, %v5149_v45 }
 0x37d   :  { %1442 = vmax.xlane.f32.xlu1 %v1441_v47  ;;  %1451 = vmax.xlane.f32.xlu0 %v1450_v1  ;;  %v5169_v47 = vmul.f32 %v4765_v56, %v5009_v16  ;;  %v1347_v54 = vpop.xlane.xlu1 %1346  ;;  %v5187_v16 = vmul.f32 %v5044_v22, %v4765_v56 }
 0x37e   :  { %v5151_v48 = vpop.xlane.xlu0 %1343 }
 0x37f   :  { %6037 = vst [vmem:[#allocation46_spill] sm:$0xff] %v5169_v47  ;;  %v1429_v20 = vsel %vm1296_vm2, %v5169_v47, -inf }
 0x381   :  { %1436 = vmax.xlane.f32.xlu1 %v1435_v19  ;;  %1421 = vmax.xlane.f32.xlu0 %v1420_v44  ;;  %v5183_v44 = vmul.f32 %v4765_v56, %v5040_v9  ;;  %v5200_v9 = vmul.f32 %v5038_v27, %v4765_v56  ;;  %v5215_v27 = vmul.f32 %v4765_v56, %v5049_v25 }
 0x382   :  { %v5165_v1 = vpop.xlane.xlu0 %1367 }
 0x383   :  { %v1453_v47 = vsel %vm1296_vm2, %v5183_v44, -inf  ;;  %v1471_v63 = vsel %vm1296_vm2, %v5200_v9, -inf }
 0x385   :  { %1460 = vmax.xlane.f32.xlu1 %v1459_v55  ;;  %1445 = vmax.xlane.f32.xlu0 %v1444_v46  ;;  %v1341_v55 = vpop.xlane.xlu1 %1340  ;;  %v1507_v46 = vsub.f32 %v4818_v29, %v1353_v34  ;;  %v1505_v29 = vsub.f32 %v4834_v43, %v1347_v54  ;;  %v1499_v43 = vsub.f32 %v4799_v57, %v5115_v0  ;;  %v1456_v57 = vsel %vm1296_vm2, %v5215_v27, -inf }
 0x386   :  { %v5179_v19 = vpop.xlane.xlu0 %1337 }
 0x387   :  { %v1585_v25 = vmul.f32 1.442695, %v1505_v29  ;;  %v1573_v0 = vmul.f32 1.442695, %v1499_v43  ;;  %v5250_v29 = vmul.f32 %v4765_v56, %v5063_v11 }
 0x389   :  { %1430 = vmax.xlane.f32.xlu1 %v1429_v20  ;;  %1439 = vmax.xlane.f32.xlu0 %v1438_v12  ;;  %v1462_v20 = vsel %vm1296_vm2, %v5187_v16, -inf  ;;  %v1589_v12 = vmul.f32 1.442695, %v1507_v46  ;;  %v5217_v34 = vpop.xlane.xlu1 %1364  ;;  %v5231_v46 = vmul.f32 %v5046_v23, %v4765_v56  ;;  %v1503_v23 = vsub.f32 %v4844_v61, %v1341_v55 }
 0x38a   :  { %v5202_v22 = vpop.xlane.xlu0 %1361  ;;  %v1500_v61 = vsub.f32 %v4809_v5, %v5093_v28  ;;  %v5263_v55 = vmul.f32 %v5067_v40, %v4765_v56 }
 0x38b   :  { %3989 = vpow2.f32 %v1589_v12  ;;  %v1591_v12 = vmul.f32 1.442695, %v1508_v39  ;;  %v1474_v38 = vsel %vm1296_vm2, %v5231_v46, -inf  ;;  %v1581_v45 = vmul.f32 1.442695, %v1503_v23 }
 0x38c   :  { %3991 = vpow2.f32 %v1585_v25  ;;  %v1477_v25 = vsel %vm1296_vm2, %v5250_v29, -inf  ;;  %v1575_v5 = vmul.f32 1.442695, %v1500_v61 }
 0x38d   :  { %1454 = vmax.xlane.f32.xlu1 %v1453_v47  ;;  %1463 = vmax.xlane.f32.xlu0 %v1462_v20  ;;  %v1432_v47 = vsel %vm1296_vm2, %v5196_v17, -inf  ;;  %v5235_v20 = vmul.f32 %v5061_v3, %v4765_v56  ;;  %v1335_v59 = vpop.xlane.xlu1 %1334  ;;  %v5246_v3 = vmul.f32 %v4765_v56, %v5054_v52  ;;  %3993 = vpow2.f32 %v1573_v0 }
 0x38e   :  { %v5225_v54 = vpop.xlane.xlu0 %1379  ;;  %v1569_v52 = vmul.f32 1.442695, %v1497_v53  ;;  %3995 = vpow2.f32 %v1591_v12  ;;  %v1501_v11 = vsub.f32 %v4868_v6, %v1335_v59  ;;  %v1498_v6 = vsub.f32 %v4829_v36, %v5121_v62 }
 0x38f   :  { %v1483_v43 = vsel %vm1296_vm2, %v5235_v20, -inf  ;;  %v5278_v53 = vmul.f32 %v4765_v56, %v5069_v14  ;;  %v1486_v12 = vsel %vm1296_vm2, %v5263_v55, -inf  ;;  %v1506_v62 = vsub.f32 %v4839_v49, %v5135_v10 }
 0x390   :  { %3997 = vpow2.f32 %v1569_v52  ;;  %v1577_v40 = vmul.f32 1.442695, %v1501_v11  ;;  %v1571_v36 = vmul.f32 1.442695, %v1498_v6 }
 0x391   :  { %1472 = vmax.xlane.f32.xlu1 %v1471_v63  ;;  %1433 = vmax.xlane.f32.xlu0 %v1432_v47  ;;  %v1465_v63 = vsel %vm1296_vm2, %v5211_v24, -inf  ;;  %v1359_v39 = vpop.xlane.xlu1 %1358  ;;  %3999 = vpow2.f32 %v1581_v45  ;;  %v1480_v61 = vsel %vm1296_vm2, %v5278_v53, -inf  ;;  %v1587_v49 = vmul.f32 1.442695, %v1506_v62 }
 0x392   :  { %v5252_v47 = vpop.xlane.xlu0 %1403  ;;  %v1509_v0 = vsub.f32 %v4878_v30, %v1359_v39  ;;  %4001 = vpow2.f32 %v1575_v5  ;;  %v1504_v30 = vsub.f32 %v4851_v8, %v5151_v48  ;;  %v1511_v8 = vsub.f32 %v4858_v21, %v5217_v34 }
 0x393   :  { %4003 = vpow2.f32 %v1577_v40  ;;  %v1512_v45 = vsub.f32 %v4863_v26, %v5165_v1  ;;  %v1502_v34 = vsub.f32 %v4873_v4, %v5179_v19  ;;  %v1516_v1 = vsub.f32 %v4893_v15, %v5225_v54 }
 0x394   :  { %v1593_v56 = vmul.f32 1.442695, %v1509_v0  ;;  %4005 = vpow2.f32 %v1571_v36  ;;  %v1583_v48 = vmul.f32 1.442695, %v1504_v30  ;;  %v1597_v21 = vmul.f32 1.442695, %v1511_v8 }
 0x395   :  { %1466 = vmax.xlane.f32.xlu1 %v1465_v63  ;;  %1457 = vmax.xlane.f32.xlu0 %v1456_v57  ;;  %v1468_v63 = vsel %vm1296_vm2, %v5246_v3, -inf  ;;  %v5269_v57 = vpop.eup %3989  ;;  %v1377_v10 = vpop.xlane.xlu1 %1376  ;;  %v1599_v26 = vmul.f32 1.442695, %v1512_v45  ;;  %v1579_v4 = vmul.f32 1.442695, %v1502_v34  ;;  %v1510_v19 = vsub.f32 %v4883_v50, %v5202_v22 }
 0x396   :  { %v5273_v28 = vpop.xlane.xlu0 %1373  ;;  %v1735_v59 = vsel %vm1296_vm2, %v5269_v57, 0.0  ;;  %v5284_v23 = vpop.eup %3991  ;;  %4007 = vpow2.f32 %v1593_v56  ;;  %v1607_v15 = vmul.f32 1.442695, %v1516_v1  ;;  %v1515_v22 = vsub.f32 %v4888_v41, %v1377_v10 }
 0x397   :  { %v5290_v14 = vpop.eup %3993  ;;  %4009 = vpow2.f32 %v1587_v49  ;;  %v1514_v54 = vsub.f32 %v4913_v51, %v5273_v28  ;;  %v1595_v50 = vmul.f32 1.442695, %v1510_v19 }
 0x398   :  { %v5298_v52 = vpop.eup %3995  ;;  %v1711_v39 = vsel %vm1296_vm2, %v5290_v14, 0.0  ;;  %4011 = vpow2.f32 %v1583_v48  ;;  %v1605_v41 = vmul.f32 1.442695, %v1515_v22 }
 0x399   :  { %1484 = vmax.xlane.f32.xlu1 %v1483_v43  ;;  %1475 = vmax.xlane.f32.xlu0 %v1474_v38  ;;  %v1729_v38 = vsel %vm1296_vm2, %v5284_v23, 0.0  ;;  %v1401_v40 = vpop.xlane.xlu1 %1400  ;;  %4013 = vpow2.f32 %v1597_v21  ;;  %v1603_v51 = vmul.f32 1.442695, %v1514_v54 }
 0x39a   :  { %v5292_v43 = vpop.xlane.xlu0 %1397  ;;  %v5304_v11 = vpop.eup %3997  ;;  %4015 = vpow2.f32 %v1599_v26  ;;  %v1523_v10 = vsub.f32 %v4900_v35, %v1401_v40 }
 0x39b   :  { %v1705_v0 = vsel %vm1296_vm2, %v5304_v11, 0.0  ;;  %4017 = vpow2.f32 %v1579_v4  ;;  %v1522_v28 = vsub.f32 %v4923_v2, %v5292_v43 }
 0x39c   :  { %4019 = vpow2.f32 %v1607_v15  ;;  %v1621_v35 = vmul.f32 1.442695, %v1523_v10 }
 0x39d   :  { %1478 = vmax.xlane.f32.xlu1 %v1477_v25  ;;  %1469 = vmax.xlane.f32.xlu0 %v1468_v63  ;;  %v1738_v25 = vsel %vm1296_vm2, %v5298_v52, 0.0  ;;  %v5310_v63 = vpop.eup %3999  ;;  %4021 = vpow2.f32 %v1595_v50 }
 0x39e   :  { %v1392_v5 = vpop.xlane.xlu0 %1391  ;;  %v5316_v6 = vpop.eup %4001  ;;  %4023 = vpow2.f32 %v1603_v51 }
 0x39f   :  { %v1714_v30 = vsel %vm1296_vm2, %v5316_v6, 0.0  ;;  %v1520_v2 = vsub.f32 %v4933_v42, %v1392_v5  ;;  %4025 = vpow2.f32 %v1605_v41 }
 0x3a1   :  { %1736 = vadd.xlane.f32.xlu1 %v1735_v59  ;;  %1487 = vmax.xlane.f32.xlu0 %v1486_v12  ;;  %v1723_v59 = vsel %vm1296_vm2, %v5310_v63, 0.0  ;;  %v5322_v12 = vpop.eup %4003 }
 0x3a2   :  { %v5328_v36 = vpop.eup %4005  ;;  %v5330_v62 = vpop.xlane.xlu0 %1415  ;;  %v1717_v56 = vsel %vm1296_vm2, %v5322_v12, 0.0 }
 0x3a3   :  { %v1708_v48 = vsel %vm1296_vm2, %v5328_v36, 0.0 }
 0x3a5   :  { %1730 = vadd.xlane.f32.xlu1 %v1729_v38  ;;  %1481 = vmax.xlane.f32.xlu0 %v1480_v61  ;;  %v5336_v38 = vpop.eup %4007  ;;  %v1371_v61 = vpop.xlane.xlu1 %1370 }
 0x3a6   :  { %v5341_v49 = vpop.eup %4009  ;;  %v1741_v8 = vsel %vm1296_vm2, %v5336_v38, 0.0  ;;  %v1513_v40 = vsub.f32 %v4905_v37, %v1371_v61 }
 0x3a7   :  { %v5347_v45 = vpop.eup %4011  ;;  %v1732_v34 = vsel %vm1296_vm2, %v5341_v49, 0.0 }
 0x3a8   :  { %v5351_v43 = vpop.eup %4013  ;;  %v1726_v26 = vsel %vm1296_vm2, %v5347_v45, 0.0  ;;  %v1601_v54 = vmul.f32 1.442695, %v1513_v40  ;;  %v6040_v40 = vld [vmem:[#allocation10_spill] sm:$0xff] }
 0x3a9   :  { %1712 = vadd.xlane.f32.xlu0 %v1711_v39  ;;  %1739 = vadd.xlane.f32.xlu1 %v1738_v25  ;;  %v1386_v39 = vpop.xlane.xlu0 %1385  ;;  %v1619_v25 = vmul.f32 1.442695, %v1522_v28  ;;  %v1395_v21 = vpop.xlane.xlu1 %1394  ;;  %v1747_v4 = vsel %vm1296_vm2, %v5351_v43, 0.0 }
 0x3aa   :  { %v5357_v1 = vpop.eup %4015  ;;  %v1518_v42 = vsub.f32 %v4955_v60, %v1386_v39  ;;  %v1521_v37 = vsub.f32 %v4918_v58, %v1395_v21  ;;  %v1524_v58 = vsub.f32 %v4908_v31, %v5252_v47 }
 0x3ab   :  { %4027 = vpow2.f32 %v1619_v25  ;;  %v5361_v5 = vpop.eup %4017  ;;  %v1750_v19 = vsel %vm1296_vm2, %v5357_v1, 0.0 }
 0x3ac   :  { %v5367_v15 = vpop.eup %4019  ;;  %4029 = vpow2.f32 %v1621_v35  ;;  %v1611_v60 = vmul.f32 1.442695, %v1518_v42  ;;  %v1720_v22 = vsel %vm1296_vm2, %v5361_v5, 0.0  ;;  %v1617_v28 = vmul.f32 1.442695, %v1521_v37 }
 0x3ad   :  { %1706 = vadd.xlane.f32.xlu0 %v1705_v0  ;;  %1724 = vadd.xlane.f32.xlu1 %v1723_v59  ;;  %v1615_v0 = vmul.f32 1.442695, %v1520_v2  ;;  %v1410_v59 = vpop.xlane.xlu0 %1409  ;;  %v5371_v50 = vpop.eup %4021  ;;  %v1762_v61 = vsel %vm1296_vm2, %v5367_v15, 0.0  ;;  %v1623_v25 = vmul.f32 1.442695, %v1524_v58  ;;  %v6044_v58 = vld [vmem:[#allocation13_spill] sm:$0xff] }
 0x3ae   :  { %v5377_v51 = vpop.eup %4023  ;;  %v1744_v41 = vsel %vm1296_vm2, %v5371_v50, 0.0 }
 0x3af   :  { %4031 = vpow2.f32 %v1615_v0  ;;  %v1756_v10 = vsel %vm1296_vm2, %v5377_v51, 0.0 }
 0x3b0   :  { %4033 = vpow2.f32 %v1601_v54  ;;  %v6042_v54 = vld [vmem:[#allocation12_spill] sm:$0xff] }
 0x3b1   :  { %1715 = vadd.xlane.f32.xlu0 %v1714_v30  ;;  %1718 = vadd.xlane.f32.xlu1 %v1717_v56  ;;  %v1389_v30 = vpop.xlane.xlu1 %1388  ;;  %v1526_v56 = vsub.f32 %v4965_v7, %v1410_v59  ;;  %4035 = vpow2.f32 %v1611_v60  ;;  %v5381_v7 = vpop.eup %4025 }
 0x3b2   :  { %4037 = vpow2.f32 %v1617_v28  ;;  %v1519_v2 = vsub.f32 %v4928_v32, %v1389_v30  ;;  %v1759_v47 = vsel %vm1296_vm2, %v5381_v7, 0.0 }
 0x3b4   :  { %v1613_v35 = vmul.f32 1.442695, %v1519_v2 }
 0x3b5   :  { %1742 = vadd.xlane.f32.xlu1 %v1741_v8  ;;  %1709 = vadd.xlane.f32.xlu0 %v1708_v48  ;;  %v1627_v8 = vmul.f32 1.442695, %v1526_v56  ;;  %v1413_v48 = vpop.xlane.xlu1 %1412  ;;  %v5387_v39 = vpop.eup %4027 }
 0x3b6   :  { %v5390_v31 = vpop.eup %4029  ;;  %v1780_v21 = vsel %vm1296_vm2, %v5387_v39, 0.0  ;;  %v1527_v0 = vsub.f32 %v6040_v40, %v1413_v48 }
 0x3b7   :  { %4039 = vpow2.f32 %v1627_v8  ;;  %v1783_v32 = vsel %vm1296_vm2, %v5390_v31, 0.0 }
 0x3b8   :  { %4041 = vpow2.f32 %v1623_v25  ;;  %v6045_v25 = vld [vmem:[#allocation11_spill] sm:$0xff] }
 0x3b9   :  { %1733 = vadd.xlane.f32.xlu0 %v1732_v34  ;;  %1727 = vadd.xlane.f32.xlu1 %v1726_v26  ;;  %v5396_v34 = vpop.eup %4031  ;;  %v1383_v26 = vpop.xlane.xlu1 %1382  ;;  %4043 = vpow2.f32 %v1613_v35  ;;  %v1528_v2 = vsub.f32 %v6045_v25, %v5330_v62 }
 0x3ba   :  { %6039 = vst [vmem:[#allocation48_spill] sm:$0xff] %v5396_v34  ;;  %v5399_v42 = vpop.eup %4033  ;;  %v1774_v59 = vsel %vm1296_vm2, %v5396_v34, 0.0  ;;  %v1517_v37 = vsub.f32 %v6042_v54, %v1383_v26 }
 0x3bb   :  { %v1753_v56 = vsel %vm1296_vm2, %v5399_v42, 0.0  ;;  %v1631_v35 = vmul.f32 1.442695, %v1528_v2 }
 0x3bc   :  { %v1609_v28 = vmul.f32 1.442695, %v1517_v37 }
 0x3bd   :  { %1748 = vadd.xlane.f32.xlu0 %v1747_v4  ;;  %1751 = vadd.xlane.f32.xlu1 %v1750_v19  ;;  %v5405_v4 = vpop.eup %4035  ;;  %v1629_v19 = vmul.f32 1.442695, %v1527_v0  ;;  %v1407_v60 = vpop.xlane.xlu1 %1406 }
 0x3be   :  { %6041 = vst [vmem:[#allocation10_spill] sm:$0xff] %v5405_v4  ;;  %v5408_v30 = vpop.eup %4037  ;;  %v1525_v8 = vsub.f32 %v6044_v58, %v1407_v60 }
 0x3bf   :  { %4045 = vpow2.f32 %v1629_v19  ;;  %v1777_v48 = vsel %vm1296_vm2, %v5408_v30, 0.0 }
 0x3c0   :  { %4047 = vpow2.f32 %v1609_v28 }
 0x3c1   :  { %1721 = vadd.xlane.f32.xlu0 %v1720_v22  ;;  %1763 = vadd.xlane.f32.xlu1 %v1762_v61  ;;  %v1768_v22 = vsel %vm1296_vm2, %v5405_v4, 0.0  ;;  %v5414_v61 = vpop.eup %4039 }
 0x3c2   :  { %6043 = vst [vmem:[#allocation12_spill] sm:$0xff] %v5414_v61 }
 0x3c5   :  { %1745 = vadd.xlane.f32.xlu0 %v1744_v41  ;;  %1757 = vadd.xlane.f32.xlu1 %v1756_v10  ;;  %v1792_v41 = vsel %vm1296_vm2, %v5414_v61, 0.0  ;;  %v5421_v10 = vpop.eup %4041 }
 0x3c6   :  { %v5427_v26 = vpop.eup %4043 }
 0x3c7   :  { %v1771_v40 = vsel %vm1296_vm2, %v5427_v26, 0.0 }
 0x3c9   :  { %1760 = vadd.xlane.f32.xlu0 %v1759_v47  ;;  %1781 = vadd.xlane.f32.xlu1 %v1780_v21  ;;  %v1625_v47 = vmul.f32 1.442695, %v1525_v8  ;;  %v1786_v21 = vsel %vm1296_vm2, %v5421_v10, 0.0  ;;  %v5431_v0 = vpop.eup %4045 }
 0x3ca   :  { %6046 = vst [vmem:[#allocation13_spill] sm:$0xff] %v5431_v0  ;;  %v1795_v62 = vsel %vm1296_vm2, %v5431_v0, 0.0 }
 0x3cb   :  { %4049 = vpow2.f32 %v1625_v47 }
 0x3cc   :  { %4051 = vpow2.f32 %v1631_v35 }
 0x3cd   :  { %1784 = vadd.xlane.f32.xlu0 %v1783_v32  ;;  %1775 = vadd.xlane.f32.xlu1 %v1774_v59  ;;  %v5435_v32 = vpop.eup %4047 }
 0x3ce   :  { %v1765_v59 = vsel %vm1296_vm2, %v5435_v32, 0.0 }
 0x3d1   :  { %1754 = vadd.xlane.f32.xlu0 %v1753_v56  ;;  %1769 = vadd.xlane.f32.xlu1 %v1768_v22 }
 0x3d5   :  { %1778 = vadd.xlane.f32.xlu0 %v1777_v48  ;;  %1793 = vadd.xlane.f32.xlu1 %v1792_v41  ;;  %v5439_v19 = vpop.eup %4049 }
 0x3d6   :  { %6047 = vst [vmem:[#allocation11_spill] sm:$0xff] %v5439_v19  ;;  %v1789_v54 = vsel %vm1296_vm2, %v5439_v19, 0.0  ;;  %v5443_v37 = vpop.eup %4051 }
 0x3d7   :  { %6048 = vst [vmem:[#allocation49_spill] sm:$0xff] %v5443_v37  ;;  %v1798_v60 = vsel %vm1296_vm2, %v5443_v37, 0.0 }
 0x3d9   :  { %1787 = vadd.xlane.f32.xlu0 %v1786_v21 }
 0x3dd   :  { %1772 = vadd.xlane.f32.xlu0 %v1771_v40 }
 0x3e1   :  { %1796 = vadd.xlane.f32.xlu0 %v1795_v62  ;;  %v6049_v62 = vld [vmem:[#allocation38_spill] sm:$0xff] }
 0x3e5   :  { %1766 = vadd.xlane.f32.xlu0 %v1765_v59 }
 0x3e9   :  { %1790 = vadd.xlane.f32.xlu0 %v1789_v54 }
 0x3ed   :  { %1799 = vadd.xlane.f32.xlu0 %v1798_v60  ;;  %v1689_v56 = vpop.xlane.xlu1 %1688 }
 0x3f1   :  { %v1683_v22 = vpop.xlane.xlu1 %1682 }
 0x3f5   :  { %v1701_v28 = vpop.xlane.xlu1 %1700 }
 0x3f6   :  { %v1692_v58 = vpop.xlane.xlu0 %1691 }
 0x3f7   :  { %4053 = vrcp.f32 %v1692_v58  ;;  %v6050_v58 = vld [vmem:[#allocation34_spill] sm:$0xff] }
 0x3f8   :  { %4055 = vrcp.f32 %v1683_v22 }
 0x3f9   :  { %4057 = vrcp.f32 %v1689_v56 }
 0x3fa   :  { %v1695_v8 = vpop.xlane.xlu1 %1694  ;;  %v1686_v48 = vpop.xlane.xlu0 %1685 }
 0x3fb   :  { %4059 = vrcp.f32 %v1686_v48 }
 0x3fc   :  { %4061 = vrcp.f32 %v1701_v28  ;;  %v6051_v28 = vld [vmem:[#allocation32_spill] sm:$0xff] }
 0x3fe   :  { %v1425_v41 = vpop.xlane.xlu1 %1424  ;;  %v1704_v25 = vpop.xlane.xlu0 %1703 }
 0x3ff   :  { %v1531_v2 = vsub.f32 %v5085_v18, %v1425_v41  ;;  %4063 = vrcp.f32 %v1704_v25  ;;  %v6052_v41 = vld [vmem:[#allocation35_spill] sm:$0xff] }
 0x400   :  { %4065 = vrcp.f32 %v1695_v8 }
 0x401   :  { %v1637_v47 = vmul.f32 1.442695, %v1531_v2  ;;  %v4054_v40 = vpop.eup %4053  ;;  %v6053_v2 = vld [vmem:[#allocation31_spill] sm:$0xff] }
 0x402   :  { %v1449_v21 = vpop.xlane.xlu1 %1448  ;;  %v1698_v35 = vpop.xlane.xlu0 %1697  ;;  %v1940_v48 = vmul.f32 %v4054_v40, %v6050_v58  ;;  %v6055_v58 = vld [vmem:[#allocation41_spill] sm:$0xff] }
 0x403   :  { %4067 = vpow2.f32 %v1637_v47  ;;  %v1539_v59 = vsub.f32 %v6049_v62, %v1449_v21  ;;  %v4056_v54 = vpop.eup %4055  ;;  %v6054_v21 = vld [vmem:[#allocation40_spill] sm:$0xff] }
 0x404   :  { %4069 = vrcp.f32 %v1698_v35  ;;  %v4058_v60 = vpop.eup %4057  ;;  %v1937_v8 = vmul.f32 %v4056_v54, %v6051_v28  ;;  %v6059_v28 = vld [vmem:[#allocation15_spill] sm:$0xff] }
 0x405   :  { %v1653_v22 = vmul.f32 1.442695, %v1539_v59  ;;  %v4060_v56 = vpop.eup %4059  ;;  %v1939_v47 = vmul.f32 %v4058_v60, %v6053_v2  ;;  %v6061_v2 = vld [vmem:[#allocation36_spill] sm:$0xff] }
 0x406   :  { %v1419_v37 = vpop.xlane.xlu1 %1418  ;;  %v1428_v0 = vpop.xlane.xlu0 %1427  ;;  %v1938_v25 = vmul.f32 %v4060_v56, %v6052_v41  ;;  %v6057_v56 = vld [vmem:[#allocation42_spill] sm:$0xff]  ;;  %v6060_v41 = vld [vmem:[#allocation37_spill] sm:$0xff] }
 0x407   :  { %4071 = vpow2.f32 %v1653_v22  ;;  %v1529_v18 = vsub.f32 %v5109_v33, %v1419_v37  ;;  %v1532_v62 = vsub.f32 %v6054_v21, %v1428_v0  ;;  %v4062_v19 = vpop.eup %4061  ;;  %v2002_v59 = vpack.c.bf16 %v1940_v48, %v1939_v47  ;;  %v6062_v21 = vld [vmem:[#allocation39_spill] sm:$0xff] }
 0x408   :  { %v2001_v35 = vpack.c.bf16 %v1938_v25, %v1937_v8 }
 0x409   :  { %v1633_v61 = vmul.f32 1.442695, %v1529_v18  ;;  %v4064_v40 = vpop.eup %4063  ;;  %v1639_v54 = vmul.f32 1.442695, %v1532_v62  ;;  %v6058_v18 = vld [vmem:[#allocation7_spill] sm:$0xff] }
 0x40a   :  { %v1443_v34 = vpop.xlane.xlu1 %1442  ;;  %v1452_v4 = vpop.xlane.xlu0 %1451  ;;  %3549 = vmatprep.mubr.msk.bf16.mxu0 %vm1296_vm2, %v2001_v35  ;;  %v1944_v25 = vmul.f32 %v4064_v40, %v6060_v41  ;;  %v6063_v35 = vld [vmem:[#allocation33_spill] sm:$0xff] }
 0x40b   :  { %4073 = vpow2.f32 %v1633_v61  ;;  %v1537_v22 = vsub.f32 %v6055_v58, %v1443_v34  ;;  %v4066_v33 = vpop.eup %4065  ;;  %3550 = vmatmul.mubr.msk.bf16.vlgmr.msra.gmra.mrb[48].mxu0 %vm1296_vm2, %v2002_v59  ;;  %v1540_v0 = vsub.f32 %v6057_v56, %v1452_v4  ;;  %v1943_v4 = vmul.f32 %v4062_v19, %v6063_v35  ;;  %v6065_v40 = vld [vmem:[#allocation5_spill] sm:$0xff]  ;;  %v6066_v19 = vld [vmem:[#allocation44_spill] sm:$0xff] }
 0x40c   :  { %3558 = vmatpush3.bf16.msra.mxu0 %v6058_v18  ;;  %v1941_v47 = vmul.f32 %v4066_v33, %v6061_v2  ;;  %v6064_v18 = vld [vmem:[#allocation43_spill] sm:$0xff]  ;;  %v6068_v2 = vld [vmem:[#allocation17_spill] sm:$0xff] }
 0x40d   :  { %v5458_v37 = vpop.eup %4067  ;;  %v1649_v60 = vmul.f32 1.442695, %v1537_v22  ;;  %3559 = vmatprep.subr.bf16.mxu0 %v6059_v28  ;;  %v1655_v58 = vmul.f32 1.442695, %v1540_v0 }
 0x40e   :  { %6056 = vst [vmem:[#allocation38_spill] sm:$0xff] %v5458_v37  ;;  %v4070_v48 = vpop.eup %4069  ;;  %v1437_v8 = vpop.xlane.xlu1 %1436  ;;  %v1807_v34 = vsel %vm1296_vm2, %v5458_v37, 0.0 }
 0x40f   :  { %v1422_v61 = vpop.xlane.xlu0 %1421  ;;  %4075 = vpow2.f32 %v1649_v60  ;;  %1808 = vadd.xlane.f32.xlu1 %v1807_v34  ;;  %v1942_v62 = vmul.f32 %v4070_v48, %v6062_v21  ;;  %v1535_v37 = vsub.f32 %v6064_v18, %v1437_v8  ;;  %v2004_v48 = vpack.c.bf16 %v1944_v25, %v1943_v4 }
 0x410   :  { %4077 = vpow2.f32 %v1639_v54  ;;  %v1530_v22 = vsub.f32 %v5139_v13, %v1422_v61  ;;  %3560 = vmatpush3.bf16.msra.mxu0 %v6059_v28  ;;  %v6067_v28 = vld [vmem:[#allocation45_spill] sm:$0xff] }
 0x411   :  { %v5469_v59 = vpop.eup %4071  ;;  %v2003_v56 = vpack.c.bf16 %v1942_v62, %v1941_v47  ;;  %3561 = vmatprep.subr.bf16.mxu0 %v6065_v40  ;;  %4079 = vpow2.f32 %v1655_v58  ;;  %v1645_v41 = vmul.f32 1.442695, %v1535_v37  ;;  %v6069_v62 = vld [vmem:[#allocation46_spill] sm:$0xff] }
 0x412   :  { %v1461_v60 = vpop.xlane.xlu1 %1460  ;;  %v1831_v33 = vsel %vm1296_vm2, %v5469_v59, 0.0  ;;  %v1635_v0 = vmul.f32 1.442695, %v1530_v22  ;;  %v6070_v37 = vld [vmem:[#allocation6_spill] sm:$0xff] }
 0x413   :  { %v1446_v34 = vpop.xlane.xlu0 %1445  ;;  %3553 = vmatprep.mubr.msk.bf16.mxu0 %vm1296_vm2, %v2003_v56  ;;  %1832 = vadd.xlane.f32.xlu0 %v1831_v33  ;;  %v1543_v8 = vsub.f32 %v6067_v28, %v1461_v60  ;;  %v6071_v33 = vld [vmem:[#allocation47_spill] sm:$0xff] }
 0x414   :  { %v1538_v54 = vsub.f32 %v6066_v19, %v1446_v34  ;;  %3554 = vmatmul.mubr.msk.bf16.gmra.mrb[52].mxu0 %vm1296_vm2, %v2004_v48 }
 0x415   :  { %v5480_v13 = vpop.eup %4073  ;;  %3562 = vmatpush3.bf16.msra.mxu0 %v6065_v40  ;;  %v1661_v58 = vmul.f32 1.442695, %v1543_v8 }
 0x416   :  { %v1651_v61 = vmul.f32 1.442695, %v1538_v54  ;;  %3563 = vmatprep.subr.bf16.mxu0 %v6068_v2  ;;  %v1431_v25 = vpop.xlane.xlu1 %1430  ;;  %v1801_v21 = vsel %vm1296_vm2, %v5480_v13, 0.0 }
 0x417   :  { %v1440_v47 = vpop.xlane.xlu0 %1439  ;;  %v1533_v35 = vsub.f32 %v6069_v62, %v1431_v25  ;;  %1802 = vadd.xlane.f32.xlu1 %v1801_v21 }
 0x418   :  { %4081 = vpow2.f32 %v1651_v61  ;;  %v1536_v48 = vsub.f32 %v6071_v33, %v1440_v47 }
 0x419   :  { %v5488_v4 = vpop.eup %4075  ;;  %4083 = vpow2.f32 %v1635_v0  ;;  %3564 = vmatpush3.bf16.msra.mxu0 %v6068_v2  ;;  %v1641_v22 = vmul.f32 1.442695, %v1533_v35 }
 0x41a   :  { %4085 = vpow2.f32 %v1645_v41  ;;  %3589 = vmatprep.subr.bf16.mxu0 %v6070_v37  ;;  %v1455_v56 = vpop.xlane.xlu1 %1454  ;;  %v1825_v40 = vsel %vm1296_vm2, %v5488_v4, 0.0  ;;  %v5494_v60 = vpop.eup %4077  ;;  %v1647_v61 = vmul.f32 1.442695, %v1536_v48 }
 0x41b   :  { %v1464_v18 = vpop.xlane.xlu0 %1463  ;;  %v1541_v34 = vsub.f32 %v5183_v44, %v1455_v56  ;;  %1826 = vadd.xlane.f32.xlu0 %v1825_v40  ;;  %4087 = vpow2.f32 %v1661_v58  ;;  %v1810_v28 = vsel %vm1296_vm2, %v5494_v60, 0.0  ;;  %v5500_v8 = vpop.eup %4079 }
 0x41c   :  { %4089 = vpow2.f32 %v1641_v22  ;;  %v1544_v41 = vsub.f32 %v5187_v16, %v1464_v18  ;;  %v1834_v21 = vsel %vm1296_vm2, %v5500_v8, 0.0 }
 0x41d   :  { %v1657_v19 = vmul.f32 1.442695, %v1541_v34 }
 0x41e   :  { %v1473_v54 = vpop.xlane.xlu1 %1472  ;;  %v1663_v16 = vmul.f32 1.442695, %v1544_v41 }
 0x41f   :  { %v1434_v0 = vpop.xlane.xlu0 %1433  ;;  %1811 = vadd.xlane.f32.xlu0 %v1810_v28  ;;  %4091 = vpow2.f32 %v1657_v19  ;;  %v1547_v44 = vsub.f32 %v5200_v9, %v1473_v54 }
 0x420   :  { %4093 = vpow2.f32 %v1647_v61  ;;  %v1534_v9 = vsub.f32 %v5196_v17, %v1434_v0 }
 0x421   :  { %v1669_v18 = vmul.f32 1.442695, %v1547_v44 }
 0x422   :  { %v5503_v2 = vpop.eup %4081  ;;  %v1467_v25 = vpop.xlane.xlu1 %1466  ;;  %v1643_v17 = vmul.f32 1.442695, %v1534_v9 }
 0x423   :  { %v1458_v47 = vpop.xlane.xlu0 %1457  ;;  %v5508_v62 = vpop.eup %4083  ;;  %1835 = vadd.xlane.f32.xlu0 %v1834_v21  ;;  %v1828_v58 = vsel %vm1296_vm2, %v5503_v2, 0.0  ;;  %v1545_v40 = vsub.f32 %v5211_v24, %v1467_v25 }
 0x424   :  { %v1542_v35 = vsub.f32 %v5215_v27, %v1458_v47  ;;  %v5513_v22 = vpop.eup %4085  ;;  %1829 = vadd.xlane.f32.xlu1 %v1828_v58  ;;  %v1804_v27 = vsel %vm1296_vm2, %v5508_v62, 0.0 }
 0x425   :  { %v5519_v48 = vpop.eup %4087  ;;  %v1819_v19 = vsel %vm1296_vm2, %v5513_v22, 0.0  ;;  %v1665_v24 = vmul.f32 1.442695, %v1545_v40 }
 0x426   :  { %v1659_v56 = vmul.f32 1.442695, %v1542_v35  ;;  %v1485_v34 = vpop.xlane.xlu1 %1484  ;;  %6072 = vst [vmem:[#allocation34_spill] sm:$0xff] %v5519_v48  ;;  %v5523_v54 = vpop.eup %4089  ;;  %v1843_v44 = vsel %vm1296_vm2, %v5519_v48, 0.0 }
 0x427   :  { %v1476_v33 = vpop.xlane.xlu0 %1475  ;;  %1805 = vadd.xlane.f32.xlu0 %v1804_v27  ;;  %v1551_v28 = vsub.f32 %v5235_v20, %v1485_v34  ;;  %v1813_v47 = vsel %vm1296_vm2, %v5523_v54, 0.0 }
 0x428   :  { %4095 = vpow2.f32 %v1659_v56  ;;  %1820 = vadd.xlane.f32.xlu1 %v1819_v19  ;;  %v1548_v0 = vsub.f32 %v5231_v46, %v1476_v33 }
 0x429   :  { %4097 = vpow2.f32 %v1663_v16  ;;  %v5529_v25 = vpop.eup %4091  ;;  %v1677_v35 = vmul.f32 1.442695, %v1551_v28 }
 0x42a   :  { %4099 = vpow2.f32 %v1669_v18  ;;  %v1479_v61 = vpop.xlane.xlu1 %1478  ;;  %v1671_v21 = vmul.f32 1.442695, %v1548_v0  ;;  %v1837_v9 = vsel %vm1296_vm2, %v5529_v25, 0.0  ;;  %v5539_v56 = vpop.eup %4093 }
 0x42b   :  { %v1470_v41 = vpop.xlane.xlu0 %1469  ;;  %1844 = vadd.xlane.f32.xlu0 %v1843_v44  ;;  %4101 = vpow2.f32 %v1643_v17  ;;  %v1549_v20 = vsub.f32 %v5250_v29, %v1479_v61  ;;  %v1822_v29 = vsel %vm1296_vm2, %v5539_v56, 0.0 }
 0x42c   :  { %1814 = vadd.xlane.f32.xlu1 %v1813_v47  ;;  %v1546_v46 = vsub.f32 %v5246_v3, %v1470_v41  ;;  %4103 = vpow2.f32 %v1665_v24 }
 0x42d   :  { %4105 = vpow2.f32 %v1671_v21  ;;  %v1673_v3 = vmul.f32 1.442695, %v1549_v20 }
 0x42e   :  { %v5535_v58 = vpop.xlane.xlu1 %1736  ;;  %v1667_v18 = vmul.f32 1.442695, %v1546_v46  ;;  %4107 = vpow2.f32 %v1677_v35 }
 0x42f   :  { %v1488_v16 = vpop.xlane.xlu0 %1487  ;;  %1838 = vadd.xlane.f32.xlu0 %v1837_v9 }
 0x430   :  { %v1552_v40 = vsub.f32 %v5263_v55, %v1488_v16  ;;  %4109 = vpow2.f32 %v1667_v18 }
 0x431   :  { %4111 = vpow2.f32 %v1673_v3 }
 0x432   :  { %v5542_v34 = vpop.eup %4095  ;;  %v1731_v33 = vpop.xlane.xlu1 %1730  ;;  %v1679_v55 = vmul.f32 1.442695, %v1552_v40 }
 0x433   :  { %v1482_v27 = vpop.xlane.xlu0 %1481  ;;  %v5546_v19 = vpop.eup %4097  ;;  %1823 = vadd.xlane.f32.xlu0 %v1822_v29  ;;  %v1840_v17 = vsel %vm1296_vm2, %v5542_v34, 0.0 }
 0x434   :  { %v5550_v0 = vpop.eup %4099  ;;  %1841 = vadd.xlane.f32.xlu1 %v1840_v17  ;;  %v1550_v24 = vsub.f32 %v5278_v53, %v1482_v27  ;;  %v1846_v41 = vsel %vm1296_vm2, %v5546_v19, 0.0  ;;  %4113 = vpow2.f32 %v1679_v55 }
 0x435   :  { %v5555_v44 = vpop.eup %4101  ;;  %v1855_v47 = vsel %vm1296_vm2, %v5550_v0, 0.0 }
 0x436   :  { %v1740_v28 = vpop.xlane.xlu1 %1739  ;;  %v5559_v21 = vpop.eup %4103  ;;  %v1675_v46 = vmul.f32 1.442695, %v1550_v24  ;;  %v1816_v53 = vsel %vm1296_vm2, %v5555_v44, 0.0 }
 0x437   :  { %v1713_v61 = vpop.xlane.xlu0 %1712  ;;  %1847 = vadd.xlane.f32.xlu0 %v1846_v41  ;;  %v5563_v16 = vpop.eup %4105  ;;  %v1849_v9 = vsel %vm1296_vm2, %v5559_v21, 0.0 }
 0x438   :  { %1856 = vadd.xlane.f32.xlu1 %v1855_v47  ;;  %v5567_v18 = vpop.eup %4107  ;;  %4115 = vpow2.f32 %v1675_v46  ;;  %v1858_v27 = vsel %vm1296_vm2, %v5563_v16, 0.0 }
 0x439   :  { %6073 = vst [vmem:[#allocation32_spill] sm:$0xff] %v5567_v18  ;;  %v1867_v17 = vsel %vm1296_vm2, %v5567_v18, 0.0 }
 0x43a   :  { %v1725_v35 = vpop.xlane.xlu1 %1724  ;;  %v5571_v29 = vpop.eup %4109 }
 0x43b   :  { %v1707_v20 = vpop.xlane.xlu0 %1706  ;;  %1817 = vadd.xlane.f32.xlu0 %v1816_v53  ;;  %v5575_v55 = vpop.eup %4111  ;;  %v1852_v47 = vsel %vm1296_vm2, %v5571_v29, 0.0 }
 0x43c   :  { %1850 = vadd.xlane.f32.xlu1 %v1849_v9  ;;  %6074 = vst [vmem:[#allocation35_spill] sm:$0xff] %v5575_v55  ;;  %v1861_v53 = vsel %vm1296_vm2, %v5575_v55, 0.0 }
 0x43e   :  { %v1719_v40 = vpop.xlane.xlu1 %1718  ;;  %v5579_v46 = vpop.eup %4113 }
 0x43f   :  { %v1716_v3 = vpop.xlane.xlu0 %1715  ;;  %1859 = vadd.xlane.f32.xlu0 %v1858_v27  ;;  %6075 = vst [vmem:[#allocation31_spill] sm:$0xff] %v5579_v46 }
 0x440   :  { %1868 = vadd.xlane.f32.xlu1 %v1867_v17  ;;  %4117 = vrcp.f32 %v1716_v3 }
 0x441   :  { %4119 = vrcp.f32 %v1707_v20  ;;  %v1870_v20 = vsel %vm1296_vm2, %v5579_v46, 0.0 }
 0x442   :  { %v1743_v24 = vpop.xlane.xlu1 %1742  ;;  %4121 = vrcp.f32 %v1713_v61  ;;  %v5585_v3 = vpop.eup %4115 }
 0x443   :  { %v1710_v41 = vpop.xlane.xlu0 %1709  ;;  %1853 = vadd.xlane.f32.xlu0 %v1852_v47  ;;  %6076 = vst [vmem:[#allocation40_spill] sm:$0xff] %v5585_v3  ;;  %v1864_v17 = vsel %vm1296_vm2, %v5585_v3, 0.0 }
 0x444   :  { %4123 = vrcp.f32 %v1710_v41  ;;  %1862 = vadd.xlane.f32.xlu1 %v1861_v53 }
 0x445   :  { %4125 = vrcp.f32 %v1740_v28 }
 0x446   :  { %4127 = vrcp.f32 %v1731_v33  ;;  %v1728_v9 = vpop.xlane.xlu1 %1727 }
 0x447   :  { %v1734_v27 = vpop.xlane.xlu0 %1733  ;;  %4129 = vrcp.f32 %v5535_v58  ;;  %1871 = vadd.xlane.f32.xlu0 %v1870_v20 }
 0x448   :  { %4131 = vrcp.f32 %v1734_v27 }
 0x449   :  { %4133 = vrcp.f32 %v1725_v35 }
 0x44a   :  { %v4118_v47 = vpop.eup %4117  ;;  %v1752_v33 = vpop.xlane.xlu1 %1751  ;;  %4135 = vrcp.f32 %v1728_v9 }
 0x44b   :  { %v1749_v61 = vpop.xlane.xlu0 %1748  ;;  %1865 = vadd.xlane.f32.xlu0 %v1864_v17  ;;  %v4120_v41 = vpop.eup %4119  ;;  %4137 = vrcp.f32 %v1719_v40  ;;  %v1948_v18 = vmul.f32 %v4118_v47, %v5316_v6 }
 0x44c   :  { %v4122_v28 = vpop.eup %4121  ;;  %4139 = vrcp.f32 %v1752_v33  ;;  %v1945_v58 = vmul.f32 %v4120_v41, %v5304_v11  ;;  %v6081_v33 = vld [vmem:[#allocation16_spill] sm:$0xff] }
 0x44d   :  { %v1947_v3 = vmul.f32 %v4122_v28, %v5290_v14  ;;  %v6077_v14 = vld [vmem:[#allocation4_spill] sm:$0xff] }
 0x44e   :  { %v4124_v53 = vpop.eup %4123  ;;  %v1764_v47 = vpop.xlane.xlu1 %1763 }
 0x44f   :  { %v1722_v48 = vpop.xlane.xlu0 %1721  ;;  %v4126_v55 = vpop.eup %4125  ;;  %v1946_v27 = vmul.f32 %v4124_v53, %v5328_v36  ;;  %v2006_v40 = vpack.c.bf16 %v1948_v18, %v1947_v3 }
 0x450   :  { %v4128_v20 = vpop.eup %4127  ;;  %4141 = vrcp.f32 %v1722_v48  ;;  %v1956_v9 = vmul.f32 %v4126_v55, %v5298_v52  ;;  %v6078_v55 = vld [vmem:[#allocation19_spill] sm:$0xff] }
 0x451   :  { %v4130_v17 = vpop.eup %4129  ;;  %4143 = vrcp.f32 %v1749_v61  ;;  %v2005_v35 = vpack.c.bf16 %v1946_v27, %v1945_v58  ;;  %v1953_v11 = vmul.f32 %v4128_v20, %v5284_v23  ;;  %v6080_v61 = vld [vmem:[#allocation8_spill] sm:$0xff] }
 0x452   :  { %v4132_v46 = vpop.eup %4131  ;;  %4145 = vrcp.f32 %v1743_v24  ;;  %v1955_v41 = vmul.f32 %v4130_v17, %v5269_v57 }
 0x453   :  { %v1746_v6 = vpop.xlane.xlu0 %1745  ;;  %3565 = vmatprep.mubr.msk.bf16.mxu0 %vm1296_vm2, %v2005_v35  ;;  %v1954_v36 = vmul.f32 %v4132_v46, %v5341_v49  ;;  %v4134_v48 = vpop.eup %4133 }
 0x454   :  { %4147 = vrcp.f32 %v1746_v6  ;;  %3566 = vmatmul.mubr.msk.bf16.vlgmr.msra.gmra.mrb[56].mxu0 %vm1296_vm2, %v2006_v40  ;;  %v2010_v18 = vpack.c.bf16 %v1956_v9, %v1955_v41  ;;  %v4136_v3 = vpop.eup %4135  ;;  %v1758_v49 = vpop.xlane.xlu1 %1757  ;;  %v1951_v35 = vmul.f32 %v4134_v48, %v5310_v63  ;;  %v6082_v6 = vld [vmem:[#allocation21_spill] sm:$0xff] }
 0x455   :  { %3590 = vmatpush3.bf16.msra.mxu0 %v6070_v37  ;;  %2662 = vrot.lane.b32.xlu1 %v6077_v14, %s4233_s23  ;;  %v2009_v52 = vpack.c.bf16 %v1954_v36, %v1953_v11  ;;  %v4138_v23 = vpop.eup %4137  ;;  %v6079_v37 = vld [vmem:[#allocation9_spill] sm:$0xff]  ;;  %v1952_v53 = vmul.f32 %v4136_v3, %v5347_v45  ;;  %v6083_v11 = vld [vmem:[#allocation18_spill] sm:$0xff] }
 0x456   :  { %3591 = vmatprep.subr.bf16.mxu0 %v6078_v55  ;;  %v4140_v57 = vpop.eup %4139  ;;  %v1949_v27 = vmul.f32 %v4138_v23, %v5322_v12 }
 0x457   :  { %v1761_v24 = vpop.xlane.xlu0 %1760  ;;  %3581 = vmatprep.mubr.msk.bf16.mxu1 %vm1296_vm2, %v2009_v52  ;;  %v2008_v36 = vpack.c.bf16 %v1952_v53, %v1951_v35 }
 0x458   :  { %3582 = vmatmul.mubr.msk.bf16.vlgmr.msra.gmra.mrb[32].mxu1 %vm1296_vm2, %v2010_v18  ;;  %4149 = vrcp.f32 %v1761_v24  ;;  %v1782_v63 = vpop.xlane.xlu1 %1781  ;;  %v6086_v18 = vld [vmem:[#allocation3_spill] sm:$0xff] }
 0x459   :  { %3592 = vmatpush3.bf16.msra.mxu0 %v6078_v55  ;;  %3606 = vmatpush3.bf16.msra.mxu1 %v6079_v37  ;;  %4151 = vrcp.f32 %v1758_v49 }
 0x45a   :  { %v4142_v46 = vpop.eup %4141  ;;  %3593 = vmatprep.subr.bf16.mxu0 %v6080_v61  ;;  %3607 = vmatprep.subr.bf16.mxu1 %v6081_v33  ;;  %4153 = vrcp.f32 %v1764_v47 }
 0x45b   :  { %v1785_v28 = vpop.xlane.xlu0 %1784  ;;  %v4144_v58 = vpop.eup %4143  ;;  %v1950_v20 = vmul.f32 %v4142_v46, %v5361_v5  ;;  %v1960_v5 = vmul.f32 %v4140_v57, %v5357_v1  ;;  %v6085_v1 = vld [vmem:[#allocation14_spill] sm:$0xff] }
 0x45c   :  { %v4146_v17 = vpop.eup %4145  ;;  %v1959_v12 = vmul.f32 %v4144_v58, %v5351_v43  ;;  %v6084_v43 = vld [vmem:[#allocation20_spill] sm:$0xff] }
 0x45d   :  { %3594 = vmatpush3.bf16.msra.mxu0 %v6080_v61  ;;  %3608 = vmatpush3.bf16.msra.mxu1 %v6081_v33  ;;  %v2007_v9 = vpack.c.bf16 %v1950_v20, %v1949_v27  ;;  %v1957_v41 = vmul.f32 %v4146_v17, %v5336_v38  ;;  %v1776_v38 = vpop.xlane.xlu1 %1775 }
 0x45e   :  { %v4148_v40 = vpop.eup %4147  ;;  %3595 = vmatprep.subr.bf16.mxu0 %v6082_v6  ;;  %3609 = vmatprep.subr.bf16.mxu1 %v6083_v11  ;;  %v2012_v48 = vpack.c.bf16 %v1960_v5, %v1959_v12  ;;  %v6091_v12 = vld [vmem:[#allocation25_spill] sm:$0xff] }
 0x45f   :  { %v1755_v45 = vpop.xlane.xlu0 %1754  ;;  %3569 = vmatprep.mubr.msk.bf16.mxu0 %vm1296_vm2, %v2007_v9  ;;  %v1958_v14 = vmul.f32 %v4148_v40, %v5371_v50  ;;  %v6087_v50 = vld [vmem:[#allocation22_spill] sm:$0xff] }
 0x460   :  { %4155 = vrcp.f32 %v1755_v45  ;;  %3570 = vmatmul.mubr.msk.bf16.gmra.mrb[60].mxu0 %vm1296_vm2, %v2008_v36 }
 0x461   :  { %3596 = vmatpush3.bf16.msra.mxu0 %v6082_v6  ;;  %3610 = vmatpush3.bf16.msra.mxu1 %v6083_v11  ;;  %v2011_v52 = vpack.c.bf16 %v1958_v14, %v1957_v41  ;;  %4157 = vrcp.f32 %v1782_v63  ;;  %v1770_v53 = vpop.xlane.xlu1 %1769  ;;  %v6088_v11 = vld [vmem:[#allocation23_spill] sm:$0xff]  ;;  %v6092_v14 = vld [vmem:[#allocation29_spill] sm:$0xff] }
 0x462   :  { %3611 = vmatprep.subr.bf16.mxu1 %v6084_v43  ;;  %3621 = vmatprep.subr.bf16.mxu0 %v6085_v1  ;;  %v4150_v24 = vpop.eup %4149 }
 0x463   :  { %v1779_v47 = vpop.xlane.xlu0 %1778  ;;  %2573 = vrot.lane.b32.xlu0 %v6086_v18, %s4233_s23  ;;  %3585 = vmatprep.mubr.msk.bf16.mxu1 %vm1296_vm2, %v2011_v52  ;;  %v4152_v3 = vpop.eup %4151  ;;  %v1963_v49 = vmul.f32 %v4150_v24, %v5381_v7 }
 0x464   :  { %4159 = vrcp.f32 %v1779_v47  ;;  %3586 = vmatmul.mubr.msk.bf16.gmra.mrb[36].mxu1 %vm1296_vm2, %v2012_v48  ;;  %v4154_v23 = vpop.eup %4153  ;;  %v1962_v61 = vmul.f32 %v4152_v3, %v5377_v51  ;;  %v6094_v48 = vld [vmem:[#allocation10_spill] sm:$0xff] }
 0x465   :  { %4161 = vrcp.f32 %v1785_v28  ;;  %3612 = vmatpush3.bf16.msra.mxu1 %v6084_v43  ;;  %v1964_v28 = vmul.f32 %v4154_v23, %v5367_v15  ;;  %v1794_v40 = vpop.xlane.xlu1 %1793 }
 0x466   :  { %3637 = vmatprep.subr.bf16.mxu1 %v6087_v50 }
 0x467   :  { %v1788_v55 = vpop.xlane.xlu0 %1787  ;;  %v2014_v20 = vpack.c.bf16 %v1964_v28, %v1963_v49 }
 0x468   :  { %4163 = vrcp.f32 %v1788_v55 }
 0x46a   :  { %v4156_v57 = vpop.eup %4155 }
 0x46b   :  { %v1773_v37 = vpop.xlane.xlu0 %1772  ;;  %v1961_v46 = vmul.f32 %v4156_v57, %v5399_v42  ;;  %v4158_v33 = vpop.eup %4157  ;;  %v6096_v57 = vld [vmem:[#allocation11_spill] sm:$0xff] }
 0x46c   :  { %v1970_v7 = vmul.f32 %v4158_v33, %v5387_v39  ;;  %4165 = vrcp.f32 %v1773_v37  ;;  %v6097_v37 = vld [vmem:[#allocation12_spill] sm:$0xff]  ;;  %v6098_v33 = vld [vmem:[#allocation13_spill] sm:$0xff] }
 0x46d   :  { %v2013_v58 = vpack.c.bf16 %v1962_v61, %v1961_v46  ;;  %4167 = vrcp.f32 %v1770_v53  ;;  %v6099_v53 = vld [vmem:[#allocation49_spill] sm:$0xff] }
 0x46e   :  { %v4160_v27 = vpop.eup %4159  ;;  %4169 = vrcp.f32 %v1776_v38 }
 0x46f   :  { %v1797_v17 = vpop.xlane.xlu0 %1796  ;;  %v4162_v35 = vpop.eup %4161  ;;  %3597 = vmatprep.mubr.msk.bf16.mxu0 %vm1296_vm2, %v2013_v58  ;;  %v1969_v9 = vmul.f32 %v4160_v27, %v5408_v30  ;;  %v6089_v30 = vld [vmem:[#allocation28_spill] sm:$0xff] }
 0x470   :  { %3598 = vmatmul.mubr.msk.bf16.vlgmr.msra.gmra.mrb[64].mxu0 %vm1296_vm2, %v2014_v20  ;;  %v1971_v51 = vmul.f32 %v4162_v35, %v5390_v31  ;;  %v6090_v31 = vld [vmem:[#allocation27_spill] sm:$0xff] }
 0x471   :  { %3622 = vmatpush3.bf16.msra.mxu0 %v6085_v1  ;;  %v2017_v15 = vpack.c.bf16 %v1970_v7, %v1969_v9  ;;  %v6093_v1 = vld [vmem:[#allocation24_spill] sm:$0xff] }
 0x472   :  { %v4164_v42 = vpop.eup %4163  ;;  %3623 = vmatprep.subr.bf16.mxu0 %v6088_v11 }
 0x473   :  { %v1972_v6 = vmul.f32 %v4164_v42, %v5421_v10  ;;  %v1767_v45 = vpop.xlane.xlu0 %1766  ;;  %3613 = vmatprep.mubr.msk.bf16.mxu1 %vm1296_vm2, %v2017_v15 }
 0x474   :  { %4171 = vrcp.f32 %v1767_v45 }
 0x475   :  { %v2018_v39 = vpack.c.bf16 %v1972_v6, %v1971_v51  ;;  %4173 = vrcp.f32 %v1794_v40  ;;  %3624 = vmatpush3.bf16.msra.mxu0 %v6088_v11 }
 0x476   :  { %3625 = vmatprep.subr.bf16.mxu0 %v6089_v30  ;;  %v4166_v10 = vpop.eup %4165 }
 0x477   :  { %3614 = vmatmul.mubr.msk.bf16.vlgmr.msra.gmra.mrb[40].mxu1 %vm1296_vm2, %v2018_v39  ;;  %v1791_v36 = vpop.xlane.xlu0 %1790  ;;  %v4168_v63 = vpop.eup %4167  ;;  %v1967_v43 = vmul.f32 %v4166_v10, %v5427_v26 }
 0x478   :  { %3638 = vmatpush3.bf16.msra.mxu1 %v6087_v50  ;;  %4175 = vrcp.f32 %v1791_v36  ;;  %v4170_v41 = vpop.eup %4169  ;;  %v1966_v18 = vmul.f32 %v4168_v63, %v6094_v48  ;;  %v6095_v50 = vld [vmem:[#allocation48_spill] sm:$0xff]  ;;  %v6100_v48 = vld [vmem:[#allocation38_spill] sm:$0xff] }
 0x479   :  { %3639 = vmatprep.subr.bf16.mxu1 %v6090_v31  ;;  %4177 = vrcp.f32 %v1797_v17  ;;  %3626 = vmatpush3.bf16.msra.mxu0 %v6089_v30  ;;  %v1968_v55 = vmul.f32 %v4170_v41, %v6095_v50 }
 0x47a   :  { %3627 = vmatprep.subr.bf16.mxu0 %v6091_v12 }
 0x47b   :  { %v1800_v5 = vpop.xlane.xlu0 %1799  ;;  %v2016_v23 = vpack.c.bf16 %v1968_v55, %v1967_v43 }
 0x47c   :  { %3640 = vmatpush3.bf16.msra.mxu1 %v6090_v31  ;;  %4179 = vrcp.f32 %v1800_v5 }
 0x47d   :  { %3641 = vmatprep.subr.bf16.mxu1 %v6092_v14  ;;  %3628 = vmatpush3.bf16.msra.mxu0 %v6091_v12 }
 0x47e   :  { %v4172_v52 = vpop.eup %4171  ;;  %3653 = vmatprep.subr.bf16.mxu0 %v6093_v1 }
 0x47f   :  { %v1965_v47 = vmul.f32 %v4172_v52, %v5435_v32  ;;  %v4174_v38 = vpop.eup %4173 }
 0x480   :  { %3642 = vmatpush3.bf16.msra.mxu1 %v6092_v14  ;;  %v1974_v26 = vmul.f32 %v4174_v38, %v6097_v37 }
 0x481   :  { %v2015_v24 = vpack.c.bf16 %v1966_v18, %v1965_v47 }
 0x482   :  { %v4176_v3 = vpop.eup %4175 }
 0x483   :  { %3601 = vmatprep.mubr.msk.bf16.mxu0 %vm1296_vm2, %v2015_v24  ;;  %v1973_v49 = vmul.f32 %v4176_v3, %v6096_v57  ;;  %v4178_v46 = vpop.eup %4177  ;;  %v6102_v24 = vld [vmem:[#allocation30_spill] sm:$0xff] }
 0x484   :  { %3602 = vmatmul.mubr.msk.bf16.gmra.mrb[68].mxu0 %vm1296_vm2, %v2016_v23  ;;  %v1975_v28 = vmul.f32 %v4178_v46, %v6098_v33 }
 0x485   :  { %v2019_v32 = vpack.c.bf16 %v1974_v26, %v1973_v49 }
 0x486   :  { %v4180_v61 = vpop.eup %4179 }
 0x487   :  { %3617 = vmatprep.mubr.msk.bf16.mxu1 %vm1296_vm2, %v2019_v32  ;;  %v1976_v58 = vmul.f32 %v4180_v61, %v6099_v53 }
 0x489   :  { %v2020_v27 = vpack.c.bf16 %v1976_v58, %v1975_v28 }
 0x48b   :  { %3618 = vmatmul.mubr.msk.bf16.gmra.mrb[44].mxu1 %vm1296_vm2, %v2020_v27 }
 0x49c   :  { %v1809_v35 = vpop.xlane.xlu1 %1808 }
 0x4a0   :  { %v1833_v20 = vpop.xlane.xlu0 %1832 }
 0x4a4   :  { %v1803_v7 = vpop.xlane.xlu1 %1802 }
 0x4a8   :  { %v1827_v17 = vpop.xlane.xlu0 %1826 }
 0x4a9   :  { %4181 = vrcp.f32 %v1827_v17 }
 0x4ac   :  { %v1812_v9 = vpop.xlane.xlu0 %1811 }
 0x4ad   :  { %4183 = vrcp.f32 %v1812_v9 }
 0x4b0   :  { %v1836_v42 = vpop.xlane.xlu0 %1835 }
 0x4b1   :  { %v1830_v15 = vpop.xlane.xlu1 %1829 }
 0x4b2   :  { %4185 = vrcp.f32 %v1830_v15 }
 0x4b3   :  { %4187 = vrcp.f32 %v1803_v7  ;;  %v4182_v11 = vpop.eup %4181 }
 0x4b4   :  { %4189 = vrcp.f32 %v1809_v35  ;;  %v1806_v51 = vpop.xlane.xlu0 %1805  ;;  %v1985_v10 = vmul.f32 %v4182_v11, %v5488_v4 }
 0x4b5   :  { %4191 = vrcp.f32 %v1806_v51  ;;  %v1821_v40 = vpop.xlane.xlu1 %1820 }
 0x4b7   :  { %v4184_v45 = vpop.eup %4183 }
 0x4b8   :  { %v1845_v6 = vpop.xlane.xlu0 %1844  ;;  %v1980_v41 = vmul.f32 %v4184_v45, %v5494_v60 }
 0x4b9   :  { %v1815_v31 = vpop.xlane.xlu1 %1814 }
 0x4bc   :  { %v4186_v39 = vpop.eup %4185  ;;  %v1839_v30 = vpop.xlane.xlu0 %1838 }
 0x4bd   :  { %v4188_v36 = vpop.eup %4187  ;;  %v1986_v12 = vmul.f32 %v4186_v39, %v5503_v2 }
 0x4be   :  { %v4190_v5 = vpop.eup %4189  ;;  %v1977_v43 = vmul.f32 %v4188_v36, %v5480_v13  ;;  %v6101_v13 = vld [vmem:[#allocation26_spill] sm:$0xff] }
 0x4bf   :  { %v4192_v63 = vpop.eup %4191  ;;  %v2025_v14 = vpack.c.bf16 %v1986_v12, %v1985_v10  ;;  %v1979_v18 = vmul.f32 %v4190_v5, %v6100_v48 }
 0x4c0   :  { %v1824_v52 = vpop.xlane.xlu0 %1823  ;;  %v1978_v47 = vmul.f32 %v4192_v63, %v5508_v62 }
 0x4c1   :  { %v1842_v38 = vpop.xlane.xlu1 %1841  ;;  %3645 = vmatprep.mubr.msk.bf16.mxu1 %vm1296_vm2, %v2025_v14  ;;  %v2022_v55 = vpack.c.bf16 %v1980_v41, %v1979_v18  ;;  %4193 = vrcp.f32 %v1824_v52  ;;  %v6103_v52 = vld [vmem:[#allocation31_spill] sm:$0xff]  ;;  %v6105_v18 = vld [vmem:[#allocation40_spill] sm:$0xff] }
 0x4c2   :  { %v2021_v50 = vpack.c.bf16 %v1978_v47, %v1977_v43  ;;  %4195 = vrcp.f32 %v1815_v31  ;;  %v6104_v47 = vld [vmem:[#allocation35_spill] sm:$0xff] }
 0x4c3   :  { %4197 = vrcp.f32 %v1821_v40 }
 0x4c4   :  { %3629 = vmatprep.mubr.msk.bf16.mxu0 %vm1296_vm2, %v2021_v50  ;;  %v1848_v4 = vpop.xlane.xlu0 %1847  ;;  %v6106_v50 = vld [vmem:[#allocation34_spill] sm:$0xff] }
 0x4c5   :  { %v1857_v2 = vpop.xlane.xlu1 %1856  ;;  %3630 = vmatmul.mubr.msk.bf16.vlgmr.msra.gmra.mrb[72].mxu0 %vm1296_vm2, %v2022_v55 }
 0x4c6   :  { %3654 = vmatpush3.bf16.msra.mxu0 %v6093_v1 }
 0x4c7   :  { %3655 = vmatprep.subr.bf16.mxu0 %v6101_v13 }
 0x4c8   :  { %v1818_v60 = vpop.xlane.xlu0 %1817 }
 0x4c9   :  { %v1851_v62 = vpop.xlane.xlu1 %1850  ;;  %4199 = vrcp.f32 %v1818_v60 }
 0x4ca   :  { %4201 = vrcp.f32 %v1833_v20  ;;  %3656 = vmatpush3.bf16.msra.mxu0 %v6101_v13 }
 0x4cb   :  { %4203 = vrcp.f32 %v1836_v42  ;;  %3657 = vmatprep.subr.bf16.mxu0 %v6102_v24  ;;  %v4194_v1 = vpop.eup %4193 }
 0x4cc   :  { %4205 = vrcp.f32 %v1839_v30  ;;  %v1860_v3 = vpop.xlane.xlu0 %1859  ;;  %v4196_v49 = vpop.eup %4195  ;;  %v1984_v32 = vmul.f32 %v4194_v1, %v5539_v56 }
 0x4cd   :  { %4207 = vrcp.f32 %v1842_v38  ;;  %v1869_v23 = vpop.xlane.xlu1 %1868  ;;  %v4198_v26 = vpop.eup %4197  ;;  %v1981_v28 = vmul.f32 %v4196_v49, %v5523_v54 }
 0x4ce   :  { %4209 = vrcp.f32 %v1860_v3  ;;  %3658 = vmatpush3.bf16.msra.mxu0 %v6102_v24  ;;  %v1983_v20 = vmul.f32 %v4198_v26, %v5513_v22 }
 0x4cf   :  { %4211 = vrcp.f32 %v1851_v62 }
 0x4d0   :  { %4213 = vrcp.f32 %v1857_v2  ;;  %v1854_v57 = vpop.xlane.xlu0 %1853  ;;  %v2024_v56 = vpack.c.bf16 %v1984_v32, %v1983_v20 }
 0x4d1   :  { %v1863_v37 = vpop.xlane.xlu1 %1862  ;;  %4215 = vrcp.f32 %v1854_v57 }
 0x4d2   :  { %4217 = vrcp.f32 %v1845_v6 }
 0x4d3   :  { %v4200_v46 = vpop.eup %4199  ;;  %4219 = vrcp.f32 %v1848_v4  ;;  %v6107_v4 = vld [vmem:[#allocation32_spill] sm:$0xff] }
 0x4d4   :  { %v4202_v61 = vpop.eup %4201  ;;  %v1872_v33 = vpop.xlane.xlu0 %1871  ;;  %v1982_v53 = vmul.f32 %v4200_v46, %v5555_v44 }
 0x4d5   :  { %v4204_v58 = vpop.eup %4203  ;;  %v2663_v27 = vpop.permute.xlu1 %2662  ;;  %4221 = vrcp.f32 %v1872_v33  ;;  %v1987_v39 = vmul.f32 %v4202_v61, %v5469_v59 }
 0x4d6   :  { %v4206_v17 = vpop.eup %4205  ;;  %3659 = vmatprep.subr.bf16.mxu0 %v2663_v27  ;;  %v2023_v35 = vpack.c.bf16 %v1982_v53, %v1981_v28  ;;  %4223 = vrcp.f32 %v1863_v37  ;;  %v1988_v22 = vmul.f32 %v4204_v58, %v5500_v8 }
 0x4d7   :  { %v4208_v9 = vpop.eup %4207  ;;  %3660 = vmatpush3.bf16.msra.mxu0 %v2663_v27  ;;  %4225 = vrcp.f32 %v1869_v23  ;;  %v1989_v10 = vmul.f32 %v4206_v17, %v5529_v25 }
 0x4d8   :  { %v4210_v7 = vpop.eup %4209  ;;  %3633 = vmatprep.mubr.msk.bf16.mxu0 %vm1296_vm2, %v2023_v35  ;;  %v1866_v54 = vpop.xlane.xlu0 %1865  ;;  %v1990_v45 = vmul.f32 %v4208_v9, %v5542_v34  ;;  %v2026_v12 = vpack.c.bf16 %v1988_v22, %v1987_v39 }
 0x4d9   :  { %v4212_v42 = vpop.eup %4211  ;;  %4227 = vrcp.f32 %v1866_v54  ;;  %3634 = vmatmul.mubr.msk.bf16.gmra.mrb[76].mxu0 %vm1296_vm2, %v2024_v56  ;;  %v1996_v51 = vmul.f32 %v4210_v7, %v5563_v16 }
 0x4da   :  { %v4214_v44 = vpop.eup %4213  ;;  %v1993_v6 = vmul.f32 %v4212_v42, %v5559_v21  ;;  %v2027_v34 = vpack.c.bf16 %v1990_v45, %v1989_v10 }
 0x4db   :  { %v4216_v15 = vpop.eup %4215  ;;  %v1995_v30 = vmul.f32 %v4214_v44, %v5550_v0  ;;  %v3971_v44 = vld [vmem:[%s5934_s5] sm:$0xff]  }
 0x4dc   :  { %v2574_v40 = vpop.permute.xlu0 %2573  ;;  %v1994_v11 = vmul.f32 %v4216_v15, %v5571_v29  ;;  %v4218_v36 = vpop.eup %4217 }
 0x4dd   :  { %3643 = vmatprep.subr.bf16.mxu1 %v2574_v40  ;;  %v4220_v8 = vpop.eup %4219  ;;  %v2030_v16 = vpack.c.bf16 %v1996_v51, %v1995_v30  ;;  %v1991_v55 = vmul.f32 %v4218_v36, %v6106_v50 }
 0x4de   :  { %3644 = vmatpush3.bf16.msra.mxu1 %v2574_v40  ;;  %v2029_v31 = vpack.c.bf16 %v1994_v11, %v1993_v6  ;;  %v5699_v5 = vpop.f32.mrb[48].mxu0  ;;  %v1992_v14 = vmul.f32 %v4220_v8, %v5546_v19  ;;  %v3972_v40 = vld [vmem:[%s5934_s5 + $0x8] sm:$0xff]  }
 0x4df   :  { %v4222_v21 = vpop.eup %4221  ;;  %v5701_v63 = vpop.f32.mrb[49].mxu0  ;;  %3669 = vmatprep.subr.bf16.mxu1 %v3971_v44 }
 0x4e0   :  { %3661 = vmatprep.mubr.msk.bf16.mxu0 %vm1296_vm2, %v2029_v31  ;;  %v4224_v59 = vpop.eup %4223  ;;  %v5704_v29 = vpop.f32.mrb[50].mxu0  ;;  %v2000_v43 = vmul.f32 %v4222_v21, %v6103_v52  ;;  %v2028_v62 = vpack.c.bf16 %v1992_v14, %v1991_v55 }
 0x4e1   :  { %3646 = vmatmul.mubr.msk.bf16.vlgmr.msra.gmra.mrb[48].mxu1 %vm1296_vm2, %v2026_v12  ;;  %3662 = vmatmul.mubr.msk.bf16.vlgmr.msra.gmra.mrb[80].mxu0 %vm1296_vm2, %v2030_v16  ;;  %v4226_v0 = vpop.eup %4225  ;;  %v5708_v25 = vpop.f32.mrb[51].mxu0  ;;  %v1997_v48 = vmul.f32 %v4224_v59, %v6104_v47 }
 0x4e2   :  { %3649 = vmatprep.mubr.msk.bf16.mxu1 %vm1296_vm2, %v2027_v34  ;;  %v1999_v2 = vmul.f32 %v4226_v0, %v6107_v4  ;;  %3670 = vmatpush3.bf16.msra.mxu1 %v3971_v44 }
 0x4e3   :  { %v4228_v41 = vpop.eup %4227  ;;  %3671 = vmatprep.subr.bf16.mxu1 %v3972_v40 }
 0x4e4   :  { %v1998_v38 = vmul.f32 %v4228_v41, %v6105_v18  ;;  %v2032_v24 = vpack.c.bf16 %v2000_v43, %v1999_v2 }
 0x4e6   :  { %v2031_v13 = vpack.c.bf16 %v1998_v38, %v1997_v48  ;;  %3672 = vmatpush3.bf16.msra.mxu1 %v3972_v40 }
 0x4e7   :  { %v5717_v60 = vpop.f32.mrb[52].mxu0 }
 0x4e8   :  { %v5719_v3 = vpop.f32.mrb[53].mxu0  ;;  %3665 = vmatprep.mubr.msk.bf16.mxu0 %vm1296_vm2, %v2031_v13 }
 0x4e9   :  { %v5722_v19 = vpop.f32.mrb[54].mxu0  ;;  %3650 = vmatmul.mubr.msk.bf16.gmra.mrb[52].mxu1 %vm1296_vm2, %v2028_v62  ;;  %3666 = vmatmul.mubr.msk.bf16.gmra.mrb[84].mxu0 %vm1296_vm2, %v2032_v24 }
 0x4ea   :  { %v5726_v23 = vpop.f32.mrb[55].mxu0 }
 0x527   :  { %v3567_v1 = vpop.f32.mrb[56].mxu0 }
 0x528   :  { %v2180_v57 = vpop.f32.mrb[57].mxu0 }
 0x529   :  { %v3568_v49 = vpop.f32.mrb[58].mxu0 }
 0x52a   :  { %v3849_v37 = vpack.i.bf16 %v3568_v49, %v3567_v1  ;;  %v2183_v26 = vpop.f32.mrb[59].mxu0 }
 0x52b   :  { %v3859_v46 = vpack.i.bf16 %v2183_v26, %v2180_v57  ;;  %v3583_v32 = vpop.f32.mrb[32].mxu1 }
 0x52c   :  { %3850 = vrot.lane.b32.xlu1 %v3849_v37, %s4234_s0  ;;  %v2269_v61 = vpop.f32.mrb[33].mxu1 }
 0x52d   :  { %3860 = vrot.lane.b32.xlu0 %v3859_v46, %s4234_s0  ;;  %v3584_v33 = vpop.f32.mrb[34].mxu1 }
 0x52e   :  { %v3854_v28 = vpack.i.bf16 %v3584_v33, %v3583_v32  ;;  %v2272_v53 = vpop.f32.mrb[35].mxu1 }
 0x52f   :  { %v3864_v58 = vpack.i.bf16 %v2272_v53, %v2269_v61 }
 0x530   :  { %3855 = vrot.lane.b32.xlu1 %v3854_v28, %s4235_s26 }
 0x531   :  { %3865 = vrot.lane.b32.xlu0 %v3864_v58, %s4235_s26 }
 0x533   :  { %v3571_v27 = vpop.f32.mrb[60].mxu0 }
 0x534   :  { %v2196_v20 = vpop.f32.mrb[61].mxu0 }
 0x535   :  { %v3572_v17 = vpop.f32.mrb[62].mxu0 }
 0x536   :  { %v3869_v35 = vpack.i.bf16 %v3572_v17, %v3571_v27  ;;  %v2199_v9 = vpop.f32.mrb[63].mxu0 }
 0x537   :  { %v3879_v56 = vpack.i.bf16 %v2199_v9, %v2196_v20  ;;  %v3587_v7 = vpop.f32.mrb[36].mxu1 }
 0x538   :  { %3870 = vrot.lane.b32.xlu1 %v3869_v35, %s4234_s0  ;;  %v2285_v54 = vpop.f32.mrb[37].mxu1 }
 0x539   :  { %3880 = vrot.lane.b32.xlu0 %v3879_v56, %s4234_s0  ;;  %v3588_v42 = vpop.f32.mrb[38].mxu1 }
 0x53a   :  { %v3874_v15 = vpack.i.bf16 %v3588_v42, %v3587_v7  ;;  %v2288_v22 = vpop.f32.mrb[39].mxu1 }
 0x53b   :  { %v3884_v51 = vpack.i.bf16 %v2288_v22, %v2285_v54 }
 0x53c   :  { %3875 = vrot.lane.b32.xlu1 %v3874_v15, %s4235_s26 }
 0x53d   :  { %3885 = vrot.lane.b32.xlu0 %v3884_v51, %s4235_s26 }
 0x543   :  { %v3599_v6 = vpop.f32.mrb[64].mxu0 }
 0x544   :  { %v2358_v11 = vpop.f32.mrb[65].mxu0 }
 0x545   :  { %v3600_v45 = vpop.f32.mrb[66].mxu0 }
 0x546   :  { %v3889_v39 = vpack.i.bf16 %v3600_v45, %v3599_v6  ;;  %v2361_v30 = vpop.f32.mrb[67].mxu0 }
 0x547   :  { %v3894_v36 = vpack.i.bf16 %v2361_v30, %v2358_v11 }
 0x548   :  { %3890 = vrot.lane.b32.xlu1 %v3889_v39, %s4236_s8 }
 0x549   :  { %3895 = vrot.lane.b32.xlu0 %v3894_v36, %s4236_s8 }
 0x54a   :  { %v5744_v31 = vpop.f32.mrb[40].mxu1 }
 0x54b   :  { %v5746_v10 = vpop.f32.mrb[41].mxu1 }
 0x54c   :  { %v5748_v8 = vpop.f32.mrb[42].mxu1 }
 0x54d   :  { %v5750_v12 = vpop.f32.mrb[43].mxu1 }
 0x557   :  { %v3603_v16 = vpop.f32.mrb[68].mxu0 }
 0x558   :  { %v2374_v21 = vpop.f32.mrb[69].mxu0 }
 0x559   :  { %v3604_v34 = vpop.f32.mrb[70].mxu0 }
 0x55a   :  { %v3899_v59 = vpack.i.bf16 %v3604_v34, %v3603_v16  ;;  %v2377_v0 = vpop.f32.mrb[71].mxu0 }
 0x55b   :  { %v3904_v41 = vpack.i.bf16 %v2377_v0, %v2374_v21 }
 0x55c   :  { %3900 = vrot.lane.b32.xlu1 %v3899_v59, %s4236_s8 }
 0x55d   :  { %3905 = vrot.lane.b32.xlu0 %v3904_v41, %s4236_s8 }
 0x55e   :  { %v5754_v14 = vpop.f32.mrb[44].mxu1 }
 0x55f   :  { %v5756_v52 = vpop.f32.mrb[45].mxu1 }
 0x560   :  { %v5758_v43 = vpop.f32.mrb[46].mxu1 }
 0x561   :  { %v5760_v47 = vpop.f32.mrb[47].mxu1 }
 0x598   :  { %v3631_v48 = vpop.f32.mrb[72].mxu0 }
 0x599   :  { %v2536_v18 = vpop.f32.mrb[73].mxu0 }
 0x59a   :  { %v3632_v38 = vpop.f32.mrb[74].mxu0 }
 0x59b   :  { %v3909_v50 = vpack.i.bf16 %v3632_v38, %v3631_v48  ;;  %v2539_v55 = vpop.f32.mrb[75].mxu0 }
 0x59c   :  { %v3919_v4 = vpack.i.bf16 %v2539_v55, %v2536_v18 }
 0x59d   :  { %3910 = vrot.lane.b32.xlu1 %v3909_v50, %s4234_s0 }
 0x59e   :  { %3920 = vrot.lane.b32.xlu0 %v3919_v4, %s4234_s0  ;;  %v3851_v2 = vpop.permute.xlu1 %3850 }
 0x59f   :  { %v3861_v13 = vpop.permute.xlu0 %3860  ;;  %v3853_v17 = vunpack.i.h.bf16 %v3851_v2  ;;  %v3852_v35 = vunpack.i.l.bf16 %v3851_v2 }
 0x5a0   :  { %v3863_v7 = vunpack.i.h.bf16 %v3861_v13  ;;  %v3862_v54 = vunpack.i.l.bf16 %v3861_v13 }
 0x5a1   :  { %v2940_v30 = vsel %vm434_vm1, %v5704_v29, %v3853_v17  ;;  %v2939_v36 = vsel %vm434_vm1, %v5699_v5, %v3852_v35 }
 0x5a2   :  { %v3856_v62 = vpop.permute.xlu1 %3855  ;;  %v2938_v21 = vsel %vm434_vm1, %v5708_v25, %v3863_v7  ;;  %v2937_v34 = vsel %vm434_vm1, %v5701_v63, %v3862_v54 }
 0x5a3   :  { %v3866_v24 = vpop.permute.xlu0 %3865  ;;  %v3858_v51 = vunpack.i.h.bf16 %v3856_v62  ;;  %v3857_v40 = vunpack.i.l.bf16 %v3856_v62 }
 0x5a4   :  { %v3868_v45 = vunpack.i.h.bf16 %v3866_v24  ;;  %v3867_v39 = vunpack.i.l.bf16 %v3866_v24 }
 0x5a5   :  { %v2957_v48 = vsel %vm2953_vm3, %v2940_v30, %v3858_v51  ;;  %v2956_v29 = vsel %vm2953_vm3, %v2939_v36, %v3857_v40 }
 0x5a6   :  { %v2954_v55 = vsel %vm2953_vm3, %v2937_v34, %v3867_v39  ;;  %v2955_v4 = vsel %vm2953_vm3, %v2938_v21, %v3868_v45 }
 0x5aa   :  { %v5764_v1 = vpop.permute.xlu1 %3870 }
 0x5ab   :  { %v5766_v49 = vpop.permute.xlu0 %3880 }
 0x5ac   :  { %v3635_v57 = vpop.f32.mrb[76].mxu0 }
 0x5ad   :  { %v2552_v37 = vpop.f32.mrb[77].mxu0 }
 0x5ae   :  { %v3636_v26 = vpop.f32.mrb[78].mxu0  ;;  %v5768_v33 = vpop.permute.xlu1 %3875 }
 0x5af   :  { %v3929_v46 = vpack.i.bf16 %v3636_v26, %v3635_v57  ;;  %v2555_v32 = vpop.f32.mrb[79].mxu0  ;;  %v5770_v28 = vpop.permute.xlu0 %3885  ;;  %v3878_v7 = vunpack.i.h.bf16 %v5768_v33  ;;  %v3877_v54 = vunpack.i.l.bf16 %v5768_v33 }
 0x5b0   :  { %v3934_v61 = vpack.i.bf16 %v2555_v32, %v2552_v37 }
 0x5b4   :  { %v3647_v53 = vpop.f32.mrb[48].mxu1  ;;  %v3663_v58 = vpop.f32.mrb[80].mxu0 }
 0x5b5   :  { %v2625_v27 = vpop.f32.mrb[49].mxu1  ;;  %v2714_v20 = vpop.f32.mrb[81].mxu0 }
 0x5b6   :  { %v3648_v9 = vpop.f32.mrb[50].mxu1  ;;  %v3664_v56 = vpop.f32.mrb[82].mxu0 }
 0x5b7   :  { %v3914_v42 = vpack.i.bf16 %v3648_v9, %v3647_v53  ;;  %v3939_v44 = vpack.i.bf16 %v3664_v56, %v3663_v58  ;;  %v2628_v15 = vpop.f32.mrb[51].mxu1  ;;  %v2717_v22 = vpop.f32.mrb[83].mxu0  ;;  %v3883_v9 = vunpack.i.h.bf16 %v5766_v49  ;;  %v3882_v56 = vunpack.i.l.bf16 %v5766_v49 }
 0x5b8   :  { %v3924_v6 = vpack.i.bf16 %v2628_v15, %v2625_v27  ;;  %v3944_v11 = vpack.i.bf16 %v2717_v22, %v2714_v20 }
 0x5b9   :  { %3915 = vrot.lane.b32.xlu1 %v3914_v42, %s4235_s26  ;;  %v3888_v42 = vunpack.i.h.bf16 %v5770_v28  ;;  %v2942_v49 = vsel %vm434_vm1, %v5726_v23, %v3883_v9  ;;  %v2941_v51 = vsel %vm434_vm1, %v5719_v3, %v3882_v56 }
 0x5ba   :  { %v3891_v16 = vpop.permute.xlu1 %3890  ;;  %3925 = vrot.lane.b32.xlu0 %v3924_v6, %s4235_s26 }
 0x5bb   :  { %v3893_v59 = vunpack.i.h.bf16 %v3891_v16  ;;  %v3892_v0 = vunpack.i.l.bf16 %v3891_v16  ;;  %v3896_v41 = vpop.permute.xlu0 %3895 }
 0x5bc   :  { %v3898_v18 = vunpack.i.h.bf16 %v3896_v41  ;;  %v3897_v38 = vunpack.i.l.bf16 %v3896_v41  ;;  %v3651_v5 = vpop.f32.mrb[52].mxu1  ;;  %v3667_v50 = vpop.f32.mrb[84].mxu0 }
 0x5bd   :  { %v2974_v25 = vsel %vm2970_vm4, %v2957_v48, %v3893_v59  ;;  %v2973_v2 = vsel %vm2970_vm4, %v2956_v29, %v3892_v0  ;;  %v2730_v63 = vpop.f32.mrb[85].mxu0  ;;  %3930 = vrot.lane.b32.xlu1 %v3929_v46, %s4234_s0  ;;  %v2641_v13 = vpop.f32.mrb[53].mxu1  ;;  %v3873_v46 = vunpack.i.h.bf16 %v5764_v1 }
 0x5be   :  { %v2988_v62 = vpack.c.bf16 %v2974_v25, %v2973_v2  ;;  %v2971_v24 = vsel %vm2970_vm4, %v2954_v55, %v3897_v38  ;;  %v2972_v57 = vsel %vm2970_vm4, %v2955_v4, %v3898_v18  ;;  %v3668_v37 = vpop.f32.mrb[86].mxu0  ;;  %3935 = vrot.lane.b32.xlu0 %v3934_v61, %s4234_s0  ;;  %v3652_v26 = vpop.f32.mrb[54].mxu1  ;;  %v3872_v61 = vunpack.i.l.bf16 %v5764_v1 }
 0x5bf   :  { %v2987_v32 = vpack.c.bf16 %v2972_v57, %v2971_v24  ;;  %v3964_v53 = vpack.i.bf16 %v3668_v37, %v3667_v50  ;;  %v3954_v58 = vpack.i.bf16 %v3652_v26, %v3651_v5  ;;  %v2644_v27 = vpop.f32.mrb[55].mxu1  ;;  %v2733_v20 = vpop.f32.mrb[87].mxu0  ;;  %v2944_v15 = vsel %vm434_vm1, %v5722_v19, %v3873_v46 }
 0x5c0   :  { %v3949_v17 = vpack.i.bf16 %v2644_v27, %v2641_v13  ;;  %v3959_v35 = vpack.i.bf16 %v2733_v20, %v2730_v63  ;;  %v2943_v1 = vsel %vm434_vm1, %v5717_v60, %v3872_v61  ;;  %v2959_v60 = vsel %vm2953_vm3, %v2942_v49, %v3888_v42 }
 0x5c1   :  { %3673 = vmatprep.mubr.msk.bf16.mxu1 %vm107_vm0, %v2987_v32  ;;  %3940 = vrot.lane.b32.xlu1 %v3939_v44, %s4236_s8  ;;  %v3887_v44 = vunpack.i.l.bf16 %v5770_v28  ;;  %v2960_v28 = vsel %vm2953_vm3, %v2943_v1, %v3877_v54 }
 0x5c2   :  { %3674 = vmatmul.mubr.msk.bf16.vlgmr.msra.gmra.mrb[56].mxu1 %vm107_vm0, %v2988_v62  ;;  %3945 = vrot.lane.b32.xlu0 %v3944_v11, %s4236_s8  ;;  %v2961_v11 = vsel %vm2953_vm3, %v2944_v15, %v3878_v7 }
 0x5c3   :  { %v2958_v19 = vsel %vm2953_vm3, %v2941_v51, %v3887_v44 }
 0x5c5   :  { %3955 = vrot.lane.b32.xlu1 %v3954_v58, %s4235_s26 }
 0x5c6   :  { %3950 = vrot.lane.b32.xlu0 %v3949_v17, %s4235_s26 }
 0x5c9   :  { %3965 = vrot.lane.b32.xlu1 %v3964_v53, %s4236_s8 }
 0x5ca   :  { %3960 = vrot.lane.b32.xlu0 %v3959_v35, %s4236_s8 }
 0x5ce   :  { %v3901_v22 = vpop.permute.xlu1 %3900 }
 0x5cf   :  { %v3903_v40 = vunpack.i.h.bf16 %v3901_v22  ;;  %v3902_v6 = vunpack.i.l.bf16 %v3901_v22  ;;  %v3906_v33 = vpop.permute.xlu0 %3905 }
 0x5d0   :  { %v3908_v45 = vunpack.i.h.bf16 %v3906_v33  ;;  %v3907_v39 = vunpack.i.l.bf16 %v3906_v33 }
 0x5d1   :  { %v2978_v30 = vsel %vm2970_vm4, %v2961_v11, %v3903_v40  ;;  %v2977_v23 = vsel %vm2970_vm4, %v2960_v28, %v3902_v6 }
 0x5d2   :  { %v2990_v36 = vpack.c.bf16 %v2978_v30, %v2977_v23  ;;  %v2975_v3 = vsel %vm2970_vm4, %v2958_v19, %v3907_v39  ;;  %v2976_v16 = vsel %vm2970_vm4, %v2959_v60, %v3908_v45 }
 0x5d3   :  { %v2989_v21 = vpack.c.bf16 %v2976_v16, %v2975_v3 }
 0x5d5   :  { %3677 = vmatprep.mubr.msk.bf16.mxu1 %vm107_vm0, %v2989_v21 }
 0x5d6   :  { %3678 = vmatmul.mubr.msk.bf16.gmra.mrb[60].mxu1 %vm107_vm0, %v2990_v36 }
 0x60f   :  { %v3911_v34 = vpop.permute.xlu1 %3910 }
 0x610   :  { %v3921_v59 = vpop.permute.xlu0 %3920  ;;  %v3913_v48 = vunpack.i.h.bf16 %v3911_v34  ;;  %v3912_v29 = vunpack.i.l.bf16 %v3911_v34  ;;  %v3234_v34 = vld [vmem:[%s5935_s6] ss:$0 sm:$0xff] }
 0x611   :  { %v3923_v18 = vunpack.i.h.bf16 %v3921_v59  ;;  %v3922_v5 = vunpack.i.l.bf16 %v3921_v59 }
 0x612   :  { %v2948_v63 = vsel %vm434_vm1, %v5748_v8, %v3913_v48  ;;  %v2947_v13 = vsel %vm434_vm1, %v5744_v31, %v3912_v29 }
 0x613   :  { %v2946_v62 = vsel %vm434_vm1, %v5750_v12, %v3923_v18  ;;  %v2945_v57 = vsel %vm434_vm1, %v5746_v10, %v3922_v5 }
 0x62b   :  { %v3916_v0 = vpop.permute.xlu1 %3915 }
 0x62c   :  { %v3926_v41 = vpop.permute.xlu0 %3925  ;;  %v3918_v50 = vunpack.i.h.bf16 %v3916_v0  ;;  %v3917_v4 = vunpack.i.l.bf16 %v3916_v0 }
 0x62d   :  { %v3927_v25 = vunpack.i.l.bf16 %v3926_v41  ;;  %v3928_v2 = vunpack.i.h.bf16 %v3926_v41 }
 0x62e   :  { %v2965_v37 = vsel %vm2953_vm3, %v2948_v63, %v3918_v50  ;;  %v2964_v58 = vsel %vm2953_vm3, %v2947_v13, %v3917_v4 }
 0x62f   :  { %v3931_v38 = vpop.permute.xlu1 %3930  ;;  %v2962_v27 = vsel %vm2953_vm3, %v2945_v57, %v3927_v25  ;;  %v2963_v31 = vsel %vm2953_vm3, %v2946_v62, %v3928_v2 }
 0x630   :  { %v3936_v55 = vpop.permute.xlu0 %3935  ;;  %v3933_v17 = vunpack.i.h.bf16 %v3931_v38  ;;  %v3932_v46 = vunpack.i.l.bf16 %v3931_v38 }
 0x631   :  { %v3938_v7 = vunpack.i.h.bf16 %v3936_v55  ;;  %v3937_v54 = vunpack.i.l.bf16 %v3936_v55 }
 0x632   :  { %v2952_v51 = vsel %vm434_vm1, %v5758_v43, %v3933_v17  ;;  %v2951_v40 = vsel %vm434_vm1, %v5754_v14, %v3932_v46 }
 0x633   :  { %v3941_v24 = vpop.permute.xlu1 %3940  ;;  %v2950_v33 = vsel %vm434_vm1, %v5760_v47, %v3938_v7  ;;  %v2949_v11 = vsel %vm434_vm1, %v5756_v52, %v3937_v54 }
 0x634   :  { %v3943_v26 = vunpack.i.h.bf16 %v3941_v24  ;;  %v3942_v32 = vunpack.i.l.bf16 %v3941_v24  ;;  %v3946_v53 = vpop.permute.xlu0 %3945 }
 0x635   :  { %v3948_v8 = vunpack.i.h.bf16 %v3946_v53  ;;  %v3947_v20 = vunpack.i.l.bf16 %v3946_v53 }
 0x636   :  { %v2981_v12 = vsel %vm2970_vm4, %v2964_v58, %v3942_v32  ;;  %v2982_v35 = vsel %vm2970_vm4, %v2965_v37, %v3943_v26 }
 0x637   :  { %v2992_v10 = vpack.c.bf16 %v2982_v35, %v2981_v12  ;;  %v2979_v61 = vsel %vm2970_vm4, %v2962_v27, %v3947_v20  ;;  %v2980_v9 = vsel %vm2970_vm4, %v2963_v31, %v3948_v8  ;;  %v3956_v56 = vpop.permute.xlu1 %3955 }
 0x638   :  { %v2991_v42 = vpack.c.bf16 %v2980_v9, %v2979_v61  ;;  %v3951_v44 = vpop.permute.xlu0 %3950  ;;  %v3958_v15 = vunpack.i.h.bf16 %v3956_v56  ;;  %v3957_v1 = vunpack.i.l.bf16 %v3956_v56 }
 0x639   :  { %v3953_v22 = vunpack.i.h.bf16 %v3951_v44  ;;  %v3952_v49 = vunpack.i.l.bf16 %v3951_v44 }
 0x63a   :  { %3681 = vmatprep.mubr.msk.bf16.mxu1 %vm107_vm0, %v2991_v42  ;;  %v2969_v19 = vsel %vm2953_vm3, %v2952_v51, %v3958_v15  ;;  %v2968_v60 = vsel %vm2953_vm3, %v2951_v40, %v3957_v1 }
 0x63b   :  { %v3966_v6 = vpop.permute.xlu1 %3965  ;;  %3682 = vmatmul.mubr.msk.bf16.gmra.mrb[64].mxu1 %vm107_vm0, %v2992_v10  ;;  %v2966_v14 = vsel %vm2953_vm3, %v2949_v11, %v3952_v49  ;;  %v2967_v23 = vsel %vm2953_vm3, %v2950_v33, %v3953_v22 }
 0x63c   :  { %v3968_v28 = vunpack.i.h.bf16 %v3966_v6  ;;  %v3967_v45 = vunpack.i.l.bf16 %v3966_v6  ;;  %v3961_v39 = vpop.permute.xlu0 %3960 }
 0x63d   :  { %v3963_v43 = vunpack.i.h.bf16 %v3961_v39  ;;  %v3962_v30 = vunpack.i.l.bf16 %v3961_v39 }
 0x63e   :  { %v2985_v36 = vsel %vm2970_vm4, %v2968_v60, %v3967_v45  ;;  %v2986_v47 = vsel %vm2970_vm4, %v2969_v19, %v3968_v28 }
 0x63f   :  { %v2994_v3 = vpack.c.bf16 %v2986_v47, %v2985_v36  ;;  %v2983_v52 = vsel %vm2970_vm4, %v2966_v14, %v3962_v30  ;;  %v2984_v16 = vsel %vm2970_vm4, %v2967_v23, %v3963_v43 }
 0x640   :  { %v2993_v21 = vpack.c.bf16 %v2984_v16, %v2983_v52 }
 0x642   :  { %3685 = vmatprep.mubr.msk.bf16.mxu1 %vm107_vm0, %v2993_v21 }
 0x643   :  { %3686 = vmatmul.mubr.msk.bf16.gmra.mrb[68].mxu1 %vm107_vm0, %v2994_v3 }
 0x695   :  { %v3675_v59 = vpop.f32.mrb[56].mxu1 }
 0x696   :  { %v3085_v0 = vadd.f32 %v3675_v59, %v3234_v34  ;;  %v3076_v41 = vpop.f32.mrb[57].mxu1 }
 0x697   :  { %v3077_v48 = vadd.f32 %v3234_v34, %v3076_v41  ;;  %v3676_v29 = vpop.f32.mrb[58].mxu1 }
 0x698   :  { %3141 = vst.msk [vmem:[%s5936_s7 + $0x10] sm:$0xff] %vm107_vm0, %v3085_v0  ;;  %v3088_v18 = vadd.f32 %v3676_v29, %v3234_v34  ;;  %v3079_v38 = vpop.f32.mrb[59].mxu1 }
 0x699   :  { %3139 = vst.msk [vmem:[%s5936_s7] sm:$0xff] %vm107_vm0, %v3077_v48  ;;  %v3080_v5 = vadd.f32 %v3234_v34, %v3079_v38 }
 0x69a   :  { %3142 = vst.msk [vmem:[%s5936_s7 + $0x18] sm:$0xff] %vm107_vm0, %v3088_v18 }
 0x69b   :  { %3140 = vst.msk [vmem:[%s5936_s7 + $0x8] sm:$0xff] %vm107_vm0, %v3080_v5 }
 0x6a9   :  { %v3679_v50 = vpop.f32.mrb[60].mxu1 }
 0x6aa   :  { %v3101_v55 = vadd.f32 %v3679_v50, %v3234_v34  ;;  %v3092_v4 = vpop.f32.mrb[61].mxu1 }
 0x6ab   :  { %v3093_v25 = vadd.f32 %v3234_v34, %v3092_v4  ;;  %v3680_v2 = vpop.f32.mrb[62].mxu1 }
 0x6ac   :  { %3145 = vst.msk [vmem:[%s5936_s7 + $0x30] sm:$0xff] %vm107_vm0, %v3101_v55  ;;  %v3104_v63 = vadd.f32 %v3680_v2, %v3234_v34  ;;  %v3095_v13 = vpop.f32.mrb[63].mxu1 }
 0x6ad   :  { %3143 = vst.msk [vmem:[%s5936_s7 + $0x20] sm:$0xff] %vm107_vm0, %v3093_v25  ;;  %v3096_v62 = vadd.f32 %v3234_v34, %v3095_v13 }
 0x6ae   :  { %3146 = vst.msk [vmem:[%s5936_s7 + $0x38] sm:$0xff] %vm107_vm0, %v3104_v63 }
 0x6af   :  { %3144 = vst.msk [vmem:[%s5936_s7 + $0x28] sm:$0xff] %vm107_vm0, %v3096_v62 }
 0x70e   :  { %v3683_v24 = vpop.f32.mrb[64].mxu1 }
 0x70f   :  { %v3117_v57 = vadd.f32 %v3683_v24, %v3234_v34  ;;  %v3108_v37 = vpop.f32.mrb[65].mxu1 }
 0x710   :  { %v3109_v26 = vadd.f32 %v3234_v34, %v3108_v37  ;;  %v3684_v32 = vpop.f32.mrb[66].mxu1 }
 0x711   :  { %3149 = vst.msk [vmem:[%s5936_s7 + $0x50] sm:$0xff] %vm107_vm0, %v3117_v57  ;;  %v3120_v53 = vadd.f32 %v3684_v32, %v3234_v34  ;;  %v3111_v58 = vpop.f32.mrb[67].mxu1 }
 0x712   :  { %3147 = vst.msk [vmem:[%s5936_s7 + $0x40] sm:$0xff] %vm107_vm0, %v3109_v26  ;;  %v3112_v27 = vadd.f32 %v3234_v34, %v3111_v58 }
 0x713   :  { %3150 = vst.msk [vmem:[%s5936_s7 + $0x58] sm:$0xff] %vm107_vm0, %v3120_v53 }
 0x714   :  { %3148 = vst.msk [vmem:[%s5936_s7 + $0x48] sm:$0xff] %vm107_vm0, %v3112_v27 }
 0x716   :  { %v3687_v8 = vpop.f32.mrb[68].mxu1 }
 0x717   :  { %v3133_v20 = vadd.f32 %v3687_v8, %v3234_v34  ;;  %v3124_v31 = vpop.f32.mrb[69].mxu1 }
 0x718   :  { %v3125_v17 = vadd.f32 %v3234_v34, %v3124_v31  ;;  %v3688_v12 = vpop.f32.mrb[70].mxu1 }
 0x719   :  { %3153 = vst.msk [vmem:[%s5936_s7 + $0x70] sm:$0xff] %vm107_vm0, %v3133_v20  ;;  %v3136_v35 = vadd.f32 %v3688_v12, %v3234_v34  ;;  %v3127_v46 = vpop.f32.mrb[71].mxu1 }
 0x71a   :  { %3151 = vst.msk [vmem:[%s5936_s7 + $0x60] sm:$0xff] %vm107_vm0, %v3125_v17  ;;  %v3128_v10 = vadd.f32 %v3234_v34, %v3127_v46 }
 0x71b   :  { %3154 = vst.msk [vmem:[%s5936_s7 + $0x78] sm:$0xff] %vm107_vm0, %v3136_v35 }
 0x71c   :  { %3152 = vst.msk [vmem:[%s5936_s7 + $0x68] sm:$0xff] %vm107_vm0, %v3128_v10 }

// kernel: swin_transformer_block.3
= control target key start
LH: loop header
LB: loop body
LE: loop exit
PB: predicated region body
PF: predicated region fallthrough
CT: control target
= control target key end

     0   :  { %vm44_vm0 = vcmask 261120   ;;  %s6164_s15 = smov 120   ;;  %s6165_s16 = smov 104   ;;  %vm6167_vm1 = vmmov 0   ;;  %vm641_vm2 = vcmask 64512   ;;  %vm2304_vm3 = vcmask 130048   ;;  %s8215_s1 = inlined_call_operand.vmem [shape: f32[8,16,32], index: 1, kind: input, shape index: {}]   ;;  %s8216_s4 = inlined_call_operand.vmem [shape: bf16[32,96], index: 4, kind: input, shape index: {}]   ;;  %s8217_s2 = inlined_call_operand.vmem [shape: f32[1,32], index: 2, kind: input, shape index: {}]   ;;  %s8218_s3 = inlined_call_operand.vmem [shape: f32[1,32], index: 3, kind: input, shape index: {}]   ;;  %s8219_s0 = inlined_call_operand.<no memory space> [shape: f32[1], index: 0, kind: input, shape index: {}]   ;;  %s8220_s5 = inlined_call_operand.vmem [shape: bf16[32,32], index: 5, kind: input, shape index: {}]   ;;  %s8221_s6 = inlined_call_operand.vmem [shape: f32[1,32], index: 6, kind: input, shape index: {}]   ;;  %s8222_s7 = inlined_call_operand.vmem [shape: f32[8,16,32], index: 7, kind: output, shape index: {}]  }
   0x1   :  { %v28_v0 = vld [vmem:[%s8215_s1] sm:$0xff]  ;;  %v30_v1 = vld [vmem:[%s8215_s1 + $0x10] sm:$0xff]  ;;  %v29_v2 = vld [vmem:[%s8215_s1 + $0x8] sm:$0xff]  ;;  %s6168_s17 = smov 96   ;;  %s6169_s18 = smov 64   ;;  %vm4769_vm4 = vcmask 195584  }
   0x2   :  { %v45_v3 = vsel %vm44_vm0, %v28_v0, 0.0  ;;  %v51_v4 = vsel %vm44_vm0, %v30_v1, 0.0  ;;  %v31_v5 = vld [vmem:[%s8215_s1 + $0x18] sm:$0xff]  ;;  %v48_v6 = vsel %vm44_vm0, %v29_v2, 0.0  ;;  %v32_v8 = vld [vmem:[%s8215_s1 + $0x20] sm:$0xff]  ;;  %v33_v9 = vld [vmem:[%s8215_s1 + $0x28] sm:$0xff] }
   0x3   :  { %46 = vadd.xlane.f32.xlu0 %v45_v3  ;;  %52 = vadd.xlane.f32.xlu1 %v51_v4  ;;  %v54_v7 = vsel %vm44_vm0, %v31_v5, 0.0  ;;  %v57_v10 = vsel %vm44_vm0, %v32_v8, 0.0  ;;  %v60_v11 = vsel %vm44_vm0, %v33_v9, 0.0  ;;  %v6240_v12 = vld [vmem:[%s8215_s1 + $0x30] sm:$0xff]  ;;  %v6245_v13 = vld [vmem:[%s8215_s1 + $0x38] sm:$0xff]  ;;  %v6254_v16 = vld [vmem:[%s8215_s1 + $0x40] sm:$0xff] }
   0x4   :  { %v63_v14 = vsel %vm44_vm0, %v6240_v12, 0.0  ;;  %v66_v15 = vsel %vm44_vm0, %v6245_v13, 0.0  ;;  %v6259_v17 = vld [vmem:[%s8215_s1 + $0x48] sm:$0xff]  ;;  %v69_v18 = vsel %vm44_vm0, %v6254_v16, 0.0  ;;  %v6268_v20 = vld [vmem:[%s8215_s1 + $0x50] sm:$0xff]  ;;  %v6273_v21 = vld [vmem:[%s8215_s1 + $0x58] sm:$0xff] }
   0x5   :  { %v72_v19 = vsel %vm44_vm0, %v6259_v17, 0.0  ;;  %v75_v22 = vsel %vm44_vm0, %v6268_v20, 0.0  ;;  %v78_v23 = vsel %vm44_vm0, %v6273_v21, 0.0  ;;  %v6300_v45 = vld [vmem:[%s8215_s1 + $0x60] sm:$0xff]  ;;  %v6311_v53 = vld [vmem:[%s8215_s1 + $0x70] sm:$0xff]  ;;  %v6316_v55 = vld [vmem:[%s8215_s1 + $0x68] sm:$0xff] }
   0x6   :  { %v81_v50 = vsel %vm44_vm0, %v6300_v45, 0.0  ;;  %v87_v57 = vsel %vm44_vm0, %v6311_v53, 0.0  ;;  %v84_v61 = vsel %vm44_vm0, %v6316_v55, 0.0  ;;  %v6330_v63 = vld [vmem:[%s8215_s1 + $0x78] sm:$0xff]  ;;  %s6171_s21 = smov 16   ;;  %s6172_s22 = smov 24  }
   0x7   :  { %49 = vadd.xlane.f32.xlu0 %v48_v6  ;;  %55 = vadd.xlane.f32.xlu1 %v54_v7  ;;  %v90_v3 = vsel %vm44_vm0, %v6330_v63, 0.0 }
   0xb   :  { %58 = vadd.xlane.f32.xlu0 %v57_v10  ;;  %61 = vadd.xlane.f32.xlu1 %v60_v11 }
   0xf   :  { %64 = vadd.xlane.f32.xlu0 %v63_v14  ;;  %67 = vadd.xlane.f32.xlu1 %v66_v15 }
  0x13   :  { %70 = vadd.xlane.f32.xlu0 %v69_v18  ;;  %73 = vadd.xlane.f32.xlu1 %v72_v19 }
  0x17   :  { %76 = vadd.xlane.f32.xlu0 %v75_v22  ;;  %79 = vadd.xlane.f32.xlu1 %v78_v23 }
  0x90   :  { %v47_v24 = vpop.xlane.xlu0 %46  ;;  %v53_v25 = vpop.xlane.xlu1 %52 }
  0x91   :  { %v94_v26 = vmul.f32 0.03125, %v47_v24  ;;  %v96_v27 = vmul.f32 0.03125, %v53_v25 }
  0x93   :  { %v6279_v28 = vsub.f32 %v28_v0, %v94_v26  ;;  %v6281_v29 = vsub.f32 %v30_v1, %v96_v27 }
  0x94   :  { %v50_v30 = vpop.xlane.xlu0 %49  ;;  %v56_v31 = vpop.xlane.xlu1 %55 }
  0x95   :  { %v95_v32 = vmul.f32 0.03125, %v50_v30  ;;  %v97_v33 = vmul.f32 0.03125, %v56_v31  ;;  %v126_v34 = vmul.f32 %v6279_v28, %v6279_v28  ;;  %v128_v35 = vmul.f32 %v6281_v29, %v6281_v29  ;;  %v5871_v30 = vld [vmem:[%s8216_s4] sm:$0xff]   ;;  %v5872_v31 = vld [vmem:[%s8216_s4 + $0x8] sm:$0xff]  }
  0x96   :  { %5193 = vmatprep.subr.bf16.mxu0 %v5871_v30  ;;  %5617 = vmatprep.subr.bf16.mxu1 %v5871_v30 }
  0x97   :  { %v6287_v36 = vsub.f32 %v29_v2, %v95_v32  ;;  %v6289_v37 = vsub.f32 %v31_v5, %v97_v33  ;;  %v142_v38 = vsel %vm44_vm0, %v126_v34, 0.0  ;;  %v148_v41 = vsel %vm44_vm0, %v128_v35, 0.0  ;;  %5194 = vmatpush3.bf16.msra.mxu0 %v5871_v30  ;;  %5619 = vmatpush3.bf16.msra.mxu1 %v5871_v30 }
  0x98   :  { %143 = vadd.xlane.f32.xlu0 %v142_v38  ;;  %v59_v39 = vpop.xlane.xlu0 %58  ;;  %v62_v40 = vpop.xlane.xlu1 %61  ;;  %5195 = vmatprep.subr.bf16.mxu0 %v5872_v31 }
  0x99   :  { %v127_v42 = vmul.f32 %v6287_v36, %v6287_v36  ;;  %v129_v43 = vmul.f32 %v6289_v37, %v6289_v37  ;;  %v98_v44 = vmul.f32 0.03125, %v59_v39  ;;  %v99_v47 = vmul.f32 0.03125, %v62_v40  ;;  %5618 = vmatprep.subr.bf16.mxu1 %v5872_v31 }
  0x9b   :  { %v145_v46 = vsel %vm44_vm0, %v127_v42, 0.0  ;;  %v151_v51 = vsel %vm44_vm0, %v129_v43, 0.0  ;;  %v6306_v52 = vsub.f32 %v32_v8, %v98_v44  ;;  %v6318_v56 = vsub.f32 %v33_v9, %v99_v47  ;;  %5196 = vmatpush3.bf16.msra.mxu0 %v5872_v31  ;;  %5620 = vmatpush3.bf16.msra.mxu1 %v5872_v31 }
  0x9c   :  { %149 = vadd.xlane.f32.xlu0 %v148_v41  ;;  %146 = vadd.xlane.f32.xlu1 %v145_v46  ;;  %v65_v48 = vpop.xlane.xlu0 %64  ;;  %v68_v49 = vpop.xlane.xlu1 %67 }
  0x9d   :  { %v100_v54 = vmul.f32 0.03125, %v65_v48  ;;  %v101_v58 = vmul.f32 0.03125, %v68_v49  ;;  %v130_v0 = vmul.f32 %v6306_v52, %v6306_v52  ;;  %v131_v5 = vmul.f32 %v6318_v56, %v6318_v56 }
  0x9f   :  { %v6325_v62 = vsub.f32 %v6240_v12, %v100_v54  ;;  %v6335_v2 = vsub.f32 %v6245_v13, %v101_v58  ;;  %v154_v7 = vsel %vm44_vm0, %v130_v0, 0.0  ;;  %v157_v13 = vsel %vm44_vm0, %v131_v5, 0.0 }
  0xa0   :  { %82 = vadd.xlane.f32.xlu0 %v81_v50  ;;  %152 = vadd.xlane.f32.xlu1 %v151_v51  ;;  %v71_v59 = vpop.xlane.xlu0 %70  ;;  %v74_v60 = vpop.xlane.xlu1 %73 }
  0xa1   :  { %v102_v1 = vmul.f32 0.03125, %v71_v59  ;;  %v103_v4 = vmul.f32 0.03125, %v74_v60  ;;  %v132_v9 = vmul.f32 %v6325_v62, %v6325_v62  ;;  %v133_v14 = vmul.f32 %v6335_v2, %v6335_v2 }
  0xa3   :  { %v6343_v8 = vsub.f32 %v6254_v16, %v102_v1  ;;  %v6348_v12 = vsub.f32 %v6259_v17, %v103_v4  ;;  %v160_v15 = vsel %vm44_vm0, %v132_v9, 0.0  ;;  %v163_v22 = vsel %vm44_vm0, %v133_v14, 0.0 }
  0xa4   :  { %88 = vadd.xlane.f32.xlu0 %v87_v57  ;;  %85 = vadd.xlane.f32.xlu1 %v84_v61  ;;  %v77_v6 = vpop.xlane.xlu0 %76  ;;  %v80_v11 = vpop.xlane.xlu1 %79 }
  0xa5   :  { %v104_v10 = vmul.f32 0.03125, %v77_v6  ;;  %v105_v18 = vmul.f32 0.03125, %v80_v11  ;;  %v134_v19 = vmul.f32 %v6343_v8, %v6343_v8  ;;  %v135_v24 = vmul.f32 %v6348_v12, %v6348_v12 }
  0xa7   :  { %v6355_v16 = vsub.f32 %v6268_v20, %v104_v10  ;;  %v6361_v17 = vsub.f32 %v6273_v21, %v105_v18  ;;  %v166_v23 = vsel %vm44_vm0, %v134_v19, 0.0  ;;  %v169_v25 = vsel %vm44_vm0, %v135_v24, 0.0  ;;  %v6413_v24 = vld [vmem:[%s8218_s3] ss:$0 sm:$0xff]  ;;  %s6163_s3 = smov 112  }
  0xa8   :  { %91 = vadd.xlane.f32.xlu1 %v90_v3  ;;  %155 = vadd.xlane.f32.xlu0 %v154_v7 }
  0xa9   :  { %v136_v20 = vmul.f32 %v6355_v16, %v6355_v16  ;;  %v137_v27 = vmul.f32 %v6361_v17, %v6361_v17 }
  0xab   :  { %v172_v26 = vsel %vm44_vm0, %v136_v20, 0.0  ;;  %v175_v21 = vsel %vm44_vm0, %v137_v27, 0.0 }
  0xac   :  { %158 = vadd.xlane.f32.xlu1 %v157_v13  ;;  %161 = vadd.xlane.f32.xlu0 %v160_v15 }
  0xb0   :  { %164 = vadd.xlane.f32.xlu1 %v163_v22  ;;  %167 = vadd.xlane.f32.xlu0 %v166_v23 }
  0xb4   :  { %170 = vadd.xlane.f32.xlu1 %v169_v25  ;;  %173 = vadd.xlane.f32.xlu0 %v172_v26 }
  0xb8   :  { %176 = vadd.xlane.f32.xlu1 %v175_v21 }
 0x125   :  { %v144_v32 = vpop.xlane.xlu0 %143 }
 0x126   :  { %v190_v33 = vmul.f32 0.03125, %v144_v32 }
 0x128   :  { %v206_v34 = vadd.f32 1e-05, %v190_v33 }
 0x129   :  { %v147_v35 = vpop.xlane.xlu1 %146  ;;  %v150_v38 = vpop.xlane.xlu0 %149 }
 0x12a   :  { %5875 = vrsqrt.f32 %v206_v34  ;;  %v191_v39 = vmul.f32 0.03125, %v147_v35  ;;  %v192_v40 = vmul.f32 0.03125, %v150_v38 }
 0x12c   :  { %v207_v41 = vadd.f32 1e-05, %v191_v39  ;;  %v208_v42 = vadd.f32 1e-05, %v192_v40 }
 0x12d   :  { %v153_v43 = vpop.xlane.xlu1 %152  ;;  %v83_v44 = vpop.xlane.xlu0 %82 }
 0x12e   :  { %5877 = vrsqrt.f32 %v207_v41  ;;  %v193_v46 = vmul.f32 0.03125, %v153_v43  ;;  %v106_v47 = vmul.f32 0.03125, %v83_v44 }
 0x12f   :  { %5879 = vrsqrt.f32 %v208_v42 }
 0x130   :  { %v209_v48 = vadd.f32 1e-05, %v193_v46  ;;  %v6380_v49 = vsub.f32 %v6300_v45, %v106_v47 }
 0x131   :  { %v86_v50 = vpop.xlane.xlu1 %85  ;;  %v89_v51 = vpop.xlane.xlu0 %88 }
 0x132   :  { %5881 = vrsqrt.f32 %v209_v48  ;;  %v107_v54 = vmul.f32 0.03125, %v86_v50  ;;  %v108_v57 = vmul.f32 0.03125, %v89_v51  ;;  %v138_v58 = vmul.f32 %v6380_v49, %v6380_v49 }
 0x134   :  { %v5876_v59 = vpop.eup %5875  ;;  %v6385_v60 = vsub.f32 %v6316_v55, %v107_v54  ;;  %v6388_v61 = vsub.f32 %v6311_v53, %v108_v57  ;;  %v178_v0 = vsel %vm44_vm0, %v138_v58, 0.0  ;;  %v6399_v53 = vld [vmem:[%s8217_s2] ss:$0 sm:$0xff] }
 0x135   :  { %v92_v1 = vpop.xlane.xlu1 %91  ;;  %179 = vadd.xlane.f32.xlu0 %v178_v0  ;;  %v156_v45 = vpop.xlane.xlu0 %155  ;;  %v238_v3 = vmul.f32 %v5876_v59, %v6279_v28 }
 0x136   :  { %v109_v4 = vmul.f32 0.03125, %v92_v1  ;;  %v194_v5 = vmul.f32 0.03125, %v156_v45  ;;  %v139_v6 = vmul.f32 %v6385_v60, %v6385_v60  ;;  %v140_v7 = vmul.f32 %v6388_v61, %v6388_v61 }
 0x137   :  { %v261_v19 = vmul.f32 %v6399_v53, %v238_v3 }
 0x138   :  { %v5878_v55 = vpop.eup %5877  ;;  %v6402_v9 = vsub.f32 %v6330_v63, %v109_v4  ;;  %v210_v10 = vadd.f32 1e-05, %v194_v5  ;;  %v181_v28 = vsel %vm44_vm0, %v139_v6, 0.0  ;;  %v184_v11 = vsel %vm44_vm0, %v140_v7, 0.0 }
 0x139   :  { %v5880_v13 = vpop.eup %5879  ;;  %182 = vadd.xlane.f32.xlu1 %v181_v28  ;;  %v159_v14 = vpop.xlane.xlu1 %158  ;;  %185 = vadd.xlane.f32.xlu0 %v184_v11  ;;  %v239_v18 = vmul.f32 %v5878_v55, %v6287_v36  ;;  %v284_v32 = vadd.f32 %v6413_v24, %v261_v19 }
 0x13a   :  { %v162_v15 = vpop.xlane.xlu0 %161  ;;  %5883 = vrsqrt.f32 %v210_v10  ;;  %v195_v22 = vmul.f32 0.03125, %v159_v14  ;;  %v141_v63 = vmul.f32 %v6402_v9, %v6402_v9  ;;  %v240_v25 = vmul.f32 %v5880_v13, %v6281_v29 }
 0x13b   :  { %v196_v23 = vmul.f32 0.03125, %v162_v15  ;;  %v262_v20 = vmul.f32 %v6399_v53, %v239_v18 }
 0x13c   :  { %v5882_v26 = vpop.eup %5881  ;;  %v211_v27 = vadd.f32 1e-05, %v195_v22  ;;  %v187_v21 = vsel %vm44_vm0, %v141_v63, 0.0  ;;  %v263_v35 = vmul.f32 %v6399_v53, %v240_v25 }
 0x13d   :  { %v212_v36 = vadd.f32 1e-05, %v196_v23  ;;  %188 = vadd.xlane.f32.xlu1 %v187_v21  ;;  %v165_v30 = vpop.xlane.xlu1 %164  ;;  %v285_v33 = vadd.f32 %v6413_v24, %v262_v20  ;;  %v241_v34 = vmul.f32 %v5882_v26, %v6289_v37 }
 0x13e   :  { %v168_v31 = vpop.xlane.xlu0 %167  ;;  %5885 = vrsqrt.f32 %v211_v27  ;;  %v197_v38 = vmul.f32 0.03125, %v165_v30  ;;  %v286_v46 = vadd.f32 %v6413_v24, %v263_v35 }
 0x13f   :  { %v198_v39 = vmul.f32 0.03125, %v168_v31  ;;  %5887 = vrsqrt.f32 %v212_v36  ;;  %v300_v29 = vpack.c.bf16 %v285_v33, %v284_v32  ;;  %v264_v40 = vmul.f32 %v6399_v53, %v241_v34 }
 0x140   :  { %v213_v41 = vadd.f32 1e-05, %v197_v38 }
 0x141   :  { %v214_v42 = vadd.f32 1e-05, %v198_v39  ;;  %v171_v43 = vpop.xlane.xlu1 %170  ;;  %5197 = vmatprep.mubr.msk.bf16.mxu0 %vm44_vm0, %v300_v29  ;;  %v287_v47 = vadd.f32 %v6413_v24, %v264_v40 }
 0x142   :  { %v174_v44 = vpop.xlane.xlu0 %173  ;;  %5889 = vrsqrt.f32 %v213_v41  ;;  %v199_v37 = vmul.f32 0.03125, %v171_v43 }
 0x143   :  { %v200_v48 = vmul.f32 0.03125, %v174_v44  ;;  %5891 = vrsqrt.f32 %v214_v42  ;;  %v301_v50 = vpack.c.bf16 %v287_v47, %v286_v46 }
 0x144   :  { %v5884_v51 = vpop.eup %5883  ;;  %v215_v54 = vadd.f32 1e-05, %v199_v37 }
 0x145   :  { %v216_v57 = vadd.f32 1e-05, %v200_v48  ;;  %v177_v58 = vpop.xlane.xlu1 %176  ;;  %5198 = vmatmul.mubr.msk.bf16.vlgmr.msra.gmra.mrb[0].mxu0 %vm44_vm0, %v301_v50  ;;  %v242_v59 = vmul.f32 %v5884_v51, %v6306_v52 }
 0x146   :  { %5893 = vrsqrt.f32 %v215_v54  ;;  %v201_v0 = vmul.f32 0.03125, %v177_v58 }
 0x147   :  { %5895 = vrsqrt.f32 %v216_v57  ;;  %v265_v5 = vmul.f32 %v6399_v53, %v242_v59 }
 0x148   :  { %v5886_v1 = vpop.eup %5885  ;;  %v217_v45 = vadd.f32 1e-05, %v201_v0 }
 0x149   :  { %v5888_v3 = vpop.eup %5887  ;;  %v243_v4 = vmul.f32 %v5886_v1, %v6318_v56  ;;  %v288_v28 = vadd.f32 %v6413_v24, %v265_v5 }
 0x14a   :  { %5897 = vrsqrt.f32 %v217_v45  ;;  %v244_v6 = vmul.f32 %v5888_v3, %v6325_v62 }
 0x14b   :  { %v266_v7 = vmul.f32 %v6399_v53, %v243_v4 }
 0x14c   :  { %v5890_v55 = vpop.eup %5889  ;;  %v267_v13 = vmul.f32 %v6399_v53, %v244_v6 }
 0x14d   :  { %v5892_v10 = vpop.eup %5891  ;;  %v289_v52 = vadd.f32 %v6413_v24, %v266_v7  ;;  %v245_v11 = vmul.f32 %v5890_v55, %v6335_v2 }
 0x14e   :  { %v246_v14 = vmul.f32 %v5892_v10, %v6343_v8  ;;  %v290_v62 = vadd.f32 %v6413_v24, %v267_v13 }
 0x14f   :  { %v302_v56 = vpack.c.bf16 %v289_v52, %v288_v28  ;;  %v268_v15 = vmul.f32 %v6399_v53, %v245_v11 }
 0x150   :  { %v5894_v18 = vpop.eup %5893  ;;  %v269_v63 = vmul.f32 %v6399_v53, %v246_v14 }
 0x151   :  { %v5896_v19 = vpop.eup %5895  ;;  %5201 = vmatprep.mubr.msk.bf16.mxu0 %vm44_vm0, %v302_v56  ;;  %v291_v22 = vadd.f32 %v6413_v24, %v268_v15  ;;  %v247_v23 = vmul.f32 %v5894_v18, %v6348_v12 }
 0x152   :  { %v248_v2 = vmul.f32 %v5896_v19, %v6355_v16  ;;  %v292_v26 = vadd.f32 %v6413_v24, %v269_v63 }
 0x153   :  { %v303_v20 = vpack.c.bf16 %v291_v22, %v290_v62  ;;  %v270_v8 = vmul.f32 %v6399_v53, %v247_v23 }
 0x154   :  { %v5898_v25 = vpop.eup %5897  ;;  %v271_v21 = vmul.f32 %v6399_v53, %v248_v2 }
 0x155   :  { %5202 = vmatmul.mubr.msk.bf16.gmra.mrb[4].mxu0 %vm44_vm0, %v303_v20  ;;  %v293_v27 = vadd.f32 %v6413_v24, %v270_v8  ;;  %v249_v36 = vmul.f32 %v5898_v25, %v6361_v17 }
 0x156   :  { %v294_v16 = vadd.f32 %v6413_v24, %v271_v21 }
 0x157   :  { %v304_v30 = vpack.c.bf16 %v293_v27, %v292_v26  ;;  %v272_v12 = vmul.f32 %v6399_v53, %v249_v36 }
 0x159   :  { %5205 = vmatprep.mubr.msk.bf16.mxu1 %vm44_vm0, %v304_v30  ;;  %v295_v31 = vadd.f32 %v6413_v24, %v272_v12 }
 0x15b   :  { %v305_v32 = vpack.c.bf16 %v295_v31, %v294_v16 }
 0x15d   :  { %5206 = vmatmul.mubr.msk.bf16.vlgmr.msra.gmra.mrb[0].mxu1 %vm44_vm0, %v305_v32 }
 0x1c2   :  { %v180_v33 = vpop.xlane.xlu0 %179 }
 0x1c3   :  { %v202_v34 = vmul.f32 0.03125, %v180_v33 }
 0x1c5   :  { %v218_v35 = vadd.f32 1e-05, %v202_v34 }
 0x1c6   :  { %v183_v38 = vpop.xlane.xlu1 %182  ;;  %v186_v39 = vpop.xlane.xlu0 %185 }
 0x1c7   :  { %5899 = vrsqrt.f32 %v218_v35  ;;  %v203_v17 = vmul.f32 0.03125, %v183_v38  ;;  %v204_v29 = vmul.f32 0.03125, %v186_v39 }
 0x1c9   :  { %v219_v40 = vadd.f32 1e-05, %v203_v17  ;;  %v220_v41 = vadd.f32 1e-05, %v204_v29 }
 0x1ca   :  { %v189_v42 = vpop.xlane.xlu1 %188 }
 0x1cb   :  { %5901 = vrsqrt.f32 %v219_v40  ;;  %v205_v43 = vmul.f32 0.03125, %v189_v42 }
 0x1cc   :  { %5903 = vrsqrt.f32 %v220_v41 }
 0x1cd   :  { %v221_v44 = vadd.f32 1e-05, %v205_v43 }
 0x1cf   :  { %5905 = vrsqrt.f32 %v221_v44 }
 0x1d1   :  { %v5900_v46 = vpop.eup %5899 }
 0x1d2   :  { %v250_v47 = vmul.f32 %v5900_v46, %v6380_v49 }
 0x1d4   :  { %v273_v51 = vmul.f32 %v6399_v53, %v250_v47 }
 0x1d5   :  { %v5902_v37 = vpop.eup %5901 }
 0x1d6   :  { %v5904_v48 = vpop.eup %5903  ;;  %v251_v50 = vmul.f32 %v5902_v37, %v6385_v60  ;;  %v296_v59 = vadd.f32 %v6413_v24, %v273_v51 }
 0x1d7   :  { %v252_v54 = vmul.f32 %v5904_v48, %v6388_v61 }
 0x1d8   :  { %v274_v57 = vmul.f32 %v6399_v53, %v251_v50 }
 0x1d9   :  { %v5906_v58 = vpop.eup %5905  ;;  %v275_v45 = vmul.f32 %v6399_v53, %v252_v54 }
 0x1da   :  { %v297_v0 = vadd.f32 %v6413_v24, %v274_v57  ;;  %v253_v1 = vmul.f32 %v5906_v58, %v6402_v9 }
 0x1db   :  { %v298_v60 = vadd.f32 %v6413_v24, %v275_v45 }
 0x1dc   :  { %v306_v49 = vpack.c.bf16 %v297_v0, %v296_v59  ;;  %v276_v3 = vmul.f32 %v6399_v53, %v253_v1  ;;  %v8223_v53 = vmov 0.0  }
 0x1dd   :  { %5213 = vmatprep.subr.bf16.mxu1 %v8223_v53  ;;  %5237 = vmatprep.subr.bf16.mxu0 %v8223_v53 }
 0x1de   :  { %5209 = vmatprep.mubr.msk.bf16.mxu1 %vm44_vm0, %v306_v49  ;;  %v299_v61 = vadd.f32 %v6413_v24, %v276_v3  ;;  %5239 = vmatprep.mubr.msk.bf16.mxu0 %vm6167_vm1, %v8223_v53 }
 0x1e0   :  { %v307_v4 = vpack.c.bf16 %v299_v61, %v298_v60 }
 0x1e2   :  { %5210 = vmatmul.mubr.msk.bf16.gmra.mrb[4].mxu1 %vm44_vm0, %v307_v4 }
 0x1e3   :  { %5215 = vmatprep.mubr.msk.bf16.mxu1 %vm6167_vm1, %v8223_v53 }
 0x218   :  { %v5199_v5 = vpop.f32.mrb[0].mxu0 }
 0x219   :  { %v382_v6 = vpop.f32.mrb[1].mxu0 }
 0x21a   :  { %v5200_v7 = vpop.f32.mrb[2].mxu0 }
 0x21b   :  { %v385_v55 = vpop.f32.mrb[3].mxu0  ;;  %v5651_v10 = vpack.i.bf16 %v5200_v7, %v5199_v5  ;;  %v6469_v9 = vpack.c.bf16 %v5200_v7, %v5199_v5 }
 0x21c   :  { %v5636_v28 = vpack.i.bf16 %v385_v55, %v382_v6  ;;  %v6471_v52 = vpack.c.bf16 %v385_v55, %v382_v6 }
 0x21e   :  { %5637 = vrot.lane.b32.xlu1 %v5636_v28, %s6163_s3  ;;  %5632 = vrot.lane.b32.xlu0 %v5636_v28, %s6164_s15 }
 0x222   :  { %5642 = vrot.lane.b32.xlu1 %v5636_v28, %s6165_s16  ;;  %5652 = vrot.lane.b32.xlu0 %v5651_v10, %s6163_s3 }
 0x226   :  { %5647 = vrot.lane.b32.xlu1 %v5651_v10, %s6164_s15 }
 0x228   :  { %v5203_v24 = vpop.f32.mrb[4].mxu0 }
 0x229   :  { %v398_v11 = vpop.f32.mrb[5].mxu0 }
 0x22a   :  { %5657 = vrot.lane.b32.xlu1 %v5651_v10, %s6165_s16  ;;  %v5204_v13 = vpop.f32.mrb[6].mxu0 }
 0x22b   :  { %v401_v14 = vpop.f32.mrb[7].mxu0  ;;  %v5676_v56 = vpack.i.bf16 %v5204_v13, %v5203_v24  ;;  %v6483_v15 = vpack.c.bf16 %v5204_v13, %v5203_v24 }
 0x22c   :  { %v5666_v18 = vpack.i.bf16 %v401_v14, %v398_v11  ;;  %v6487_v19 = vpack.c.bf16 %v401_v14, %v398_v11 }
 0x22e   :  { %5667 = vrot.lane.b32.xlu1 %v5666_v18, %s6163_s3  ;;  %5662 = vrot.lane.b32.xlu0 %v5666_v18, %s6164_s15 }
 0x230   :  { %v5207_v62 = vpop.f32.mrb[0].mxu1 }
 0x231   :  { %v414_v22 = vpop.f32.mrb[1].mxu1 }
 0x232   :  { %639 = vrot.lane.b32.xlu1 %v6471_v52, %s6168_s17  ;;  %5672 = vrot.lane.b32.xlu0 %v5666_v18, %s6165_s16  ;;  %v5208_v23 = vpop.f32.mrb[2].mxu1 }
 0x233   :  { %v417_v63 = vpop.f32.mrb[3].mxu1  ;;  %v5711_v2 = vpack.i.bf16 %v5208_v23, %v5207_v62  ;;  %v6494_v20 = vpack.c.bf16 %v5208_v23, %v5207_v62 }
 0x234   :  { %v5701_v8 = vpack.i.bf16 %v417_v63, %v414_v22  ;;  %v6496_v25 = vpack.c.bf16 %v417_v63, %v414_v22 }
 0x236   :  { %5677 = vrot.lane.b32.xlu0 %v5676_v56, %s6164_s15 }
 0x23a   :  { %5682 = vrot.lane.b32.xlu0 %v5676_v56, %s6163_s3 }
 0x290   :  { %v5638_v26 = vpop.permute.xlu1 %5637  ;;  %v5633_v27 = vpop.permute.xlu0 %5632 }
 0x291   :  { %v5640_v36 = vunpack.i.h.bf16 %v5638_v26  ;;  %v5639_v21 = vunpack.i.l.bf16 %v5638_v26  ;;  %v5635_v30 = vunpack.i.h.bf16 %v5633_v27  ;;  %v5634_v12 = vunpack.i.l.bf16 %v5633_v27 }
 0x293   :  { %v6500_v16 = vpack.c.bf16 %v5640_v36, %v5639_v21  ;;  %v6502_v31 = vpack.c.bf16 %v5635_v30, %v5634_v12 }
 0x294   :  { %v5643_v32 = vpop.permute.xlu1 %5642  ;;  %v5653_v29 = vpop.permute.xlu0 %5652 }
 0x295   :  { %v5645_v33 = vunpack.i.h.bf16 %v5643_v32  ;;  %v5644_v34 = vunpack.i.l.bf16 %v5643_v32  ;;  %740 = vrot.lane.b32.xlu0 %v6500_v16, %s6168_s17  ;;  %690 = vrot.lane.b32.xlu1 %v6502_v31, %s6168_s17  ;;  %v5655_v41 = vunpack.i.h.bf16 %v5653_v29  ;;  %v5654_v42 = vunpack.i.l.bf16 %v5653_v29 }
 0x297   :  { %v6508_v35 = vpack.c.bf16 %v5645_v33, %v5644_v34  ;;  %v6520_v46 = vpack.c.bf16 %v5655_v41, %v5654_v42 }
 0x298   :  { %v5648_v38 = vpop.permute.xlu1 %5647 }
 0x299   :  { %790 = vrot.lane.b32.xlu0 %v6508_v35, %s6168_s17  ;;  %5687 = vrot.lane.b32.xlu1 %v5676_v56, %s6165_s16  ;;  %v5650_v39 = vunpack.i.h.bf16 %v5648_v38  ;;  %v5649_v17 = vunpack.i.l.bf16 %v5648_v38 }
 0x29b   :  { %v6515_v43 = vpack.c.bf16 %v5650_v39, %v5649_v17 }
 0x29c   :  { %v5658_v40 = vpop.permute.xlu1 %5657 }
 0x29d   :  { %5702 = vrot.lane.b32.xlu0 %v5701_v8, %s6165_s16  ;;  %5692 = vrot.lane.b32.xlu1 %v5701_v8, %s6164_s15  ;;  %v5660_v48 = vunpack.i.h.bf16 %v5658_v40  ;;  %v5659_v50 = vunpack.i.l.bf16 %v5658_v40 }
 0x29f   :  { %v6530_v51 = vpack.c.bf16 %v5660_v48, %v5659_v50 }
 0x2a0   :  { %v5668_v44 = vpop.permute.xlu1 %5667  ;;  %v5663_v54 = vpop.permute.xlu0 %5662 }
 0x2a1   :  { %890 = vrot.lane.b32.xlu0 %v6515_v43, %s6168_s17  ;;  %5697 = vrot.lane.b32.xlu1 %v5701_v8, %s6163_s3  ;;  %v5665_v57 = vunpack.i.h.bf16 %v5663_v54  ;;  %v5664_v58 = vunpack.i.l.bf16 %v5663_v54  ;;  %v5670_v59 = vunpack.i.h.bf16 %v5668_v44  ;;  %v5669_v0 = vunpack.i.l.bf16 %v5668_v44 }
 0x2a3   :  { %v6541_v45 = vpack.c.bf16 %v5665_v57, %v5664_v58  ;;  %v6545_v5 = vpack.c.bf16 %v5670_v59, %v5669_v0 }
 0x2a4   :  { %v640_v47 = vpop.permute.xlu1 %639  ;;  %v5673_v1 = vpop.permute.xlu0 %5672 }
 0x2a5   :  { %v646_v37 = vsel %vm641_vm2, %v640_v47, 0  ;;  %940 = vrot.lane.b32.xlu0 %v6520_v46, %s6168_s17  ;;  %840 = vrot.lane.b32.xlu1 %v6469_v9, %s6168_s17  ;;  %v5675_v60 = vunpack.i.h.bf16 %v5673_v1  ;;  %v5674_v61 = vunpack.i.l.bf16 %v5673_v1 }
 0x2a6   :  { %5214 = vmatpush3.bf16.xpose.msra.mxu1 %v646_v37 }
 0x2a7   :  { %5219 = vmatprep.subr.bf16.mxu1 %v8223_v53  ;;  %v6554_v11 = vpack.c.bf16 %v5675_v60, %v5674_v61 }
 0x2a8   :  { %v5678_v24 = vpop.permute.xlu0 %5677 }
 0x2a9   :  { %5712 = vrot.lane.b32.xlu0 %v5711_v2, %s6163_s3  ;;  %5707 = vrot.lane.b32.xlu1 %v5711_v2, %s6164_s15  ;;  %v5680_v13 = vunpack.i.h.bf16 %v5678_v24  ;;  %v5679_v14 = vunpack.i.l.bf16 %v5678_v24 }
 0x2ab   :  { %v6562_v22 = vpack.c.bf16 %v5680_v13, %v5679_v14 }
 0x2ac   :  { %v5683_v56 = vpop.permute.xlu0 %5682 }
 0x2ad   :  { %5216 = vmatmul.mubr.msk.bf16.vlgmr.msra.gmra.mrb[8].mxu1 %vm641_vm2, %v6471_v52  ;;  %1040 = vrot.lane.b32.xlu0 %v6487_v19, %s6168_s17  ;;  %v5685_v18 = vunpack.i.h.bf16 %v5683_v56  ;;  %v5684_v62 = vunpack.i.l.bf16 %v5683_v56 }
 0x2ae   :  { %990 = vrot.lane.b32.xlu1 %v6530_v51, %s6168_s17  ;;  %5221 = vmatprep.mubr.msk.bf16.mxu1 %vm6167_vm1, %v8223_v53 }
 0x2af   :  { %v6567_v23 = vpack.c.bf16 %v5685_v18, %v5684_v62 }
 0x2b2   :  { %5717 = vrot.lane.b32.xlu1 %v5711_v2, %s6165_s16 }
 0x2b5   :  { %v5211_v49 = vpop.f32.mrb[4].mxu1 }
 0x2b6   :  { %1090 = vrot.lane.b32.xlu1 %v6541_v45, %s6168_s17  ;;  %v430_v3 = vpop.f32.mrb[5].mxu1 }
 0x2b7   :  { %v5212_v4 = vpop.f32.mrb[6].mxu1 }
 0x2b8   :  { %v433_v6 = vpop.f32.mrb[7].mxu1  ;;  %v5736_v7 = vpack.i.bf16 %v5212_v4, %v5211_v49  ;;  %v6547_v55 = vpack.c.bf16 %v5212_v4, %v5211_v49 }
 0x2b9   :  { %v5721_v10 = vpack.i.bf16 %v433_v6, %v430_v3  ;;  %v6549_v28 = vpack.c.bf16 %v433_v6, %v430_v3 }
 0x2ba   :  { %8265 = vst [vmem:[#allocation3_spill] sm:$0xff] %v6547_v55  ;;  %1140 = vrot.lane.b32.xlu1 %v6545_v5, %s6168_s17 }
 0x2bb   :  { %5722 = vrot.lane.b32.xlu0 %v5721_v10, %s6164_s15 }
 0x2be   :  { %5727 = vrot.lane.b32.xlu1 %v5721_v10, %s6163_s3 }
 0x2bf   :  { %1190 = vrot.lane.b32.xlu0 %v6554_v11, %s6168_s17 }
 0x2c2   :  { %1240 = vrot.lane.b32.xlu1 %v6483_v15, %s6168_s17 }
 0x2c3   :  { %5732 = vrot.lane.b32.xlu0 %v5721_v10, %s6165_s16 }
 0x2c6   :  { %5737 = vrot.lane.b32.xlu1 %v5736_v7, %s6164_s15 }
 0x2c7   :  { %1290 = vrot.lane.b32.xlu0 %v6562_v22, %s6168_s17 }
 0x2cb   :  { %1340 = vrot.lane.b32.xlu0 %v6567_v23, %s6168_s17 }
 0x2cf   :  { %5742 = vrot.lane.b32.xlu0 %v5736_v7, %s6163_s3 }
 0x2d3   :  { %1440 = vrot.lane.b32.xlu0 %v6496_v25, %s6168_s17 }
 0x307   :  { %v741_v63 = vpop.permute.xlu0 %740  ;;  %v691_v2 = vpop.permute.xlu1 %690 }
 0x308   :  { %v696_v8 = vsel %vm641_vm2, %v691_v2, 0  ;;  %v746_v33 = vsel %vm641_vm2, %v741_v63, 0 }
 0x309   :  { %5220 = vmatpush3.bf16.xpose.msra.mxu1 %v696_v8 }
 0x30a   :  { %5225 = vmatprep.subr.bf16.mxu1 %v8223_v53 }
 0x30b   :  { %v791_v26 = vpop.permute.xlu0 %790  ;;  %v5688_v27 = vpop.permute.xlu1 %5687 }
 0x30c   :  { %v5690_v36 = vunpack.i.h.bf16 %v5688_v27  ;;  %v5689_v21 = vunpack.i.l.bf16 %v5688_v27  ;;  %v796_v50 = vsel %vm641_vm2, %v791_v26, 0 }
 0x30e   :  { %v6576_v30 = vpack.c.bf16 %v5690_v36, %v5689_v21 }
 0x30f   :  { %v5703_v12 = vpop.permute.xlu0 %5702  ;;  %v5693_v32 = vpop.permute.xlu1 %5692 }
 0x310   :  { %5222 = vmatmul.mubr.msk.bf16.vlgmr.msra.gmra.mrb[12].mxu1 %vm641_vm2, %v6502_v31  ;;  %1390 = vrot.lane.b32.xlu1 %v6576_v30, %s6168_s17  ;;  %v5695_v34 = vunpack.i.h.bf16 %v5693_v32  ;;  %v5694_v38 = vunpack.i.l.bf16 %v5693_v32  ;;  %v5705_v42 = vunpack.i.h.bf16 %v5703_v12  ;;  %v5704_v44 = vunpack.i.l.bf16 %v5703_v12 }
 0x311   :  { %5226 = vmatpush3.bf16.xpose.msra.mxu1 %v746_v33  ;;  %5227 = vmatprep.mubr.msk.bf16.mxu1 %vm6167_vm1, %v8223_v53 }
 0x312   :  { %5231 = vmatprep.subr.bf16.mxu1 %v8223_v53  ;;  %v6589_v48 = vpack.c.bf16 %v5695_v34, %v5694_v38  ;;  %v6601_v59 = vpack.c.bf16 %v5705_v42, %v5704_v44 }
 0x313   :  { %v891_v39 = vpop.permute.xlu0 %890  ;;  %v5698_v17 = vpop.permute.xlu1 %5697 }
 0x314   :  { %v5700_v29 = vunpack.i.h.bf16 %v5698_v17  ;;  %v5699_v40 = vunpack.i.l.bf16 %v5698_v17  ;;  %5747 = vrot.lane.b32.xlu1 %v5736_v7, %s6165_s16  ;;  %v896_v6 = vsel %vm641_vm2, %v891_v39, 0 }
 0x316   :  { %v6587_v41 = vpack.c.bf16 %v5700_v29, %v5699_v40 }
 0x317   :  { %v941_v47 = vpop.permute.xlu0 %940  ;;  %v841_v37 = vpop.permute.xlu1 %840 }
 0x318   :  { %v846_v54 = vsel %vm641_vm2, %v841_v37, 0  ;;  %5228 = vmatmul.mubr.msk.bf16.vlgmr.msra.gmra.mrb[16].mxu1 %vm641_vm2, %v6500_v16  ;;  %1540 = vrot.lane.b32.xlu0 %v6587_v41, %s6168_s17  ;;  %v946_v7 = vsel %vm641_vm2, %v941_v47, 0 }
 0x319   :  { %1490 = vrot.lane.b32.xlu1 %v6589_v48, %s6168_s17  ;;  %5232 = vmatpush3.bf16.xpose.msra.mxu1 %v796_v50 }
 0x31a   :  { %5238 = vmatpush3.bf16.xpose.msra.mxu0 %v846_v54  ;;  %5233 = vmatprep.mubr.msk.bf16.mxu1 %vm6167_vm1, %v8223_v53 }
 0x31b   :  { %v5713_v57 = vpop.permute.xlu0 %5712  ;;  %v5708_v58 = vpop.permute.xlu1 %5707  ;;  %5243 = vmatprep.subr.bf16.mxu1 %v8223_v53  ;;  %5249 = vmatprep.subr.bf16.mxu0 %v8223_v53 }
 0x31c   :  { %v5715_v0 = vunpack.i.h.bf16 %v5713_v57  ;;  %v5714_v1 = vunpack.i.l.bf16 %v5713_v57  ;;  %v5710_v49 = vunpack.i.h.bf16 %v5708_v58  ;;  %v5709_v3 = vunpack.i.l.bf16 %v5708_v58  ;;  %1640 = vrot.lane.b32.xlu0 %v6494_v20, %s6168_s17 }
 0x31d   :  { %1590 = vrot.lane.b32.xlu1 %v6601_v59, %s6168_s17 }
 0x31e   :  { %v6609_v60 = vpack.c.bf16 %v5715_v0, %v5714_v1  ;;  %v6611_v61 = vpack.c.bf16 %v5710_v49, %v5709_v3 }
 0x31f   :  { %v1041_v14 = vpop.permute.xlu0 %1040 }
 0x320   :  { %v991_v4 = vpop.permute.xlu1 %990  ;;  %5234 = vmatmul.mubr.msk.bf16.vlgmr.msra.gmra.mrb[20].mxu1 %vm641_vm2, %v6508_v35  ;;  %1740 = vrot.lane.b32.xlu0 %v6609_v60, %s6168_s17  ;;  %v1046_v63 = vsel %vm641_vm2, %v1041_v14, 0 }
 0x321   :  { %5240 = vmatmul.mubr.msk.bf16.vlgmr.msra.gmra.mrb[8].mxu0 %vm641_vm2, %v6469_v9  ;;  %1690 = vrot.lane.b32.xlu1 %v6611_v61, %s6168_s17  ;;  %v996_v62 = vsel %vm641_vm2, %v991_v4, 0 }
 0x322   :  { %5244 = vmatpush3.bf16.xpose.msra.mxu1 %v896_v6  ;;  %5250 = vmatpush3.bf16.xpose.msra.mxu0 %v946_v7 }
 0x323   :  { %5245 = vmatprep.mubr.msk.bf16.mxu1 %vm6167_vm1, %v8223_v53  ;;  %5251 = vmatprep.mubr.msk.bf16.mxu0 %vm6167_vm1, %v8223_v53 }
 0x324   :  { %v5718_v10 = vpop.permute.xlu1 %5717  ;;  %1840 = vrot.lane.b32.xlu0 %v6549_v28, %s6168_s17  ;;  %5255 = vmatprep.subr.bf16.mxu1 %v8223_v53 }
 0x325   :  { %v5720_v24 = vunpack.i.h.bf16 %v5718_v10  ;;  %v5719_v13 = vunpack.i.l.bf16 %v5718_v10  ;;  %5261 = vmatprep.subr.bf16.mxu0 %v8223_v53 }
 0x327   :  { %v6631_v56 = vpack.c.bf16 %v5720_v24, %v5719_v13 }
 0x328   :  { %v1091_v18 = vpop.permute.xlu1 %1090  ;;  %2040 = vrot.lane.b32.xlu0 %v6547_v55, %s6168_s17 }
 0x329   :  { %5246 = vmatmul.mubr.msk.bf16.vlgmr.msra.gmra.mrb[24].mxu1 %vm641_vm2, %v6515_v43  ;;  %5252 = vmatmul.mubr.msk.bf16.vlgmr.msra.gmra.mrb[12].mxu0 %vm641_vm2, %v6520_v46  ;;  %v1096_v12 = vsel %vm641_vm2, %v1091_v18, 0 }
 0x32a   :  { %1790 = vrot.lane.b32.xlu1 %v6631_v56, %s6168_s17  ;;  %5256 = vmatpush3.bf16.xpose.msra.mxu1 %v996_v62 }
 0x32b   :  { %5262 = vmatpush3.bf16.xpose.msra.mxu0 %v1046_v63  ;;  %5257 = vmatprep.mubr.msk.bf16.mxu1 %vm6167_vm1, %v8223_v53 }
 0x32c   :  { %v1141_v2 = vpop.permute.xlu1 %1140  ;;  %5263 = vmatprep.mubr.msk.bf16.mxu0 %vm6167_vm1, %v8223_v53  ;;  %5267 = vmatprep.subr.bf16.mxu1 %v8223_v53 }
 0x32d   :  { %v5723_v8 = vpop.permute.xlu0 %5722  ;;  %5273 = vmatprep.subr.bf16.mxu0 %v8223_v53  ;;  %v1146_v38 = vsel %vm641_vm2, %v1141_v2, 0 }
 0x32e   :  { %v5725_v26 = vunpack.i.h.bf16 %v5723_v8  ;;  %v5724_v27 = vunpack.i.l.bf16 %v5723_v8 }
 0x330   :  { %v5728_v36 = vpop.permute.xlu1 %5727  ;;  %v6649_v21 = vpack.c.bf16 %v5725_v26, %v5724_v27 }
 0x331   :  { %v5730_v32 = vunpack.i.h.bf16 %v5728_v36  ;;  %v5729_v33 = vunpack.i.l.bf16 %v5728_v36  ;;  %5258 = vmatmul.mubr.msk.bf16.vlgmr.msra.gmra.mrb[28].mxu1 %vm641_vm2, %v6530_v51  ;;  %v1191_v34 = vpop.permute.xlu0 %1190 }
 0x332   :  { %5264 = vmatmul.mubr.msk.bf16.vlgmr.msra.gmra.mrb[16].mxu0 %vm641_vm2, %v6487_v19  ;;  %5268 = vmatpush3.bf16.xpose.msra.mxu1 %v1096_v12  ;;  %v1196_v42 = vsel %vm641_vm2, %v1191_v34, 0 }
 0x333   :  { %5274 = vmatpush3.bf16.xpose.msra.mxu0 %v1146_v38  ;;  %1890 = vrot.lane.b32.xlu1 %v6649_v21, %s6168_s17  ;;  %v6659_v39 = vpack.c.bf16 %v5730_v32, %v5729_v33 }
 0x334   :  { %v1241_v17 = vpop.permute.xlu1 %1240  ;;  %5269 = vmatprep.mubr.msk.bf16.mxu1 %vm6167_vm1, %v8223_v53  ;;  %5275 = vmatprep.mubr.msk.bf16.mxu0 %vm6167_vm1, %v8223_v53 }
 0x335   :  { %1940 = vrot.lane.b32.xlu0 %v6659_v39, %s6168_s17  ;;  %v5733_v29 = vpop.permute.xlu0 %5732  ;;  %5279 = vmatprep.subr.bf16.mxu1 %v8223_v53  ;;  %v1246_v50 = vsel %vm641_vm2, %v1241_v17, 0 }
 0x336   :  { %5285 = vmatprep.subr.bf16.mxu0 %v8223_v53  ;;  %v5735_v54 = vunpack.i.h.bf16 %v5733_v29  ;;  %v5734_v57 = vunpack.i.l.bf16 %v5733_v29 }
 0x338   :  { %v5738_v40 = vpop.permute.xlu1 %5737  ;;  %v6685_v1 = vpack.c.bf16 %v5735_v54, %v5734_v57 }
 0x339   :  { %v5740_v44 = vunpack.i.h.bf16 %v5738_v40  ;;  %v5739_v47 = vunpack.i.l.bf16 %v5738_v40  ;;  %5270 = vmatmul.mubr.msk.bf16.vlgmr.msra.gmra.mrb[32].mxu1 %vm641_vm2, %v6541_v45  ;;  %v1291_v37 = vpop.permute.xlu0 %1290 }
 0x33a   :  { %5276 = vmatmul.mubr.msk.bf16.vlgmr.msra.gmra.mrb[20].mxu0 %vm641_vm2, %v6545_v5  ;;  %5280 = vmatpush3.bf16.xpose.msra.mxu1 %v1196_v42  ;;  %v1296_v49 = vsel %vm641_vm2, %v1291_v37, 0 }
 0x33b   :  { %5286 = vmatpush3.bf16.xpose.msra.mxu0 %v1246_v50  ;;  %v6675_v58 = vpack.c.bf16 %v5740_v44, %v5739_v47  ;;  %5281 = vmatprep.mubr.msk.bf16.mxu1 %vm6167_vm1, %v8223_v53  ;;  %v6883_v50 = vstv %s8219_s0  ;;  %s6170_s0 = smov 8  }
 0x33c   :  { %5287 = vmatprep.mubr.msk.bf16.mxu0 %vm6167_vm1, %v8223_v53  ;;  %5291 = vmatprep.subr.bf16.mxu1 %v8223_v53 }
 0x33d   :  { %8266 = vst [vmem:[#allocation4_spill] sm:$0xff] %v6675_v58  ;;  %2090 = vrot.lane.b32.xlu1 %v6675_v58, %s6168_s17  ;;  %v1341_v0 = vpop.permute.xlu0 %1340  ;;  %5297 = vmatprep.subr.bf16.mxu0 %v8223_v53 }
 0x33e   :  { %v1346_v4 = vsel %vm641_vm2, %v1341_v0, 0 }
 0x341   :  { %5282 = vmatmul.mubr.msk.bf16.vlgmr.msra.gmra.mrb[36].mxu1 %vm641_vm2, %v6554_v11  ;;  %1990 = vrot.lane.b32.xlu1 %v6685_v1, %s6168_s17  ;;  %v5743_v3 = vpop.permute.xlu0 %5742 }
 0x342   :  { %5288 = vmatmul.mubr.msk.bf16.vlgmr.msra.gmra.mrb[24].mxu0 %vm641_vm2, %v6483_v15  ;;  %v5745_v6 = vunpack.i.h.bf16 %v5743_v3  ;;  %v5744_v7 = vunpack.i.l.bf16 %v5743_v3  ;;  %5292 = vmatpush3.bf16.xpose.msra.mxu1 %v1296_v49 }
 0x343   :  { %5298 = vmatpush3.bf16.xpose.msra.mxu0 %v1346_v4  ;;  %5293 = vmatprep.mubr.msk.bf16.mxu1 %vm6167_vm1, %v8223_v53 }
 0x344   :  { %v6697_v10 = vpack.c.bf16 %v5745_v6, %v5744_v7  ;;  %5299 = vmatprep.mubr.msk.bf16.mxu0 %vm6167_vm1, %v8223_v53  ;;  %5309 = vmatprep.subr.bf16.mxu0 %v8223_v53 }
 0x345   :  { %5303 = vmatprep.subr.bf16.mxu1 %v8223_v53  ;;  %v1441_v24 = vpop.permute.xlu0 %1440 }
 0x346   :  { %8267 = vst [vmem:[#allocation5_spill] sm:$0xff] %v6697_v10  ;;  %2140 = vrot.lane.b32.xlu0 %v6697_v10, %s6168_s17  ;;  %v1446_v13 = vsel %vm641_vm2, %v1441_v24, 0 }
 0x349   :  { %5294 = vmatmul.mubr.msk.bf16.vlgmr.msra.gmra.mrb[40].mxu1 %vm641_vm2, %v6562_v22 }
 0x34a   :  { %5300 = vmatmul.mubr.msk.bf16.vlgmr.msra.gmra.mrb[28].mxu0 %vm641_vm2, %v6567_v23  ;;  %3041 = vrot.lane.b32.xlu0 %v6471_v52, %s6169_s18 }
 0x34b   :  { %5310 = vmatpush3.bf16.xpose.msra.mxu0 %v1446_v13  ;;  %5311 = vmatprep.mubr.msk.bf16.mxu0 %vm6167_vm1, %v8223_v53 }
 0x34c   :  { %5305 = vmatprep.mubr.msk.bf16.mxu1 %vm6167_vm1, %v8223_v53  ;;  %5321 = vmatprep.subr.bf16.mxu0 %v8223_v53 }
 0x34e   :  { %3135 = vrot.lane.b32.xlu0 %v6500_v16, %s6169_s18 }
 0x352   :  { %5312 = vmatmul.mubr.msk.bf16.vlgmr.msra.gmra.mrb[32].mxu0 %vm641_vm2, %v6496_v25  ;;  %3229 = vrot.lane.b32.xlu0 %v6469_v9, %s6169_s18 }
 0x353   :  { %5323 = vmatprep.mubr.msk.bf16.mxu0 %vm6167_vm1, %v8223_v53 }
 0x356   :  { %3323 = vrot.lane.b32.xlu0 %v6520_v46, %s6169_s18 }
 0x35a   :  { %3417 = vrot.lane.b32.xlu0 %v6487_v19, %s6169_s18 }
 0x35e   :  { %3605 = vrot.lane.b32.xlu0 %v6483_v15, %s6169_s18 }
 0x362   :  { %3699 = vrot.lane.b32.xlu0 %v6567_v23, %s6169_s18 }
 0x366   :  { %3793 = vrot.lane.b32.xlu0 %v6496_v25, %s6169_s18 }
 0x36a   :  { %3887 = vrot.lane.b32.xlu0 %v6587_v41, %s6169_s18 }
 0x36e   :  { %3981 = vrot.lane.b32.xlu0 %v6494_v20, %s6169_s18 }
 0x372   :  { %4075 = vrot.lane.b32.xlu0 %v6609_v60, %s6169_s18 }
 0x376   :  { %4169 = vrot.lane.b32.xlu0 %v6549_v28, %s6169_s18 }
 0x37a   :  { %3511 = vrot.lane.b32.xlu0 %v6545_v5, %s6169_s18 }
 0x380   :  { %v6745_v9 = vpop.f32.mrb[8].mxu1 }
 0x381   :  { %v5217_v52 = vpop.f32.mrb[9].mxu1  ;;  %v6892_v6 = vmul.f32 %v6883_v50, %v6745_v9 }
 0x382   :  { %v6747_v15 = vpop.f32.mrb[10].mxu1  ;;  %v1391_v19 = vpop.permute.xlu1 %1390 }
 0x383   :  { %v1396_v25 = vsel %vm641_vm2, %v1391_v19, 0  ;;  %v5218_v16 = vpop.f32.mrb[11].mxu1  ;;  %v6901_v52 = vmul.f32 %v6883_v50, %v6747_v15  ;;  %v2305_v9 = vsel %vm2304_vm3, %v6892_v6, -inf }
 0x384   :  { %5304 = vmatpush3.bf16.xpose.msra.mxu1 %v1396_v25 }
 0x385   :  { %5315 = vmatprep.subr.bf16.mxu1 %v8223_v53  ;;  %v2308_v15 = vsel %vm2304_vm3, %v6901_v52, -inf }
 0x386   :  { %v5748_v46 = vpop.permute.xlu1 %5747 }
 0x387   :  { %v5750_v23 = vunpack.i.h.bf16 %v5748_v46  ;;  %v5749_v14 = vunpack.i.l.bf16 %v5748_v46 }
 0x389   :  { %v6751_v18 = vpack.c.bf16 %v5750_v23, %v5749_v14 }
 0x38a   :  { %v1541_v62 = vpop.permute.xlu0 %1540 }
 0x38b   :  { %8268 = vst [vmem:[#allocation6_spill] sm:$0xff] %v6751_v18  ;;  %v1546_v5 = vsel %vm641_vm2, %v1541_v62, 0  ;;  %v1491_v63 = vpop.permute.xlu1 %1490  ;;  %5306 = vmatmul.mubr.msk.bf16.vlgmr.msra.gmra.mrb[44].mxu1 %vm641_vm2, %v6576_v30  ;;  %2190 = vrot.lane.b32.xlu1 %v6751_v18, %s6168_s17 }
 0x38c   :  { %v1496_v2 = vsel %vm641_vm2, %v1491_v63, 0  ;;  %5322 = vmatpush3.bf16.xpose.msra.mxu0 %v1546_v5  ;;  %5317 = vmatprep.mubr.msk.bf16.mxu1 %vm6167_vm1, %v8223_v53 }
 0x38d   :  { %5316 = vmatpush3.bf16.xpose.msra.mxu1 %v1496_v2  ;;  %5333 = vmatprep.subr.bf16.mxu0 %v8223_v53 }
 0x38e   :  { %5327 = vmatprep.subr.bf16.mxu1 %v8223_v53  ;;  %v1641_v8 = vpop.permute.xlu0 %1640 }
 0x38f   :  { %3088 = vrot.lane.b32.xlu1 %v6502_v31, %s6169_s18  ;;  %v1591_v26 = vpop.permute.xlu1 %1590  ;;  %v1646_v27 = vsel %vm641_vm2, %v1641_v8, 0 }
 0x390   :  { %v1596_v36 = vsel %vm641_vm2, %v1591_v26, 0 }
 0x392   :  { %v1741_v31 = vpop.permute.xlu0 %1740 }
 0x393   :  { %5324 = vmatmul.mubr.msk.bf16.vlgmr.msra.gmra.mrb[36].mxu0 %vm641_vm2, %v6587_v41  ;;  %3182 = vrot.lane.b32.xlu1 %v6508_v35, %s6169_s18  ;;  %v1691_v35 = vpop.permute.xlu1 %1690  ;;  %v1746_v41 = vsel %vm641_vm2, %v1741_v31, 0 }
 0x394   :  { %5318 = vmatmul.mubr.msk.bf16.vlgmr.msra.gmra.mrb[48].mxu1 %vm641_vm2, %v6589_v48  ;;  %5334 = vmatpush3.bf16.xpose.msra.mxu0 %v1646_v27  ;;  %v1696_v12 = vsel %vm641_vm2, %v1691_v35, 0 }
 0x395   :  { %5328 = vmatpush3.bf16.xpose.msra.mxu1 %v1596_v36  ;;  %5335 = vmatprep.mubr.msk.bf16.mxu0 %vm6167_vm1, %v8223_v53 }
 0x396   :  { %5329 = vmatprep.mubr.msk.bf16.mxu1 %vm6167_vm1, %v8223_v53  ;;  %5339 = vmatprep.subr.bf16.mxu1 %v8223_v53 }
 0x397   :  { %3276 = vrot.lane.b32.xlu1 %v6515_v43, %s6169_s18  ;;  %5345 = vmatprep.subr.bf16.mxu0 %v8223_v53  ;;  %v1841_v43 = vpop.permute.xlu0 %1840 }
 0x39b   :  { %5336 = vmatmul.mubr.msk.bf16.vlgmr.msra.gmra.mrb[40].mxu0 %vm641_vm2, %v6494_v20  ;;  %3370 = vrot.lane.b32.xlu1 %v6530_v51, %s6169_s18  ;;  %v1846_v51 = vsel %vm641_vm2, %v1841_v43, 0  ;;  %v2041_v32 = vpop.permute.xlu0 %2040 }
 0x39c   :  { %5330 = vmatmul.mubr.msk.bf16.vlgmr.msra.gmra.mrb[52].mxu1 %vm641_vm2, %v6601_v59  ;;  %5346 = vmatpush3.bf16.xpose.msra.mxu0 %v1746_v41  ;;  %v1791_v20 = vpop.permute.xlu1 %1790 }
 0x39d   :  { %5340 = vmatpush3.bf16.xpose.msra.mxu1 %v1696_v12  ;;  %5341 = vmatprep.mubr.msk.bf16.mxu1 %vm6167_vm1, %v8223_v53  ;;  %v1796_v33 = vsel %vm641_vm2, %v1791_v20, 0 }
 0x39e   :  { %5347 = vmatprep.mubr.msk.bf16.mxu0 %vm6167_vm1, %v8223_v53  ;;  %5351 = vmatprep.subr.bf16.mxu1 %v8223_v53 }
 0x39f   :  { %3652 = vrot.lane.b32.xlu1 %v6562_v22, %s6169_s18  ;;  %5357 = vmatprep.subr.bf16.mxu0 %v8223_v53 }
 0x3a3   :  { %5348 = vmatmul.mubr.msk.bf16.vlgmr.msra.gmra.mrb[44].mxu0 %vm641_vm2, %v6609_v60  ;;  %3746 = vrot.lane.b32.xlu1 %v6576_v30, %s6169_s18 }
 0x3a4   :  { %5342 = vmatmul.mubr.msk.bf16.vlgmr.msra.gmra.mrb[56].mxu1 %vm641_vm2, %v6611_v61  ;;  %5358 = vmatpush3.bf16.xpose.msra.mxu0 %v1846_v51 }
 0x3a5   :  { %5352 = vmatpush3.bf16.xpose.msra.mxu1 %v1796_v33  ;;  %5353 = vmatprep.mubr.msk.bf16.mxu1 %vm6167_vm1, %v8223_v53  ;;  %v1891_v30 = vpop.permute.xlu1 %1890 }
 0x3a6   :  { %5359 = vmatprep.mubr.msk.bf16.mxu0 %vm6167_vm1, %v8223_v53  ;;  %5363 = vmatprep.subr.bf16.mxu1 %v8223_v53  ;;  %v1896_v34 = vsel %vm641_vm2, %v1891_v30, 0 }
 0x3a7   :  { %3840 = vrot.lane.b32.xlu1 %v6589_v48, %s6169_s18  ;;  %5369 = vmatprep.subr.bf16.mxu0 %v8223_v53  ;;  %v1941_v22 = vpop.permute.xlu0 %1940 }
 0x3a8   :  { %v1946_v60 = vsel %vm641_vm2, %v1941_v22, 0 }
 0x3ab   :  { %5360 = vmatmul.mubr.msk.bf16.vlgmr.msra.gmra.mrb[48].mxu0 %vm641_vm2, %v6549_v28  ;;  %3934 = vrot.lane.b32.xlu1 %v6601_v59, %s6169_s18  ;;  %v2046_v28 = vsel %vm641_vm2, %v2041_v32, 0 }
 0x3ac   :  { %5354 = vmatmul.mubr.msk.bf16.vlgmr.msra.gmra.mrb[60].mxu1 %vm641_vm2, %v6631_v56  ;;  %5370 = vmatpush3.bf16.xpose.msra.mxu0 %v1946_v60 }
 0x3ad   :  { %5364 = vmatpush3.bf16.xpose.msra.mxu1 %v1896_v34  ;;  %5365 = vmatprep.mubr.msk.bf16.mxu1 %vm6167_vm1, %v8223_v53 }
 0x3ae   :  { %5371 = vmatprep.mubr.msk.bf16.mxu0 %vm6167_vm1, %v8223_v53  ;;  %5375 = vmatprep.subr.bf16.mxu1 %v8223_v53 }
 0x3af   :  { %v2091_v48 = vpop.permute.xlu1 %2090  ;;  %4028 = vrot.lane.b32.xlu1 %v6611_v61, %s6169_s18  ;;  %5381 = vmatprep.subr.bf16.mxu0 %v8223_v53 }
 0x3b0   :  { %v2096_v17 = vsel %vm641_vm2, %v2091_v48, 0 }
 0x3b3   :  { %v1991_v59 = vpop.permute.xlu1 %1990  ;;  %5372 = vmatmul.mubr.msk.bf16.vlgmr.msra.gmra.mrb[52].mxu0 %vm641_vm2, %v6659_v39  ;;  %4122 = vrot.lane.b32.xlu1 %v6631_v56, %s6169_s18 }
 0x3b4   :  { %v1996_v38 = vsel %vm641_vm2, %v1991_v59, 0  ;;  %5366 = vmatmul.mubr.msk.bf16.vlgmr.msra.gmra.mrb[64].mxu1 %vm641_vm2, %v6649_v21  ;;  %5382 = vmatpush3.bf16.xpose.msra.mxu0 %v2046_v28 }
 0x3b5   :  { %5376 = vmatpush3.bf16.xpose.msra.mxu1 %v1996_v38  ;;  %5377 = vmatprep.mubr.msk.bf16.mxu1 %vm6167_vm1, %v8223_v53 }
 0x3b6   :  { %5383 = vmatprep.mubr.msk.bf16.mxu0 %vm6167_vm1, %v8223_v53  ;;  %5387 = vmatprep.subr.bf16.mxu1 %v8223_v53 }
 0x3b7   :  { %3464 = vrot.lane.b32.xlu1 %v6541_v45, %s6169_s18  ;;  %5393 = vmatprep.subr.bf16.mxu0 %v8223_v53 }
 0x3b8   :  { %v2141_v61 = vpop.permute.xlu0 %2140 }
 0x3b9   :  { %v2146_v56 = vsel %vm641_vm2, %v2141_v61, 0 }
 0x3bb   :  { %5384 = vmatmul.mubr.msk.bf16.vlgmr.msra.gmra.mrb[56].mxu0 %vm641_vm2, %v6547_v55  ;;  %3558 = vrot.lane.b32.xlu1 %v6554_v11, %s6169_s18 }
 0x3bc   :  { %5378 = vmatmul.mubr.msk.bf16.vlgmr.msra.gmra.mrb[68].mxu1 %vm641_vm2, %v6685_v1  ;;  %5394 = vmatpush3.bf16.xpose.msra.mxu0 %v2146_v56  ;;  %v3042_v45 = vpop.permute.xlu0 %3041 }
 0x3bd   :  { %5388 = vmatpush3.bf16.xpose.msra.mxu1 %v2096_v17  ;;  %5389 = vmatprep.mubr.msk.bf16.mxu1 %vm6167_vm1, %v8223_v53 }
 0x3be   :  { %5395 = vmatprep.mubr.msk.bf16.mxu0 %vm6167_vm1, %v8223_v53  ;;  %5405 = vmatprep.subr.bf16.mxu0 %v8223_v53 }
 0x3bf   :  { %4216 = vrot.lane.b32.xlu1 %v6649_v21, %s6169_s18  ;;  %5399 = vmatprep.subr.bf16.mxu1 %v8223_v53 }
 0x3c3   :  { %5396 = vmatmul.mubr.msk.bf16.vlgmr.msra.gmra.mrb[60].mxu0 %vm641_vm2, %v6697_v10  ;;  %4263 = vrot.lane.b32.xlu1 %v6659_v39, %s6169_s18 }
 0x3c4   :  { %5390 = vmatmul.mubr.msk.bf16.vlgmr.msra.gmra.mrb[72].mxu1 %vm641_vm2, %v6675_v58  ;;  %5406 = vmatpush3.bf16.msra.mxu0 %v3042_v45 }
 0x3c5   :  { %5401 = vmatprep.mubr.msk.bf16.mxu1 %vm6167_vm1, %v8223_v53  ;;  %5407 = vmatprep.mubr.msk.bf16.mxu0 %vm6167_vm1, %v8223_v53 }
 0x3c6   :  { %5417 = vmatprep.subr.bf16.mxu0 %v8223_v53 }
 0x3c7   :  { %4310 = vrot.lane.b32.xlu1 %v6685_v1, %s6169_s18 }
 0x3e3   :  { %v732_v11 = vpop.f32.mrb[12].mxu1 }
 0x3e4   :  { %v5223_v21 = vpop.f32.mrb[13].mxu1  ;;  %v6917_v63 = vmul.f32 %v6883_v50, %v732_v11 }
 0x3e5   :  { %v735_v29 = vpop.f32.mrb[14].mxu1 }
 0x3e6   :  { %v5224_v40 = vpop.f32.mrb[15].mxu1  ;;  %v6929_v41 = vmul.f32 %v6883_v50, %v735_v29  ;;  %v2311_v12 = vsel %vm2304_vm3, %v6917_v63, -inf }
 0x3e8   :  { %v2314_v34 = vsel %vm2304_vm3, %v6929_v41, -inf }
 0x3eb   :  { %v6874_v39 = vpop.f32.mrb[16].mxu1 }
 0x3ec   :  { %v5229_v42 = vpop.f32.mrb[17].mxu1  ;;  %v6958_v56 = vmul.f32 %v6883_v50, %v6874_v39 }
 0x3ed   :  { %v6876_v44 = vpop.f32.mrb[18].mxu1 }
 0x3ee   :  { %v5230_v47 = vpop.f32.mrb[19].mxu1  ;;  %v6951_v38 = vmul.f32 %v6883_v50, %v6876_v44 }
 0x3ef   :  { %v2317_v47 = vsel %vm2304_vm3, %v6958_v56, -inf }
 0x3f0   :  { %v2320_v42 = vsel %vm2304_vm3, %v6951_v38, -inf }
 0x3f3   :  { %v6878_v37 = vpop.f32.mrb[20].mxu1 }
 0x3f4   :  { %v882_v54 = vpop.f32.mrb[8].mxu0  ;;  %v5235_v57 = vpop.f32.mrb[21].mxu1 }
 0x3f5   :  { %v6886_v0 = vmul.f32 %v6883_v50, %v882_v54  ;;  %v5241_v1 = vpop.f32.mrb[9].mxu0  ;;  %v6888_v49 = vpop.f32.mrb[22].mxu1 }
 0x3f6   :  { %v885_v3 = vpop.f32.mrb[10].mxu0  ;;  %v5236_v4 = vpop.f32.mrb[23].mxu1 }
 0x3f7   :  { %v6895_v7 = vmul.f32 %v6883_v50, %v885_v3  ;;  %v5242_v24 = vpop.f32.mrb[11].mxu0  ;;  %v2329_v13 = vsel %vm2304_vm3, %v6886_v0, -inf  ;;  %v6978_v3 = vmul.f32 %v6883_v50, %v6888_v49 }
 0x3f8   :  { %2330 = vmax.xlane.f32.xlu0 %v2329_v13  ;;  %v6984_v24 = vmul.f32 %v6883_v50, %v6878_v37 }
 0x3f9   :  { %v2332_v19 = vsel %vm2304_vm3, %v6895_v7, -inf  ;;  %v2326_v49 = vsel %vm2304_vm3, %v6978_v3, -inf }
 0x3fa   :  { %2333 = vmax.xlane.f32.xlu1 %v2332_v19 }
 0x3fc   :  { %v6907_v25 = vpop.f32.mrb[24].mxu1  ;;  %v982_v16 = vpop.f32.mrb[12].mxu0  ;;  %2306 = vmax.xlane.f32.xlu0 %v2305_v9 }
 0x3fd   :  { %v6910_v46 = vmul.f32 %v6883_v50, %v982_v16  ;;  %v5247_v23 = vpop.f32.mrb[25].mxu1  ;;  %v5253_v14 = vpop.f32.mrb[13].mxu0 }
 0x3fe   :  { %v6914_v62 = vpop.f32.mrb[26].mxu1  ;;  %v985_v5 = vpop.f32.mrb[14].mxu0  ;;  %2309 = vmax.xlane.f32.xlu1 %v2308_v15 }
 0x3ff   :  { %v6920_v2 = vmul.f32 %v6883_v50, %v985_v5  ;;  %v2191_v8 = vpop.permute.xlu1 %2190  ;;  %v5248_v26 = vpop.f32.mrb[27].mxu1  ;;  %v2341_v27 = vsel %vm2304_vm3, %v6910_v46, -inf  ;;  %v2323_v5 = vsel %vm2304_vm3, %v6984_v24, -inf }
 0x400   :  { %v2196_v36 = vsel %vm641_vm2, %v2191_v8, 0  ;;  %v5254_v31 = vpop.f32.mrb[15].mxu0  ;;  %2342 = vmax.xlane.f32.xlu0 %v2341_v27 }
 0x401   :  { %5400 = vmatpush3.bf16.xpose.msra.mxu1 %v2196_v36  ;;  %v2344_v35 = vsel %vm2304_vm3, %v6920_v2, -inf  ;;  %v7004_v36 = vmul.f32 %v6883_v50, %v6914_v62 }
 0x402   :  { %2345 = vmax.xlane.f32.xlu1 %v2344_v35  ;;  %5411 = vmatprep.subr.bf16.mxu1 %v8223_v53  ;;  %v7010_v35 = vmul.f32 %v6883_v50, %v6907_v25 }
 0x403   :  { %v3089_v22 = vpop.permute.xlu1 %3088  ;;  %v2338_v62 = vsel %vm2304_vm3, %v7004_v36, -inf }
 0x404   :  { %v6933_v43 = vpop.f32.mrb[28].mxu1  ;;  %2312 = vmax.xlane.f32.xlu0 %v2311_v12 }
 0x405   :  { %v1082_v20 = vpop.f32.mrb[16].mxu0  ;;  %v5259_v51 = vpop.f32.mrb[29].mxu1 }
 0x406   :  { %v5265_v32 = vpop.f32.mrb[17].mxu0  ;;  %v6935_v33 = vpop.f32.mrb[30].mxu1  ;;  %v6938_v30 = vmul.f32 %v6883_v50, %v1082_v20 }
 0x407   :  { %v1085_v60 = vpop.f32.mrb[18].mxu0  ;;  %v5260_v28 = vpop.f32.mrb[31].mxu1 }
 0x408   :  { %v6943_v48 = vmul.f32 %v6883_v50, %v1085_v60  ;;  %v5266_v59 = vpop.f32.mrb[19].mxu0  ;;  %5402 = vmatmul.mubr.msk.bf16.vlgmr.msra.gmra.mrb[76].mxu1 %vm641_vm2, %v6751_v18  ;;  %2315 = vmax.xlane.f32.xlu0 %v2314_v34  ;;  %v2353_v17 = vsel %vm2304_vm3, %v6938_v30, -inf  ;;  %v2335_v28 = vsel %vm2304_vm3, %v7010_v35, -inf }
 0x409   :  { %5412 = vmatpush3.bf16.msra.mxu1 %v3089_v22  ;;  %5413 = vmatprep.mubr.msk.bf16.mxu1 %vm6167_vm1, %v8223_v53 }
 0x40a   :  { %v2356_v61 = vsel %vm2304_vm3, %v6943_v48, -inf  ;;  %5423 = vmatprep.subr.bf16.mxu1 %v8223_v53 }
 0x40b   :  { %2357 = vmax.xlane.f32.xlu1 %v2356_v61 }
 0x40c   :  { %v6962_v45 = vpop.f32.mrb[32].mxu1  ;;  %2354 = vmax.xlane.f32.xlu0 %v2353_v17 }
 0x40d   :  { %v1182_v11 = vpop.f32.mrb[20].mxu0  ;;  %v5271_v21 = vpop.f32.mrb[33].mxu1 }
 0x40e   :  { %v5277_v29 = vpop.f32.mrb[21].mxu0  ;;  %v6964_v40 = vpop.f32.mrb[34].mxu1  ;;  %v6969_v44 = vmul.f32 %v6883_v50, %v1182_v11  ;;  %v7030_v11 = vmul.f32 %v6883_v50, %v6935_v33 }
 0x40f   :  { %v1185_v39 = vpop.f32.mrb[22].mxu0  ;;  %2321 = vmax.xlane.f32.xlu1 %v2320_v42  ;;  %v5272_v57 = vpop.f32.mrb[35].mxu1  ;;  %v7036_v29 = vmul.f32 %v6883_v50, %v6933_v43 }
 0x410   :  { %v6974_v54 = vmul.f32 %v6883_v50, %v1185_v39  ;;  %v5278_v1 = vpop.f32.mrb[23].mxu0  ;;  %2318 = vmax.xlane.f32.xlu0 %v2317_v47  ;;  %v2365_v13 = vsel %vm2304_vm3, %v6969_v44, -inf  ;;  %v2350_v57 = vsel %vm2304_vm3, %v7030_v11, -inf }
 0x412   :  { %v2368_v4 = vsel %vm2304_vm3, %v6974_v54, -inf }
 0x413   :  { %2369 = vmax.xlane.f32.xlu1 %v2368_v4  ;;  %v2347_v4 = vsel %vm2304_vm3, %v7036_v29, -inf }
 0x414   :  { %v6988_v19 = vpop.f32.mrb[36].mxu1  ;;  %2366 = vmax.xlane.f32.xlu0 %v2365_v13 }
 0x415   :  { %v1282_v9 = vpop.f32.mrb[24].mxu0  ;;  %v5283_v16 = vpop.f32.mrb[37].mxu1 }
 0x416   :  { %v5289_v23 = vpop.f32.mrb[25].mxu0  ;;  %v6990_v14 = vpop.f32.mrb[38].mxu1  ;;  %v6995_v15 = vmul.f32 %v6883_v50, %v1282_v9  ;;  %v7052_v9 = vmul.f32 %v6883_v50, %v6964_v40 }
 0x417   :  { %v1285_v37 = vpop.f32.mrb[26].mxu0  ;;  %2327 = vmax.xlane.f32.xlu1 %v2326_v49  ;;  %v5284_v26 = vpop.f32.mrb[39].mxu1  ;;  %v7058_v23 = vmul.f32 %v6883_v50, %v6962_v45 }
 0x418   :  { %v7000_v8 = vmul.f32 %v6883_v50, %v1285_v37  ;;  %v5290_v27 = vpop.f32.mrb[27].mxu0  ;;  %2324 = vmax.xlane.f32.xlu0 %v2323_v5  ;;  %v2377_v12 = vsel %vm2304_vm3, %v6995_v15, -inf  ;;  %8271 = vst [vmem:[#allocation9_spill] sm:$0xff] %v7052_v9  ;;  %v2362_v37 = vsel %vm2304_vm3, %v7052_v9, -inf  ;;  %v7066_v5 = vpop.permute.xlu1 %3182 }
 0x419   :  { %8272 = vst [vmem:[#allocation10_spill] sm:$0xff] %v7058_v23  ;;  %v2359_v40 = vsel %vm2304_vm3, %v7058_v23, -inf  ;;  %8273 = vst [vmem:[#allocation11_spill] sm:$0xff] %v7066_v5  ;;  %v7068_v26 = vpop.permute.xlu0 %3135 }
 0x41a   :  { %v2380_v31 = vsel %vm2304_vm3, %v7000_v8, -inf  ;;  %8274 = vst [vmem:[#allocation12_spill] sm:$0xff] %v7068_v26 }
 0x41b   :  { %2381 = vmax.xlane.f32.xlu1 %v2380_v31 }
 0x41c   :  { %v7014_v20 = vpop.f32.mrb[40].mxu1  ;;  %2378 = vmax.xlane.f32.xlu0 %v2377_v12  ;;  %v7070_v27 = vpop.permute.xlu1 %3276 }
 0x41d   :  { %v1382_v51 = vpop.f32.mrb[28].mxu0  ;;  %v5295_v32 = vpop.f32.mrb[41].mxu1  ;;  %8275 = vst [vmem:[#allocation13_spill] sm:$0xff] %v7070_v27 }
 0x41e   :  { %v5301_v22 = vpop.f32.mrb[29].mxu0  ;;  %v7016_v60 = vpop.f32.mrb[42].mxu1  ;;  %v7021_v34 = vmul.f32 %v6883_v50, %v1382_v51 }
 0x41f   :  { %v1385_v25 = vpop.f32.mrb[30].mxu0  ;;  %2339 = vmax.xlane.f32.xlu1 %v2338_v62  ;;  %v5296_v61 = vpop.f32.mrb[43].mxu1 }
 0x420   :  { %v7026_v59 = vmul.f32 %v6883_v50, %v1385_v25  ;;  %v5302_v17 = vpop.f32.mrb[31].mxu0  ;;  %2336 = vmax.xlane.f32.xlu0 %v2335_v28  ;;  %v2389_v42 = vsel %vm2304_vm3, %v7021_v34, -inf  ;;  %v7072_v45 = vpop.permute.xlu0 %3229 }
 0x421   :  { %8276 = vst [vmem:[#allocation14_spill] sm:$0xff] %v7072_v45  ;;  %v7074_v31 = vpop.permute.xlu1 %3370 }
 0x422   :  { %v2392_v21 = vsel %vm2304_vm3, %v7026_v59, -inf  ;;  %8277 = vst [vmem:[#allocation15_spill] sm:$0xff] %v7074_v31 }
 0x423   :  { %2393 = vmax.xlane.f32.xlu1 %v2392_v21 }
 0x424   :  { %2390 = vmax.xlane.f32.xlu0 %v2389_v42  ;;  %v7076_v12 = vpop.permute.xlu0 %3323 }
 0x425   :  { %v1482_v39 = vpop.f32.mrb[32].mxu0  ;;  %8278 = vst [vmem:[#allocation16_spill] sm:$0xff] %v7076_v12  ;;  %v7078_v51 = vpop.permute.xlu1 %3652 }
 0x426   :  { %v5313_v47 = vpop.f32.mrb[33].mxu0  ;;  %v7043_v33 = vmul.f32 %v6883_v50, %v1482_v39  ;;  %8279 = vst [vmem:[#allocation17_spill] sm:$0xff] %v7078_v51 }
 0x427   :  { %v1485_v1 = vpop.f32.mrb[34].mxu0  ;;  %2351 = vmax.xlane.f32.xlu1 %v2350_v57 }
 0x428   :  { %8269 = vst [vmem:[#allocation7_spill] sm:$0xff] %v7043_v33  ;;  %v7048_v43 = vmul.f32 %v6883_v50, %v1485_v1  ;;  %v5314_v13 = vpop.f32.mrb[35].mxu0  ;;  %2348 = vmax.xlane.f32.xlu0 %v2347_v4  ;;  %v2401_v49 = vsel %vm2304_vm3, %v7043_v33, -inf  ;;  %v7080_v32 = vpop.permute.xlu0 %3417 }
 0x429   :  { %8280 = vst [vmem:[#allocation18_spill] sm:$0xff] %v7080_v32  ;;  %v7082_v22 = vpop.permute.xlu1 %3746 }
 0x42a   :  { %8270 = vst [vmem:[#allocation8_spill] sm:$0xff] %v7048_v43  ;;  %v2404_v16 = vsel %vm2304_vm3, %v7048_v43, -inf  ;;  %8281 = vst [vmem:[#allocation19_spill] sm:$0xff] %v7082_v22 }
 0x42b   :  { %2405 = vmax.xlane.f32.xlu1 %v2404_v16 }
 0x42c   :  { %2402 = vmax.xlane.f32.xlu0 %v2401_v49  ;;  %v7084_v62 = vpop.permute.xlu0 %3605 }
 0x42d   :  { %8282 = vst [vmem:[#allocation20_spill] sm:$0xff] %v7084_v62  ;;  %v7086_v25 = vpop.permute.xlu1 %3840 }
 0x42e   :  { %8283 = vst [vmem:[#allocation21_spill] sm:$0xff] %v7086_v25 }
 0x42f   :  { %2363 = vmax.xlane.f32.xlu1 %v2362_v37 }
 0x430   :  { %2360 = vmax.xlane.f32.xlu0 %v2359_v40  ;;  %v7088_v28 = vpop.permute.xlu0 %3699 }
 0x431   :  { %8284 = vst [vmem:[#allocation22_spill] sm:$0xff] %v7088_v28  ;;  %v7090_v61 = vpop.permute.xlu1 %3934 }
 0x432   :  { %8285 = vst [vmem:[#allocation23_spill] sm:$0xff] %v7090_v61 }
 0x434   :  { %v7092_v17 = vpop.permute.xlu0 %3793 }
 0x435   :  { %8286 = vst [vmem:[#allocation24_spill] sm:$0xff] %v7092_v17  ;;  %v7094_v21 = vpop.permute.xlu1 %4028 }
 0x436   :  { %8287 = vst [vmem:[#allocation25_spill] sm:$0xff] %v7094_v21 }
 0x438   :  { %v7098_v39 = vpop.permute.xlu0 %3887 }
 0x439   :  { %8288 = vst [vmem:[#allocation26_spill] sm:$0xff] %v7098_v39  ;;  %v7100_v57 = vpop.permute.xlu1 %4122 }
 0x43a   :  { %8289 = vst [vmem:[#allocation27_spill] sm:$0xff] %v7100_v57 }
 0x43c   :  { %v7104_v13 = vpop.permute.xlu0 %3981 }
 0x43d   :  { %8290 = vst [vmem:[#allocation28_spill] sm:$0xff] %v7104_v13  ;;  %v7106_v16 = vpop.permute.xlu1 %3464 }
 0x43e   :  { %8291 = vst [vmem:[#allocation29_spill] sm:$0xff] %v7106_v16 }
 0x440   :  { %v7116_v57 = vpop.permute.xlu0 %4075 }
 0x441   :  { %8292 = vst [vmem:[#allocation30_spill] sm:$0xff] %v7116_v57  ;;  %v7118_v22 = vpop.permute.xlu1 %3558 }
 0x442   :  { %8293 = vst [vmem:[#allocation31_spill] sm:$0xff] %v7118_v22 }
 0x444   :  { %v7128_v17 = vpop.permute.xlu0 %4169 }
 0x445   :  { %8294 = vst [vmem:[#allocation32_spill] sm:$0xff] %v7128_v17 }
 0x45e   :  { %v7096_v42 = vpop.f32.mrb[44].mxu1 }
 0x45f   :  { %v5307_v47 = vpop.f32.mrb[45].mxu1 }
 0x460   :  { %v7102_v1 = vpop.f32.mrb[46].mxu1 }
 0x461   :  { %v5308_v4 = vpop.f32.mrb[47].mxu1 }
 0x466   :  { %v7108_v49 = vpop.f32.mrb[36].mxu0 }
 0x467   :  { %v7110_v37 = vpop.f32.mrb[48].mxu1  ;;  %v5325_v40 = vpop.f32.mrb[37].mxu0 }
 0x468   :  { %v5319_v53 = vpop.f32.mrb[49].mxu1  ;;  %v7112_v21 = vpop.f32.mrb[38].mxu0 }
 0x469   :  { %v7114_v61 = vpop.f32.mrb[50].mxu1  ;;  %v5326_v47 = vpop.f32.mrb[39].mxu0 }
 0x46a   :  { %v5320_v25 = vpop.f32.mrb[51].mxu1  ;;  %v7130_v47 = vpop.permute.xlu1 %4216 }
 0x46b   :  { %8295 = vst [vmem:[#allocation33_spill] sm:$0xff] %v7130_v47 }
 0x46e   :  { %v7120_v4 = vpop.f32.mrb[40].mxu0  ;;  %v7140_v32 = vpop.permute.xlu1 %4263 }
 0x46f   :  { %v7122_v13 = vpop.f32.mrb[52].mxu1  ;;  %v5337_v51 = vpop.f32.mrb[41].mxu0  ;;  %8296 = vst [vmem:[#allocation34_spill] sm:$0xff] %v7140_v32 }
 0x470   :  { %v5331_v10 = vpop.f32.mrb[53].mxu1  ;;  %v7124_v39 = vpop.f32.mrb[42].mxu0 }
 0x471   :  { %v7126_v40 = vpop.f32.mrb[54].mxu1  ;;  %v5338_v53 = vpop.f32.mrb[43].mxu0 }
 0x472   :  { %v5332_v18 = vpop.f32.mrb[55].mxu1  ;;  %v7142_v53 = vpop.permute.xlu0 %3511 }
 0x473   :  { %8297 = vst [vmem:[#allocation35_spill] sm:$0xff] %v7142_v53  ;;  %v7152_v55 = vpop.permute.xlu1 %4310 }
 0x474   :  { %8298 = vst [vmem:[#allocation36_spill] sm:$0xff] %v7152_v55 }
 0x476   :  { %v7132_v25 = vpop.f32.mrb[44].mxu0 }
 0x477   :  { %v7134_v57 = vpop.f32.mrb[56].mxu1  ;;  %v5349_v28 = vpop.f32.mrb[45].mxu0 }
 0x478   :  { %v5343_v62 = vpop.f32.mrb[57].mxu1  ;;  %v7136_v22 = vpop.f32.mrb[46].mxu0 }
 0x479   :  { %v7138_v51 = vpop.f32.mrb[58].mxu1  ;;  %v5350_v10 = vpop.f32.mrb[47].mxu0 }
 0x47a   :  { %v5344_v16 = vpop.f32.mrb[59].mxu1 }
 0x47e   :  { %v7144_v18 = vpop.f32.mrb[48].mxu0 }
 0x47f   :  { %v7146_v17 = vpop.f32.mrb[60].mxu1  ;;  %v5361_v47 = vpop.f32.mrb[49].mxu0 }
 0x480   :  { %v5355_v31 = vpop.f32.mrb[61].mxu1  ;;  %v7148_v12 = vpop.f32.mrb[50].mxu0 }
 0x481   :  { %v7150_v28 = vpop.f32.mrb[62].mxu1  ;;  %v5362_v62 = vpop.f32.mrb[51].mxu0 }
 0x482   :  { %v5356_v27 = vpop.f32.mrb[63].mxu1 }
 0x485   :  { %v2331_v10 = vpop.xlane.xlu0 %2330 }
 0x486   :  { %v2505_v16 = vsub.f32 %v6886_v0, %v2331_v10  ;;  %v7155_v32 = vpop.f32.mrb[52].mxu0 }
 0x487   :  { %v7157_v53 = vpop.f32.mrb[64].mxu1  ;;  %v2334_v45 = vpop.xlane.xlu1 %2333 }
 0x488   :  { %v2577_v5 = vmul.f32 1.442695, %v2505_v16  ;;  %v2506_v47 = vsub.f32 %v6895_v7, %v2334_v45  ;;  %v5367_v31 = vpop.f32.mrb[65].mxu1  ;;  %v5373_v58 = vpop.f32.mrb[53].mxu0 }
 0x489   :  { %v7160_v26 = vpop.f32.mrb[66].mxu1  ;;  %v7162_v9 = vpop.f32.mrb[54].mxu0 }
 0x48a   :  { %5907 = vpow2.f32 %v2577_v5  ;;  %v2579_v27 = vmul.f32 1.442695, %v2506_v47  ;;  %v2307_v62 = vpop.xlane.xlu0 %2306  ;;  %v5368_v55 = vpop.f32.mrb[67].mxu1 }
 0x48b   :  { %v2497_v0 = vsub.f32 %v6892_v6, %v2307_v62  ;;  %v5374_v10 = vpop.f32.mrb[55].mxu0  ;;  %v2310_v43 = vpop.xlane.xlu1 %2309 }
 0x48c   :  { %5909 = vpow2.f32 %v2579_v27  ;;  %v2498_v33 = vsub.f32 %v6901_v52, %v2310_v43 }
 0x48d   :  { %v2561_v16 = vmul.f32 1.442695, %v2497_v0 }
 0x48e   :  { %v2563_v23 = vmul.f32 1.442695, %v2498_v33  ;;  %v7166_v7 = vpop.f32.mrb[56].mxu0 }
 0x48f   :  { %5911 = vpow2.f32 %v2561_v16  ;;  %v7168_v58 = vpop.f32.mrb[68].mxu1  ;;  %v5385_v5 = vpop.f32.mrb[57].mxu0 }
 0x490   :  { %5913 = vpow2.f32 %v2563_v23  ;;  %v5379_v45 = vpop.f32.mrb[69].mxu1  ;;  %v7172_v55 = vpop.f32.mrb[58].mxu0 }
 0x491   :  { %v7170_v47 = vpop.f32.mrb[70].mxu1  ;;  %v5386_v31 = vpop.f32.mrb[59].mxu0 }
 0x492   :  { %v5380_v6 = vpop.f32.mrb[71].mxu1  ;;  %v7196_v31 = vmul.f32 %v6883_v50, %v7108_v49 }
 0x494   :  { %v7174_v62 = vpop.eup %5907  ;;  %v2413_v49 = vsel %vm2304_vm3, %v7196_v31, -inf }
 0x495   :  { %8299 = vst [vmem:[#allocation37_spill] sm:$0xff] %v7174_v62  ;;  %v2713_v52 = vsel %vm2304_vm3, %v7174_v62, 0.0 }
 0x496   :  { %v7178_v33 = vpop.eup %5909  ;;  %2714 = vadd.xlane.f32.xlu0 %v2713_v52  ;;  %v7180_v43 = vpop.f32.mrb[60].mxu0 }
 0x497   :  { %8300 = vst [vmem:[#allocation38_spill] sm:$0xff] %v7178_v33  ;;  %v7182_v27 = vpop.f32.mrb[72].mxu1  ;;  %v5397_v23 = vpop.f32.mrb[61].mxu0  ;;  %v2716_v0 = vsel %vm2304_vm3, %v7178_v33, 0.0  ;;  %v7208_v33 = vmul.f32 %v6883_v50, %v6988_v19 }
 0x498   :  { %v5391_v10 = vpop.f32.mrb[73].mxu1  ;;  %2717 = vadd.xlane.f32.xlu1 %v2716_v0  ;;  %v7190_v5 = vpop.f32.mrb[62].mxu0 }
 0x499   :  { %v7186_v16 = vpop.eup %5911  ;;  %v7188_v45 = vpop.f32.mrb[74].mxu1  ;;  %v7202_v10 = vmul.f32 %v6883_v50, %v7112_v21  ;;  %v2371_v19 = vsel %vm2304_vm3, %v7208_v33, -inf }
 0x49a   :  { %v7192_v6 = vpop.eup %5913  ;;  %v5392_v52 = vpop.f32.mrb[75].mxu1  ;;  %v2689_v23 = vsel %vm2304_vm3, %v7186_v16, 0.0 }
 0x49b   :  { %v5398_v0 = vpop.f32.mrb[63].mxu0  ;;  %2690 = vadd.xlane.f32.xlu0 %v2689_v23  ;;  %v2692_v62 = vsel %vm2304_vm3, %v7192_v6, 0.0  ;;  %v7214_v52 = vmul.f32 %v6883_v50, %v6990_v14  ;;  %v2416_v21 = vsel %vm2304_vm3, %v7202_v10, -inf  ;;  %v7220_v23 = vmul.f32 %v6883_v50, %v7120_v4 }
 0x49c   :  { %2693 = vadd.xlane.f32.xlu1 %v2692_v62  ;;  %v7226_v62 = vmul.f32 %v6883_v50, %v7124_v39  ;;  %v7232_v0 = vmul.f32 %v6883_v50, %v7014_v20 }
 0x49d   :  { %v2374_v14 = vsel %vm2304_vm3, %v7214_v52, -inf  ;;  %v2425_v4 = vsel %vm2304_vm3, %v7220_v23, -inf }
 0x49e   :  { %v2428_v39 = vsel %vm2304_vm3, %v7226_v62, -inf  ;;  %v2383_v20 = vsel %vm2304_vm3, %v7232_v0, -inf }
 0x49f   :  { %2414 = vmax.xlane.f32.xlu0 %v2413_v49  ;;  %v7238_v49 = vmul.f32 %v6883_v50, %v7016_v60 }
 0x4a0   :  { %2417 = vmax.xlane.f32.xlu1 %v2416_v21  ;;  %v7244_v21 = vmul.f32 %v6883_v50, %v7132_v25 }
 0x4a1   :  { %v2386_v60 = vsel %vm2304_vm3, %v7238_v49, -inf }
 0x4a2   :  { %v2437_v25 = vsel %vm2304_vm3, %v7244_v21, -inf }
 0x4a3   :  { %2372 = vmax.xlane.f32.xlu0 %v2371_v19  ;;  %v7250_v19 = vmul.f32 %v6883_v50, %v7136_v22 }
 0x4a4   :  { %2375 = vmax.xlane.f32.xlu1 %v2374_v14  ;;  %v7256_v14 = vmul.f32 %v6883_v50, %v7096_v42 }
 0x4a5   :  { %v2440_v22 = vsel %vm2304_vm3, %v7250_v19, -inf }
 0x4a6   :  { %8301 = vst [vmem:[#allocation39_spill] sm:$0xff] %v7256_v14  ;;  %v2395_v42 = vsel %vm2304_vm3, %v7256_v14, -inf  ;;  %v7290_v14 = vmul.f32 %v6883_v50, %v7114_v61 }
 0x4a7   :  { %2426 = vmax.xlane.f32.xlu0 %v2425_v4  ;;  %v7258_v4 = vpop.xlane.xlu0 %2342 }
 0x4a8   :  { %2429 = vmax.xlane.f32.xlu1 %v2428_v39  ;;  %v7264_v39 = vmul.f32 %v6883_v50, %v7102_v1  ;;  %8303 = vst [vmem:[#allocation41_spill] sm:$0xff] %v7290_v14  ;;  %v2410_v61 = vsel %vm2304_vm3, %v7290_v14, -inf  ;;  %v2346_v14 = vpop.xlane.xlu1 %2345 }
 0x4aa   :  { %v2398_v1 = vsel %vm2304_vm3, %v7264_v39, -inf }
 0x4ab   :  { %2384 = vmax.xlane.f32.xlu0 %v2383_v20  ;;  %v7270_v20 = vmul.f32 %v6883_v50, %v7144_v18 }
 0x4ac   :  { %2387 = vmax.xlane.f32.xlu1 %v2386_v60  ;;  %v7276_v60 = vmul.f32 %v6883_v50, %v7148_v12 }
 0x4ad   :  { %8302 = vst [vmem:[#allocation40_spill] sm:$0xff] %v7270_v20  ;;  %v2449_v18 = vsel %vm2304_vm3, %v7270_v20, -inf  ;;  %v7304_v20 = vmul.f32 %v6883_v50, %v7162_v9 }
 0x4ae   :  { %v2452_v12 = vsel %vm2304_vm3, %v7276_v60, -inf }
 0x4af   :  { %2438 = vmax.xlane.f32.xlu0 %v2437_v25  ;;  %v7280_v25 = vpop.xlane.xlu0 %2312  ;;  %v2464_v9 = vsel %vm2304_vm3, %v7304_v20, -inf }
 0x4b0   :  { %2441 = vmax.xlane.f32.xlu1 %v2440_v22  ;;  %v7284_v22 = vmul.f32 %v6883_v50, %v7110_v37 }
 0x4b2   :  { %v2407_v37 = vsel %vm2304_vm3, %v7284_v22, -inf }
 0x4b3   :  { %2396 = vmax.xlane.f32.xlu0 %v2395_v42  ;;  %v7296_v42 = vmul.f32 %v6883_v50, %v7155_v32 }
 0x4b4   :  { %2399 = vmax.xlane.f32.xlu1 %v2398_v1  ;;  %v7298_v1 = vpop.xlane.xlu0 %2315 }
 0x4b5   :  { %8304 = vst [vmem:[#allocation42_spill] sm:$0xff] %v7296_v42  ;;  %v2461_v32 = vsel %vm2304_vm3, %v7296_v42, -inf  ;;  %v7330_v42 = vmul.f32 %v6883_v50, %v7172_v55  ;;  %v7346_v55 = vmul.f32 %v6883_v50, %v7138_v51 }
 0x4b7   :  { %2450 = vmax.xlane.f32.xlu0 %v2449_v18  ;;  %v7310_v18 = vmul.f32 %v6883_v50, %v7122_v13  ;;  %8309 = vst [vmem:[#allocation47_spill] sm:$0xff] %v7346_v55  ;;  %v2434_v51 = vsel %vm2304_vm3, %v7346_v55, -inf  ;;  %v2509_v55 = vsub.f32 %v6910_v46, %v7258_v4 }
 0x4b8   :  { %2453 = vmax.xlane.f32.xlu1 %v2452_v12  ;;  %v7316_v12 = vmul.f32 %v6883_v50, %v7126_v40 }
 0x4b9   :  { %8305 = vst [vmem:[#allocation43_spill] sm:$0xff] %v7310_v18  ;;  %v2419_v13 = vsel %vm2304_vm3, %v7310_v18, -inf  ;;  %v2585_v4 = vmul.f32 1.442695, %v2509_v55 }
 0x4ba   :  { %8306 = vst [vmem:[#allocation44_spill] sm:$0xff] %v7316_v12  ;;  %v2422_v40 = vsel %vm2304_vm3, %v7316_v12, -inf  ;;  %v7358_v12 = vmul.f32 %v6883_v50, %v7180_v43  ;;  %v7374_v43 = vmul.f32 %v6883_v50, %v7150_v28 }
 0x4bb   :  { %2408 = vmax.xlane.f32.xlu0 %v2407_v37  ;;  %v7320_v37 = vpop.xlane.xlu0 %2354  ;;  %5915 = vpow2.f32 %v2585_v4 }
 0x4bc   :  { %2411 = vmax.xlane.f32.xlu1 %v2410_v61  ;;  %v7324_v61 = vmul.f32 %v6883_v50, %v7166_v7  ;;  %v2446_v46 = vsel %vm2304_vm3, %v7374_v43, -inf }
 0x4be   :  { %8307 = vst [vmem:[#allocation45_spill] sm:$0xff] %v7324_v61  ;;  %v2473_v18 = vsel %vm2304_vm3, %v7324_v61, -inf }
 0x4bf   :  { %2462 = vmax.xlane.f32.xlu0 %v2461_v32  ;;  %v7334_v32 = vpop.xlane.xlu1 %2357  ;;  %v7340_v7 = vpop.xlane.xlu0 %2318 }
 0x4c0   :  { %2465 = vmax.xlane.f32.xlu1 %v2464_v9  ;;  %v7338_v9 = vmul.f32 %v6883_v50, %v7134_v57  ;;  %v2514_v55 = vsub.f32 %v6943_v48, %v7334_v32 }
 0x4c2   :  { %8308 = vst [vmem:[#allocation46_spill] sm:$0xff] %v7338_v9  ;;  %v2431_v57 = vsel %vm2304_vm3, %v7338_v9, -inf }
 0x4c3   :  { %2420 = vmax.xlane.f32.xlu0 %v2419_v13  ;;  %v2476_v13 = vsel %vm2304_vm3, %v7330_v42, -inf  ;;  %v7360_v61 = vpop.xlane.xlu1 %2321 }
 0x4c4   :  { %2423 = vmax.xlane.f32.xlu1 %v2422_v40  ;;  %v7352_v40 = vmul.f32 %v6883_v50, %v7146_v17  ;;  %v7368_v17 = vmul.f32 %v6883_v50, %v7190_v5  ;;  %v7384_v5 = vmul.f32 %v6883_v50, %v7157_v53  ;;  %v2499_v53 = vsub.f32 %v6917_v63, %v7280_v25 }
 0x4c6   :  { %8310 = vst [vmem:[#allocation48_spill] sm:$0xff] %v7352_v40  ;;  %v2488_v28 = vsel %vm2304_vm3, %v7368_v17, -inf }
 0x4c7   :  { %2474 = vmax.xlane.f32.xlu0 %v2473_v18  ;;  %v7364_v18 = vpop.xlane.xlu0 %2366 }
 0x4c8   :  { %2477 = vmax.xlane.f32.xlu1 %v2476_v13  ;;  %v2443_v13 = vsel %vm2304_vm3, %v7352_v40, -inf  ;;  %v2510_v40 = vsub.f32 %v6920_v2, %v2346_v14  ;;  %v7401_v2 = vmul.f32 %v6883_v50, %v7168_v58  ;;  %v2565_v58 = vmul.f32 1.442695, %v2499_v53 }
 0x4ca   :  { %v2587_v14 = vmul.f32 1.442695, %v2510_v40  ;;  %v2467_v40 = vsel %vm2304_vm3, %v7401_v2, -inf }
 0x4cb   :  { %2432 = vmax.xlane.f32.xlu0 %v2431_v57  ;;  %v2485_v57 = vsel %vm2304_vm3, %v7358_v12, -inf  ;;  %v7387_v9 = vpop.xlane.xlu0 %2324 }
 0x4cc   :  { %2435 = vmax.xlane.f32.xlu1 %v2434_v51  ;;  %v7380_v51 = vpop.xlane.xlu1 %2369  ;;  %5917 = vpow2.f32 %v2587_v14 }
 0x4cd   :  { %5919 = vpow2.f32 %v2565_v58 }
 0x4cf   :  { %2444 = vmax.xlane.f32.xlu0 %v2443_v13  ;;  %v7393_v13 = vmul.f32 %v6883_v50, %v7160_v26  ;;  %v2455_v26 = vsel %vm2304_vm3, %v7384_v5, -inf  ;;  %v7415_v25 = vpop.xlane.xlu0 %2378 }
 0x4d0   :  { %2486 = vmax.xlane.f32.xlu1 %v2485_v57  ;;  %v2500_v57 = vsub.f32 %v6929_v41, %v7298_v1  ;;  %v7419_v41 = vmul.f32 %v6883_v50, %v7182_v27  ;;  %v2513_v1 = vsub.f32 %v6938_v30, %v7320_v37  ;;  %v2501_v37 = vsub.f32 %v6958_v56, %v7340_v7 }
 0x4d1   :  { %v2458_v63 = vsel %vm2304_vm3, %v7393_v13, -inf }
 0x4d2   :  { %v2593_v30 = vmul.f32 1.442695, %v2513_v1  ;;  %v2479_v14 = vsel %vm2304_vm3, %v7419_v41, -inf  ;;  %v2569_v7 = vmul.f32 1.442695, %v2501_v37 }
 0x4d3   :  { %2489 = vmax.xlane.f32.xlu0 %v2488_v28  ;;  %v7409_v28 = vmul.f32 %v6883_v50, %v7170_v47  ;;  %v2567_v47 = vmul.f32 1.442695, %v2500_v57  ;;  %v2502_v57 = vsub.f32 %v6951_v38, %v7360_v61  ;;  %v2517_v61 = vsub.f32 %v6969_v44, %v7364_v18 }
 0x4d4   :  { %2447 = vmax.xlane.f32.xlu1 %v2446_v46  ;;  %v7411_v46 = vpop.xlane.xlu1 %2327 }
 0x4d5   :  { %v2470_v27 = vsel %vm2304_vm3, %v7409_v28, -inf  ;;  %5921 = vpow2.f32 %v2567_v47  ;;  %v2503_v47 = vsub.f32 %v6984_v24, %v7387_v9  ;;  %v2571_v38 = vmul.f32 1.442695, %v2502_v57 }
 0x4d6   :  { %5923 = vpow2.f32 %v2593_v30  ;;  %v2518_v24 = vsub.f32 %v6974_v54, %v7380_v51  ;;  %v2601_v44 = vmul.f32 1.442695, %v2517_v61  ;;  %v2504_v18 = vsub.f32 %v6978_v3, %v7411_v46 }
 0x4d7   :  { %2456 = vmax.xlane.f32.xlu0 %v2455_v26  ;;  %v7429_v26 = vmul.f32 %v6883_v50, %v7188_v45  ;;  %v2595_v45 = vmul.f32 1.442695, %v2514_v55  ;;  %v2573_v9 = vmul.f32 1.442695, %v2503_v47  ;;  %v2521_v3 = vsub.f32 %v6995_v15, %v7415_v25 }
 0x4d8   :  { %2459 = vmax.xlane.f32.xlu1 %v2458_v63  ;;  %v7435_v48 = vpop.xlane.xlu1 %2381  ;;  %v2337_v63 = vpop.xlane.xlu0 %2336  ;;  %v2603_v57 = vmul.f32 1.442695, %v2518_v24 }
 0x4d9   :  { %v2482_v56 = vsel %vm2304_vm3, %v7429_v26, -inf  ;;  %5925 = vpow2.f32 %v2595_v45  ;;  %v2507_v54 = vsub.f32 %v7010_v35, %v2337_v63  ;;  %v2522_v35 = vsub.f32 %v7000_v8, %v7435_v48 }
 0x4da   :  { %5927 = vpow2.f32 %v2569_v7  ;;  %v2609_v15 = vmul.f32 1.442695, %v2521_v3 }
 0x4db   :  { %v2232_v4 = vpop.f32.mrb[76].mxu1  ;;  %2468 = vmax.xlane.f32.xlu0 %v2467_v40  ;;  %5929 = vpow2.f32 %v2571_v38  ;;  %v2581_v63 = vmul.f32 1.442695, %v2507_v54  ;;  %v2611_v8 = vmul.f32 1.442695, %v2522_v35 }
 0x4dc   :  { %v5403_v53 = vpop.f32.mrb[77].mxu1  ;;  %2471 = vmax.xlane.f32.xlu1 %v2470_v27  ;;  %v7442_v40 = vmul.f32 %v6883_v50, %v2232_v4  ;;  %v2340_v4 = vpop.xlane.xlu1 %2339  ;;  %5931 = vpow2.f32 %v2573_v9 }
 0x4dd   :  { %v2235_v32 = vpop.f32.mrb[78].mxu1  ;;  %v2391_v30 = vpop.xlane.xlu0 %2390  ;;  %5933 = vpow2.f32 %v2601_v44  ;;  %v2508_v25 = vsub.f32 %v7004_v36, %v2340_v4 }
 0x4de   :  { %v5404_v58 = vpop.f32.mrb[79].mxu1  ;;  %v7445_v1 = vmul.f32 %v6883_v50, %v2235_v32  ;;  %v2491_v55 = vsel %vm2304_vm3, %v7442_v40, -inf  ;;  %v7455_v50 = vpop.eup %5915  ;;  %5935 = vpow2.f32 %v2603_v57  ;;  %v2525_v4 = vsub.f32 %v7021_v34, %v2391_v30 }
 0x4df   :  { %2480 = vmax.xlane.f32.xlu0 %v2479_v14  ;;  %v7459_v53 = vpop.eup %5917  ;;  %v2725_v37 = vsel %vm2304_vm3, %v7455_v50, 0.0  ;;  %v2575_v58 = vmul.f32 1.442695, %v2504_v18  ;;  %v2583_v36 = vmul.f32 1.442695, %v2508_v25 }
 0x4e0   :  { %2483 = vmax.xlane.f32.xlu1 %v2482_v56  ;;  %v2494_v27 = vsel %vm2304_vm3, %v7445_v1, -inf  ;;  %v7467_v32 = vpop.eup %5919  ;;  %v2728_v14 = vsel %vm2304_vm3, %v7459_v53, 0.0  ;;  %v2394_v51 = vpop.xlane.xlu1 %2393  ;;  %v2617_v3 = vmul.f32 1.442695, %v2525_v4 }
 0x4e1   :  { %v7471_v45 = vpop.eup %5921  ;;  %v2349_v46 = vpop.xlane.xlu0 %2348  ;;  %v2695_v56 = vsel %vm2304_vm3, %v7467_v32, 0.0  ;;  %5937 = vpow2.f32 %v2575_v58  ;;  %v2526_v54 = vsub.f32 %v7026_v59, %v2394_v51  ;;  %v8311_v51 = vld [vmem:[#allocation10_spill] sm:$0xff] }
 0x4e2   :  { %v7478_v7 = vpop.eup %5923  ;;  %v2698_v47 = vsel %vm2304_vm3, %v7471_v45, 0.0  ;;  %5939 = vpow2.f32 %v2581_v63  ;;  %v2511_v48 = vsub.f32 %v7036_v29, %v2349_v46 }
 0x4e3   :  { %2492 = vmax.xlane.f32.xlu0 %v2491_v55  ;;  %v7482_v38 = vpop.eup %5925  ;;  %v2737_v61 = vsel %vm2304_vm3, %v7478_v7, 0.0  ;;  %5941 = vpow2.f32 %v2609_v15  ;;  %v2619_v59 = vmul.f32 1.442695, %v2526_v54 }
 0x4e4   :  { %2495 = vmax.xlane.f32.xlu1 %v2494_v27  ;;  %v7489_v55 = vpop.eup %5927  ;;  %v2352_v27 = vpop.xlane.xlu1 %2351  ;;  %v2740_v24 = vsel %vm2304_vm3, %v7482_v38, 0.0  ;;  %5943 = vpow2.f32 %v2611_v8  ;;  %v2589_v29 = vmul.f32 1.442695, %v2511_v48 }
 0x4e5   :  { %v7493_v9 = vpop.eup %5929  ;;  %v2403_v44 = vpop.xlane.xlu0 %2402  ;;  %v2701_v18 = vsel %vm2304_vm3, %v7489_v55, 0.0  ;;  %5945 = vpow2.f32 %v2583_v36  ;;  %v2512_v34 = vsub.f32 %v7030_v11, %v2352_v27  ;;  %v8312_v11 = vld [vmem:[#allocation7_spill] sm:$0xff]  ;;  %v8314_v36 = vld [vmem:[#allocation8_spill] sm:$0xff] }
 0x4e6   :  { %5947 = vpow2.f32 %v2589_v29  ;;  %v2529_v25 = vsub.f32 %v8312_v11, %v2403_v44  ;;  %v8315_v44 = vld [vmem:[#allocation9_spill] sm:$0xff] }
 0x4e7   :  { %2726 = vadd.xlane.f32.xlu0 %v2725_v37  ;;  %v7499_v37 = vpop.eup %5931  ;;  %5949 = vpow2.f32 %v2617_v3  ;;  %v2591_v15 = vmul.f32 1.442695, %v2512_v34 }
 0x4e8   :  { %2729 = vadd.xlane.f32.xlu1 %v2728_v14  ;;  %v2704_v14 = vsel %vm2304_vm3, %v7493_v9, 0.0  ;;  %v7503_v57 = vpop.eup %5933  ;;  %v2406_v58 = vpop.xlane.xlu1 %2405  ;;  %v2707_v46 = vsel %vm2304_vm3, %v7499_v37, 0.0  ;;  %5951 = vpow2.f32 %v2619_v59 }
 0x4e9   :  { %v2361_v30 = vpop.xlane.xlu0 %2360  ;;  %v2530_v4 = vsub.f32 %v8314_v36, %v2406_v58  ;;  %5953 = vpow2.f32 %v2591_v15 }
 0x4ea   :  { %v2515_v63 = vsub.f32 %v8311_v51, %v2361_v30 }
 0x4eb   :  { %2696 = vadd.xlane.f32.xlu0 %v2695_v56  ;;  %v7509_v56 = vpop.eup %5935 }
 0x4ec   :  { %2699 = vadd.xlane.f32.xlu1 %v2698_v47  ;;  %v2749_v47 = vsel %vm2304_vm3, %v7503_v57, 0.0  ;;  %v7513_v35 = vpop.eup %5937 }
 0x4ed   :  { %v7519_v27 = vpop.eup %5939  ;;  %v2710_v8 = vsel %vm2304_vm3, %v7513_v35, 0.0 }
 0x4ee   :  { %v7523_v48 = vpop.eup %5941  ;;  %v2719_v29 = vsel %vm2304_vm3, %v7519_v27, 0.0 }
 0x4ef   :  { %2738 = vadd.xlane.f32.xlu0 %v2737_v61  ;;  %v2752_v61 = vsel %vm2304_vm3, %v7509_v56, 0.0  ;;  %8313 = vst [vmem:[#allocation10_spill] sm:$0xff] %v7523_v48  ;;  %v7529_v3 = vpop.eup %5943  ;;  %v2761_v34 = vsel %vm2304_vm3, %v7523_v48, 0.0 }
 0x4f0   :  { %2741 = vadd.xlane.f32.xlu1 %v2740_v24  ;;  %v2364_v24 = vpop.xlane.xlu1 %2363  ;;  %8316 = vst [vmem:[#allocation7_spill] sm:$0xff] %v7529_v3  ;;  %v7533_v30 = vpop.eup %5945 }
 0x4f1   :  { %v2516_v54 = vsub.f32 %v8315_v44, %v2364_v24  ;;  %v7537_v59 = vpop.eup %5947  ;;  %v2722_v51 = vsel %vm2304_vm3, %v7533_v30, 0.0 }
 0x4f2   :  { %v2731_v15 = vsel %vm2304_vm3, %v7537_v59, 0.0 }
 0x4f3   :  { %2702 = vadd.xlane.f32.xlu0 %v2701_v18  ;;  %v2597_v18 = vmul.f32 1.442695, %v2515_v63  ;;  %v2599_v58 = vmul.f32 1.442695, %v2516_v54  ;;  %v7541_v63 = vpop.eup %5949 }
 0x4f4   :  { %2705 = vadd.xlane.f32.xlu1 %v2704_v14  ;;  %v2625_v14 = vmul.f32 1.442695, %v2529_v25  ;;  %8317 = vst [vmem:[#allocation8_spill] sm:$0xff] %v7541_v63  ;;  %v7545_v11 = vpop.eup %5951  ;;  %v2773_v25 = vsel %vm2304_vm3, %v7541_v63, 0.0 }
 0x4f5   :  { %5955 = vpow2.f32 %v2597_v18  ;;  %8318 = vst [vmem:[#allocation9_spill] sm:$0xff] %v7545_v11  ;;  %v2776_v24 = vsel %vm2304_vm3, %v7545_v11, 0.0 }
 0x4f6   :  { %5957 = vpow2.f32 %v2625_v14 }
 0x4f7   :  { %2708 = vadd.xlane.f32.xlu0 %v2707_v46  ;;  %v2627_v46 = vmul.f32 1.442695, %v2530_v4 }
 0x4f8   :  { %2750 = vadd.xlane.f32.xlu1 %v2749_v47  ;;  %v2764_v47 = vsel %vm2304_vm3, %v7529_v3, 0.0 }
 0x4f9   :  { %5959 = vpow2.f32 %v2627_v46 }
 0x4fa   :  { %5961 = vpow2.f32 %v2599_v58 }
 0x4fb   :  { %2753 = vadd.xlane.f32.xlu0 %v2752_v61  ;;  %v7549_v61 = vpop.eup %5953 }
 0x4fc   :  { %2711 = vadd.xlane.f32.xlu1 %v2710_v8  ;;  %v2734_v36 = vsel %vm2304_vm3, %v7549_v61, 0.0 }
 0x4ff   :  { %2720 = vadd.xlane.f32.xlu0 %v2719_v29  ;;  %v7553_v8 = vpop.eup %5955 }
 0x500   :  { %2762 = vadd.xlane.f32.xlu1 %v2761_v34  ;;  %v7557_v4 = vpop.eup %5957  ;;  %v2743_v18 = vsel %vm2304_vm3, %v7553_v8, 0.0 }
 0x501   :  { %8319 = vst [vmem:[#allocation49_spill] sm:$0xff] %v7557_v4  ;;  %v2785_v44 = vsel %vm2304_vm3, %v7557_v4, 0.0 }
 0x503   :  { %2765 = vadd.xlane.f32.xlu0 %v2764_v47  ;;  %v7561_v14 = vpop.eup %5959 }
 0x504   :  { %2723 = vadd.xlane.f32.xlu1 %v2722_v51  ;;  %8320 = vst [vmem:[#allocation50_spill] sm:$0xff] %v7561_v14  ;;  %v7565_v54 = vpop.eup %5961  ;;  %v2788_v29 = vsel %vm2304_vm3, %v7561_v14, 0.0 }
 0x505   :  { %v2746_v34 = vsel %vm2304_vm3, %v7565_v54, 0.0 }
 0x507   :  { %2732 = vadd.xlane.f32.xlu0 %v2731_v15 }
 0x508   :  { %2774 = vadd.xlane.f32.xlu1 %v2773_v25 }
 0x50b   :  { %2777 = vadd.xlane.f32.xlu0 %v2776_v24 }
 0x50c   :  { %2735 = vadd.xlane.f32.xlu1 %v2734_v36 }
 0x50f   :  { %2744 = vadd.xlane.f32.xlu0 %v2743_v18 }
 0x510   :  { %2786 = vadd.xlane.f32.xlu1 %v2785_v44 }
 0x513   :  { %2789 = vadd.xlane.f32.xlu0 %v2788_v29 }
 0x514   :  { %2747 = vadd.xlane.f32.xlu1 %v2746_v34 }
 0x523   :  { %v7571_v46 = vpop.xlane.xlu0 %2714 }
 0x525   :  { %v7573_v58 = vpop.xlane.xlu1 %2717 }
 0x528   :  { %v2691_v47 = vpop.xlane.xlu0 %2690 }
 0x529   :  { %5963 = vrcp.f32 %v2691_v47  ;;  %v2694_v51 = vpop.xlane.xlu1 %2693 }
 0x52a   :  { %5965 = vrcp.f32 %v2694_v51 }
 0x52c   :  { %v2415_v15 = vpop.xlane.xlu0 %2414 }
 0x52d   :  { %v2533_v25 = vsub.f32 %v7196_v31, %v2415_v15  ;;  %v2418_v24 = vpop.xlane.xlu1 %2417 }
 0x52e   :  { %v2534_v18 = vsub.f32 %v7202_v10, %v2418_v24 }
 0x52f   :  { %v2633_v36 = vmul.f32 1.442695, %v2533_v25 }
 0x530   :  { %v2373_v44 = vpop.xlane.xlu0 %2372  ;;  %v2635_v63 = vmul.f32 1.442695, %v2534_v18 }
 0x531   :  { %5967 = vpow2.f32 %v2633_v36  ;;  %v2519_v29 = vsub.f32 %v7208_v33, %v2373_v44  ;;  %v2376_v34 = vpop.xlane.xlu1 %2375 }
 0x532   :  { %v2520_v4 = vsub.f32 %v7214_v52, %v2376_v34 }
 0x533   :  { %v5964_v14 = vpop.eup %5963  ;;  %v2605_v11 = vmul.f32 1.442695, %v2519_v29 }
 0x534   :  { %v5966_v47 = vpop.eup %5965  ;;  %v2607_v48 = vmul.f32 1.442695, %v2520_v4  ;;  %v2427_v51 = vpop.xlane.xlu0 %2426  ;;  %v2945_v3 = vmul.f32 %v5964_v14, %v7186_v16 }
 0x535   :  { %v2946_v31 = vmul.f32 %v5966_v47, %v7192_v6  ;;  %5969 = vpow2.f32 %v2605_v11  ;;  %v2537_v10 = vsub.f32 %v7220_v23, %v2427_v51  ;;  %v2430_v15 = vpop.xlane.xlu1 %2429  ;;  %v8321_v6 = vld [vmem:[#allocation12_spill] sm:$0xff]  ;;  %v8322_v11 = vmov 0.0  }
 0x536   :  { %5971 = vpow2.f32 %v2607_v48  ;;  %v2538_v25 = vsub.f32 %v7226_v62, %v2430_v15 }
 0x537   :  { %5973 = vpow2.f32 %v2635_v63  ;;  %v2641_v33 = vmul.f32 1.442695, %v2537_v10  ;;  %v3009_v52 = vpack.c.bf16 %v2946_v31, %v2945_v3  ;;  %v8323_v10 = vld [vmem:[#allocation39_spill] sm:$0xff] }
 0x538   :  { %v2385_v24 = vpop.xlane.xlu0 %2384  ;;  %v2643_v48 = vmul.f32 1.442695, %v2538_v25 }
 0x539   :  { %5975 = vpow2.f32 %v2641_v33  ;;  %v2523_v36 = vsub.f32 %v7232_v0, %v2385_v24  ;;  %v2388_v4 = vpop.xlane.xlu1 %2387  ;;  %5408 = vmatmul.mubr.msk.bf16.vlgmr.msra.gmra.mrb[64].mxu0 %vm2304_vm3, %v3009_v52 }
 0x53a   :  { %v2524_v16 = vsub.f32 %v7238_v49, %v2388_v4  ;;  %5418 = vmatpush3.bf16.msra.mxu0 %v8321_v6  ;;  %5419 = vmatprep.mubr.msk.bf16.mxu0 %vm6167_vm1, %v8322_v11  ;;  %v8324_v6 = vld [vmem:[#allocation40_spill] sm:$0xff] }
 0x53b   :  { %v7589_v23 = vpop.eup %5967  ;;  %v2613_v63 = vmul.f32 1.442695, %v2523_v36  ;;  %5429 = vmatprep.subr.bf16.mxu0 %v8322_v11 }
 0x53c   :  { %v2615_v62 = vmul.f32 1.442695, %v2524_v16  ;;  %v2439_v3 = vpop.xlane.xlu0 %2438  ;;  %v2797_v0 = vsel %vm2304_vm3, %v7589_v23, 0.0 }
 0x53d   :  { %5977 = vpow2.f32 %v2613_v63  ;;  %v2541_v14 = vsub.f32 %v7244_v21, %v2439_v3  ;;  %2798 = vadd.xlane.f32.xlu1 %v2797_v0  ;;  %v2442_v49 = vpop.xlane.xlu1 %2441 }
 0x53e   :  { %5979 = vpow2.f32 %v2615_v62  ;;  %v2542_v29 = vsub.f32 %v7250_v19, %v2442_v49 }
 0x53f   :  { %v7595_v18 = vpop.eup %5969  ;;  %5981 = vpow2.f32 %v2643_v48  ;;  %v2649_v44 = vmul.f32 1.442695, %v2541_v14 }
 0x540   :  { %v7598_v34 = vpop.eup %5971  ;;  %v2397_v47 = vpop.xlane.xlu0 %2396  ;;  %v2755_v51 = vsel %vm2304_vm3, %v7595_v18, 0.0  ;;  %v2651_v52 = vmul.f32 1.442695, %v2542_v29 }
 0x541   :  { %v7602_v31 = vpop.eup %5973  ;;  %5983 = vpow2.f32 %v2649_v44  ;;  %v2527_v21 = vsub.f32 %v8323_v10, %v2397_v47  ;;  %2756 = vadd.xlane.f32.xlu0 %v2755_v51  ;;  %v2400_v15 = vpop.xlane.xlu1 %2399  ;;  %v2758_v33 = vsel %vm2304_vm3, %v7598_v34, 0.0 }
 0x542   :  { %v2528_v25 = vsub.f32 %v7264_v39, %v2400_v15  ;;  %2759 = vadd.xlane.f32.xlu1 %v2758_v33  ;;  %v2800_v16 = vsel %vm2304_vm3, %v7602_v31, 0.0 }
 0x543   :  { %v7608_v19 = vpop.eup %5975  ;;  %v2621_v24 = vmul.f32 1.442695, %v2527_v21  ;;  %v8325_v21 = vld [vmem:[#allocation41_spill] sm:$0xff] }
 0x544   :  { %v2623_v36 = vmul.f32 1.442695, %v2528_v25  ;;  %v2451_v4 = vpop.xlane.xlu0 %2450  ;;  %v2809_v62 = vsel %vm2304_vm3, %v7608_v19, 0.0 }
 0x545   :  { %5985 = vpow2.f32 %v2621_v24  ;;  %v2545_v48 = vsub.f32 %v8324_v6, %v2451_v4  ;;  %2801 = vadd.xlane.f32.xlu0 %v2800_v16  ;;  %v2454_v63 = vpop.xlane.xlu1 %2453  ;;  %v8326_v4 = vld [vmem:[#allocation42_spill] sm:$0xff] }
 0x546   :  { %5987 = vpow2.f32 %v2623_v36  ;;  %2810 = vadd.xlane.f32.xlu1 %v2809_v62  ;;  %v2546_v0 = vsub.f32 %v7276_v60, %v2454_v63 }
 0x547   :  { %v7615_v39 = vpop.eup %5977  ;;  %5989 = vpow2.f32 %v2651_v52  ;;  %v2657_v3 = vmul.f32 1.442695, %v2545_v48 }
 0x548   :  { %v7618_v14 = vpop.eup %5979  ;;  %v2409_v49 = vpop.xlane.xlu0 %2408  ;;  %v2767_v44 = vsel %vm2304_vm3, %v7615_v39, 0.0  ;;  %v2659_v33 = vmul.f32 1.442695, %v2546_v0 }
 0x549   :  { %v7622_v29 = vpop.eup %5981  ;;  %5991 = vpow2.f32 %v2657_v3  ;;  %v2531_v47 = vsub.f32 %v7284_v22, %v2409_v49  ;;  %2768 = vadd.xlane.f32.xlu0 %v2767_v44  ;;  %v2412_v51 = vpop.xlane.xlu1 %2411  ;;  %v2770_v10 = vsel %vm2304_vm3, %v7618_v14, 0.0 }
 0x54a   :  { %v2532_v15 = vsub.f32 %v8325_v21, %v2412_v51  ;;  %2771 = vadd.xlane.f32.xlu1 %v2770_v10  ;;  %v2812_v36 = vsel %vm2304_vm3, %v7622_v29, 0.0 }
 0x54b   :  { %v7628_v60 = vpop.eup %5983  ;;  %v2629_v25 = vmul.f32 1.442695, %v2531_v47  ;;  %v8327_v47 = vld [vmem:[#allocation43_spill] sm:$0xff] }
 0x54c   :  { %v2631_v52 = vmul.f32 1.442695, %v2532_v15  ;;  %v2463_v24 = vpop.xlane.xlu0 %2462  ;;  %v2821_v6 = vsel %vm2304_vm3, %v7628_v60, 0.0  ;;  %v8328_v15 = vld [vmem:[#allocation44_spill] sm:$0xff] }
 0x54d   :  { %5993 = vpow2.f32 %v2629_v25  ;;  %v2549_v22 = vsub.f32 %v8326_v4, %v2463_v24  ;;  %2813 = vadd.xlane.f32.xlu0 %v2812_v36  ;;  %v2466_v16 = vpop.xlane.xlu1 %2465 }
 0x54e   :  { %5995 = vpow2.f32 %v2631_v52  ;;  %2822 = vadd.xlane.f32.xlu1 %v2821_v6  ;;  %v2550_v62 = vsub.f32 %v7304_v20, %v2466_v16 }
 0x54f   :  { %v7635_v48 = vpop.eup %5985  ;;  %5997 = vpow2.f32 %v2659_v33  ;;  %v2665_v63 = vmul.f32 1.442695, %v2549_v22  ;;  %v8329_v22 = vld [vmem:[#allocation45_spill] sm:$0xff] }
 0x550   :  { %v7638_v3 = vpop.eup %5987  ;;  %v2421_v0 = vpop.xlane.xlu0 %2420  ;;  %v2779_v49 = vsel %vm2304_vm3, %v7635_v48, 0.0  ;;  %v2667_v25 = vmul.f32 1.442695, %v2550_v62 }
 0x551   :  { %v7642_v44 = vpop.eup %5989  ;;  %5999 = vpow2.f32 %v2665_v63  ;;  %v2535_v51 = vsub.f32 %v8327_v47, %v2421_v0  ;;  %2780 = vadd.xlane.f32.xlu0 %v2779_v49  ;;  %v2424_v10 = vpop.xlane.xlu1 %2423  ;;  %v2782_v21 = vsel %vm2304_vm3, %v7638_v3, 0.0 }
 0x552   :  { %v2536_v33 = vsub.f32 %v8328_v15, %v2424_v10  ;;  %2783 = vadd.xlane.f32.xlu1 %v2782_v21  ;;  %v2824_v4 = vsel %vm2304_vm3, %v7642_v44, 0.0  ;;  %v8330_v15 = vld [vmem:[#allocation46_spill] sm:$0xff] }
 0x553   :  { %v7648_v20 = vpop.eup %5991  ;;  %v2637_v52 = vmul.f32 1.442695, %v2535_v51 }
 0x554   :  { %v2639_v24 = vmul.f32 1.442695, %v2536_v33  ;;  %v2475_v36 = vpop.xlane.xlu0 %2474  ;;  %v2833_v63 = vsel %vm2304_vm3, %v7648_v20, 0.0 }
 0x555   :  { %6001 = vpow2.f32 %v2637_v52  ;;  %v2553_v16 = vsub.f32 %v8329_v22, %v2475_v36  ;;  %2825 = vadd.xlane.f32.xlu0 %v2824_v4  ;;  %v2478_v6 = vpop.xlane.xlu1 %2477 }
 0x556   :  { %6003 = vpow2.f32 %v2639_v24  ;;  %2834 = vadd.xlane.f32.xlu1 %v2833_v63  ;;  %v2554_v49 = vsub.f32 %v7330_v42, %v2478_v6 }
 0x557   :  { %v7655_v0 = vpop.eup %5993  ;;  %6005 = vpow2.f32 %v2667_v25  ;;  %v2673_v62 = vmul.f32 1.442695, %v2553_v16  ;;  %v8331_v25 = vld [vmem:[#allocation47_spill] sm:$0xff] }
 0x558   :  { %v7658_v47 = vpop.eup %5995  ;;  %v2433_v51 = vpop.xlane.xlu0 %2432  ;;  %v2791_v10 = vsel %vm2304_vm3, %v7655_v0, 0.0  ;;  %v2675_v4 = vmul.f32 1.442695, %v2554_v49 }
 0x559   :  { %v7662_v21 = vpop.eup %5997  ;;  %6007 = vpow2.f32 %v2673_v62  ;;  %v2539_v33 = vsub.f32 %v8330_v15, %v2433_v51  ;;  %2792 = vadd.xlane.f32.xlu0 %v2791_v10  ;;  %v2436_v52 = vpop.xlane.xlu1 %2435  ;;  %v2794_v24 = vsel %vm2304_vm3, %v7658_v47, 0.0  ;;  %v8333_v62 = vld [vmem:[#allocation48_spill] sm:$0xff] }
 0x55a   :  { %v2540_v36 = vsub.f32 %v8331_v25, %v2436_v52  ;;  %2795 = vadd.xlane.f32.xlu1 %v2794_v24  ;;  %v2836_v63 = vsel %vm2304_vm3, %v7662_v21, 0.0 }
 0x55b   :  { %v7668_v42 = vpop.eup %5999  ;;  %v2645_v22 = vmul.f32 1.442695, %v2539_v33 }
 0x55c   :  { %8332 = vst [vmem:[#allocation12_spill] sm:$0xff] %v7668_v42  ;;  %v2647_v16 = vmul.f32 1.442695, %v2540_v36  ;;  %v2445_v6 = vpop.xlane.xlu0 %2444  ;;  %v2845_v15 = vsel %vm2304_vm3, %v7668_v42, 0.0 }
 0x55d   :  { %6009 = vpow2.f32 %v2645_v22  ;;  %v2543_v51 = vsub.f32 %v8333_v62, %v2445_v6  ;;  %2837 = vadd.xlane.f32.xlu0 %v2836_v63  ;;  %v2487_v10 = vpop.xlane.xlu1 %2486 }
 0x55e   :  { %6011 = vpow2.f32 %v2647_v16  ;;  %v2557_v52 = vsub.f32 %v7358_v12, %v2487_v10  ;;  %2846 = vadd.xlane.f32.xlu1 %v2845_v15 }
 0x55f   :  { %v7676_v24 = vpop.eup %6001  ;;  %6013 = vpow2.f32 %v2675_v4  ;;  %v2653_v49 = vmul.f32 1.442695, %v2543_v51 }
 0x560   :  { %v7678_v33 = vpop.eup %6003  ;;  %v2681_v25 = vmul.f32 1.442695, %v2557_v52  ;;  %v2490_v36 = vpop.xlane.xlu0 %2489  ;;  %v2803_v22 = vsel %vm2304_vm3, %v7676_v24, 0.0 }
 0x561   :  { %8334 = vst [vmem:[#allocation39_spill] sm:$0xff] %v7678_v33  ;;  %v7682_v6 = vpop.eup %6005  ;;  %v2558_v63 = vsub.f32 %v7368_v17, %v2490_v36  ;;  %2804 = vadd.xlane.f32.xlu0 %v2803_v22  ;;  %v2448_v16 = vpop.xlane.xlu1 %2447  ;;  %v2806_v12 = vsel %vm2304_vm3, %v7678_v33, 0.0 }
 0x562   :  { %8335 = vst [vmem:[#allocation40_spill] sm:$0xff] %v7682_v6  ;;  %6015 = vpow2.f32 %v2681_v25  ;;  %v2544_v4 = vsub.f32 %v7374_v43, %v2448_v16  ;;  %2807 = vadd.xlane.f32.xlu1 %v2806_v12  ;;  %v2848_v52 = vsel %vm2304_vm3, %v7682_v6, 0.0 }
 0x563   :  { %v7688_v62 = vpop.eup %6007  ;;  %6017 = vpow2.f32 %v2653_v49  ;;  %v2683_v51 = vmul.f32 1.442695, %v2558_v63 }
 0x564   :  { %8336 = vst [vmem:[#allocation41_spill] sm:$0xff] %v7688_v62  ;;  %v2655_v10 = vmul.f32 1.442695, %v2544_v4  ;;  %v2457_v15 = vpop.xlane.xlu0 %2456  ;;  %v2857_v22 = vsel %vm2304_vm3, %v7688_v62, 0.0 }
 0x565   :  { %v2547_v17 = vsub.f32 %v7384_v5, %v2457_v15  ;;  %2849 = vadd.xlane.f32.xlu0 %v2848_v52  ;;  %v2460_v36 = vpop.xlane.xlu1 %2459 }
 0x566   :  { %6019 = vpow2.f32 %v2655_v10  ;;  %v2548_v43 = vsub.f32 %v7393_v13, %v2460_v36  ;;  %2858 = vadd.xlane.f32.xlu1 %v2857_v22 }
 0x567   :  { %v7696_v25 = vpop.eup %6009  ;;  %6021 = vpow2.f32 %v2683_v51  ;;  %v2661_v49 = vmul.f32 1.442695, %v2547_v17 }
 0x568   :  { %8337 = vst [vmem:[#allocation42_spill] sm:$0xff] %v7696_v25  ;;  %v7698_v63 = vpop.eup %6011  ;;  %v2663_v16 = vmul.f32 1.442695, %v2548_v43  ;;  %v2469_v12 = vpop.xlane.xlu0 %2468  ;;  %v2815_v5 = vsel %vm2304_vm3, %v7696_v25, 0.0 }
 0x569   :  { %8338 = vst [vmem:[#allocation43_spill] sm:$0xff] %v7698_v63  ;;  %v7702_v4 = vpop.eup %6013  ;;  %v2551_v15 = vsub.f32 %v7401_v2, %v2469_v12  ;;  %2816 = vadd.xlane.f32.xlu0 %v2815_v5  ;;  %v7705_v10 = vpop.xlane.xlu1 %2471  ;;  %v2818_v13 = vsel %vm2304_vm3, %v7698_v63, 0.0 }
 0x56a   :  { %8339 = vst [vmem:[#allocation44_spill] sm:$0xff] %v7702_v4  ;;  %6023 = vpow2.f32 %v2663_v16  ;;  %2819 = vadd.xlane.f32.xlu1 %v2818_v13  ;;  %v2860_v36 = vsel %vm2304_vm3, %v7702_v4, 0.0 }
 0x56b   :  { %6025 = vpow2.f32 %v2661_v49  ;;  %v2669_v51 = vmul.f32 1.442695, %v2551_v15 }
 0x56c   :  { %v7709_v52 = vpop.eup %6015  ;;  %v7711_v17 = vpop.xlane.xlu0 %2480 }
 0x56d   :  { %8340 = vst [vmem:[#allocation45_spill] sm:$0xff] %v7709_v52  ;;  %v7715_v22 = vpop.eup %6017  ;;  %2861 = vadd.xlane.f32.xlu0 %v2860_v36  ;;  %v7717_v2 = vpop.xlane.xlu1 %2483  ;;  %v2869_v43 = vsel %vm2304_vm3, %v7709_v52, 0.0  ;;  %6027 = vpow2.f32 %v2669_v51 }
 0x56e   :  { %8341 = vst [vmem:[#allocation46_spill] sm:$0xff] %v7715_v22  ;;  %2870 = vadd.xlane.f32.xlu1 %v2869_v43  ;;  %v2827_v12 = vsel %vm2304_vm3, %v7715_v22, 0.0  ;;  %v2556_v33 = vsub.f32 %v7429_v26, %v7717_v2  ;;  %v2555_v2 = vsub.f32 %v7419_v41, %v7711_v17 }
 0x570   :  { %v7721_v16 = vpop.eup %6019  ;;  %v7723_v49 = vpop.xlane.xlu0 %2492 }
 0x571   :  { %8342 = vst [vmem:[#allocation47_spill] sm:$0xff] %v7721_v16  ;;  %v7727_v5 = vpop.eup %6021  ;;  %2828 = vadd.xlane.f32.xlu0 %v2827_v12  ;;  %v7729_v15 = vpop.xlane.xlu1 %2495  ;;  %v2830_v13 = vsel %vm2304_vm3, %v7721_v16, 0.0  ;;  %v2559_v41 = vsub.f32 %v7442_v40, %v7723_v49  ;;  %v8356_v40 = vld [vmem:[#allocation18_spill] sm:$0xff] }
 0x572   :  { %8343 = vst [vmem:[#allocation48_spill] sm:$0xff] %v7727_v5  ;;  %2831 = vadd.xlane.f32.xlu1 %v2830_v13  ;;  %v2872_v51 = vsel %vm2304_vm3, %v7727_v5, 0.0 }
 0x573   :  { %v2685_v49 = vmul.f32 1.442695, %v2559_v41 }
 0x574   :  { %v7733_v36 = vpop.eup %6023  ;;  %v2727_v43 = vpop.xlane.xlu0 %2726 }
 0x575   :  { %8344 = vst [vmem:[#allocation51_spill] sm:$0xff] %v7733_v36  ;;  %v7737_v52 = vpop.eup %6025  ;;  %2873 = vadd.xlane.f32.xlu0 %v2872_v51  ;;  %v2730_v62 = vpop.xlane.xlu1 %2729  ;;  %v2842_v4 = vsel %vm2304_vm3, %v7733_v36, 0.0 }
 0x576   :  { %8345 = vst [vmem:[#allocation52_spill] sm:$0xff] %v7737_v52  ;;  %2843 = vadd.xlane.f32.xlu1 %v2842_v4  ;;  %v2839_v22 = vsel %vm2304_vm3, %v7737_v52, 0.0 }
 0x577   :  { %v7743_v16 = vpop.eup %6027 }
 0x578   :  { %v2697_v12 = vpop.xlane.xlu0 %2696  ;;  %8346 = vst [vmem:[#allocation53_spill] sm:$0xff] %v7743_v16  ;;  %v2851_v5 = vsel %vm2304_vm3, %v7743_v16, 0.0  ;;  %v8349_v16 = vld [vmem:[#allocation14_spill] sm:$0xff] }
 0x579   :  { %6029 = vrcp.f32 %v2697_v12  ;;  %2840 = vadd.xlane.f32.xlu0 %v2839_v22  ;;  %v2700_v13 = vpop.xlane.xlu1 %2699 }
 0x57a   :  { %6031 = vrcp.f32 %v2700_v13 }
 0x57c   :  { %v2739_v63 = vpop.xlane.xlu0 %2738 }
 0x57d   :  { %2852 = vadd.xlane.f32.xlu0 %v2851_v5  ;;  %v2742_v51 = vpop.xlane.xlu1 %2741  ;;  %v8347_v5 = vld [vmem:[#allocation4_spill] sm:$0xff] }
 0x580   :  { %v2703_v25 = vpop.xlane.xlu0 %2702 }
 0x581   :  { %6033 = vrcp.f32 %v2703_v25  ;;  %v2706_v36 = vpop.xlane.xlu1 %2705 }
 0x582   :  { %6035 = vrcp.f32 %v2706_v36 }
 0x583   :  { %v6030_v4 = vpop.eup %6029  ;;  %6037 = vrcp.f32 %v7573_v58 }
 0x584   :  { %v6032_v6 = vpop.eup %6031  ;;  %v2709_v42 = vpop.xlane.xlu0 %2708  ;;  %v2947_v52 = vmul.f32 %v6030_v4, %v7467_v32  ;;  %6039 = vrcp.f32 %v7571_v46  ;;  %v8348_v32 = vld [vmem:[#allocation11_spill] sm:$0xff] }
 0x585   :  { %v2948_v12 = vmul.f32 %v6032_v6, %v7471_v45  ;;  %v7749_v22 = vpop.xlane.xlu1 %2750  ;;  %6041 = vrcp.f32 %v2709_v42 }
 0x587   :  { %4404 = vrot.lane.b32.xlu1 %v8347_v5, %s6169_s18  ;;  %v3010_v13 = vpack.c.bf16 %v2948_v12, %v2947_v52 }
 0x588   :  { %v7755_v25 = vpop.xlane.xlu0 %2753 }
 0x589   :  { %v2712_v36 = vpop.xlane.xlu1 %2711  ;;  %5414 = vmatmul.mubr.msk.bf16.vlgmr.msra.gmra.mrb[80].mxu1 %vm2304_vm3, %v3010_v13 }
 0x58a   :  { %6043 = vrcp.f32 %v2712_v36  ;;  %5424 = vmatpush3.bf16.msra.mxu1 %v8348_v32  ;;  %5425 = vmatprep.mubr.msk.bf16.mxu1 %vm6167_vm1, %v8322_v11 }
 0x58b   :  { %v6034_v45 = vpop.eup %6033  ;;  %5435 = vmatprep.subr.bf16.mxu1 %v8322_v11  ;;  %6045 = vrcp.f32 %v2730_v62  ;;  %v8351_v62 = vld [vmem:[#allocation3_spill] sm:$0xff] }
 0x58c   :  { %v6036_v46 = vpop.eup %6035  ;;  %v2721_v58 = vpop.xlane.xlu0 %2720  ;;  %v2949_v6 = vmul.f32 %v6034_v45, %v7489_v55  ;;  %6047 = vrcp.f32 %v2727_v43  ;;  %v8350_v55 = vld [vmem:[#allocation38_spill] sm:$0xff]  ;;  %v2552_v45 = vsub.f32 %v7409_v28, %v7705_v10 }
 0x58d   :  { %v2950_v42 = vmul.f32 %v6036_v46, %v7493_v9  ;;  %v7764_v52 = vpop.xlane.xlu1 %2762  ;;  %v6038_v12 = vpop.eup %6037  ;;  %6049 = vrcp.f32 %v2721_v58  ;;  %v8352_v58 = vld [vmem:[#allocation37_spill] sm:$0xff] }
 0x58e   :  { %v6040_v13 = vpop.eup %6039  ;;  %v2954_v9 = vmul.f32 %v6038_v12, %v8350_v55 }
 0x58f   :  { %v3011_v4 = vpack.c.bf16 %v2950_v42, %v2949_v6  ;;  %v6042_v32 = vpop.eup %6041  ;;  %v2953_v6 = vmul.f32 %v6040_v13, %v8352_v58 }
 0x590   :  { %v7766_v5 = vpop.xlane.xlu0 %2765  ;;  %v2951_v42 = vmul.f32 %v6042_v32, %v7499_v37  ;;  %v2679_v32 = vmul.f32 1.442695, %v2556_v33 }
 0x591   :  { %v2724_v36 = vpop.xlane.xlu1 %2723  ;;  %5420 = vmatmul.mubr.msk.bf16.vlgmr.msra.gmra.mrb[68].mxu0 %vm2304_vm3, %v3011_v4 }
 0x592   :  { %6051 = vrcp.f32 %v2724_v36  ;;  %5430 = vmatpush3.bf16.msra.mxu0 %v8349_v16  ;;  %5431 = vmatprep.mubr.msk.bf16.mxu0 %vm6167_vm1, %v8322_v11  ;;  %v3013_v36 = vpack.c.bf16 %v2954_v9, %v2953_v6  ;;  %v2560_v9 = vsub.f32 %v7445_v1, %v7729_v15  ;;  %v2677_v1 = vmul.f32 1.442695, %v2555_v2 }
 0x593   :  { %4357 = vrot.lane.b32.xlu0 %v8351_v62, %s6169_s18  ;;  %5441 = vmatprep.subr.bf16.mxu0 %v8322_v11  ;;  %6053 = vrcp.f32 %v2742_v51  ;;  %v2671_v62 = vmul.f32 1.442695, %v2552_v45 }
 0x594   :  { %v6044_v43 = vpop.eup %6043  ;;  %v2733_v46 = vpop.xlane.xlu0 %2732  ;;  %6055 = vrcp.f32 %v2739_v63  ;;  %v8354_v63 = vld [vmem:[#allocation16_spill] sm:$0xff] }
 0x595   :  { %v2952_v16 = vmul.f32 %v6044_v43, %v7513_v35  ;;  %v7781_v4 = vpop.xlane.xlu1 %2774  ;;  %v6046_v55 = vpop.eup %6045  ;;  %6057 = vrcp.f32 %v2733_v46  ;;  %v8353_v35 = vld [vmem:[#allocation13_spill] sm:$0xff] }
 0x596   :  { %v6048_v10 = vpop.eup %6047  ;;  %v2958_v51 = vmul.f32 %v6046_v55, %v7459_v53 }
 0x597   :  { %v3012_v12 = vpack.c.bf16 %v2952_v16, %v2951_v42  ;;  %v6050_v37 = vpop.eup %6049  ;;  %v2957_v53 = vmul.f32 %v6048_v10, %v7455_v50 }
 0x598   :  { %v7785_v28 = vpop.xlane.xlu0 %2777  ;;  %v2955_v43 = vmul.f32 %v6050_v37, %v7519_v27  ;;  %v2687_v27 = vmul.f32 1.442695, %v2560_v9  ;;  %v8357_v37 = vld [vmem:[#allocation29_spill] sm:$0xff] }
 0x599   :  { %v2736_v13 = vpop.xlane.xlu1 %2735  ;;  %5426 = vmatmul.mubr.msk.bf16.vlgmr.msra.gmra.mrb[84].mxu1 %vm2304_vm3, %v3012_v12  ;;  %5432 = vmatmul.mubr.msk.bf16.vlgmr.msra.gmra.mrb[72].mxu0 %vm2304_vm3, %v3013_v36  ;;  %v3015_v17 = vpack.c.bf16 %v2958_v51, %v2957_v53 }
 0x59a   :  { %6059 = vrcp.f32 %v2736_v13  ;;  %5436 = vmatpush3.bf16.msra.mxu1 %v8353_v35  ;;  %5442 = vmatpush3.bf16.msra.mxu0 %v8354_v63 }
 0x59b   :  { %5437 = vmatprep.mubr.msk.bf16.mxu1 %vm6167_vm1, %v8322_v11  ;;  %5443 = vmatprep.mubr.msk.bf16.mxu0 %vm6167_vm1, %v8322_v11  ;;  %6061 = vpow2.f32 %v2671_v62 }
 0x59c   :  { %v6052_v26 = vpop.eup %6051  ;;  %5447 = vmatprep.subr.bf16.mxu1 %v8322_v11  ;;  %5453 = vmatprep.subr.bf16.mxu0 %v8322_v11  ;;  %v2745_v46 = vpop.xlane.xlu0 %2744  ;;  %6063 = vrcp.f32 %v7755_v25  ;;  %v8355_v25 = vld [vmem:[#allocation15_spill] sm:$0xff] }
 0x59d   :  { %v2956_v45 = vmul.f32 %v6052_v26, %v7533_v30  ;;  %v7805_v58 = vpop.xlane.xlu1 %2786  ;;  %6065 = vrcp.f32 %v7749_v22  ;;  %v6054_v6 = vpop.eup %6053 }
 0x59e   :  { %6067 = vrcp.f32 %v2745_v46  ;;  %v6056_v50 = vpop.eup %6055  ;;  %v2962_v22 = vmul.f32 %v6054_v6, %v7482_v38  ;;  %v8360_v46 = vld [vmem:[#allocation7_spill] sm:$0xff] }
 0x59f   :  { %v3014_v33 = vpack.c.bf16 %v2956_v45, %v2955_v43  ;;  %6069 = vpow2.f32 %v2679_v32  ;;  %v6058_v30 = vpop.eup %6057  ;;  %v2961_v16 = vmul.f32 %v6056_v50, %v7478_v7 }
 0x5a0   :  { %v2959_v12 = vmul.f32 %v6058_v30, %v7537_v59  ;;  %v8358_v59 = vld [vmem:[#allocation35_spill] sm:$0xff]  ;;  %v8363_v30 = vld [vmem:[#allocation22_spill] sm:$0xff] }
 0x5a1   :  { %v2748_v15 = vpop.xlane.xlu1 %2747  ;;  %5438 = vmatmul.mubr.msk.bf16.vlgmr.msra.gmra.mrb[88].mxu1 %vm2304_vm3, %v3014_v33  ;;  %5444 = vmatmul.mubr.msk.bf16.vlgmr.msra.gmra.mrb[76].mxu0 %vm2304_vm3, %v3015_v17  ;;  %v3017_v62 = vpack.c.bf16 %v2962_v22, %v2961_v16  ;;  %v2790_v33 = vpop.xlane.xlu0 %2789  ;;  %v8362_v17 = vld [vmem:[#allocation10_spill] sm:$0xff] }
 0x5a2   :  { %6071 = vrcp.f32 %v2748_v15  ;;  %5448 = vmatpush3.bf16.msra.mxu1 %v8355_v25  ;;  %5454 = vmatpush3.bf16.msra.mxu0 %v8356_v40  ;;  %v8364_v25 = vld [vmem:[#allocation9_spill] sm:$0xff] }
 0x5a3   :  { %5449 = vmatprep.mubr.msk.bf16.mxu1 %vm6167_vm1, %v8322_v11  ;;  %5455 = vmatprep.mubr.msk.bf16.mxu0 %vm6167_vm1, %v8322_v11  ;;  %6073 = vpow2.f32 %v2677_v1 }
 0x5a4   :  { %v6060_v42 = vpop.eup %6059  ;;  %5459 = vmatprep.subr.bf16.mxu1 %v8322_v11  ;;  %5465 = vmatprep.subr.bf16.mxu0 %v8322_v11  ;;  %6075 = vpow2.f32 %v2687_v27 }
 0x5a5   :  { %v2960_v36 = vmul.f32 %v6060_v42, %v7549_v61  ;;  %v7825_v38 = vpop.eup %6061  ;;  %6077 = vrcp.f32 %v7766_v5 }
 0x5a6   :  { %6079 = vpow2.f32 %v2685_v49  ;;  %v6064_v10 = vpop.eup %6063  ;;  %v2854_v61 = vsel %vm2304_vm3, %v7825_v38, 0.0  ;;  %v8365_v49 = vld [vmem:[#allocation8_spill] sm:$0xff] }
 0x5a7   :  { %v3016_v55 = vpack.c.bf16 %v2960_v36, %v2959_v12  ;;  %6081 = vrcp.f32 %v7764_v52  ;;  %v6066_v13 = vpop.eup %6065  ;;  %v2966_v35 = vmul.f32 %v6064_v10, %v7509_v56  ;;  %v8367_v36 = vld [vmem:[#allocation50_spill] sm:$0xff]  ;;  %v8369_v10 = vld [vmem:[#allocation49_spill] sm:$0xff] }
 0x5a8   :  { %v6068_v7 = vpop.eup %6067  ;;  %v2965_v63 = vmul.f32 %v6066_v13, %v7503_v57  ;;  %6083 = vrcp.f32 %v7785_v28  ;;  %v8359_v28 = vld [vmem:[#allocation31_spill] sm:$0xff] }
 0x5a9   :  { %5450 = vmatmul.mubr.msk.bf16.vlgmr.msra.gmra.mrb[92].mxu1 %vm2304_vm3, %v3016_v55  ;;  %5456 = vmatmul.mubr.msk.bf16.vlgmr.msra.gmra.mrb[80].mxu0 %vm2304_vm3, %v3017_v62  ;;  %v7835_v5 = vpop.eup %6069  ;;  %v2963_v51 = vmul.f32 %v6068_v7, %v7553_v8  ;;  %6085 = vrcp.f32 %v7781_v4  ;;  %v8361_v4 = vld [vmem:[#allocation20_spill] sm:$0xff]  ;;  %v8368_v62 = vld [vmem:[#allocation6_spill] sm:$0xff] }
 0x5aa   :  { %5460 = vmatpush3.bf16.msra.mxu1 %v8357_v37  ;;  %5466 = vmatpush3.bf16.msra.mxu0 %v8358_v59  ;;  %v2866_v56 = vsel %vm2304_vm3, %v7835_v5, 0.0  ;;  %v3019_v53 = vpack.c.bf16 %v2966_v35, %v2965_v63  ;;  %6087 = vrcp.f32 %v2790_v33  ;;  %v8370_v37 = vld [vmem:[#allocation26_spill] sm:$0xff] }
 0x5ab   :  { %2855 = vadd.xlane.f32.xlu1 %v2854_v61  ;;  %5461 = vmatprep.mubr.msk.bf16.mxu1 %vm6167_vm1, %v8322_v11  ;;  %6089 = vrcp.f32 %v7805_v58  ;;  %v8366_v58 = vld [vmem:[#allocation24_spill] sm:$0xff]  ;;  %v8371_v61 = vld [vmem:[#allocation5_spill] sm:$0xff] }
 0x5ac   :  { %v6072_v52 = vpop.eup %6071  ;;  %5467 = vmatprep.mubr.msk.bf16.mxu0 %vm6167_vm1, %v8322_v11  ;;  %5471 = vmatprep.subr.bf16.mxu1 %v8322_v11 }
 0x5ad   :  { %v2964_v26 = vmul.f32 %v6072_v52, %v7565_v54  ;;  %5477 = vmatprep.subr.bf16.mxu0 %v8322_v11  ;;  %v7847_v2 = vpop.eup %6073 }
 0x5ae   :  { %v7852_v32 = vpop.eup %6075  ;;  %v2863_v8 = vsel %vm2304_vm3, %v7847_v2, 0.0 }
 0x5af   :  { %2867 = vadd.xlane.f32.xlu1 %v2866_v56  ;;  %v3018_v9 = vpack.c.bf16 %v2964_v26, %v2963_v51  ;;  %v6078_v43 = vpop.eup %6077  ;;  %v2878_v45 = vsel %vm2304_vm3, %v7852_v32, 0.0 }
 0x5b0   :  { %v7855_v57 = vpop.eup %6079  ;;  %v2970_v41 = vmul.f32 %v6078_v43, %v8360_v46 }
 0x5b1   :  { %5462 = vmatmul.mubr.msk.bf16.vlgmr.msra.gmra.mrb[96].mxu1 %vm2304_vm3, %v3018_v9  ;;  %5468 = vmatmul.mubr.msk.bf16.vlgmr.msra.gmra.mrb[84].mxu0 %vm2304_vm3, %v3019_v53  ;;  %v6082_v54 = vpop.eup %6081  ;;  %v2875_v1 = vsel %vm2304_vm3, %v7855_v57, 0.0 }
 0x5b2   :  { %2864 = vadd.xlane.f32.xlu0 %v2863_v8  ;;  %5472 = vmatpush3.bf16.msra.mxu1 %v8359_v28  ;;  %v2969_v6 = vmul.f32 %v6082_v54, %v8362_v17  ;;  %v6084_v27 = vpop.eup %6083 }
 0x5b3   :  { %5478 = vmatpush3.bf16.msra.mxu0 %v8361_v4  ;;  %2879 = vadd.xlane.f32.xlu1 %v2878_v45  ;;  %v6086_v15 = vpop.eup %6085  ;;  %v2974_v40 = vmul.f32 %v6084_v27, %v8364_v25 }
 0x5b4   :  { %5479 = vmatprep.mubr.msk.bf16.mxu0 %vm6167_vm1, %v8322_v11  ;;  %5489 = vmatprep.subr.bf16.mxu0 %v8322_v11  ;;  %v3021_v50 = vpack.c.bf16 %v2970_v41, %v2969_v6  ;;  %v2973_v22 = vmul.f32 %v6086_v15, %v8365_v49  ;;  %v6088_v16 = vpop.eup %6087 }
 0x5b5   :  { %5473 = vmatprep.mubr.msk.bf16.mxu1 %vm6167_vm1, %v8322_v11  ;;  %5483 = vmatprep.subr.bf16.mxu1 %v8322_v11  ;;  %v6090_v12 = vpop.eup %6089  ;;  %v2978_v55 = vmul.f32 %v6088_v16, %v8367_v36 }
 0x5b6   :  { %2876 = vadd.xlane.f32.xlu0 %v2875_v1  ;;  %v3023_v42 = vpack.c.bf16 %v2974_v40, %v2973_v22  ;;  %v2977_v13 = vmul.f32 %v6090_v12, %v8369_v10  ;;  %v8372_v1 = vld [vmem:[#allocation17_spill] sm:$0xff]  ;;  %v8375_v10 = vld [vmem:[#allocation30_spill] sm:$0xff] }
 0x5b8   :  { %v3025_v7 = vpack.c.bf16 %v2978_v55, %v2977_v13 }
 0x5b9   :  { %5480 = vmatmul.mubr.msk.bf16.vlgmr.msra.gmra.mrb[88].mxu0 %vm2304_vm3, %v3021_v50 }
 0x5ba   :  { %5490 = vmatpush3.bf16.msra.mxu0 %v8363_v30  ;;  %5491 = vmatprep.mubr.msk.bf16.mxu0 %vm6167_vm1, %v8322_v11  ;;  %v8373_v30 = vld [vmem:[#allocation28_spill] sm:$0xff] }
 0x5bb   :  { %5501 = vmatprep.subr.bf16.mxu0 %v8322_v11 }
 0x5c1   :  { %5492 = vmatmul.mubr.msk.bf16.vlgmr.msra.gmra.mrb[92].mxu0 %vm2304_vm3, %v3023_v42 }
 0x5c2   :  { %5502 = vmatpush3.bf16.msra.mxu0 %v8366_v58  ;;  %5503 = vmatprep.mubr.msk.bf16.mxu0 %vm6167_vm1, %v8322_v11 }
 0x5c3   :  { %5513 = vmatprep.subr.bf16.mxu0 %v8322_v11 }
 0x5c4   :  { %4498 = vrot.lane.b32.xlu1 %v8368_v62, %s6169_s18 }
 0x5c9   :  { %5504 = vmatmul.mubr.msk.bf16.vlgmr.msra.gmra.mrb[96].mxu0 %vm2304_vm3, %v3025_v7 }
 0x5ca   :  { %5514 = vmatpush3.bf16.msra.mxu0 %v8370_v37  ;;  %5515 = vmatprep.mubr.msk.bf16.mxu0 %vm6167_vm1, %v8322_v11  ;;  %v2799_v59 = vpop.xlane.xlu1 %2798 }
 0x5cb   :  { %5525 = vmatprep.subr.bf16.mxu0 %v8322_v11 }
 0x5cc   :  { %4451 = vrot.lane.b32.xlu0 %v8371_v61, %s6169_s18 }
 0x5ce   :  { %v2757_v35 = vpop.xlane.xlu0 %2756 }
 0x5cf   :  { %6091 = vrcp.f32 %v2757_v35  ;;  %v2760_v52 = vpop.xlane.xlu1 %2759 }
 0x5d0   :  { %6093 = vrcp.f32 %v2760_v52 }
 0x5d1   :  { %6095 = vrcp.f32 %v2799_v59 }
 0x5d2   :  { %v2802_v63 = vpop.xlane.xlu0 %2801 }
 0x5d3   :  { %6097 = vrcp.f32 %v2802_v63  ;;  %v2811_v51 = vpop.xlane.xlu1 %2810 }
 0x5d6   :  { %v2769_v26 = vpop.xlane.xlu0 %2768 }
 0x5d7   :  { %6099 = vrcp.f32 %v2769_v26  ;;  %v2772_v56 = vpop.xlane.xlu1 %2771 }
 0x5d8   :  { %6101 = vrcp.f32 %v2772_v56 }
 0x5d9   :  { %v6092_v9 = vpop.eup %6091  ;;  %6103 = vrcp.f32 %v2811_v51 }
 0x5da   :  { %v6094_v53 = vpop.eup %6093  ;;  %v2814_v43 = vpop.xlane.xlu0 %2813  ;;  %v2967_v54 = vmul.f32 %v6092_v9, %v7595_v18  ;;  %v8377_v9 = vld [vmem:[#allocation32_spill] sm:$0xff] }
 0x5db   :  { %v6096_v8 = vpop.eup %6095  ;;  %v2968_v28 = vmul.f32 %v6094_v53, %v7598_v34  ;;  %6105 = vrcp.f32 %v2814_v43  ;;  %v2823_v45 = vpop.xlane.xlu1 %2822 }
 0x5dc   :  { %v2981_v33 = vmul.f32 %v6096_v8, %v7589_v23 }
 0x5dd   :  { %v6098_v46 = vpop.eup %6097  ;;  %v3020_v41 = vpack.c.bf16 %v2968_v28, %v2967_v54 }
 0x5de   :  { %v2982_v4 = vmul.f32 %v6098_v46, %v7602_v31  ;;  %v2781_v17 = vpop.xlane.xlu0 %2780 }
 0x5df   :  { %6107 = vrcp.f32 %v2781_v17  ;;  %v2784_v6 = vpop.xlane.xlu1 %2783  ;;  %5474 = vmatmul.mubr.msk.bf16.vlgmr.msra.gmra.mrb[100].mxu1 %vm2304_vm3, %v3020_v41  ;;  %v8379_v17 = vld [vmem:[#allocation39_spill] sm:$0xff] }
 0x5e0   :  { %6109 = vrcp.f32 %v2784_v6  ;;  %5484 = vmatpush3.bf16.msra.mxu1 %v8372_v1  ;;  %v3027_v50 = vpack.c.bf16 %v2982_v4, %v2981_v33  ;;  %5485 = vmatprep.mubr.msk.bf16.mxu1 %vm6167_vm1, %v8322_v11  ;;  %v8380_v1 = vld [vmem:[#allocation34_spill] sm:$0xff] }
 0x5e1   :  { %v6100_v18 = vpop.eup %6099  ;;  %6111 = vrcp.f32 %v2823_v45  ;;  %5495 = vmatprep.subr.bf16.mxu1 %v8322_v11 }
 0x5e2   :  { %v6102_v34 = vpop.eup %6101  ;;  %5516 = vmatmul.mubr.msk.bf16.vlgmr.msra.gmra.mrb[100].mxu0 %vm2304_vm3, %v3027_v50  ;;  %v2826_v23 = vpop.xlane.xlu0 %2825  ;;  %v2971_v27 = vmul.f32 %v6100_v18, %v7615_v39 }
 0x5e3   :  { %v6104_v31 = vpop.eup %6103  ;;  %v2972_v15 = vmul.f32 %v6102_v34, %v7618_v14  ;;  %5526 = vmatpush3.bf16.msra.mxu0 %v8373_v30  ;;  %6113 = vrcp.f32 %v2826_v23  ;;  %v2835_v25 = vpop.xlane.xlu1 %2834  ;;  %5527 = vmatprep.mubr.msk.bf16.mxu0 %vm6167_vm1, %v8322_v11  ;;  %v8374_v14 = vld [vmem:[#allocation19_spill] sm:$0xff]  ;;  %v8381_v23 = vld [vmem:[#allocation12_spill] sm:$0xff] }
 0x5e4   :  { %5537 = vmatprep.subr.bf16.mxu0 %v8322_v11  ;;  %v2985_v22 = vmul.f32 %v6104_v31, %v7608_v19 }
 0x5e5   :  { %v6106_v40 = vpop.eup %6105  ;;  %v3022_v49 = vpack.c.bf16 %v2972_v15, %v2971_v27  ;;  %v8382_v27 = vld [vmem:[#allocation40_spill] sm:$0xff] }
 0x5e6   :  { %v2986_v42 = vmul.f32 %v6106_v40, %v7622_v29  ;;  %v2793_v16 = vpop.xlane.xlu0 %2792 }
 0x5e7   :  { %6115 = vrcp.f32 %v2793_v16  ;;  %v2796_v39 = vpop.xlane.xlu1 %2795  ;;  %5486 = vmatmul.mubr.msk.bf16.vlgmr.msra.gmra.mrb[104].mxu1 %vm2304_vm3, %v3022_v49  ;;  %v8384_v16 = vld [vmem:[#allocation42_spill] sm:$0xff] }
 0x5e8   :  { %6117 = vrcp.f32 %v2796_v39  ;;  %5496 = vmatpush3.bf16.msra.mxu1 %v8374_v14  ;;  %v3029_v12 = vpack.c.bf16 %v2986_v42, %v2985_v22  ;;  %5497 = vmatprep.mubr.msk.bf16.mxu1 %vm6167_vm1, %v8322_v11  ;;  %v8385_v14 = vld [vmem:[#allocation43_spill] sm:$0xff] }
 0x5e9   :  { %v6108_v58 = vpop.eup %6107  ;;  %6119 = vrcp.f32 %v2835_v25  ;;  %5507 = vmatprep.subr.bf16.mxu1 %v8322_v11  ;;  %v8383_v25 = vld [vmem:[#allocation25_spill] sm:$0xff] }
 0x5ea   :  { %v6110_v36 = vpop.eup %6109  ;;  %5528 = vmatmul.mubr.msk.bf16.vlgmr.msra.gmra.mrb[104].mxu0 %vm2304_vm3, %v3029_v12  ;;  %v2838_v19 = vpop.xlane.xlu0 %2837  ;;  %v2975_v55 = vmul.f32 %v6108_v58, %v7635_v48 }
 0x5eb   :  { %v6112_v29 = vpop.eup %6111  ;;  %v2976_v62 = vmul.f32 %v6110_v36, %v7638_v3  ;;  %5538 = vmatpush3.bf16.msra.mxu0 %v8375_v10  ;;  %6121 = vrcp.f32 %v2838_v19  ;;  %v2847_v13 = vpop.xlane.xlu1 %2846  ;;  %5539 = vmatprep.mubr.msk.bf16.mxu0 %vm6167_vm1, %v8322_v11  ;;  %v8376_v3 = vld [vmem:[#allocation21_spill] sm:$0xff] }
 0x5ec   :  { %5549 = vmatprep.subr.bf16.mxu0 %v8322_v11  ;;  %v2989_v59 = vmul.f32 %v6112_v29, %v7628_v60 }
 0x5ed   :  { %v6114_v7 = vpop.eup %6113  ;;  %v3024_v37 = vpack.c.bf16 %v2976_v62, %v2975_v55  ;;  %v8386_v55 = vld [vmem:[#allocation27_spill] sm:$0xff] }
 0x5ee   :  { %v2990_v61 = vmul.f32 %v6114_v7, %v7642_v44  ;;  %v2805_v35 = vpop.xlane.xlu0 %2804 }
 0x5ef   :  { %6123 = vrcp.f32 %v2805_v35  ;;  %v2808_v48 = vpop.xlane.xlu1 %2807  ;;  %5498 = vmatmul.mubr.msk.bf16.vlgmr.msra.gmra.mrb[108].mxu1 %vm2304_vm3, %v3024_v37  ;;  %v8387_v37 = vld [vmem:[#allocation46_spill] sm:$0xff] }
 0x5f0   :  { %6125 = vrcp.f32 %v2808_v48  ;;  %5508 = vmatpush3.bf16.msra.mxu1 %v8376_v3  ;;  %v3031_v52 = vpack.c.bf16 %v2990_v61, %v2989_v59  ;;  %5509 = vmatprep.mubr.msk.bf16.mxu1 %vm6167_vm1, %v8322_v11  ;;  %v8388_v61 = vld [vmem:[#allocation47_spill] sm:$0xff]  ;;  %v8389_v48 = vld [vmem:[#allocation44_spill] sm:$0xff] }
 0x5f1   :  { %v6116_v63 = vpop.eup %6115  ;;  %6127 = vrcp.f32 %v2847_v13  ;;  %5519 = vmatprep.subr.bf16.mxu1 %v8322_v11 }
 0x5f2   :  { %v6118_v51 = vpop.eup %6117  ;;  %5540 = vmatmul.mubr.msk.bf16.vlgmr.msra.gmra.mrb[108].mxu0 %vm2304_vm3, %v3031_v52  ;;  %v2850_v60 = vpop.xlane.xlu0 %2849  ;;  %v2979_v26 = vmul.f32 %v6116_v63, %v7655_v0 }
 0x5f3   :  { %v6120_v44 = vpop.eup %6119  ;;  %v2980_v56 = vmul.f32 %v6118_v51, %v7658_v47  ;;  %5550 = vmatpush3.bf16.msra.mxu0 %v8377_v9  ;;  %6129 = vrcp.f32 %v2850_v60  ;;  %v2859_v53 = vpop.xlane.xlu1 %2858  ;;  %5551 = vmatprep.mubr.msk.bf16.mxu0 %vm6167_vm1, %v8322_v11  ;;  %v8378_v47 = vld [vmem:[#allocation23_spill] sm:$0xff]  ;;  %v8390_v60 = vld [vmem:[#allocation41_spill] sm:$0xff] }
 0x5f4   :  { %5561 = vmatprep.subr.bf16.mxu0 %v8322_v11  ;;  %v2993_v54 = vmul.f32 %v6120_v44, %v7648_v20 }
 0x5f5   :  { %v6122_v43 = vpop.eup %6121  ;;  %v3026_v8 = vpack.c.bf16 %v2980_v56, %v2979_v26 }
 0x5f6   :  { %v2994_v28 = vmul.f32 %v6122_v43, %v7662_v21  ;;  %v2817_v45 = vpop.xlane.xlu0 %2816  ;;  %v8391_v43 = vld [vmem:[#allocation33_spill] sm:$0xff] }
 0x5f7   :  { %6131 = vrcp.f32 %v2817_v45  ;;  %v2820_v0 = vpop.xlane.xlu1 %2819  ;;  %5510 = vmatmul.mubr.msk.bf16.vlgmr.msra.gmra.mrb[112].mxu1 %vm2304_vm3, %v3026_v8 }
 0x5f8   :  { %6133 = vrcp.f32 %v2820_v0  ;;  %5520 = vmatpush3.bf16.msra.mxu1 %v8378_v47  ;;  %v3033_v46 = vpack.c.bf16 %v2994_v28, %v2993_v54  ;;  %5521 = vmatprep.mubr.msk.bf16.mxu1 %vm6167_vm1, %v8322_v11  ;;  %v8392_v28 = vld [vmem:[#allocation52_spill] sm:$0xff]  ;;  %v8393_v0 = vld [vmem:[#allocation51_spill] sm:$0xff] }
 0x5f9   :  { %v6124_v41 = vpop.eup %6123  ;;  %5531 = vmatprep.subr.bf16.mxu1 %v8322_v11 }
 0x5fa   :  { %v6126_v33 = vpop.eup %6125  ;;  %5552 = vmatmul.mubr.msk.bf16.vlgmr.msra.gmra.mrb[112].mxu0 %vm2304_vm3, %v3033_v46  ;;  %v2862_v20 = vpop.xlane.xlu0 %2861  ;;  %v2983_v4 = vmul.f32 %v6124_v41, %v7676_v24  ;;  %v8394_v41 = vld [vmem:[#allocation36_spill] sm:$0xff] }
 0x5fb   :  { %v6128_v21 = vpop.eup %6127  ;;  %v2984_v6 = vmul.f32 %v6126_v33, %v8379_v17  ;;  %5562 = vmatpush3.bf16.msra.mxu0 %v8380_v1  ;;  %v7954_v50 = vpop.xlane.xlu1 %2870  ;;  %5563 = vmatprep.mubr.msk.bf16.mxu0 %vm6167_vm1, %v8322_v11  ;;  %6135 = vrcp.f32 %v2862_v20 }
 0x5fc   :  { %5573 = vmatprep.subr.bf16.mxu0 %v8322_v11  ;;  %v2997_v31 = vmul.f32 %v6128_v21, %v8381_v23  ;;  %v8395_v23 = vld [vmem:[#allocation53_spill] sm:$0xff] }
 0x5fd   :  { %v6130_v18 = vpop.eup %6129  ;;  %v3028_v34 = vpack.c.bf16 %v2984_v6, %v2983_v4 }
 0x5fe   :  { %v2998_v15 = vmul.f32 %v6130_v18, %v8382_v27  ;;  %v2829_v30 = vpop.xlane.xlu0 %2828 }
 0x5ff   :  { %6137 = vrcp.f32 %v2829_v30  ;;  %v2832_v24 = vpop.xlane.xlu1 %2831  ;;  %5522 = vmatmul.mubr.msk.bf16.vlgmr.msra.gmra.mrb[116].mxu1 %vm2304_vm3, %v3028_v34  ;;  %v8396_v30 = vld [vmem:[#allocation48_spill] sm:$0xff] }
 0x600   :  { %6139 = vrcp.f32 %v2832_v24  ;;  %5532 = vmatpush3.bf16.msra.mxu1 %v8383_v25  ;;  %v3035_v40 = vpack.c.bf16 %v2998_v15, %v2997_v31  ;;  %5533 = vmatprep.mubr.msk.bf16.mxu1 %vm6167_vm1, %v8322_v11 }
 0x601   :  { %v6132_v49 = vpop.eup %6131  ;;  %6141 = vrcp.f32 %v2859_v53  ;;  %5543 = vmatprep.subr.bf16.mxu1 %v8322_v11 }
 0x602   :  { %v6134_v22 = vpop.eup %6133  ;;  %5564 = vmatmul.mubr.msk.bf16.vlgmr.msra.gmra.mrb[116].mxu0 %vm2304_vm3, %v3035_v40  ;;  %v2874_v42 = vpop.xlane.xlu0 %2873  ;;  %v2987_v39 = vmul.f32 %v6132_v49, %v8384_v16  ;;  %v8397_v40 = vld [vmem:[#allocation45_spill] sm:$0xff] }
 0x603   :  { %v2988_v12 = vmul.f32 %v6134_v22, %v8385_v14  ;;  %v2844_v58 = vpop.xlane.xlu1 %2843  ;;  %5575 = vmatprep.mubr.msk.bf16.mxu0 %vm6167_vm1, %v8322_v11 }
 0x604   :  { %6143 = vrcp.f32 %v2844_v58 }
 0x605   :  { %v3030_v36 = vpack.c.bf16 %v2988_v12, %v2987_v39  ;;  %v6136_v29 = vpop.eup %6135 }
 0x606   :  { %v2841_v19 = vpop.xlane.xlu0 %2840  ;;  %v3002_v3 = vmul.f32 %v6136_v29, %v8389_v48 }
 0x607   :  { %6145 = vrcp.f32 %v2841_v19  ;;  %5534 = vmatmul.mubr.msk.bf16.vlgmr.msra.gmra.mrb[120].mxu1 %vm2304_vm3, %v3030_v36  ;;  %v4405_v33 = vpop.permute.xlu1 %4404 }
 0x608   :  { %5544 = vmatpush3.bf16.msra.mxu1 %v8386_v55  ;;  %5545 = vmatprep.mubr.msk.bf16.mxu1 %vm6167_vm1, %v8322_v11 }
 0x609   :  { %v6138_v62 = vpop.eup %6137  ;;  %5555 = vmatprep.subr.bf16.mxu1 %v8322_v11 }
 0x60a   :  { %v6140_v10 = vpop.eup %6139  ;;  %v2853_v13 = vpop.xlane.xlu0 %2852  ;;  %v2991_v59 = vmul.f32 %v6138_v62, %v8387_v37 }
 0x60b   :  { %v6142_v7 = vpop.eup %6141  ;;  %v2992_v35 = vmul.f32 %v6140_v10, %v8388_v61  ;;  %6147 = vrcp.f32 %v2853_v13 }
 0x60c   :  { %v7979_v52 = vpop.f32.mrb[64].mxu0  ;;  %v3001_v44 = vmul.f32 %v6142_v7, %v8390_v60  ;;  %6149 = vrcp.f32 %v2874_v42 }
 0x60d   :  { %v5409_v63 = vpop.f32.mrb[65].mxu0  ;;  %v3032_v51 = vpack.c.bf16 %v2992_v35, %v2991_v59 }
 0x60e   :  { %v4358_v26 = vpop.permute.xlu0 %4357  ;;  %v7982_v56 = vpop.f32.mrb[66].mxu0  ;;  %v3037_v8 = vpack.c.bf16 %v3002_v3, %v3001_v44 }
 0x60f   :  { %5574 = vmatpush3.bf16.msra.mxu0 %v4358_v26  ;;  %v5410_v9 = vpop.f32.mrb[67].mxu0  ;;  %5546 = vmatmul.mubr.msk.bf16.vlgmr.msra.gmra.mrb[124].mxu1 %vm2304_vm3, %v3032_v51  ;;  %v6144_v53 = vpop.eup %6143  ;;  %v5873_v26 = vld [vmem:[%s8220_s5] sm:$0xff]  }
 0x610   :  { %5556 = vmatpush3.bf16.msra.mxu1 %v8391_v43  ;;  %5557 = vmatprep.mubr.msk.bf16.mxu1 %vm6167_vm1, %v8322_v11  ;;  %v2996_v47 = vmul.f32 %v6144_v53, %v8393_v0 }
 0x611   :  { %v6146_v54 = vpop.eup %6145  ;;  %5567 = vmatprep.subr.bf16.mxu1 %v8322_v11  ;;  %5585 = vmatprep.subr.bf16.mxu0 %v8322_v11 }
 0x612   :  { %v2995_v45 = vmul.f32 %v6146_v54, %v8392_v28  ;;  %5576 = vmatmul.mubr.msk.bf16.vlgmr.msra.gmra.mrb[120].mxu0 %vm2304_vm3, %v3037_v8 }
 0x613   :  { %5587 = vmatprep.mubr.msk.bf16.mxu0 %vm6167_vm1, %v8322_v11 }
 0x614   :  { %v3034_v46 = vpack.c.bf16 %v2996_v47, %v2995_v45  ;;  %v5874_v45 = vld [vmem:[%s8220_s5 + $0x8] sm:$0xff]  }
 0x615   :  { %v6148_v17 = vpop.eup %6147 }
 0x616   :  { %v6150_v6 = vpop.eup %6149  ;;  %v2999_v31 = vmul.f32 %v6148_v17, %v8395_v23 }
 0x617   :  { %5558 = vmatmul.mubr.msk.bf16.vlgmr.msra.gmra.mrb[128].mxu1 %vm2304_vm3, %v3034_v46  ;;  %v3006_v24 = vmul.f32 %v6150_v6, %v8396_v30 }
 0x618   :  { %5568 = vmatpush3.bf16.msra.mxu1 %v8394_v41  ;;  %5569 = vmatprep.mubr.msk.bf16.mxu1 %vm6167_vm1, %v8322_v11 }
 0x619   :  { %5579 = vmatprep.subr.bf16.mxu1 %v8322_v11 }
 0x638   :  { %v2856_v20 = vpop.xlane.xlu1 %2855 }
 0x639   :  { %6151 = vrcp.f32 %v2856_v20 }
 0x63a   :  { %6153 = vrcp.f32 %v7954_v50 }
 0x63c   :  { %v2868_v21 = vpop.xlane.xlu1 %2867 }
 0x63d   :  { %6155 = vrcp.f32 %v2868_v21 }
 0x63f   :  { %v2865_v4 = vpop.xlane.xlu0 %2864 }
 0x640   :  { %6157 = vrcp.f32 %v2865_v4  ;;  %v2880_v15 = vpop.xlane.xlu1 %2879 }
 0x643   :  { %v6152_v1 = vpop.eup %6151  ;;  %v2877_v18 = vpop.xlane.xlu0 %2876 }
 0x644   :  { %v6154_v34 = vpop.eup %6153  ;;  %v3000_v27 = vmul.f32 %v6152_v1, %v7825_v38  ;;  %6159 = vrcp.f32 %v2877_v18  ;;  %v4499_v58 = vpop.permute.xlu1 %4498 }
 0x645   :  { %v3005_v50 = vmul.f32 %v6154_v34, %v8397_v40  ;;  %6161 = vrcp.f32 %v2880_v15 }
 0x646   :  { %v3036_v25 = vpack.c.bf16 %v3000_v27, %v2999_v31 }
 0x647   :  { %v4452_v49 = vpop.permute.xlu0 %4451  ;;  %v6156_v22 = vpop.eup %6155  ;;  %v3039_v42 = vpack.c.bf16 %v3006_v24, %v3005_v50 }
 0x648   :  { %5586 = vmatpush3.bf16.msra.mxu0 %v4452_v49  ;;  %5570 = vmatmul.mubr.msk.bf16.vlgmr.msra.gmra.mrb[132].mxu1 %vm2304_vm3, %v3036_v25  ;;  %v3004_v39 = vmul.f32 %v6156_v22, %v7835_v5 }
 0x649   :  { %5580 = vmatpush3.bf16.msra.mxu1 %v4405_v33  ;;  %5581 = vmatprep.mubr.msk.bf16.mxu1 %vm6167_vm1, %v8322_v11 }
 0x64a   :  { %v6158_v16 = vpop.eup %6157  ;;  %5591 = vmatprep.subr.bf16.mxu1 %v8322_v11  ;;  %5597 = vmatprep.subr.bf16.mxu0 %v5873_v26 }
 0x64b   :  { %v3003_v38 = vmul.f32 %v6158_v16, %v7847_v2  ;;  %5588 = vmatmul.mubr.msk.bf16.vlgmr.msra.gmra.mrb[124].mxu0 %vm2304_vm3, %v3039_v42 }
 0x64c   :  { %5598 = vmatpush3.bf16.msra.mxu0 %v5873_v26 }
 0x64d   :  { %v3038_v14 = vpack.c.bf16 %v3004_v39, %v3003_v38  ;;  %5599 = vmatprep.subr.bf16.mxu0 %v5874_v45 }
 0x64e   :  { %v6160_v12 = vpop.eup %6159 }
 0x64f   :  { %v6162_v36 = vpop.eup %6161  ;;  %v3007_v19 = vmul.f32 %v6160_v12, %v7855_v57 }
 0x650   :  { %5582 = vmatmul.mubr.msk.bf16.vlgmr.msra.gmra.mrb[136].mxu1 %vm2304_vm3, %v3038_v14  ;;  %v3008_v29 = vmul.f32 %v6162_v36, %v7852_v32  ;;  %5600 = vmatpush3.bf16.msra.mxu0 %v5874_v45 }
 0x651   :  { %5592 = vmatpush3.bf16.msra.mxu1 %v4499_v58  ;;  %5593 = vmatprep.mubr.msk.bf16.mxu1 %vm6167_vm1, %v8322_v11 }
 0x652   :  { %v3040_v55 = vpack.c.bf16 %v3008_v29, %v3007_v19 }
 0x658   :  { %5594 = vmatmul.mubr.msk.bf16.vlgmr.msra.gmra.mrb[140].mxu1 %vm2304_vm3, %v3040_v55 }
 0x65c   :  { %v3128_v2 = vpop.f32.mrb[80].mxu1 }
 0x65d   :  { %v5415_v62 = vpop.f32.mrb[81].mxu1 }
 0x65e   :  { %v3131_v5 = vpop.f32.mrb[82].mxu1 }
 0x65f   :  { %v5751_v10 = vpack.i.bf16 %v3131_v5, %v3128_v2  ;;  %v5416_v13 = vpop.f32.mrb[83].mxu1 }
 0x661   :  { %5752 = vrot.lane.b32.xlu0 %v5751_v10, %s6170_s0 }
 0x664   :  { %v3175_v7 = vpop.f32.mrb[68].mxu0 }
 0x665   :  { %v5421_v37 = vpop.f32.mrb[69].mxu0 }
 0x666   :  { %v3178_v59 = vpop.f32.mrb[70].mxu0 }
 0x667   :  { %v5756_v61 = vpack.i.bf16 %v3178_v59, %v3175_v7  ;;  %v5422_v11 = vpop.f32.mrb[71].mxu0 }
 0x669   :  { %5757 = vrot.lane.b32.xlu0 %v5756_v61, %s6171_s21 }
 0x66c   :  { %v3222_v32 = vpop.f32.mrb[84].mxu1  ;;  %v8020_v57 = vpop.f32.mrb[72].mxu0 }
 0x66d   :  { %v5427_v35 = vpop.f32.mrb[85].mxu1  ;;  %v5433_v48 = vpop.f32.mrb[73].mxu0 }
 0x66e   :  { %v3225_v3 = vpop.f32.mrb[86].mxu1  ;;  %v8022_v63 = vpop.f32.mrb[74].mxu0 }
 0x66f   :  { %v5761_v51 = vpack.i.bf16 %v3225_v3, %v3222_v32  ;;  %v5428_v60 = vpop.f32.mrb[87].mxu1  ;;  %v5434_v44 = vpop.f32.mrb[75].mxu0 }
 0x671   :  { %5762 = vrot.lane.b32.xlu0 %v5761_v51, %s6172_s22 }
 0x674   :  { %v3316_v9 = vpop.f32.mrb[88].mxu1  ;;  %v3363_v53 = vpop.f32.mrb[76].mxu0 }
 0x675   :  { %v5439_v43 = vpop.f32.mrb[89].mxu1  ;;  %v5445_v8 = vpop.f32.mrb[77].mxu0 }
 0x676   :  { %v3319_v54 = vpop.f32.mrb[90].mxu1  ;;  %v3366_v28 = vpop.f32.mrb[78].mxu0 }
 0x677   :  { %v5766_v0 = vpack.i.bf16 %v3319_v54, %v3316_v9  ;;  %v5771_v47 = vpack.i.bf16 %v3366_v28, %v3363_v53  ;;  %v5440_v46 = vpop.f32.mrb[91].mxu1  ;;  %v5446_v41 = vpop.f32.mrb[79].mxu0 }
 0x679   :  { %5767 = vrot.lane.b32.xlu1 %v5766_v0, %s6170_s0 }
 0x67c   :  { %v3410_v33 = vpop.f32.mrb[92].mxu1  ;;  %v8032_v20 = vpop.f32.mrb[80].mxu0 }
 0x67d   :  { %v5457_v21 = vpop.f32.mrb[81].mxu0  ;;  %5772 = vrot.lane.b32.xlu1 %v5771_v47, %s6171_s21  ;;  %v5451_v4 = vpop.f32.mrb[93].mxu1 }
 0x67e   :  { %v3413_v17 = vpop.f32.mrb[94].mxu1  ;;  %v8035_v6 = vpop.f32.mrb[82].mxu0 }
 0x67f   :  { %v5776_v1 = vpack.i.bf16 %v3413_v17, %v3410_v33  ;;  %v5452_v18 = vpop.f32.mrb[95].mxu1  ;;  %v5458_v34 = vpop.f32.mrb[83].mxu0 }
 0x681   :  { %5777 = vrot.lane.b32.xlu1 %v5776_v1, %s6172_s22 }
 0x684   :  { %v3504_v23 = vpop.f32.mrb[96].mxu1  ;;  %v3551_v31 = vpop.f32.mrb[84].mxu0 }
 0x685   :  { %v5463_v27 = vpop.f32.mrb[97].mxu1  ;;  %v5469_v15 = vpop.f32.mrb[85].mxu0 }
 0x686   :  { %v3507_v30 = vpop.f32.mrb[98].mxu1  ;;  %v3554_v24 = vpop.f32.mrb[86].mxu0 }
 0x687   :  { %v5781_v25 = vpack.i.bf16 %v3507_v30, %v3504_v23  ;;  %v5786_v40 = vpack.i.bf16 %v3554_v24, %v3551_v31  ;;  %v5464_v50 = vpop.f32.mrb[99].mxu1  ;;  %v5470_v49 = vpop.f32.mrb[87].mxu0 }
 0x689   :  { %5782 = vrot.lane.b32.xlu0 %v5781_v25, %s6170_s0 }
 0x68c   :  { %v8039_v22 = vpop.f32.mrb[88].mxu0 }
 0x68d   :  { %v5481_v42 = vpop.f32.mrb[89].mxu0  ;;  %5787 = vrot.lane.b32.xlu0 %v5786_v40, %s6171_s21 }
 0x68e   :  { %v8042_v16 = vpop.f32.mrb[90].mxu0 }
 0x68f   :  { %v5482_v38 = vpop.f32.mrb[91].mxu0 }
 0x694   :  { %v3739_v39 = vpop.f32.mrb[92].mxu0 }
 0x695   :  { %v5493_v14 = vpop.f32.mrb[93].mxu0 }
 0x696   :  { %v3742_v12 = vpop.f32.mrb[94].mxu0 }
 0x697   :  { %v5801_v58 = vpack.i.bf16 %v3742_v12, %v3739_v39  ;;  %v5494_v36 = vpop.f32.mrb[95].mxu0 }
 0x69c   :  { %v8044_v19 = vpop.f32.mrb[96].mxu0 }
 0x69d   :  { %v5505_v29 = vpop.f32.mrb[97].mxu0 }
 0x69e   :  { %v8046_v55 = vpop.f32.mrb[98].mxu0 }
 0x69f   :  { %v5506_v2 = vpop.f32.mrb[99].mxu0 }
 0x6b2   :  { %v3598_v62 = vpop.f32.mrb[100].mxu1 }
 0x6b3   :  { %v5475_v5 = vpop.f32.mrb[101].mxu1 }
 0x6b4   :  { %v3601_v10 = vpop.f32.mrb[102].mxu1 }
 0x6b5   :  { %v5791_v13 = vpack.i.bf16 %v3601_v10, %v3598_v62  ;;  %v3927_v7 = vpop.f32.mrb[100].mxu0  ;;  %v5476_v37 = vpop.f32.mrb[103].mxu1 }
 0x6b6   :  { %v5517_v59 = vpop.f32.mrb[101].mxu0 }
 0x6b7   :  { %v3930_v61 = vpop.f32.mrb[102].mxu0  ;;  %5792 = vrot.lane.b32.xlu0 %v5791_v13, %s6172_s22 }
 0x6b8   :  { %v5816_v11 = vpack.i.bf16 %v3930_v61, %v3927_v7  ;;  %v5518_v32 = vpop.f32.mrb[103].mxu0 }
 0x6ba   :  { %v3692_v35 = vpop.f32.mrb[104].mxu1 }
 0x6bb   :  { %v5487_v48 = vpop.f32.mrb[105].mxu1 }
 0x6bc   :  { %v3695_v3 = vpop.f32.mrb[106].mxu1 }
 0x6bd   :  { %v5796_v51 = vpack.i.bf16 %v3695_v3, %v3692_v35  ;;  %v8049_v60 = vpop.f32.mrb[104].mxu0  ;;  %v5488_v44 = vpop.f32.mrb[107].mxu1 }
 0x6be   :  { %v5529_v26 = vpop.f32.mrb[105].mxu0 }
 0x6bf   :  { %v8051_v9 = vpop.f32.mrb[106].mxu0  ;;  %5797 = vrot.lane.b32.xlu1 %v5796_v51, %s6170_s0 }
 0x6c0   :  { %v5530_v53 = vpop.f32.mrb[107].mxu0 }
 0x6c2   :  { %v3786_v43 = vpop.f32.mrb[108].mxu1 }
 0x6c3   :  { %5802 = vrot.lane.b32.xlu1 %v5801_v58, %s6171_s21  ;;  %v5499_v8 = vpop.f32.mrb[109].mxu1 }
 0x6c4   :  { %v3789_v54 = vpop.f32.mrb[110].mxu1 }
 0x6c5   :  { %v5806_v28 = vpack.i.bf16 %v3789_v54, %v3786_v43  ;;  %v4115_v45 = vpop.f32.mrb[108].mxu0  ;;  %v5500_v0 = vpop.f32.mrb[111].mxu1 }
 0x6c6   :  { %v5541_v47 = vpop.f32.mrb[109].mxu0 }
 0x6c7   :  { %v4118_v46 = vpop.f32.mrb[110].mxu0  ;;  %5807 = vrot.lane.b32.xlu1 %v5806_v28, %s6172_s22 }
 0x6c8   :  { %v5831_v41 = vpack.i.bf16 %v4118_v46, %v4115_v45  ;;  %v5542_v33 = vpop.f32.mrb[111].mxu0 }
 0x6ca   :  { %v3880_v21 = vpop.f32.mrb[112].mxu1 }
 0x6cb   :  { %v5511_v4 = vpop.f32.mrb[113].mxu1 }
 0x6cc   :  { %v3883_v17 = vpop.f32.mrb[114].mxu1 }
 0x6cd   :  { %v5811_v1 = vpack.i.bf16 %v3883_v17, %v3880_v21  ;;  %v8056_v18 = vpop.f32.mrb[112].mxu0  ;;  %v5512_v34 = vpop.f32.mrb[115].mxu1 }
 0x6ce   :  { %v5553_v23 = vpop.f32.mrb[113].mxu0 }
 0x6cf   :  { %v8058_v31 = vpop.f32.mrb[114].mxu0  ;;  %5812 = vrot.lane.b32.xlu0 %v5811_v1, %s6170_s0 }
 0x6d0   :  { %v5554_v27 = vpop.f32.mrb[115].mxu0 }
 0x6d2   :  { %v3974_v15 = vpop.f32.mrb[116].mxu1 }
 0x6d3   :  { %5817 = vrot.lane.b32.xlu0 %v5816_v11, %s6171_s21  ;;  %v5523_v30 = vpop.f32.mrb[117].mxu1  ;;  %v5753_v14 = vpop.permute.xlu0 %5752 }
 0x6d4   :  { %v3977_v24 = vpop.f32.mrb[118].mxu1  ;;  %v5755_v5 = vunpack.i.h.bf16 %v5753_v14  ;;  %v5754_v10 = vunpack.i.l.bf16 %v5753_v14 }
 0x6d5   :  { %v5821_v25 = vpack.i.bf16 %v3977_v24, %v3974_v15  ;;  %v4303_v40 = vpop.f32.mrb[116].mxu0  ;;  %v5524_v50 = vpop.f32.mrb[119].mxu1 }
 0x6d6   :  { %v5565_v49 = vpop.f32.mrb[117].mxu0  ;;  %v4738_v11 = vsel %vm641_vm2, %v7982_v56, %v5755_v5  ;;  %v4737_v32 = vsel %vm641_vm2, %v7979_v52, %v5754_v10 }
 0x6d7   :  { %v4306_v42 = vpop.f32.mrb[118].mxu0  ;;  %5822 = vrot.lane.b32.xlu0 %v5821_v25, %s6172_s22 }
 0x6d8   :  { %v5846_v38 = vpack.i.bf16 %v4306_v42, %v4303_v40  ;;  %v5566_v39 = vpop.f32.mrb[119].mxu0 }
 0x6da   :  { %v4068_v12 = vpop.f32.mrb[120].mxu1 }
 0x6db   :  { %v5535_v58 = vpop.f32.mrb[121].mxu1  ;;  %v5758_v62 = vpop.permute.xlu0 %5757 }
 0x6dc   :  { %v4071_v36 = vpop.f32.mrb[122].mxu1  ;;  %v5760_v13 = vunpack.i.h.bf16 %v5758_v62  ;;  %v5759_v7 = vunpack.i.l.bf16 %v5758_v62 }
 0x6dd   :  { %v5826_v29 = vpack.i.bf16 %v4071_v36, %v4068_v12  ;;  %v5536_v2 = vpop.f32.mrb[123].mxu1 }
 0x6de   :  { %v4753_v51 = vsel %vm2304_vm3, %v4737_v32, %v5759_v7  ;;  %v4754_v44 = vsel %vm2304_vm3, %v4738_v11, %v5760_v13 }
 0x6df   :  { %5827 = vrot.lane.b32.xlu1 %v5826_v29, %s6170_s0 }
 0x6e2   :  { %v4162_v37 = vpop.f32.mrb[124].mxu1 }
 0x6e3   :  { %5832 = vrot.lane.b32.xlu1 %v5831_v41, %s6171_s21  ;;  %v5547_v59 = vpop.f32.mrb[125].mxu1  ;;  %v5763_v61 = vpop.permute.xlu0 %5762 }
 0x6e4   :  { %v5765_v35 = vunpack.i.h.bf16 %v5763_v61  ;;  %v5764_v48 = vunpack.i.l.bf16 %v5763_v61  ;;  %v4165_v3 = vpop.f32.mrb[126].mxu1 }
 0x6e5   :  { %v5836_v26 = vpack.i.bf16 %v4165_v3, %v4162_v37  ;;  %v8071_v53 = vpop.f32.mrb[120].mxu0  ;;  %v5548_v43 = vpop.f32.mrb[127].mxu1 }
 0x6e6   :  { %v4770_v8 = vsel %vm4769_vm4, %v4753_v51, %v5764_v48  ;;  %v4771_v54 = vsel %vm4769_vm4, %v4754_v44, %v5765_v35  ;;  %v5577_v28 = vpop.f32.mrb[121].mxu0 }
 0x6e7   :  { %v4786_v56 = vpack.c.bf16 %v4771_v54, %v4770_v8  ;;  %v8075_v45 = vpop.f32.mrb[122].mxu0  ;;  %5837 = vrot.lane.b32.xlu1 %v5836_v26, %s6172_s22 }
 0x6e8   :  { %v5578_v52 = vpop.f32.mrb[123].mxu0 }
 0x6e9   :  { %5601 = vmatprep.mubr.msk.bf16.mxu0 %vm44_vm0, %v4786_v56 }
 0x6ea   :  { %v4256_v0 = vpop.f32.mrb[128].mxu1 }
 0x6eb   :  { %v5768_v47 = vpop.permute.xlu1 %5767  ;;  %v5559_v46 = vpop.f32.mrb[129].mxu1 }
 0x6ec   :  { %v4259_v41 = vpop.f32.mrb[130].mxu1  ;;  %v5770_v17 = vunpack.i.h.bf16 %v5768_v47  ;;  %v5769_v1 = vunpack.i.l.bf16 %v5768_v47 }
 0x6ed   :  { %v5841_v33 = vpack.i.bf16 %v4259_v41, %v4256_v0  ;;  %v5560_v21 = vpop.f32.mrb[131].mxu1 }
 0x6ee   :  { %v4740_v15 = vsel %vm641_vm2, %v8022_v63, %v5770_v17  ;;  %v4739_v30 = vsel %vm641_vm2, %v8020_v57, %v5769_v1 }
 0x6ef   :  { %v5773_v4 = vpop.permute.xlu1 %5772  ;;  %5842 = vrot.lane.b32.xlu0 %v5841_v33, %s6170_s0 }
 0x6f0   :  { %v5775_v34 = vunpack.i.h.bf16 %v5773_v4  ;;  %v5774_v23 = vunpack.i.l.bf16 %v5773_v4 }
 0x6f2   :  { %v4755_v40 = vsel %vm2304_vm3, %v4739_v30, %v5774_v23  ;;  %v4756_v50 = vsel %vm2304_vm3, %v4740_v15, %v5775_v34 }
 0x6f3   :  { %v5778_v27 = vpop.permute.xlu1 %5777  ;;  %5847 = vrot.lane.b32.xlu0 %v5846_v38, %s6171_s21 }
 0x6f4   :  { %v5780_v24 = vunpack.i.h.bf16 %v5778_v27  ;;  %v5779_v25 = vunpack.i.l.bf16 %v5778_v27 }
 0x6f6   :  { %v4773_v49 = vsel %vm4769_vm4, %v4756_v50, %v5780_v24  ;;  %v4772_v42 = vsel %vm4769_vm4, %v4755_v40, %v5779_v25 }
 0x6f7   :  { %v4787_v39 = vpack.c.bf16 %v4773_v49, %v4772_v42 }
 0x6f9   :  { %5602 = vmatmul.mubr.msk.bf16.vlgmr.msra.gmra.mrb[128].mxu0 %vm44_vm0, %v4787_v39 }
 0x6fb   :  { %v5783_v12 = vpop.permute.xlu0 %5782 }
 0x6fc   :  { %v5785_v59 = vunpack.i.h.bf16 %v5783_v12  ;;  %v5784_v61 = vunpack.i.l.bf16 %v5783_v12 }
 0x6fe   :  { %v4742_v51 = vsel %vm641_vm2, %v8035_v6, %v5785_v59  ;;  %v4741_v44 = vsel %vm641_vm2, %v8032_v20, %v5784_v61 }
 0x6ff   :  { %v5788_v13 = vpop.permute.xlu0 %5787 }
 0x700   :  { %v5790_v35 = vunpack.i.h.bf16 %v5788_v13  ;;  %v5789_v48 = vunpack.i.l.bf16 %v5788_v13 }
 0x702   :  { %v4757_v8 = vsel %vm2304_vm3, %v4741_v44, %v5789_v48  ;;  %v4758_v54 = vsel %vm2304_vm3, %v4742_v51, %v5790_v35 }
 0x71b   :  { %v4350_v38 = vpop.f32.mrb[132].mxu1 }
 0x71c   :  { %v5571_v14 = vpop.f32.mrb[133].mxu1 }
 0x71d   :  { %v4353_v63 = vpop.f32.mrb[134].mxu1 }
 0x71e   :  { %v5861_v58 = vpack.i.bf16 %v4353_v63, %v4350_v38  ;;  %v4491_v36 = vpop.f32.mrb[124].mxu0  ;;  %v5572_v57 = vpop.f32.mrb[135].mxu1 }
 0x71f   :  { %v5589_v29 = vpop.f32.mrb[125].mxu0 }
 0x720   :  { %v4494_v2 = vpop.f32.mrb[126].mxu0  ;;  %5862 = vrot.lane.b32.xlu0 %v5861_v58, %s6172_s22 }
 0x721   :  { %v5856_v62 = vpack.i.bf16 %v4494_v2, %v4491_v36  ;;  %v5590_v5 = vpop.f32.mrb[127].mxu0 }
 0x723   :  { %v4444_v10 = vpop.f32.mrb[136].mxu1 }
 0x724   :  { %v5583_v7 = vpop.f32.mrb[137].mxu1 }
 0x725   :  { %v4447_v37 = vpop.f32.mrb[138].mxu1 }
 0x726   :  { %v5851_v11 = vpack.i.bf16 %v4447_v37, %v4444_v10  ;;  %v5584_v32 = vpop.f32.mrb[139].mxu1 }
 0x728   :  { %5852 = vrot.lane.b32.xlu1 %v5851_v11, %s6170_s0 }
 0x729   :  { %v5793_v3 = vpop.permute.xlu0 %5792 }
 0x72a   :  { %v5795_v26 = vunpack.i.h.bf16 %v5793_v3  ;;  %v5794_v43 = vunpack.i.l.bf16 %v5793_v3 }
 0x72b   :  { %v4538_v28 = vpop.f32.mrb[140].mxu1 }
 0x72c   :  { %v4774_v56 = vsel %vm4769_vm4, %v4757_v8, %v5794_v43  ;;  %v4775_v52 = vsel %vm4769_vm4, %v4758_v54, %v5795_v26  ;;  %v5595_v0 = vpop.f32.mrb[141].mxu1  ;;  %5857 = vrot.lane.b32.xlu1 %v5856_v62, %s6171_s21 }
 0x72d   :  { %v4788_v47 = vpack.c.bf16 %v4775_v52, %v4774_v56  ;;  %v4541_v46 = vpop.f32.mrb[142].mxu1 }
 0x72e   :  { %v5866_v6 = vpack.i.bf16 %v4541_v46, %v4538_v28  ;;  %v5596_v41 = vpop.f32.mrb[143].mxu1 }
 0x72f   :  { %5605 = vmatprep.mubr.msk.bf16.mxu0 %vm44_vm0, %v4788_v47 }
 0x730   :  { %5867 = vrot.lane.b32.xlu1 %v5866_v6, %s6172_s22 }
 0x731   :  { %v5798_v20 = vpop.permute.xlu1 %5797 }
 0x732   :  { %v5800_v21 = vunpack.i.h.bf16 %v5798_v20  ;;  %v5799_v4 = vunpack.i.l.bf16 %v5798_v20 }
 0x734   :  { %v4744_v23 = vsel %vm641_vm2, %v8042_v16, %v5800_v21  ;;  %v4743_v27 = vsel %vm641_vm2, %v8039_v22, %v5799_v4 }
 0x735   :  { %v5803_v33 = vpop.permute.xlu1 %5802 }
 0x736   :  { %v5805_v17 = vunpack.i.h.bf16 %v5803_v33  ;;  %v5804_v1 = vunpack.i.l.bf16 %v5803_v33 }
 0x738   :  { %v4759_v24 = vsel %vm2304_vm3, %v4743_v27, %v5804_v1  ;;  %v4760_v25 = vsel %vm2304_vm3, %v4744_v23, %v5805_v17 }
 0x739   :  { %v5808_v34 = vpop.permute.xlu1 %5807 }
 0x73a   :  { %v5810_v15 = vunpack.i.h.bf16 %v5808_v34  ;;  %v5809_v30 = vunpack.i.l.bf16 %v5808_v34 }
 0x73c   :  { %v4777_v40 = vsel %vm4769_vm4, %v4760_v25, %v5810_v15  ;;  %v4776_v50 = vsel %vm4769_vm4, %v4759_v24, %v5809_v30 }
 0x73d   :  { %v4789_v49 = vpack.c.bf16 %v4777_v40, %v4776_v50 }
 0x73f   :  { %5606 = vmatmul.mubr.msk.bf16.gmra.mrb[132].mxu0 %vm44_vm0, %v4789_v49 }
 0x741   :  { %v5813_v42 = vpop.permute.xlu0 %5812 }
 0x742   :  { %v5815_v38 = vunpack.i.h.bf16 %v5813_v42  ;;  %v5814_v16 = vunpack.i.l.bf16 %v5813_v42 }
 0x744   :  { %v4746_v63 = vsel %vm641_vm2, %v8046_v55, %v5815_v38  ;;  %v4745_v58 = vsel %vm641_vm2, %v8044_v19, %v5814_v16 }
 0x745   :  { %v5818_v39 = vpop.permute.xlu0 %5817 }
 0x746   :  { %v5820_v14 = vunpack.i.h.bf16 %v5818_v39  ;;  %v5819_v12 = vunpack.i.l.bf16 %v5818_v39 }
 0x748   :  { %v4761_v29 = vsel %vm2304_vm3, %v4745_v58, %v5819_v12  ;;  %v4762_v2 = vsel %vm2304_vm3, %v4746_v63, %v5820_v14 }
 0x749   :  { %v5823_v22 = vpop.permute.xlu0 %5822 }
 0x74a   :  { %v5825_v36 = vunpack.i.h.bf16 %v5823_v22  ;;  %v5824_v57 = vunpack.i.l.bf16 %v5823_v22 }
 0x74c   :  { %v4778_v62 = vsel %vm4769_vm4, %v4761_v29, %v5824_v57  ;;  %v4779_v5 = vsel %vm4769_vm4, %v4762_v2, %v5825_v36 }
 0x74d   :  { %v4790_v10 = vpack.c.bf16 %v4779_v5, %v4778_v62 }
 0x74f   :  { %5609 = vmatprep.mubr.msk.bf16.mxu0 %vm44_vm0, %v4790_v10 }
 0x751   :  { %v5828_v13 = vpop.permute.xlu1 %5827 }
 0x752   :  { %v5830_v37 = vunpack.i.h.bf16 %v5828_v13  ;;  %v5829_v55 = vunpack.i.l.bf16 %v5828_v13 }
 0x754   :  { %v4748_v11 = vsel %vm641_vm2, %v8051_v9, %v5830_v37  ;;  %v4747_v32 = vsel %vm641_vm2, %v8049_v60, %v5829_v55 }
 0x755   :  { %v5833_v7 = vpop.permute.xlu1 %5832 }
 0x756   :  { %v5835_v59 = vunpack.i.h.bf16 %v5833_v7  ;;  %v5834_v61 = vunpack.i.l.bf16 %v5833_v7 }
 0x758   :  { %v4763_v3 = vsel %vm2304_vm3, %v4747_v32, %v5834_v61  ;;  %v4764_v51 = vsel %vm2304_vm3, %v4748_v11, %v5835_v59 }
 0x759   :  { %v5838_v19 = vpop.permute.xlu1 %5837 }
 0x75a   :  { %v5840_v35 = vunpack.i.h.bf16 %v5838_v19  ;;  %v5839_v48 = vunpack.i.l.bf16 %v5838_v19 }
 0x75c   :  { %v4781_v44 = vsel %vm4769_vm4, %v4764_v51, %v5840_v35  ;;  %v4780_v26 = vsel %vm4769_vm4, %v4763_v3, %v5839_v48 }
 0x75d   :  { %v4791_v43 = vpack.c.bf16 %v4781_v44, %v4780_v26 }
 0x75f   :  { %5610 = vmatmul.mubr.msk.bf16.gmra.mrb[136].mxu0 %vm44_vm0, %v4791_v43 }
 0x761   :  { %v5843_v8 = vpop.permute.xlu0 %5842 }
 0x762   :  { %v5845_v28 = vunpack.i.h.bf16 %v5843_v8  ;;  %v5844_v9 = vunpack.i.l.bf16 %v5843_v8 }
 0x764   :  { %v4750_v0 = vsel %vm641_vm2, %v8058_v31, %v5845_v28  ;;  %v4749_v47 = vsel %vm641_vm2, %v8056_v18, %v5844_v9 }
 0x765   :  { %v5848_v54 = vpop.permute.xlu0 %5847 }
 0x766   :  { %v5850_v56 = vunpack.i.h.bf16 %v5848_v54  ;;  %v5849_v52 = vunpack.i.l.bf16 %v5848_v54 }
 0x768   :  { %v4765_v41 = vsel %vm2304_vm3, %v4749_v47, %v5849_v52  ;;  %v4766_v20 = vsel %vm2304_vm3, %v4750_v0, %v5850_v56 }
 0x792   :  { %v5863_v60 = vpop.permute.xlu0 %5862 }
 0x793   :  { %v5865_v46 = vunpack.i.h.bf16 %v5863_v60  ;;  %v5864_v6 = vunpack.i.l.bf16 %v5863_v60 }
 0x795   :  { %v4782_v33 = vsel %vm4769_vm4, %v4765_v41, %v5864_v6  ;;  %v4783_v21 = vsel %vm4769_vm4, %v4766_v20, %v5865_v46 }
 0x796   :  { %v4792_v4 = vpack.c.bf16 %v4783_v21, %v4782_v33 }
 0x798   :  { %5613 = vmatprep.mubr.msk.bf16.mxu0 %vm44_vm0, %v4792_v4 }
 0x79a   :  { %v5853_v17 = vpop.permute.xlu1 %5852 }
 0x79b   :  { %v5855_v34 = vunpack.i.h.bf16 %v5853_v17  ;;  %v5854_v31 = vunpack.i.l.bf16 %v5853_v17 }
 0x79d   :  { %v4752_v15 = vsel %vm641_vm2, %v8075_v45, %v5855_v34  ;;  %v4751_v30 = vsel %vm641_vm2, %v8071_v53, %v5854_v31  ;;  %v5034_v45 = vld [vmem:[%s8221_s6] ss:$0 sm:$0xff] }
 0x79e   :  { %v5858_v1 = vpop.permute.xlu1 %5857 }
 0x79f   :  { %v5860_v23 = vunpack.i.h.bf16 %v5858_v1  ;;  %v5859_v27 = vunpack.i.l.bf16 %v5858_v1 }
 0x7a1   :  { %v4768_v40 = vsel %vm2304_vm3, %v4752_v15, %v5860_v23  ;;  %v4767_v50 = vsel %vm2304_vm3, %v4751_v30, %v5859_v27 }
 0x7a2   :  { %v5868_v18 = vpop.permute.xlu1 %5867 }
 0x7a3   :  { %v5870_v24 = vunpack.i.h.bf16 %v5868_v18  ;;  %v5869_v25 = vunpack.i.l.bf16 %v5868_v18 }
 0x7a5   :  { %v4784_v49 = vsel %vm4769_vm4, %v4767_v50, %v5869_v25  ;;  %v4785_v42 = vsel %vm4769_vm4, %v4768_v40, %v5870_v24 }
 0x7a6   :  { %v4793_v39 = vpack.c.bf16 %v4785_v42, %v4784_v49 }
 0x7a8   :  { %5614 = vmatmul.mubr.msk.bf16.gmra.mrb[140].mxu0 %vm44_vm0, %v4793_v39 }
 0x7cc   :  { %v5603_v38 = vpop.f32.mrb[128].mxu0 }
 0x7cd   :  { %v4884_v16 = vadd.f32 %v5603_v38, %v5034_v45  ;;  %v4875_v53 = vpop.f32.mrb[129].mxu0 }
 0x7ce   :  { %v4876_v14 = vadd.f32 %v5034_v45, %v4875_v53  ;;  %v5604_v12 = vpop.f32.mrb[130].mxu0 }
 0x7cf   :  { %4940 = vst.msk [vmem:[%s8222_s7 + $0x10] sm:$0xff] %vm44_vm0, %v4884_v16  ;;  %v4887_v22 = vadd.f32 %v5604_v12, %v5034_v45  ;;  %v4878_v63 = vpop.f32.mrb[131].mxu0 }
 0x7d0   :  { %4938 = vst.msk [vmem:[%s8222_s7] sm:$0xff] %vm44_vm0, %v4876_v14  ;;  %v4879_v58 = vadd.f32 %v5034_v45, %v4878_v63 }
 0x7d1   :  { %4941 = vst.msk [vmem:[%s8222_s7 + $0x18] sm:$0xff] %vm44_vm0, %v4887_v22 }
 0x7d2   :  { %4939 = vst.msk [vmem:[%s8222_s7 + $0x8] sm:$0xff] %vm44_vm0, %v4879_v58 }
 0x812   :  { %v5607_v36 = vpop.f32.mrb[132].mxu0 }
 0x813   :  { %v4900_v57 = vadd.f32 %v5607_v36, %v5034_v45  ;;  %v4891_v29 = vpop.f32.mrb[133].mxu0 }
 0x814   :  { %v4892_v2 = vadd.f32 %v5034_v45, %v4891_v29  ;;  %v5608_v62 = vpop.f32.mrb[134].mxu0 }
 0x815   :  { %4944 = vst.msk [vmem:[%s8222_s7 + $0x30] sm:$0xff] %vm44_vm0, %v4900_v57  ;;  %v4903_v5 = vadd.f32 %v5608_v62, %v5034_v45  ;;  %v4894_v10 = vpop.f32.mrb[135].mxu0 }
 0x816   :  { %4942 = vst.msk [vmem:[%s8222_s7 + $0x20] sm:$0xff] %vm44_vm0, %v4892_v2  ;;  %v4895_v13 = vadd.f32 %v5034_v45, %v4894_v10 }
 0x817   :  { %4945 = vst.msk [vmem:[%s8222_s7 + $0x38] sm:$0xff] %vm44_vm0, %v4903_v5 }
 0x818   :  { %4943 = vst.msk [vmem:[%s8222_s7 + $0x28] sm:$0xff] %vm44_vm0, %v4895_v13 }
 0x832   :  { %v5611_v7 = vpop.f32.mrb[136].mxu0 }
 0x833   :  { %v4916_v37 = vadd.f32 %v5611_v7, %v5034_v45  ;;  %v4907_v55 = vpop.f32.mrb[137].mxu0 }
 0x834   :  { %v4908_v59 = vadd.f32 %v5034_v45, %v4907_v55  ;;  %v5612_v61 = vpop.f32.mrb[138].mxu0 }
 0x835   :  { %4948 = vst.msk [vmem:[%s8222_s7 + $0x50] sm:$0xff] %vm44_vm0, %v4916_v37  ;;  %v4919_v19 = vadd.f32 %v5612_v61, %v5034_v45  ;;  %v4910_v11 = vpop.f32.mrb[139].mxu0 }
 0x836   :  { %4946 = vst.msk [vmem:[%s8222_s7 + $0x40] sm:$0xff] %vm44_vm0, %v4908_v59  ;;  %v4911_v32 = vadd.f32 %v5034_v45, %v4910_v11 }
 0x837   :  { %4949 = vst.msk [vmem:[%s8222_s7 + $0x58] sm:$0xff] %vm44_vm0, %v4919_v19 }
 0x838   :  { %4947 = vst.msk [vmem:[%s8222_s7 + $0x48] sm:$0xff] %vm44_vm0, %v4911_v32 }
 0x87b   :  { %v5615_v35 = vpop.f32.mrb[140].mxu0 }
 0x87c   :  { %v4932_v48 = vadd.f32 %v5615_v35, %v5034_v45  ;;  %v4923_v3 = vpop.f32.mrb[141].mxu0 }
 0x87d   :  { %v4924_v51 = vadd.f32 %v5034_v45, %v4923_v3  ;;  %v5616_v44 = vpop.f32.mrb[142].mxu0 }
 0x87e   :  { %4952 = vst.msk [vmem:[%s8222_s7 + $0x70] sm:$0xff] %vm44_vm0, %v4932_v48  ;;  %v4935_v26 = vadd.f32 %v5616_v44, %v5034_v45  ;;  %v4926_v43 = vpop.f32.mrb[143].mxu0 }
 0x87f   :  { %4950 = vst.msk [vmem:[%s8222_s7 + $0x60] sm:$0xff] %vm44_vm0, %v4924_v51  ;;  %v4927_v8 = vadd.f32 %v5034_v45, %v4926_v43 }
 0x880   :  { %4953 = vst.msk [vmem:[%s8222_s7 + $0x78] sm:$0xff] %vm44_vm0, %v4935_v26 }
 0x881   :  { %4951 = vst.msk [vmem:[%s8222_s7 + $0x68] sm:$0xff] %vm44_vm0, %v4927_v8 }

</bundles_post_ra>
